<compile_context>
chip_gen: v7x
topology: tpu7x:2x2x1
jax: 0.10.0
libtpu: 0.0.40
codegen_flags: <defaults>
</compile_context>

<pallas_src>
import jax
import jax.numpy as jnp
from jax.experimental import pallas as pl
from jax.experimental.pallas import tpu as pltpu

_PAD = 8  # extra rows above/below the slab: keeps the +-1 shifted window
          # reads in bounds and the interior store offset 8-aligned.


# ------------------------------ Pallas kernel -------------------------------

def initial_stage_kernel(x_ref,
                         w1_ref, b1_ref, w2_ref, b2_ref, w3_ref, b3_ref,
                         lmask_ref, rmask_ref,
                         wh1_ref, bh1_ref, wh2_ref, bh2_ref,
                         out_ref,
                         xpad_ref):
    """One batch element: 3x (3x3 conv + bias + ReLU) trunk + fused 1x1 heads."""
    _, HW, C = x_ref.shape
    R = xpad_ref.shape[0]
    S = R - 2 * _PAD            # (H + 2) * W   flat padded slab rows
    W = (S - HW) // 2           # image width   (one pad row-group per side)
    cdt = xpad_ref.dtype

    # ---- build the flat zero-padded slab (pad rows zeroed every grid step) --
    xpad_ref[pl.ds(0, _PAD + W), :] = jnp.zeros((_PAD + W, C), cdt)
    xpad_ref[pl.ds(_PAD + W + HW, W + _PAD), :] = jnp.zeros((W + _PAD, C), cdt)
    xpad_ref[pl.ds(_PAD + W, HW), :] = x_ref[0].astype(cdt)

    lmask = lmask_ref[...]      # (S, 1): 0 where the x-1 read wrapped a row
    rmask = rmask_ref[...]      # (S, 1): 0 where the x+1 read wrapped a row

    # ---- trunk: three 3x3 conv + bias + ReLU, 9 shifted-window matmuls -----
    feat = None
    for layer, (w_ref, b_ref) in enumerate(((w1_ref, b1_ref),
                                            (w2_ref, b2_ref),
                                            (w3_ref, b3_ref))):
        # Whole-slab windows: centre (aligned) and +-1 shifted columns.
        slab_c = xpad_ref[pl.ds(_PAD, S), :]
        slab_l = xpad_ref[pl.ds(_PAD - 1, S), :] * lmask   # value at x-1
        slab_r = xpad_ref[pl.ds(_PAD + 1, S), :] * rmask   # value at x+1

        acc = None                                          # value accumulator
        for kh in range(3):
            base = kh * W                                   # multiple of 8
            for kw, src in ((0, slab_l), (1, slab_c), (2, slab_r)):
                contrib = jnp.dot(src[base:base + HW, :], w_ref[kh, kw],
                                  preferred_element_type=jnp.float32)
                acc = contrib if acc is None else acc + contrib
        act = jnp.maximum(acc + b_ref[...], 0.0)            # (HW, C) f32

        if layer < 2:
            # aligned interior write-back for the next conv layer
            xpad_ref[pl.ds(_PAD + W, HW), :] = act.astype(cdt)
        else:
            feat = act                                      # heads use it directly

    # ---- fused heads: [hm_hidden | paf_hidden], then block-diag 1x1 convs --
    hidden = jnp.maximum(
        jnp.dot(feat.astype(wh1_ref.dtype), wh1_ref[...],
                preferred_element_type=jnp.float32) + bh1_ref[...], 0.0)
    fused = jnp.dot(hidden.astype(wh2_ref.dtype), wh2_ref[...],
                    preferred_element_type=jnp.float32) + bh2_ref[...]
    out_ref[0] = fused.astype(out_ref.dtype)


# ------------------------------ wrapper (JAX) --------------------------------

def _round_up(x, m):
    return (x + m - 1) // m * m


def _resident_spec(arr):
    """Full-array block, constant index_map -> VMEM-resident across the grid."""
    zeros = (0,) * arr.ndim

    def index_map(i):
        return zeros

    return pl.BlockSpec(arr.shape, index_map)


def initial_stage_forward(x_nchw, params, *, compute_dtype=jnp.float32,
                          vmem_limit_bytes=32 * 1024 * 1024):
    """Returns (heatmaps, pafs) in NCHW, matching PyTorch InitialStage.forward."""
    n, c, h, w = x_nchw.shape
    hw = h * w
    # NCHW -> flat lane-dense (N, H*W, C) exactly once.
    x = jnp.transpose(x_nchw, (0, 2, 3, 1)).reshape(n, hw, c).astype(compute_dtype)

    t1, t2, t3 = params["trunk"]
    hid = params["hm1"]["w"].shape[-1]
    hm_co = params["hm2"]["w"].shape[-1]
    pf_co = params["pf2"]["w"].shape[-1]
    out_c = hm_co + pf_co
    out_cp = _round_up(out_c, 128)          # lane-dense fused head output

    def w3x3(p):
        return p["w"].astype(compute_dtype)                 # (3,3,C,C) HWIO

    def bias_row(p):
        return p["b"].astype(jnp.float32).reshape(1, -1)

    # Border masks for the flat padded slab (period W along the row axis).
    col = jnp.arange((h + 2) * w, dtype=jnp.int32) % w
    lmask = (col != 0).astype(compute_dtype)[:, None]       # (S, 1)
    rmask = (col != w - 1).astype(compute_dtype)[:, None]

    # Fused head-1 weight [whm1 | wpf1] and block-diagonal head-2 weight.
    wh1 = jnp.concatenate([params["hm1"]["w"][0, 0],
                           params["pf1"]["w"][0, 0]], axis=1).astype(compute_dtype)
    bh1 = jnp.concatenate([params["hm1"]["b"],
                           params["pf1"]["b"]]).astype(jnp.float32).reshape(1, -1)
    wh2 = jnp.zeros((2 * hid, out_cp), compute_dtype)
    wh2 = wh2.at[:hid, :hm_co].set(params["hm2"]["w"][0, 0].astype(compute_dtype))
    wh2 = wh2.at[hid:, hm_co:out_c].set(params["pf2"]["w"][0, 0].astype(compute_dtype))
    bh2 = jnp.zeros((1, out_cp), jnp.float32)
    bh2 = bh2.at[0, :hm_co].set(params["hm2"]["b"].astype(jnp.float32))
    bh2 = bh2.at[0, hm_co:out_c].set(params["pf2"]["b"].astype(jnp.float32))

    args = (x,
            w3x3(t1), bias_row(t1), w3x3(t2), bias_row(t2), w3x3(t3), bias_row(t3),
            lmask, rmask, wh1, bh1, wh2, bh2)

    in_specs = ([pl.BlockSpec((1, hw, c), lambda i: (i, 0, 0))]
                + [_resident_spec(a) for a in args[1:]])
    out_specs = pl.BlockSpec((1, hw, out_cp), lambda i: (i, 0, 0))

    fused = pl.pallas_call(
        initial_stage_kernel,
        out_shape=jax.ShapeDtypeStruct((n, hw, out_cp), jnp.float32),
        grid_spec=pltpu.PrefetchScalarGridSpec(
            num_scalar_prefetch=0,
            grid=(n,),
            in_specs=in_specs,
            out_specs=out_specs,
            scratch_shapes=[
                pltpu.VMEM(((h + 2) * w + 2 * _PAD, c), compute_dtype),
            ],
        ),
        compiler_params=pltpu.CompilerParams(
            dimension_semantics=("parallel",),   # batch split over TensorCores
            vmem_limit_bytes=vmem_limit_bytes,
        ),
    )(*args)

    fused = fused.reshape(n, h, w, out_cp)
    heatmaps = jnp.transpose(fused[..., :hm_co], (0, 3, 1, 2))     # NHWC -> NCHW
    pafs = jnp.transpose(fused[..., hm_co:out_c], (0, 3, 1, 2))
    return heatmaps, pafs


# ------------------------- deterministic init --------------------------------

def _conv_params(key, kh, kw, ci, co):
    k1, k2 = jax.random.split(key)
    scale = float((kh * kw * ci) ** -0.5)
    return dict(
        w=scale * jax.random.normal(k1, (kh, kw, ci, co), jnp.float32),   # HWIO
        b=0.1 * jax.random.normal(k2, (co,), jnp.float32),
    )


def init_initial_stage_params(key, num_channels, num_heatmaps, num_pafs,
                              hidden=512):
    ks = jax.random.split(key, 7)
    return {
        "trunk": [
            _conv_params(ks[0], 3, 3, num_channels, num_channels),
            _conv_params(ks[1], 3, 3, num_channels, num_channels),
            _conv_params(ks[2], 3, 3, num_channels, num_channels),
        ],
        "hm1": _conv_params(ks[3], 1, 1, num_channels, hidden),
        "hm2": _conv_params(ks[4], 1, 1, hidden, num_heatmaps),
        "pf1": _conv_params(ks[5], 1, 1, num_channels, hidden),
        "pf2": _conv_params(ks[6], 1, 1, hidden, num_pafs),
    }


# ---------------------------- pure-JAX reference -----------------------------

def _ref_conv(x_nhwc, p, *, padding, relu):
    y = jax.lax.conv_general_dilated(
        x_nhwc, p["w"], (1, 1), padding,
        dimension_numbers=("NHWC", "HWIO", "NHWC"),
        precision=jax.lax.Precision.HIGHEST) + p["b"]
    return jnp.maximum(y, 0.0) if relu else y


def ref_initial_stage(x_nchw, params):
    t = jnp.transpose(x_nchw, (0, 2, 3, 1))
    for p in params["trunk"]:
        t = _ref_conv(t, p, padding="SAME", relu=True)
    hm = _ref_conv(t, params["hm1"], padding="VALID", relu=True)
    hm = _ref_conv(hm, params["hm2"], padding="VALID", relu=False)
    pf = _ref_conv(t, params["pf1"], padding="VALID", relu=True)
    pf = _ref_conv(pf, params["pf2"], padding="VALID", relu=False)
    return jnp.transpose(hm, (0, 3, 1, 2)), jnp.transpose(pf, (0, 3, 1, 2))


# ----------------------------------- main -------------------------------------

if __name__ == "__main__":
    # Real OpenPose channel counts (lane-dense C=128), small spatial/batch.
    num_channels, num_heatmaps, num_pafs = 128, 19, 38
    N, H, W = 2, 16, 16

    key = jax.random.PRNGKey(0)
    kx, kp = jax.random.split(key)
    x = jax.random.normal(kx, (N, num_channels, H, W), jnp.float32)   # NCHW
    params = init_initial_stage_params(kp, num_channels, num_heatmaps, num_pafs)

    fwd = jax.jit(lambda xx: initial_stage_forward(xx, params))
    heatmaps, pafs = fwd(x)
    heatmaps = jax.block_until_ready(heatmaps)
    pafs = jax.block_until_ready(pafs)

    hm_ref, pf_ref = ref_initial_stage(x, params)
    assert heatmaps.shape == (N, num_heatmaps, H, W)
    assert pafs.shape == (N, num_pafs, H, W)
    assert jnp.allclose(heatmaps, hm_ref, atol=2e-3, rtol=2e-3)
    assert jnp.allclose(pafs, pf_ref, atol=2e-3, rtol=2e-3)

    print("KERNEL_OK")
</pallas_src>

<mosaic_0001>
module attributes {stable_mosaic.version = 11 : i64} {
  func.func @initial_stage_kernel(%arg0: i32, %arg1: memref<1x256x128xf32, #tpu.memory_space<vmem>>, %arg2: memref<3x3x128x128xf32, #tpu.memory_space<vmem>>, %arg3: memref<1x128xf32, #tpu.memory_space<vmem>>, %arg4: memref<3x3x128x128xf32, #tpu.memory_space<vmem>>, %arg5: memref<1x128xf32, #tpu.memory_space<vmem>>, %arg6: memref<3x3x128x128xf32, #tpu.memory_space<vmem>>, %arg7: memref<1x128xf32, #tpu.memory_space<vmem>>, %arg8: memref<288x1xf32, #tpu.memory_space<vmem>>, %arg9: memref<288x1xf32, #tpu.memory_space<vmem>>, %arg10: memref<128x1024xf32, #tpu.memory_space<vmem>>, %arg11: memref<1x1024xf32, #tpu.memory_space<vmem>>, %arg12: memref<1024x128xf32, #tpu.memory_space<vmem>>, %arg13: memref<1x128xf32, #tpu.memory_space<vmem>>, %arg14: memref<1x256x128xf32, #tpu.memory_space<vmem>>, %arg15: memref<304x128xf32, #tpu.memory_space<vmem>>) attributes {dimension_semantics = [#tpu.dimension_semantics<parallel>], iteration_bounds = array<i64: 2>, scalar_prefetch = 0 : i64, scratch_operands = 1 : i64, tpu.core_type = #tpu.core_type<tc>, window_params = [{transform_indices = @transform_0, window_bounds = array<i64: 1, 256, 128>}, {pipeline_mode = #tpu.pipeline_mode<synchronous>, transform_indices = @transform_1, window_bounds = array<i64: 3, 3, 128, 128>}, {pipeline_mode = #tpu.pipeline_mode<synchronous>, transform_indices = @transform_2, window_bounds = array<i64: 1, 128>}, {pipeline_mode = #tpu.pipeline_mode<synchronous>, transform_indices = @transform_3, window_bounds = array<i64: 3, 3, 128, 128>}, {pipeline_mode = #tpu.pipeline_mode<synchronous>, transform_indices = @transform_4, window_bounds = array<i64: 1, 128>}, {pipeline_mode = #tpu.pipeline_mode<synchronous>, transform_indices = @transform_5, window_bounds = array<i64: 3, 3, 128, 128>}, {pipeline_mode = #tpu.pipeline_mode<synchronous>, transform_indices = @transform_6, window_bounds = array<i64: 1, 128>}, {pipeline_mode = #tpu.pipeline_mode<synchronous>, transform_indices = @transform_7, window_bounds = array<i64: 288, 1>}, {pipeline_mode = #tpu.pipeline_mode<synchronous>, transform_indices = @transform_8, window_bounds = array<i64: 288, 1>}, {pipeline_mode = #tpu.pipeline_mode<synchronous>, transform_indices = @transform_9, window_bounds = array<i64: 128, 1024>}, {pipeline_mode = #tpu.pipeline_mode<synchronous>, transform_indices = @transform_10, window_bounds = array<i64: 1, 1024>}, {pipeline_mode = #tpu.pipeline_mode<synchronous>, transform_indices = @transform_11, window_bounds = array<i64: 1024, 128>}, {pipeline_mode = #tpu.pipeline_mode<synchronous>, transform_indices = @transform_12, window_bounds = array<i64: 1, 128>}, {transform_indices = @transform_13, window_bounds = array<i64: 1, 256, 128>}]} {
    %cst = arith.constant 0.000000e+00 : f32
    %0 = vector.broadcast %cst : f32 to vector<24x128xf32>
    %c0 = arith.constant 0 : index
    %c0_0 = arith.constant 0 : index
    %1 = vector.load %arg15[%c0, %c0_0] : memref<304x128xf32, #tpu.memory_space<vmem>>, vector<24x128xf32>
    tpu.vector_store %arg15[%c0, %c0_0], %0 {strides = array<i32>} : memref<304x128xf32, #tpu.memory_space<vmem>>, vector<24x128xf32>,
    %cst_1 = arith.constant 0.000000e+00 : f32
    %2 = vector.broadcast %cst_1 : f32 to vector<24x128xf32>
    %c280 = arith.constant 280 : index
    %c0_2 = arith.constant 0 : index
    %3 = vector.load %arg15[%c280, %c0_2] : memref<304x128xf32, #tpu.memory_space<vmem>>, vector<24x128xf32>
    tpu.vector_store %arg15[%c280, %c0_2], %2 {strides = array<i32>} : memref<304x128xf32, #tpu.memory_space<vmem>>, vector<24x128xf32>,
    %c0_3 = arith.constant 0 : index
    %c0_4 = arith.constant 0 : index
    %c0_5 = arith.constant 0 : index
    %4 = vector.load %arg1[%c0_3, %c0_4, %c0_5] : memref<1x256x128xf32, #tpu.memory_space<vmem>>, vector<1x256x128xf32>
    %5 = vector.shape_cast %4 : vector<1x256x128xf32> to vector<256x128xf32>
    %c24 = arith.constant 24 : index
    %c0_6 = arith.constant 0 : index
    %6 = vector.load %arg15[%c24, %c0_6] : memref<304x128xf32, #tpu.memory_space<vmem>>, vector<256x128xf32>
    tpu.vector_store %arg15[%c24, %c0_6], %5 {strides = array<i32>} : memref<304x128xf32, #tpu.memory_space<vmem>>, vector<256x128xf32>,
    %c0_7 = arith.constant 0 : index
    %c0_8 = arith.constant 0 : index
    %7 = vector.load %arg8[%c0_7, %c0_8] : memref<288x1xf32, #tpu.memory_space<vmem>>, vector<288x1xf32>
    %c0_9 = arith.constant 0 : index
    %c0_10 = arith.constant 0 : index
    %8 = vector.load %arg9[%c0_9, %c0_10] : memref<288x1xf32, #tpu.memory_space<vmem>>, vector<288x1xf32>
    %c8 = arith.constant 8 : index
    %c0_11 = arith.constant 0 : index
    %9 = vector.load %arg15[%c8, %c0_11] : memref<304x128xf32, #tpu.memory_space<vmem>>, vector<288x128xf32>
    %c7 = arith.constant 7 : index
    %c0_12 = arith.constant 0 : index
    %10 = vector.load %arg15[%c7, %c0_12] : memref<304x128xf32, #tpu.memory_space<vmem>>, vector<288x128xf32>
    %11 = vector.broadcast %7 : vector<288x1xf32> to vector<288x128xf32>
    %12 = arith.mulf %10, %11 : vector<288x128xf32>
    %c9 = arith.constant 9 : index
    %c0_13 = arith.constant 0 : index
    %13 = vector.load %arg15[%c9, %c0_13] : memref<304x128xf32, #tpu.memory_space<vmem>>, vector<288x128xf32>
    %14 = vector.broadcast %8 : vector<288x1xf32> to vector<288x128xf32>
    %15 = arith.mulf %13, %14 : vector<288x128xf32>
    %16 = vector.extract_strided_slice %12 {offsets = [0, 0], sizes = [256, 128], strides = [1, 1]} : vector<288x128xf32> to vector<256x128xf32>
    %c0_14 = arith.constant 0 : index
    %c0_15 = arith.constant 0 : index
    %c0_16 = arith.constant 0 : index
    %c0_17 = arith.constant 0 : index
    %17 = vector.load %arg2[%c0_14, %c0_15, %c0_16, %c0_17] : memref<3x3x128x128xf32, #tpu.memory_space<vmem>>, vector<1x1x128x128xf32>
    %18 = vector.shape_cast %17 : vector<1x1x128x128xf32> to vector<128x128xf32>
    %cst_18 = arith.constant dense<0.000000e+00> : vector<256x128xf32>
    %19 = tpu.matmul %16, %18, %cst_18 {dimension_numbers = #tpu.dot_dimension_numbers<[1], [0], [0], [1], [0, 0, 1, 1], [], []>} : vector<256x128xf32>, vector<128x128xf32>, vector<256x128xf32> -> vector<256x128xf32>
    %20 = vector.extract_strided_slice %9 {offsets = [0, 0], sizes = [256, 128], strides = [1, 1]} : vector<288x128xf32> to vector<256x128xf32>
    %c0_19 = arith.constant 0 : index
    %c1 = arith.constant 1 : index
    %c0_20 = arith.constant 0 : index
    %c0_21 = arith.constant 0 : index
    %21 = vector.load %arg2[%c0_19, %c1, %c0_20, %c0_21] : memref<3x3x128x128xf32, #tpu.memory_space<vmem>>, vector<1x1x128x128xf32>
    %22 = vector.shape_cast %21 : vector<1x1x128x128xf32> to vector<128x128xf32>
    %cst_22 = arith.constant dense<0.000000e+00> : vector<256x128xf32>
    %23 = tpu.matmul %20, %22, %cst_22 {dimension_numbers = #tpu.dot_dimension_numbers<[1], [0], [0], [1], [0, 0, 1, 1], [], []>} : vector<256x128xf32>, vector<128x128xf32>, vector<256x128xf32> -> vector<256x128xf32>
    %24 = arith.addf %19, %23 : vector<256x128xf32>
    %25 = vector.extract_strided_slice %15 {offsets = [0, 0], sizes = [256, 128], strides = [1, 1]} : vector<288x128xf32> to vector<256x128xf32>
    %c0_23 = arith.constant 0 : index
    %c2 = arith.constant 2 : index
    %c0_24 = arith.constant 0 : index
    %c0_25 = arith.constant 0 : index
    %26 = vector.load %arg2[%c0_23, %c2, %c0_24, %c0_25] : memref<3x3x128x128xf32, #tpu.memory_space<vmem>>, vector<1x1x128x128xf32>
    %27 = vector.shape_cast %26 : vector<1x1x128x128xf32> to vector<128x128xf32>
    %cst_26 = arith.constant dense<0.000000e+00> : vector<256x128xf32>
    %28 = tpu.matmul %25, %27, %cst_26 {dimension_numbers = #tpu.dot_dimension_numbers<[1], [0], [0], [1], [0, 0, 1, 1], [], []>} : vector<256x128xf32>, vector<128x128xf32>, vector<256x128xf32> -> vector<256x128xf32>
    %29 = arith.addf %24, %28 : vector<256x128xf32>
    %30 = vector.extract_strided_slice %12 {offsets = [16, 0], sizes = [256, 128], strides = [1, 1]} : vector<288x128xf32> to vector<256x128xf32>
    %c1_27 = arith.constant 1 : index
    %c0_28 = arith.constant 0 : index
    %c0_29 = arith.constant 0 : index
    %c0_30 = arith.constant 0 : index
    %31 = vector.load %arg2[%c1_27, %c0_28, %c0_29, %c0_30] : memref<3x3x128x128xf32, #tpu.memory_space<vmem>>, vector<1x1x128x128xf32>
    %32 = vector.shape_cast %31 : vector<1x1x128x128xf32> to vector<128x128xf32>
    %cst_31 = arith.constant dense<0.000000e+00> : vector<256x128xf32>
    %33 = tpu.matmul %30, %32, %cst_31 {dimension_numbers = #tpu.dot_dimension_numbers<[1], [0], [0], [1], [0, 0, 1, 1], [], []>} : vector<256x128xf32>, vector<128x128xf32>, vector<256x128xf32> -> vector<256x128xf32>
    %34 = arith.addf %29, %33 : vector<256x128xf32>
    %35 = vector.extract_strided_slice %9 {offsets = [16, 0], sizes = [256, 128], strides = [1, 1]} : vector<288x128xf32> to vector<256x128xf32>
    %c1_32 = arith.constant 1 : index
    %c1_33 = arith.constant 1 : index
    %c0_34 = arith.constant 0 : index
    %c0_35 = arith.constant 0 : index
    %36 = vector.load %arg2[%c1_32, %c1_33, %c0_34, %c0_35] : memref<3x3x128x128xf32, #tpu.memory_space<vmem>>, vector<1x1x128x128xf32>
    %37 = vector.shape_cast %36 : vector<1x1x128x128xf32> to vector<128x128xf32>
    %cst_36 = arith.constant dense<0.000000e+00> : vector<256x128xf32>
    %38 = tpu.matmul %35, %37, %cst_36 {dimension_numbers = #tpu.dot_dimension_numbers<[1], [0], [0], [1], [0, 0, 1, 1], [], []>} : vector<256x128xf32>, vector<128x128xf32>, vector<256x128xf32> -> vector<256x128xf32>
    %39 = arith.addf %34, %38 : vector<256x128xf32>
    %40 = vector.extract_strided_slice %15 {offsets = [16, 0], sizes = [256, 128], strides = [1, 1]} : vector<288x128xf32> to vector<256x128xf32>
    %c1_37 = arith.constant 1 : index
    %c2_38 = arith.constant 2 : index
    %c0_39 = arith.constant 0 : index
    %c0_40 = arith.constant 0 : index
    %41 = vector.load %arg2[%c1_37, %c2_38, %c0_39, %c0_40] : memref<3x3x128x128xf32, #tpu.memory_space<vmem>>, vector<1x1x128x128xf32>
    %42 = vector.shape_cast %41 : vector<1x1x128x128xf32> to vector<128x128xf32>
    %cst_41 = arith.constant dense<0.000000e+00> : vector<256x128xf32>
    %43 = tpu.matmul %40, %42, %cst_41 {dimension_numbers = #tpu.dot_dimension_numbers<[1], [0], [0], [1], [0, 0, 1, 1], [], []>} : vector<256x128xf32>, vector<128x128xf32>, vector<256x128xf32> -> vector<256x128xf32>
    %44 = arith.addf %39, %43 : vector<256x128xf32>
    %45 = vector.extract_strided_slice %12 {offsets = [32, 0], sizes = [256, 128], strides = [1, 1]} : vector<288x128xf32> to vector<256x128xf32>
    %c2_42 = arith.constant 2 : index
    %c0_43 = arith.constant 0 : index
    %c0_44 = arith.constant 0 : index
    %c0_45 = arith.constant 0 : index
    %46 = vector.load %arg2[%c2_42, %c0_43, %c0_44, %c0_45] : memref<3x3x128x128xf32, #tpu.memory_space<vmem>>, vector<1x1x128x128xf32>
    %47 = vector.shape_cast %46 : vector<1x1x128x128xf32> to vector<128x128xf32>
    %cst_46 = arith.constant dense<0.000000e+00> : vector<256x128xf32>
    %48 = tpu.matmul %45, %47, %cst_46 {dimension_numbers = #tpu.dot_dimension_numbers<[1], [0], [0], [1], [0, 0, 1, 1], [], []>} : vector<256x128xf32>, vector<128x128xf32>, vector<256x128xf32> -> vector<256x128xf32>
    %49 = arith.addf %44, %48 : vector<256x128xf32>
    %50 = vector.extract_strided_slice %9 {offsets = [32, 0], sizes = [256, 128], strides = [1, 1]} : vector<288x128xf32> to vector<256x128xf32>
    %c2_47 = arith.constant 2 : index
    %c1_48 = arith.constant 1 : index
    %c0_49 = arith.constant 0 : index
    %c0_50 = arith.constant 0 : index
    %51 = vector.load %arg2[%c2_47, %c1_48, %c0_49, %c0_50] : memref<3x3x128x128xf32, #tpu.memory_space<vmem>>, vector<1x1x128x128xf32>
    %52 = vector.shape_cast %51 : vector<1x1x128x128xf32> to vector<128x128xf32>
    %cst_51 = arith.constant dense<0.000000e+00> : vector<256x128xf32>
    %53 = tpu.matmul %50, %52, %cst_51 {dimension_numbers = #tpu.dot_dimension_numbers<[1], [0], [0], [1], [0, 0, 1, 1], [], []>} : vector<256x128xf32>, vector<128x128xf32>, vector<256x128xf32> -> vector<256x128xf32>
    %54 = arith.addf %49, %53 : vector<256x128xf32>
    %55 = vector.extract_strided_slice %15 {offsets = [32, 0], sizes = [256, 128], strides = [1, 1]} : vector<288x128xf32> to vector<256x128xf32>
    %c2_52 = arith.constant 2 : index
    %c2_53 = arith.constant 2 : index
    %c0_54 = arith.constant 0 : index
    %c0_55 = arith.constant 0 : index
    %56 = vector.load %arg2[%c2_52, %c2_53, %c0_54, %c0_55] : memref<3x3x128x128xf32, #tpu.memory_space<vmem>>, vector<1x1x128x128xf32>
    %57 = vector.shape_cast %56 : vector<1x1x128x128xf32> to vector<128x128xf32>
    %cst_56 = arith.constant dense<0.000000e+00> : vector<256x128xf32>
    %58 = tpu.matmul %55, %57, %cst_56 {dimension_numbers = #tpu.dot_dimension_numbers<[1], [0], [0], [1], [0, 0, 1, 1], [], []>} : vector<256x128xf32>, vector<128x128xf32>, vector<256x128xf32> -> vector<256x128xf32>
    %59 = arith.addf %54, %58 : vector<256x128xf32>
    %c0_57 = arith.constant 0 : index
    %c0_58 = arith.constant 0 : index
    %60 = vector.load %arg3[%c0_57, %c0_58] : memref<1x128xf32, #tpu.memory_space<vmem>>, vector<1x128xf32>
    %61 = vector.broadcast %60 : vector<1x128xf32> to vector<256x128xf32>
    %62 = arith.addf %59, %61 : vector<256x128xf32>
    %cst_59 = arith.constant 0.000000e+00 : f32
    %63 = vector.broadcast %cst_59 : f32 to vector<256x128xf32>
    %64 = arith.maximumf %62, %63 : vector<256x128xf32>
    %c24_60 = arith.constant 24 : index
    %c0_61 = arith.constant 0 : index
    %65 = vector.load %arg15[%c24_60, %c0_61] : memref<304x128xf32, #tpu.memory_space<vmem>>, vector<256x128xf32>
    tpu.vector_store %arg15[%c24_60, %c0_61], %64 {strides = array<i32>} : memref<304x128xf32, #tpu.memory_space<vmem>>, vector<256x128xf32>,
    %c8_62 = arith.constant 8 : index
    %c0_63 = arith.constant 0 : index
    %66 = vector.load %arg15[%c8_62, %c0_63] : memref<304x128xf32, #tpu.memory_space<vmem>>, vector<288x128xf32>
    %c7_64 = arith.constant 7 : index
    %c0_65 = arith.constant 0 : index
    %67 = vector.load %arg15[%c7_64, %c0_65] : memref<304x128xf32, #tpu.memory_space<vmem>>, vector<288x128xf32>
    %68 = vector.broadcast %7 : vector<288x1xf32> to vector<288x128xf32>
    %69 = arith.mulf %67, %68 : vector<288x128xf32>
    %c9_66 = arith.constant 9 : index
    %c0_67 = arith.constant 0 : index
    %70 = vector.load %arg15[%c9_66, %c0_67] : memref<304x128xf32, #tpu.memory_space<vmem>>, vector<288x128xf32>
    %71 = vector.broadcast %8 : vector<288x1xf32> to vector<288x128xf32>
    %72 = arith.mulf %70, %71 : vector<288x128xf32>
    %73 = vector.extract_strided_slice %69 {offsets = [0, 0], sizes = [256, 128], strides = [1, 1]} : vector<288x128xf32> to vector<256x128xf32>
    %c0_68 = arith.constant 0 : index
    %c0_69 = arith.constant 0 : index
    %c0_70 = arith.constant 0 : index
    %c0_71 = arith.constant 0 : index
    %74 = vector.load %arg4[%c0_68, %c0_69, %c0_70, %c0_71] : memref<3x3x128x128xf32, #tpu.memory_space<vmem>>, vector<1x1x128x128xf32>
    %75 = vector.shape_cast %74 : vector<1x1x128x128xf32> to vector<128x128xf32>
    %cst_72 = arith.constant dense<0.000000e+00> : vector<256x128xf32>
    %76 = tpu.matmul %73, %75, %cst_72 {dimension_numbers = #tpu.dot_dimension_numbers<[1], [0], [0], [1], [0, 0, 1, 1], [], []>} : vector<256x128xf32>, vector<128x128xf32>, vector<256x128xf32> -> vector<256x128xf32>
    %77 = vector.extract_strided_slice %66 {offsets = [0, 0], sizes = [256, 128], strides = [1, 1]} : vector<288x128xf32> to vector<256x128xf32>
    %c0_73 = arith.constant 0 : index
    %c1_74 = arith.constant 1 : index
    %c0_75 = arith.constant 0 : index
    %c0_76 = arith.constant 0 : index
    %78 = vector.load %arg4[%c0_73, %c1_74, %c0_75, %c0_76] : memref<3x3x128x128xf32, #tpu.memory_space<vmem>>, vector<1x1x128x128xf32>
    %79 = vector.shape_cast %78 : vector<1x1x128x128xf32> to vector<128x128xf32>
    %cst_77 = arith.constant dense<0.000000e+00> : vector<256x128xf32>
    %80 = tpu.matmul %77, %79, %cst_77 {dimension_numbers = #tpu.dot_dimension_numbers<[1], [0], [0], [1], [0, 0, 1, 1], [], []>} : vector<256x128xf32>, vector<128x128xf32>, vector<256x128xf32> -> vector<256x128xf32>
    %81 = arith.addf %76, %80 : vector<256x128xf32>
    %82 = vector.extract_strided_slice %72 {offsets = [0, 0], sizes = [256, 128], strides = [1, 1]} : vector<288x128xf32> to vector<256x128xf32>
    %c0_78 = arith.constant 0 : index
    %c2_79 = arith.constant 2 : index
    %c0_80 = arith.constant 0 : index
    %c0_81 = arith.constant 0 : index
    %83 = vector.load %arg4[%c0_78, %c2_79, %c0_80, %c0_81] : memref<3x3x128x128xf32, #tpu.memory_space<vmem>>, vector<1x1x128x128xf32>
    %84 = vector.shape_cast %83 : vector<1x1x128x128xf32> to vector<128x128xf32>
    %cst_82 = arith.constant dense<0.000000e+00> : vector<256x128xf32>
    %85 = tpu.matmul %82, %84, %cst_82 {dimension_numbers = #tpu.dot_dimension_numbers<[1], [0], [0], [1], [0, 0, 1, 1], [], []>} : vector<256x128xf32>, vector<128x128xf32>, vector<256x128xf32> -> vector<256x128xf32>
    %86 = arith.addf %81, %85 : vector<256x128xf32>
    %87 = vector.extract_strided_slice %69 {offsets = [16, 0], sizes = [256, 128], strides = [1, 1]} : vector<288x128xf32> to vector<256x128xf32>
    %c1_83 = arith.constant 1 : index
    %c0_84 = arith.constant 0 : index
    %c0_85 = arith.constant 0 : index
    %c0_86 = arith.constant 0 : index
    %88 = vector.load %arg4[%c1_83, %c0_84, %c0_85, %c0_86] : memref<3x3x128x128xf32, #tpu.memory_space<vmem>>, vector<1x1x128x128xf32>
    %89 = vector.shape_cast %88 : vector<1x1x128x128xf32> to vector<128x128xf32>
    %cst_87 = arith.constant dense<0.000000e+00> : vector<256x128xf32>
    %90 = tpu.matmul %87, %89, %cst_87 {dimension_numbers = #tpu.dot_dimension_numbers<[1], [0], [0], [1], [0, 0, 1, 1], [], []>} : vector<256x128xf32>, vector<128x128xf32>, vector<256x128xf32> -> vector<256x128xf32>
    %91 = arith.addf %86, %90 : vector<256x128xf32>
    %92 = vector.extract_strided_slice %66 {offsets = [16, 0], sizes = [256, 128], strides = [1, 1]} : vector<288x128xf32> to vector<256x128xf32>
    %c1_88 = arith.constant 1 : index
    %c1_89 = arith.constant 1 : index
    %c0_90 = arith.constant 0 : index
    %c0_91 = arith.constant 0 : index
    %93 = vector.load %arg4[%c1_88, %c1_89, %c0_90, %c0_91] : memref<3x3x128x128xf32, #tpu.memory_space<vmem>>, vector<1x1x128x128xf32>
    %94 = vector.shape_cast %93 : vector<1x1x128x128xf32> to vector<128x128xf32>
    %cst_92 = arith.constant dense<0.000000e+00> : vector<256x128xf32>
    %95 = tpu.matmul %92, %94, %cst_92 {dimension_numbers = #tpu.dot_dimension_numbers<[1], [0], [0], [1], [0, 0, 1, 1], [], []>} : vector<256x128xf32>, vector<128x128xf32>, vector<256x128xf32> -> vector<256x128xf32>
    %96 = arith.addf %91, %95 : vector<256x128xf32>
    %97 = vector.extract_strided_slice %72 {offsets = [16, 0], sizes = [256, 128], strides = [1, 1]} : vector<288x128xf32> to vector<256x128xf32>
    %c1_93 = arith.constant 1 : index
    %c2_94 = arith.constant 2 : index
    %c0_95 = arith.constant 0 : index
    %c0_96 = arith.constant 0 : index
    %98 = vector.load %arg4[%c1_93, %c2_94, %c0_95, %c0_96] : memref<3x3x128x128xf32, #tpu.memory_space<vmem>>, vector<1x1x128x128xf32>
    %99 = vector.shape_cast %98 : vector<1x1x128x128xf32> to vector<128x128xf32>
    %cst_97 = arith.constant dense<0.000000e+00> : vector<256x128xf32>
    %100 = tpu.matmul %97, %99, %cst_97 {dimension_numbers = #tpu.dot_dimension_numbers<[1], [0], [0], [1], [0, 0, 1, 1], [], []>} : vector<256x128xf32>, vector<128x128xf32>, vector<256x128xf32> -> vector<256x128xf32>
    %101 = arith.addf %96, %100 : vector<256x128xf32>
    %102 = vector.extract_strided_slice %69 {offsets = [32, 0], sizes = [256, 128], strides = [1, 1]} : vector<288x128xf32> to vector<256x128xf32>
    %c2_98 = arith.constant 2 : index
    %c0_99 = arith.constant 0 : index
    %c0_100 = arith.constant 0 : index
    %c0_101 = arith.constant 0 : index
    %103 = vector.load %arg4[%c2_98, %c0_99, %c0_100, %c0_101] : memref<3x3x128x128xf32, #tpu.memory_space<vmem>>, vector<1x1x128x128xf32>
    %104 = vector.shape_cast %103 : vector<1x1x128x128xf32> to vector<128x128xf32>
    %cst_102 = arith.constant dense<0.000000e+00> : vector<256x128xf32>
    %105 = tpu.matmul %102, %104, %cst_102 {dimension_numbers = #tpu.dot_dimension_numbers<[1], [0], [0], [1], [0, 0, 1, 1], [], []>} : vector<256x128xf32>, vector<128x128xf32>, vector<256x128xf32> -> vector<256x128xf32>
    %106 = arith.addf %101, %105 : vector<256x128xf32>
    %107 = vector.extract_strided_slice %66 {offsets = [32, 0], sizes = [256, 128], strides = [1, 1]} : vector<288x128xf32> to vector<256x128xf32>
    %c2_103 = arith.constant 2 : index
    %c1_104 = arith.constant 1 : index
    %c0_105 = arith.constant 0 : index
    %c0_106 = arith.constant 0 : index
    %108 = vector.load %arg4[%c2_103, %c1_104, %c0_105, %c0_106] : memref<3x3x128x128xf32, #tpu.memory_space<vmem>>, vector<1x1x128x128xf32>
    %109 = vector.shape_cast %108 : vector<1x1x128x128xf32> to vector<128x128xf32>
    %cst_107 = arith.constant dense<0.000000e+00> : vector<256x128xf32>
    %110 = tpu.matmul %107, %109, %cst_107 {dimension_numbers = #tpu.dot_dimension_numbers<[1], [0], [0], [1], [0, 0, 1, 1], [], []>} : vector<256x128xf32>, vector<128x128xf32>, vector<256x128xf32> -> vector<256x128xf32>
    %111 = arith.addf %106, %110 : vector<256x128xf32>
    %112 = vector.extract_strided_slice %72 {offsets = [32, 0], sizes = [256, 128], strides = [1, 1]} : vector<288x128xf32> to vector<256x128xf32>
    %c2_108 = arith.constant 2 : index
    %c2_109 = arith.constant 2 : index
    %c0_110 = arith.constant 0 : index
    %c0_111 = arith.constant 0 : index
    %113 = vector.load %arg4[%c2_108, %c2_109, %c0_110, %c0_111] : memref<3x3x128x128xf32, #tpu.memory_space<vmem>>, vector<1x1x128x128xf32>
    %114 = vector.shape_cast %113 : vector<1x1x128x128xf32> to vector<128x128xf32>
    %cst_112 = arith.constant dense<0.000000e+00> : vector<256x128xf32>
    %115 = tpu.matmul %112, %114, %cst_112 {dimension_numbers = #tpu.dot_dimension_numbers<[1], [0], [0], [1], [0, 0, 1, 1], [], []>} : vector<256x128xf32>, vector<128x128xf32>, vector<256x128xf32> -> vector<256x128xf32>
    %116 = arith.addf %111, %115 : vector<256x128xf32>
    %c0_113 = arith.constant 0 : index
    %c0_114 = arith.constant 0 : index
    %117 = vector.load %arg5[%c0_113, %c0_114] : memref<1x128xf32, #tpu.memory_space<vmem>>, vector<1x128xf32>
    %118 = vector.broadcast %117 : vector<1x128xf32> to vector<256x128xf32>
    %119 = arith.addf %116, %118 : vector<256x128xf32>
    %cst_115 = arith.constant 0.000000e+00 : f32
    %120 = vector.broadcast %cst_115 : f32 to vector<256x128xf32>
    %121 = arith.maximumf %119, %120 : vector<256x128xf32>
    %c24_116 = arith.constant 24 : index
    %c0_117 = arith.constant 0 : index
    %122 = vector.load %arg15[%c24_116, %c0_117] : memref<304x128xf32, #tpu.memory_space<vmem>>, vector<256x128xf32>
    tpu.vector_store %arg15[%c24_116, %c0_117], %121 {strides = array<i32>} : memref<304x128xf32, #tpu.memory_space<vmem>>, vector<256x128xf32>,
    %c8_118 = arith.constant 8 : index
    %c0_119 = arith.constant 0 : index
    %123 = vector.load %arg15[%c8_118, %c0_119] : memref<304x128xf32, #tpu.memory_space<vmem>>, vector<288x128xf32>
    %c7_120 = arith.constant 7 : index
    %c0_121 = arith.constant 0 : index
    %124 = vector.load %arg15[%c7_120, %c0_121] : memref<304x128xf32, #tpu.memory_space<vmem>>, vector<288x128xf32>
    %125 = vector.broadcast %7 : vector<288x1xf32> to vector<288x128xf32>
    %126 = arith.mulf %124, %125 : vector<288x128xf32>
    %c9_122 = arith.constant 9 : index
    %c0_123 = arith.constant 0 : index
    %127 = vector.load %arg15[%c9_122, %c0_123] : memref<304x128xf32, #tpu.memory_space<vmem>>, vector<288x128xf32>
    %128 = vector.broadcast %8 : vector<288x1xf32> to vector<288x128xf32>
    %129 = arith.mulf %127, %128 : vector<288x128xf32>
    %130 = vector.extract_strided_slice %126 {offsets = [0, 0], sizes = [256, 128], strides = [1, 1]} : vector<288x128xf32> to vector<256x128xf32>
    %c0_124 = arith.constant 0 : index
    %c0_125 = arith.constant 0 : index
    %c0_126 = arith.constant 0 : index
    %c0_127 = arith.constant 0 : index
    %131 = vector.load %arg6[%c0_124, %c0_125, %c0_126, %c0_127] : memref<3x3x128x128xf32, #tpu.memory_space<vmem>>, vector<1x1x128x128xf32>
    %132 = vector.shape_cast %131 : vector<1x1x128x128xf32> to vector<128x128xf32>
    %cst_128 = arith.constant dense<0.000000e+00> : vector<256x128xf32>
    %133 = tpu.matmul %130, %132, %cst_128 {dimension_numbers = #tpu.dot_dimension_numbers<[1], [0], [0], [1], [0, 0, 1, 1], [], []>} : vector<256x128xf32>, vector<128x128xf32>, vector<256x128xf32> -> vector<256x128xf32>
    %134 = vector.extract_strided_slice %123 {offsets = [0, 0], sizes = [256, 128], strides = [1, 1]} : vector<288x128xf32> to vector<256x128xf32>
    %c0_129 = arith.constant 0 : index
    %c1_130 = arith.constant 1 : index
    %c0_131 = arith.constant 0 : index
    %c0_132 = arith.constant 0 : index
    %135 = vector.load %arg6[%c0_129, %c1_130, %c0_131, %c0_132] : memref<3x3x128x128xf32, #tpu.memory_space<vmem>>, vector<1x1x128x128xf32>
    %136 = vector.shape_cast %135 : vector<1x1x128x128xf32> to vector<128x128xf32>
    %cst_133 = arith.constant dense<0.000000e+00> : vector<256x128xf32>
    %137 = tpu.matmul %134, %136, %cst_133 {dimension_numbers = #tpu.dot_dimension_numbers<[1], [0], [0], [1], [0, 0, 1, 1], [], []>} : vector<256x128xf32>, vector<128x128xf32>, vector<256x128xf32> -> vector<256x128xf32>
    %138 = arith.addf %133, %137 : vector<256x128xf32>
    %139 = vector.extract_strided_slice %129 {offsets = [0, 0], sizes = [256, 128], strides = [1, 1]} : vector<288x128xf32> to vector<256x128xf32>
    %c0_134 = arith.constant 0 : index
    %c2_135 = arith.constant 2 : index
    %c0_136 = arith.constant 0 : index
    %c0_137 = arith.constant 0 : index
    %140 = vector.load %arg6[%c0_134, %c2_135, %c0_136, %c0_137] : memref<3x3x128x128xf32, #tpu.memory_space<vmem>>, vector<1x1x128x128xf32>
    %141 = vector.shape_cast %140 : vector<1x1x128x128xf32> to vector<128x128xf32>
    %cst_138 = arith.constant dense<0.000000e+00> : vector<256x128xf32>
    %142 = tpu.matmul %139, %141, %cst_138 {dimension_numbers = #tpu.dot_dimension_numbers<[1], [0], [0], [1], [0, 0, 1, 1], [], []>} : vector<256x128xf32>, vector<128x128xf32>, vector<256x128xf32> -> vector<256x128xf32>
    %143 = arith.addf %138, %142 : vector<256x128xf32>
    %144 = vector.extract_strided_slice %126 {offsets = [16, 0], sizes = [256, 128], strides = [1, 1]} : vector<288x128xf32> to vector<256x128xf32>
    %c1_139 = arith.constant 1 : index
    %c0_140 = arith.constant 0 : index
    %c0_141 = arith.constant 0 : index
    %c0_142 = arith.constant 0 : index
    %145 = vector.load %arg6[%c1_139, %c0_140, %c0_141, %c0_142] : memref<3x3x128x128xf32, #tpu.memory_space<vmem>>, vector<1x1x128x128xf32>
    %146 = vector.shape_cast %145 : vector<1x1x128x128xf32> to vector<128x128xf32>
    %cst_143 = arith.constant dense<0.000000e+00> : vector<256x128xf32>
    %147 = tpu.matmul %144, %146, %cst_143 {dimension_numbers = #tpu.dot_dimension_numbers<[1], [0], [0], [1], [0, 0, 1, 1], [], []>} : vector<256x128xf32>, vector<128x128xf32>, vector<256x128xf32> -> vector<256x128xf32>
    %148 = arith.addf %143, %147 : vector<256x128xf32>
    %149 = vector.extract_strided_slice %123 {offsets = [16, 0], sizes = [256, 128], strides = [1, 1]} : vector<288x128xf32> to vector<256x128xf32>
    %c1_144 = arith.constant 1 : index
    %c1_145 = arith.constant 1 : index
    %c0_146 = arith.constant 0 : index
    %c0_147 = arith.constant 0 : index
    %150 = vector.load %arg6[%c1_144, %c1_145, %c0_146, %c0_147] : memref<3x3x128x128xf32, #tpu.memory_space<vmem>>, vector<1x1x128x128xf32>
    %151 = vector.shape_cast %150 : vector<1x1x128x128xf32> to vector<128x128xf32>
    %cst_148 = arith.constant dense<0.000000e+00> : vector<256x128xf32>
    %152 = tpu.matmul %149, %151, %cst_148 {dimension_numbers = #tpu.dot_dimension_numbers<[1], [0], [0], [1], [0, 0, 1, 1], [], []>} : vector<256x128xf32>, vector<128x128xf32>, vector<256x128xf32> -> vector<256x128xf32>
    %153 = arith.addf %148, %152 : vector<256x128xf32>
    %154 = vector.extract_strided_slice %129 {offsets = [16, 0], sizes = [256, 128], strides = [1, 1]} : vector<288x128xf32> to vector<256x128xf32>
    %c1_149 = arith.constant 1 : index
    %c2_150 = arith.constant 2 : index
    %c0_151 = arith.constant 0 : index
    %c0_152 = arith.constant 0 : index
    %155 = vector.load %arg6[%c1_149, %c2_150, %c0_151, %c0_152] : memref<3x3x128x128xf32, #tpu.memory_space<vmem>>, vector<1x1x128x128xf32>
    %156 = vector.shape_cast %155 : vector<1x1x128x128xf32> to vector<128x128xf32>
    %cst_153 = arith.constant dense<0.000000e+00> : vector<256x128xf32>
    %157 = tpu.matmul %154, %156, %cst_153 {dimension_numbers = #tpu.dot_dimension_numbers<[1], [0], [0], [1], [0, 0, 1, 1], [], []>} : vector<256x128xf32>, vector<128x128xf32>, vector<256x128xf32> -> vector<256x128xf32>
    %158 = arith.addf %153, %157 : vector<256x128xf32>
    %159 = vector.extract_strided_slice %126 {offsets = [32, 0], sizes = [256, 128], strides = [1, 1]} : vector<288x128xf32> to vector<256x128xf32>
    %c2_154 = arith.constant 2 : index
    %c0_155 = arith.constant 0 : index
    %c0_156 = arith.constant 0 : index
    %c0_157 = arith.constant 0 : index
    %160 = vector.load %arg6[%c2_154, %c0_155, %c0_156, %c0_157] : memref<3x3x128x128xf32, #tpu.memory_space<vmem>>, vector<1x1x128x128xf32>
    %161 = vector.shape_cast %160 : vector<1x1x128x128xf32> to vector<128x128xf32>
    %cst_158 = arith.constant dense<0.000000e+00> : vector<256x128xf32>
    %162 = tpu.matmul %159, %161, %cst_158 {dimension_numbers = #tpu.dot_dimension_numbers<[1], [0], [0], [1], [0, 0, 1, 1], [], []>} : vector<256x128xf32>, vector<128x128xf32>, vector<256x128xf32> -> vector<256x128xf32>
    %163 = arith.addf %158, %162 : vector<256x128xf32>
    %164 = vector.extract_strided_slice %123 {offsets = [32, 0], sizes = [256, 128], strides = [1, 1]} : vector<288x128xf32> to vector<256x128xf32>
    %c2_159 = arith.constant 2 : index
    %c1_160 = arith.constant 1 : index
    %c0_161 = arith.constant 0 : index
    %c0_162 = arith.constant 0 : index
    %165 = vector.load %arg6[%c2_159, %c1_160, %c0_161, %c0_162] : memref<3x3x128x128xf32, #tpu.memory_space<vmem>>, vector<1x1x128x128xf32>
    %166 = vector.shape_cast %165 : vector<1x1x128x128xf32> to vector<128x128xf32>
    %cst_163 = arith.constant dense<0.000000e+00> : vector<256x128xf32>
    %167 = tpu.matmul %164, %166, %cst_163 {dimension_numbers = #tpu.dot_dimension_numbers<[1], [0], [0], [1], [0, 0, 1, 1], [], []>} : vector<256x128xf32>, vector<128x128xf32>, vector<256x128xf32> -> vector<256x128xf32>
    %168 = arith.addf %163, %167 : vector<256x128xf32>
    %169 = vector.extract_strided_slice %129 {offsets = [32, 0], sizes = [256, 128], strides = [1, 1]} : vector<288x128xf32> to vector<256x128xf32>
    %c2_164 = arith.constant 2 : index
    %c2_165 = arith.constant 2 : index
    %c0_166 = arith.constant 0 : index
    %c0_167 = arith.constant 0 : index
    %170 = vector.load %arg6[%c2_164, %c2_165, %c0_166, %c0_167] : memref<3x3x128x128xf32, #tpu.memory_space<vmem>>, vector<1x1x128x128xf32>
    %171 = vector.shape_cast %170 : vector<1x1x128x128xf32> to vector<128x128xf32>
    %cst_168 = arith.constant dense<0.000000e+00> : vector<256x128xf32>
    %172 = tpu.matmul %169, %171, %cst_168 {dimension_numbers = #tpu.dot_dimension_numbers<[1], [0], [0], [1], [0, 0, 1, 1], [], []>} : vector<256x128xf32>, vector<128x128xf32>, vector<256x128xf32> -> vector<256x128xf32>
    %173 = arith.addf %168, %172 : vector<256x128xf32>
    %c0_169 = arith.constant 0 : index
    %c0_170 = arith.constant 0 : index
    %174 = vector.load %arg7[%c0_169, %c0_170] : memref<1x128xf32, #tpu.memory_space<vmem>>, vector<1x128xf32>
    %175 = vector.broadcast %174 : vector<1x128xf32> to vector<256x128xf32>
    %176 = arith.addf %173, %175 : vector<256x128xf32>
    %cst_171 = arith.constant 0.000000e+00 : f32
    %177 = vector.broadcast %cst_171 : f32 to vector<256x128xf32>
    %178 = arith.maximumf %176, %177 : vector<256x128xf32>
    %c0_172 = arith.constant 0 : index
    %c0_173 = arith.constant 0 : index
    %179 = vector.load %arg10[%c0_172, %c0_173] : memref<128x1024xf32, #tpu.memory_space<vmem>>, vector<128x1024xf32>
    %cst_174 = arith.constant dense<0.000000e+00> : vector<256x1024xf32>
    %180 = tpu.matmul %178, %179, %cst_174 {dimension_numbers = #tpu.dot_dimension_numbers<[1], [0], [0], [1], [0, 0, 1, 1], [], []>} : vector<256x128xf32>, vector<128x1024xf32>, vector<256x1024xf32> -> vector<256x1024xf32>
    %c0_175 = arith.constant 0 : index
    %c0_176 = arith.constant 0 : index
    %181 = vector.load %arg11[%c0_175, %c0_176] : memref<1x1024xf32, #tpu.memory_space<vmem>>, vector<1x1024xf32>
    %182 = vector.broadcast %181 : vector<1x1024xf32> to vector<256x1024xf32>
    %183 = arith.addf %180, %182 : vector<256x1024xf32>
    %cst_177 = arith.constant 0.000000e+00 : f32
    %184 = vector.broadcast %cst_177 : f32 to vector<256x1024xf32>
    %185 = arith.maximumf %183, %184 : vector<256x1024xf32>
    %c0_178 = arith.constant 0 : index
    %c0_179 = arith.constant 0 : index
    %186 = vector.load %arg12[%c0_178, %c0_179] : memref<1024x128xf32, #tpu.memory_space<vmem>>, vector<1024x128xf32>
    %cst_180 = arith.constant dense<0.000000e+00> : vector<256x128xf32>
    %187 = tpu.matmul %185, %186, %cst_180 {dimension_numbers = #tpu.dot_dimension_numbers<[1], [0], [0], [1], [0, 0, 1, 1], [], []>} : vector<256x1024xf32>, vector<1024x128xf32>, vector<256x128xf32> -> vector<256x128xf32>
    %c0_181 = arith.constant 0 : index
    %c0_182 = arith.constant 0 : index
    %188 = vector.load %arg13[%c0_181, %c0_182] : memref<1x128xf32, #tpu.memory_space<vmem>>, vector<1x128xf32>
    %189 = vector.broadcast %188 : vector<1x128xf32> to vector<256x128xf32>
    %190 = arith.addf %187, %189 : vector<256x128xf32>
    %c0_183 = arith.constant 0 : index
    %c0_184 = arith.constant 0 : index
    %c0_185 = arith.constant 0 : index
    %191 = vector.load %arg14[%c0_183, %c0_184, %c0_185] : memref<1x256x128xf32, #tpu.memory_space<vmem>>, vector<1x256x128xf32>
    %192 = vector.shape_cast %191 : vector<1x256x128xf32> to vector<256x128xf32>
    %193 = vector.shape_cast %190 : vector<256x128xf32> to vector<1x256x128xf32>
    tpu.vector_store %arg14[%c0_183, %c0_184, %c0_185], %193 {strides = array<i32>} : memref<1x256x128xf32, #tpu.memory_space<vmem>>, vector<1x256x128xf32>,
    return
  }
  func.func @transform_0(%arg0: i32) -> (i32, i32, i32) {
    %c0_i32 = arith.constant 0 : i32
    %c0_i32_0 = arith.constant 0 : i32
    %c0_i32_1 = arith.constant 0 : i32
    return %arg0, %c0_i32, %c0_i32_0 : i32, i32, i32
  }
  func.func @transform_1(%arg0: i32) -> (i32, i32, i32, i32) {
    %c0_i32 = arith.constant 0 : i32
    %c0_i32_0 = arith.constant 0 : i32
    %c0_i32_1 = arith.constant 0 : i32
    %c0_i32_2 = arith.constant 0 : i32
    %c0_i32_3 = arith.constant 0 : i32
    return %c0_i32, %c0_i32_0, %c0_i32_1, %c0_i32_2 : i32, i32, i32, i32
  }
  func.func @transform_2(%arg0: i32) -> (i32, i32) {
    %c0_i32 = arith.constant 0 : i32
    %c0_i32_0 = arith.constant 0 : i32
    %c0_i32_1 = arith.constant 0 : i32
    return %c0_i32, %c0_i32_0 : i32, i32
  }
  func.func @transform_3(%arg0: i32) -> (i32, i32, i32, i32) {
    %c0_i32 = arith.constant 0 : i32
    %c0_i32_0 = arith.constant 0 : i32
    %c0_i32_1 = arith.constant 0 : i32
    %c0_i32_2 = arith.constant 0 : i32
    %c0_i32_3 = arith.constant 0 : i32
    return %c0_i32, %c0_i32_0, %c0_i32_1, %c0_i32_2 : i32, i32, i32, i32
  }
  func.func @transform_4(%arg0: i32) -> (i32, i32) {
    %c0_i32 = arith.constant 0 : i32
    %c0_i32_0 = arith.constant 0 : i32
    %c0_i32_1 = arith.constant 0 : i32
    return %c0_i32, %c0_i32_0 : i32, i32
  }
  func.func @transform_5(%arg0: i32) -> (i32, i32, i32, i32) {
    %c0_i32 = arith.constant 0 : i32
    %c0_i32_0 = arith.constant 0 : i32
    %c0_i32_1 = arith.constant 0 : i32
    %c0_i32_2 = arith.constant 0 : i32
    %c0_i32_3 = arith.constant 0 : i32
    return %c0_i32, %c0_i32_0, %c0_i32_1, %c0_i32_2 : i32, i32, i32, i32
  }
  func.func @transform_6(%arg0: i32) -> (i32, i32) {
    %c0_i32 = arith.constant 0 : i32
    %c0_i32_0 = arith.constant 0 : i32
    %c0_i32_1 = arith.constant 0 : i32
    return %c0_i32, %c0_i32_0 : i32, i32
  }
  func.func @transform_7(%arg0: i32) -> (i32, i32) {
    %c0_i32 = arith.constant 0 : i32
    %c0_i32_0 = arith.constant 0 : i32
    %c0_i32_1 = arith.constant 0 : i32
    return %c0_i32, %c0_i32_0 : i32, i32
  }
  func.func @transform_8(%arg0: i32) -> (i32, i32) {
    %c0_i32 = arith.constant 0 : i32
    %c0_i32_0 = arith.constant 0 : i32
    %c0_i32_1 = arith.constant 0 : i32
    return %c0_i32, %c0_i32_0 : i32, i32
  }
  func.func @transform_9(%arg0: i32) -> (i32, i32) {
    %c0_i32 = arith.constant 0 : i32
    %c0_i32_0 = arith.constant 0 : i32
    %c0_i32_1 = arith.constant 0 : i32
    return %c0_i32, %c0_i32_0 : i32, i32
  }
  func.func @transform_10(%arg0: i32) -> (i32, i32) {
    %c0_i32 = arith.constant 0 : i32
    %c0_i32_0 = arith.constant 0 : i32
    %c0_i32_1 = arith.constant 0 : i32
    return %c0_i32, %c0_i32_0 : i32, i32
  }
  func.func @transform_11(%arg0: i32) -> (i32, i32) {
    %c0_i32 = arith.constant 0 : i32
    %c0_i32_0 = arith.constant 0 : i32
    %c0_i32_1 = arith.constant 0 : i32
    return %c0_i32, %c0_i32_0 : i32, i32
  }
  func.func @transform_12(%arg0: i32) -> (i32, i32) {
    %c0_i32 = arith.constant 0 : i32
    %c0_i32_0 = arith.constant 0 : i32
    %c0_i32_1 = arith.constant 0 : i32
    return %c0_i32, %c0_i32_0 : i32, i32
  }
  func.func @transform_13(%arg0: i32) -> (i32, i32, i32) {
    %c0_i32 = arith.constant 0 : i32
    %c0_i32_0 = arith.constant 0 : i32
    %c0_i32_1 = arith.constant 0 : i32
    return %arg0, %c0_i32, %c0_i32_0 : i32, i32, i32
  }
}

</mosaic_0001>

<bundles_post_ra>
// kernel: _lambda_.1
= control target key start
LH: loop header
LB: loop body
LE: loop exit
PB: predicated region body
PF: predicated region fallthrough
CT: control target
= control target key end

     0   :  { %s21811_s0 = inlined_call_operand.vmem [shape: f32[2,256,128], index: 0, kind: input, shape index: {}]   ;;  %s21812_s1 = inlined_call_operand.hbm [shape: f32[3,3,128,128], index: 1, kind: input, shape index: {}]   ;;  %s21813_s2 = inlined_call_operand.vmem [shape: f32[1,128], index: 2, kind: input, shape index: {}]   ;;  %s21814_s3 = inlined_call_operand.hbm [shape: f32[3,3,128,128], index: 3, kind: input, shape index: {}]   ;;  %s21815_s4 = inlined_call_operand.vmem [shape: f32[1,128], index: 4, kind: input, shape index: {}]   ;;  %s21816_s5 = inlined_call_operand.hbm [shape: f32[3,3,128,128], index: 5, kind: input, shape index: {}]   ;;  %s21817_s6 = inlined_call_operand.vmem [shape: f32[1,128], index: 6, kind: input, shape index: {}]   ;;  %s21818_s7 = inlined_call_operand.vmem [shape: f32[288,1], index: 7, kind: input, shape index: {}]   ;;  %s21819_s8 = inlined_call_operand.vmem [shape: f32[288,1], index: 8, kind: input, shape index: {}]   ;;  %s21820_s9 = inlined_call_operand.hbm [shape: f32[128,1024], index: 9, kind: input, shape index: {}]   ;;  %s21821_s10 = inlined_call_operand.vmem [shape: f32[1,1024], index: 10, kind: input, shape index: {}]   ;;  %s21822_s11 = inlined_call_operand.hbm [shape: f32[1024,128], index: 11, kind: input, shape index: {}]   ;;  %s21823_s12 = inlined_call_operand.vmem [shape: f32[1,128], index: 12, kind: input, shape index: {}]   ;;  %s21824_s13 = inlined_call_operand.vmem [shape: f32[2,256,128], index: 13, kind: output, shape index: {}]  }
   0x1   :  { %22160 = sst [smem:[#allocation129_spill]] %s21814_s3 }
   0x2   :  { %22161 = sst [smem:[#allocation130_spill]] %s21824_s13 }
   0x3   :  { %18 = vsyncpa [#allocation4], 0 }
   0x4   :  { %19 = vsyncpa [#allocation6], 0 }
   0x5   :  { %20 = vsyncpa [#allocation9], 0  ;;  %s17744_s25 = smov 0  }
   0x6 LB: > { %22162 = sst [smem:[#allocation14_spill]] %s17660_s25  ;;  %s17750_s26 = sadd.s32 4294967295, %s17660_s25   ;;  %s17660_s25 = sphi %s17744_s25, %s26_s25  }
   0x7   : > { %p11664_p0 = scmp.ge.s32.totalorder %s17660_s25, 1  ;;  %p335_p1 = scmp.lt.s32.totalorder %s17660_s25, 3 }
   0x8   : > { %p21830_p2 = scmp.eq.s32.totalorder %s17750_s26, 0  ;;  %s17662_s28 = smov [#allocation5]  }
   0x9   : > { %p17755_p3 = pnand %p11664_p0, %p335_p1  ;;  %s363_s29 = sshll.u32 %s17662_s28, 4  ;;  %s17759_s29 = int_to_ptr.vmem [resolvable:$true] %s363_s29 }
   0xa   : > { %s17663_s30 = smov [#allocation8]   ;;  %s17664_s16 = smov [#allocation3]  }
   0xb   : > { %s22163_s27 = scalar_select %p17755_p3, 1, 0 }
   0xc   : > { %p17357_p4 = pneg %p17755_p3  ;;  %s401_s14 = sshll.u32 %s17663_s30, 4  ;;  %s17763_s14 = int_to_ptr.vmem [resolvable:$true] %s401_s14 }
   0xd   : > { %s17771_s17 = sshll.u32 %s17664_s16, 4  ;;  %s22165_s3 = sld [smem:[#allocation129_spill]]  ;;  %s348_s17 = int_to_ptr.vmem [resolvable:$true] %s17771_s17 }
   0xe   : > { %p17767_p5 = pnand %p21830_p2, %p17357_p4 }
  0x10   : > { %p17781_p7 = pneg %p17767_p5 }
  0x13   : > { %s17502_s20 = scalar_lea.hbm %s22165_s3, 18432 }
  0x14   : > { %p17503_p6 = scmp.ne.s32.totalorder %s22165_s3, %s17502_s20  ;;  %p17509_p10 = scmp.lt.u32.totalorder %s17502_s20, %s22165_s3 }
  0x16   : > { %p17505_p8 = pnand %p17781_p7, %p17503_p6 }
  0x18   : > { %p17506_p9 = pneg %p17505_p8 }
  0x1a   : > { %p17511_p11 = pnand %p17509_p10, %p17506_p9 }
  0x1c   : > { %17514 = shalt.err (!%p17511_p11)
}
  0x1d   : > { %s17515_s30 = scalar_lea.vmem %s17759_s29, 18432  ;;  %p17523_p1 = scmp.lt.s32.totalorder %s17759_s29, %s17759_s29 }
  0x1e   : > { %p17516_p12 = scmp.ne.s32.totalorder %s17759_s29, %s17515_s30  ;;  %p17524_p4 = scmp.lt.s32.totalorder %s17515_s30, %s17515_s30 }
  0x20   : > { %p17518_p13 = pnand %p17516_p12, %p17781_p7  ;;  %p17525_p6 = por %p17524_p4, %p17523_p1 }
  0x22   : > { %p17519_p0 = pneg %p17518_p13 }
  0x24   : > { %p17526_p8 = pnand %p17525_p6, %p17519_p0 }
  0x26   : > { %17529 = shalt.err (!%p17526_p8)
}
  0x27   : > { %s21826_s16 = smov 128   ;;  %s21828_s18 = smov 8  }
  0x28   : > { %17363 = dma.hbm_to_vmem [thread:$0]  (!%p17767_p5), %s22165_s3, 18432, %s17759_s29, [#allocation6], %s21826_s16, %s21826_s16, %s21828_s18  }
  0x29   : > { %s17530_s24 = scalar_lea.hbm %s21820_s9, 16384 }
  0x2a   : > { %p17531_p9 = scmp.ne.s32.totalorder %s21820_s9, %s17530_s24  ;;  %p17537_p12 = scmp.lt.u32.totalorder %s17530_s24, %s21820_s9 }
  0x2c   : > { %p17533_p10 = pnand %p17531_p9, %p17781_p7 }
  0x2e   : > { %p17534_p11 = pneg %p17533_p10 }
  0x30   : > { %p17539_p13 = pnand %p17537_p12, %p17534_p11 }
  0x32   : > { %17542 = shalt.err (!%p17539_p13)
}
  0x33   : > { %s17543_s29 = scalar_lea.vmem %s17763_s14, 16384  ;;  %p17551_p6 = scmp.lt.s32.totalorder %s17763_s14, %s17763_s14 }
  0x34   : > { %p17544_p0 = scmp.ne.s32.totalorder %s17763_s14, %s17543_s29  ;;  %p17552_p8 = scmp.lt.s32.totalorder %s17543_s29, %s17543_s29 }
  0x36   : > { %p17546_p1 = pnand %p17544_p0, %p17781_p7  ;;  %p17553_p9 = por %p17552_p8, %p17551_p6 }
  0x38   : > { %p17547_p4 = pneg %p17546_p1 }
  0x3a   : > { %p17554_p10 = pnand %p17553_p9, %p17547_p4 }
  0x3c   : > { %17557 = shalt.err (!%p17554_p10)
}
  0x3d   : > { %s17667_s19 = smov 1024   ;;  %s17668_s13 = smov 64  }
  0x3e   : > { %17369 = dma.hbm_to_vmem [thread:$0]  (!%p17767_p5), %s21820_s9, 16384, %s17763_s14, [#allocation9], %s17667_s19, %s17667_s19, %s17668_s13  }
  0x3f   : > { %s17669_s21 = smov [#allocation7]   ;;  %s17558_s30 = scalar_lea.hbm %s21812_s1, 18432 }
  0x40   : > { %s379_s22 = sshll.u32 %s17669_s21, 4  ;;  %p17559_p11 = scmp.ne.s32.totalorder %s21812_s1, %s17558_s30  ;;  %s380_s22 = int_to_ptr.vmem [resolvable:$true] %s379_s22 }
  0x41   : > { %p17565_p0 = scmp.lt.u32.totalorder %s17558_s30, %s21812_s1 }
  0x42   : > { %p17561_p12 = pnand %p17559_p11, %p17781_p7 }
  0x44   : > { %p17562_p13 = pneg %p17561_p12 }
  0x46   : > { %p17567_p1 = pnand %p17565_p0, %p17562_p13 }
  0x48   : > { %17570 = shalt.err (!%p17567_p1)
}
  0x49   : > { %s17571_s14 = scalar_lea.vmem %s348_s17, 18432  ;;  %p17579_p9 = scmp.lt.s32.totalorder %s348_s17, %s348_s17 }
  0x4a   : > { %p17572_p4 = scmp.ne.s32.totalorder %s348_s17, %s17571_s14  ;;  %p17580_p10 = scmp.lt.s32.totalorder %s17571_s14, %s17571_s14 }
  0x4c   : > { %p17574_p6 = pnand %p17572_p4, %p17781_p7  ;;  %p17581_p2 = por %p17580_p10, %p17579_p9 }
  0x4e   : > { %p17575_p8 = pneg %p17574_p6 }
  0x50   : > { %p17582_p3 = pnand %p17581_p2, %p17575_p8 }
  0x52   : > { %17585 = shalt.err (!%p17582_p3)
}
  0x53   : > { %s22167_s16 = smov 8   ;;  %s22168_s19 = smov 128  }
  0x54   : > { %17360 = dma.hbm_to_vmem [thread:$0]  (!%p17767_p5), %s21812_s1, 18432, %s348_s17, [#allocation4], %s22168_s19, %s22168_s19, %s22167_s16  }
  0x55   : > { %s17586_s20 = scalar_lea.hbm %s21816_s5, 18432 }
  0x56   : > { %p17587_p2 = scmp.ne.s32.totalorder %s21816_s5, %s17586_s20  ;;  %p17593_p12 = scmp.lt.u32.totalorder %s17586_s20, %s21816_s5 }
  0x58   : > { %p17589_p3 = pnand %p17587_p2, %p17781_p7 }
  0x5a   : > { %p17590_p11 = pneg %p17589_p3 }
  0x5c   : > { %p17595_p13 = pnand %p17593_p12, %p17590_p11 }
  0x5e   : > { %17598 = shalt.err (!%p17595_p13)
}
  0x5f   : > { %s17599_s29 = scalar_lea.vmem %s380_s22, 18432  ;;  %p17607_p6 = scmp.lt.s32.totalorder %s380_s22, %s380_s22 }
  0x60   : > { %p17600_p0 = scmp.ne.s32.totalorder %s380_s22, %s17599_s29  ;;  %p17608_p8 = scmp.lt.s32.totalorder %s17599_s29, %s17599_s29 }
  0x62   : > { %p17602_p1 = pnand %p17600_p0, %p17781_p7  ;;  %p17609_p9 = por %p17608_p8, %p17607_p6 }
  0x64   : > { %p17603_p4 = pneg %p17602_p1 }
  0x66   : > { %p17610_p10 = pnand %p17609_p9, %p17603_p4 }
  0x68   : > { %17613 = shalt.err (!%p17610_p10)
}
  0x69   : > { %17366 = dma.hbm_to_vmem [thread:$0]  (!%p17767_p5), %s21816_s5, 18432, %s380_s22, [#allocation6], %s22168_s19, %s22168_s19, %s22167_s16  }
  0x6a   : > { %s17670_s3 = smov [#allocation10]   ;;  %s17614_s20 = scalar_lea.hbm %s21822_s11, 16384 }
  0x6b   : > { %s417_s18 = sshll.u32 %s17670_s3, 4  ;;  %p17615_p2 = scmp.ne.s32.totalorder %s21822_s11, %s17614_s20  ;;  %s418_s18 = int_to_ptr.vmem [resolvable:$true] %s417_s18 }
  0x6c   : > { %p17621_p12 = scmp.lt.u32.totalorder %s17614_s20, %s21822_s11 }
  0x6d   : > { %p17617_p3 = pnand %p17615_p2, %p17781_p7 }
  0x6f   : > { %p17618_p11 = pneg %p17617_p3 }
  0x71   : > { %p17623_p13 = pnand %p17621_p12, %p17618_p11 }
  0x73   : > { %17626 = shalt.err (!%p17623_p13)
}
  0x74   : > { %s17627_s22 = scalar_lea.vmem %s418_s18, 16384  ;;  %p17635_p6 = scmp.lt.s32.totalorder %s418_s18, %s418_s18 }
  0x75   : > { %p17628_p0 = scmp.ne.s32.totalorder %s418_s18, %s17627_s22  ;;  %p17636_p8 = scmp.lt.s32.totalorder %s17627_s22, %s17627_s22 }
  0x77   : > { %p17630_p1 = pnand %p17628_p0, %p17781_p7  ;;  %p17637_p9 = por %p17636_p8, %p17635_p6 }
  0x79   : > { %p17631_p4 = pneg %p17630_p1 }
  0x7b   : > { %p17638_p10 = pnand %p17637_p9, %p17631_p4 }
  0x7d   : > { %17641 = shalt.err (!%p17638_p10)
}
  0x7e   : > { %17372 = dma.hbm_to_vmem [thread:$0]  (!%p17767_p5), %s21822_s11, 16384, %s418_s18, [#allocation9], %s22168_s19, %s22168_s19, %s22167_s16  }
  0x7f   : > { %p22169_p2 = scmp.ne.s32.totalorder %s22163_s27, 0 }
  0x81   : > { %444 = sbr.rel (%p22169_p2) target bundleno = 3459 (0xd83), region = 72 }
  0x88   : > { %p22170_p7 = scmp.eq.s32.totalorder %s17750_s26, 0 }
  0x8a   : > { %17647 = dma.done.wait (%p22170_p7), [#allocation4], 18432   ;;  %p22171_p3 = pmov %p22170_p7 }
  0x8c   : > { %17649 = vsyncadd (%p22171_p3), [#allocation4], 4294948864  ;;  %p22172_p11 = pmov %p22171_p3 }
  0x8d   : > { %p22173_p12 = pmov %p22171_p3 }
  0x8e   : > { %17651 = dma.done.wait (%p22172_p11), [#allocation6], 36864  }
  0x8f   : > { %17653 = vsyncadd (%p22173_p12), [#allocation6], 4294930432  ;;  %p22174_p13 = pmov %p22171_p3 }
  0x90   : > { %p22175_p5 = pmov %p22171_p3 }
  0x91   : > { %17655 = dma.done.wait (%p22174_p13), [#allocation9], 32768  }
  0x92   : > { %17657 = vsyncadd (%p22175_p5), [#allocation9], 4294934528  ;;  %v17671_v0 = vmov 0   ;;  %v17672_v1 = vmov 0.0   ;;  %v586_v2 = vld [vmem:[%s21818_s7 + $0x10] sm:$0xff]  ;;  %v584_v3 = vld [vmem:[%s21818_s7] sm:$0xff] }
  0x93   : > { %17404 = vset.pattern.permute.xlu1 %v17671_v0  ;;  %17403 = vset.pattern.permute.xlu0 %v17671_v0  ;;  %515 = vst [vmem:[#allocation2 + $0x8] sm:$0xff] %v17672_v1  ;;  %514 = vst [vmem:[#allocation2] sm:$0xff] %v17672_v1  ;;  %v587_v4 = vld [vmem:[%s21818_s7 + $0x18] sm:$0xff]  ;;  %v585_v5 = vld [vmem:[%s21818_s7 + $0x8] sm:$0xff]  ;;  %p504_p0 = scmp.lt.s32.totalorder %s17750_s26, 1  ;;  %s22916_s30 = sld [smem:[#allocation130_spill]] }
  0x94   : > { %516 = vst [vmem:[#allocation2 + $0x10] sm:$0xff] %v17672_v1  ;;  %517 = vst [vmem:[#allocation2 + $0x118] sm:$0xff] %v17672_v1  ;;  %13017 = vmatprep.mubr.f32.mxu0 %v17672_v1  ;;  %13737 = vmatprep.mubr.f32.mxu1 %v17672_v1  ;;  %v589_v6 = vld [vmem:[%s21818_s7 + $0x28] sm:$0xff]  ;;  %v588_v7 = vld [vmem:[%s21818_s7 + $0x20] sm:$0xff] }
  0x95   : > { %518 = vst [vmem:[#allocation2 + $0x120] sm:$0xff] %v17672_v1  ;;  %519 = vst [vmem:[#allocation2 + $0x128] sm:$0xff] %v17672_v1  ;;  %740 = vperm.xlu1 %17404, %v586_v2   ;;  %730 = vperm.xlu0 %17403, %v584_v3   ;;  %v1213_v8 = vld [vmem:[#allocation3 + $0x80] sm:$0xff]  ;;  %v1214_v9 = vld [vmem:[#allocation3 + $0x88] sm:$0xff]  ;;  %s22919_s26 = smov (!%p504_p0, %s17750_s26), 1 }
  0x96   : > { %v15145_v10 = vpack.c.bf16 %v1214_v9, %v1213_v8  ;;  %v1215_v11 = vld [vmem:[#allocation3 + $0x90] sm:$0xff]  ;;  %v1216_v12 = vld [vmem:[#allocation3 + $0x98] sm:$0xff]  ;;  %v1217_v14 = vld [vmem:[#allocation3 + $0xa0] sm:$0xff]  ;;  %s11687_s29 = sshll.u32 %s22919_s26, 8 }
  0x97   : > { %v15149_v13 = vpack.c.bf16 %v1216_v12, %v1215_v11  ;;  %v1218_v15 = vld [vmem:[#allocation3 + $0xa8] sm:$0xff]  ;;  %v590_v17 = vld [vmem:[%s21818_s7 + $0x30] sm:$0xff]  ;;  %v1219_v19 = vld [vmem:[#allocation3 + $0xb0] sm:$0xff]  ;;  %s17954_s14 = scalar_lea.vmem %s21811_s0, %s11687_s29 }
  0x98   : > { %v591_v16 = vld [vmem:[%s21818_s7 + $0x38] sm:$0xff]  ;;  %15146 = vmatprep.subr.bf16.mxu0 %v15145_v10  ;;  %v15153_v18 = vpack.c.bf16 %v1218_v15, %v1217_v14  ;;  %v1220_v20 = vld [vmem:[#allocation3 + $0xb8] sm:$0xff]  ;;  %v592_v22 = vld [vmem:[%s21818_s7 + $0x40] sm:$0xff] }
  0x99   : > { %745 = vperm.xlu1 %17404, %v587_v4   ;;  %735 = vperm.xlu0 %17403, %v585_v5   ;;  %v593_v21 = vld [vmem:[%s21818_s7 + $0x48] sm:$0xff]  ;;  %v15157_v23 = vpack.c.bf16 %v1220_v20, %v1219_v19  ;;  %v1221_v24 = vld [vmem:[#allocation3 + $0xc0] sm:$0xff]  ;;  %v1222_v25 = vld [vmem:[#allocation3 + $0xc8] sm:$0xff]  ;;  %s21742_s22 = scalar_lea.vmem %s22916_s30, %s11687_s29 }
  0x9a   : > { %15148 = vmatpush3.bf16.msra.mxu0 %v15145_v10  ;;  %v595_v26 = vld [vmem:[%s21818_s7 + $0x58] sm:$0xff]  ;;  %v594_v27 = vld [vmem:[%s21818_s7 + $0x50] sm:$0xff]  ;;  %v17963_v28 = vld [vmem:[%s17954_s14] sm:$0xff]  ;;  %v15161_v30 = vpack.c.bf16 %v1222_v25, %v1221_v24 }
  0x9b   : > { %15150 = vmatprep.subr.bf16.mxu0 %v15149_v13  ;;  %552 = vst [vmem:[#allocation2 + $0x18] sm:$0xff] %v17963_v28  ;;  %v17967_v29 = vld [vmem:[%s17954_s14 + $0x8] sm:$0xff]  ;;  %v17971_v31 = vld [vmem:[%s17954_s14 + $0x10] sm:$0xff]  ;;  %v17974_v32 = vld [vmem:[%s17954_s14 + $0x18] sm:$0xff] }
  0x9c   : > { %553 = vst [vmem:[#allocation2 + $0x20] sm:$0xff] %v17967_v29  ;;  %v597_v33 = vld [vmem:[%s21818_s7 + $0x68] sm:$0xff]  ;;  %v1223_v34 = vld [vmem:[#allocation3 + $0xd0] sm:$0xff]  ;;  %554 = vst [vmem:[#allocation2 + $0x28] sm:$0xff] %v17971_v31 }
  0x9d   : > { %755 = vperm.xlu1 %17404, %v589_v6   ;;  %750 = vperm.xlu0 %17403, %v588_v7   ;;  %v1224_v35 = vld [vmem:[#allocation3 + $0xd8] sm:$0xff]  ;;  %555 = vst [vmem:[#allocation2 + $0x30] sm:$0xff] %v17974_v32  ;;  %v596_v36 = vld [vmem:[%s21818_s7 + $0x60] sm:$0xff]  ;;  %v17993_v39 = vld [vmem:[%s17954_s14 + $0x30] sm:$0xff] }
  0x9e   : > { %15152 = vmatpush3.bf16.msra.mxu0 %v15149_v13  ;;  %v17985_v37 = vld [vmem:[%s17954_s14 + $0x20] sm:$0xff]  ;;  %v17988_v38 = vld [vmem:[%s17954_s14 + $0x28] sm:$0xff]  ;;  %v17996_v40 = vld [vmem:[%s17954_s14 + $0x38] sm:$0xff]  ;;  %v15165_v41 = vpack.c.bf16 %v1224_v35, %v1223_v34  ;;  %558 = vst [vmem:[#allocation2 + $0x48] sm:$0xff] %v17993_v39 }
  0x9f   : > { %15154 = vmatprep.subr.bf16.mxu0 %v15153_v18  ;;  %556 = vst [vmem:[#allocation2 + $0x38] sm:$0xff] %v17985_v37  ;;  %557 = vst [vmem:[#allocation2 + $0x40] sm:$0xff] %v17988_v38  ;;  %v1225_v42 = vld [vmem:[#allocation3 + $0xe0] sm:$0xff]  ;;  %v1226_v43 = vld [vmem:[#allocation3 + $0xe8] sm:$0xff] }
  0xa0   : > { %559 = vst [vmem:[#allocation2 + $0x50] sm:$0xff] %v17996_v40  ;;  %v18001_v44 = vld [vmem:[%s17954_s14 + $0x40] sm:$0xff]  ;;  %v18004_v45 = vld [vmem:[%s17954_s14 + $0x48] sm:$0xff]  ;;  %v599_v46 = vld [vmem:[%s21818_s7 + $0x78] sm:$0xff]  ;;  %v15169_v51 = vpack.c.bf16 %v1226_v43, %v1225_v42 }
  0xa1   : > { %765 = vperm.xlu1 %17404, %v591_v16   ;;  %760 = vperm.xlu0 %17403, %v590_v17   ;;  %v598_v47 = vld [vmem:[%s21818_s7 + $0x70] sm:$0xff]  ;;  %560 = vst [vmem:[#allocation2 + $0x58] sm:$0xff] %v18001_v44  ;;  %561 = vst [vmem:[#allocation2 + $0x60] sm:$0xff] %v18004_v45  ;;  %v18019_v49 = vld [vmem:[%s17954_s14 + $0x58] sm:$0xff] }
  0xa2   : > { %15156 = vmatpush3.bf16.msra.mxu0 %v15153_v18  ;;  %v18015_v48 = vld [vmem:[%s17954_s14 + $0x50] sm:$0xff]  ;;  %v601_v50 = vld [vmem:[%s21818_s7 + $0x88] sm:$0xff]  ;;  %563 = vst [vmem:[#allocation2 + $0x70] sm:$0xff] %v18019_v49  ;;  %v18026_v52 = vld [vmem:[%s17954_s14 + $0x60] sm:$0xff] }
  0xa3   : > { %15158 = vmatprep.subr.bf16.mxu0 %v15157_v23  ;;  %562 = vst [vmem:[#allocation2 + $0x68] sm:$0xff] %v18015_v48  ;;  %v1227_v53 = vld [vmem:[#allocation3 + $0xf0] sm:$0xff]  ;;  %v1228_v54 = vld [vmem:[#allocation3 + $0xf8] sm:$0xff]  ;;  %564 = vst [vmem:[#allocation2 + $0x78] sm:$0xff] %v18026_v52 }
  0xa4   : > { %v18030_v55 = vld [vmem:[%s17954_s14 + $0x68] sm:$0xff]  ;;  %v600_v56 = vld [vmem:[%s21818_s7 + $0x80] sm:$0xff]  ;;  %v18037_v57 = vld [vmem:[%s17954_s14 + $0x70] sm:$0xff]  ;;  %v15173_v59 = vpack.c.bf16 %v1228_v54, %v1227_v53 }
  0xa5   : > { %775 = vperm.xlu1 %17404, %v593_v21   ;;  %770 = vperm.xlu0 %17403, %v592_v22   ;;  %565 = vst [vmem:[#allocation2 + $0x80] sm:$0xff] %v18030_v55  ;;  %v18040_v58 = vld [vmem:[%s17954_s14 + $0x78] sm:$0xff]  ;;  %566 = vst [vmem:[#allocation2 + $0x88] sm:$0xff] %v18037_v57  ;;  %v1196_v60 = vld [vmem:[#allocation3] sm:$0xff] }
  0xa6   : > { %15160 = vmatpush3.bf16.msra.mxu0 %v15157_v23  ;;  %567 = vst [vmem:[#allocation2 + $0x90] sm:$0xff] %v18040_v58  ;;  %v18045_v61 = vld [vmem:[%s17954_s14 + $0x80] sm:$0xff]  ;;  %v18048_v62 = vld [vmem:[%s17954_s14 + $0x88] sm:$0xff]  ;;  %v1197_v63 = vld [vmem:[#allocation3 + $0x8] sm:$0xff] }
  0xa7   : > { %15162 = vmatprep.subr.bf16.mxu0 %v15161_v30  ;;  %568 = vst [vmem:[#allocation2 + $0x98] sm:$0xff] %v18045_v61  ;;  %569 = vst [vmem:[#allocation2 + $0xa0] sm:$0xff] %v18048_v62  ;;  %v18053_v0 = vld [vmem:[%s17954_s14 + $0x90] sm:$0xff]  ;;  %v18056_v2 = vld [vmem:[%s17954_s14 + $0x98] sm:$0xff]  ;;  %v15177_v7 = vpack.c.bf16 %v1197_v63, %v1196_v60 }
  0xa8   : > { %v603_v3 = vld [vmem:[%s21818_s7 + $0x98] sm:$0xff]  ;;  %v602_v4 = vld [vmem:[%s21818_s7 + $0x90] sm:$0xff]  ;;  %570 = vst [vmem:[#allocation2 + $0xa8] sm:$0xff] %v18053_v0  ;;  %571 = vst [vmem:[#allocation2 + $0xb0] sm:$0xff] %v18056_v2 }
  0xa9   : > { %785 = vperm.xlu1 %17404, %v595_v26   ;;  %780 = vperm.xlu0 %17403, %v594_v27   ;;  %v18067_v5 = vld [vmem:[%s17954_s14 + $0xa0] sm:$0xff]  ;;  %v18070_v6 = vld [vmem:[%s17954_s14 + $0xa8] sm:$0xff]  ;;  %v18075_v8 = vld [vmem:[%s17954_s14 + $0xb0] sm:$0xff] }
  0xaa   : > { %15164 = vmatpush3.bf16.msra.mxu0 %v15161_v30  ;;  %572 = vst [vmem:[#allocation2 + $0xb8] sm:$0xff] %v18067_v5  ;;  %573 = vst [vmem:[#allocation2 + $0xc0] sm:$0xff] %v18070_v6  ;;  %v1198_v9 = vld [vmem:[#allocation3 + $0x10] sm:$0xff]  ;;  %v1199_v10 = vld [vmem:[#allocation3 + $0x18] sm:$0xff] }
  0xab   : > { %15166 = vmatprep.subr.bf16.mxu0 %v15165_v41  ;;  %574 = vst [vmem:[#allocation2 + $0xc8] sm:$0xff] %v18075_v8  ;;  %v18079_v11 = vld [vmem:[%s17954_s14 + $0xb8] sm:$0xff]  ;;  %v605_v12 = vld [vmem:[%s21818_s7 + $0xa8] sm:$0xff]  ;;  %v604_v13 = vld [vmem:[%s21818_s7 + $0xa0] sm:$0xff]  ;;  %v15181_v16 = vpack.c.bf16 %v1199_v10, %v1198_v9 }
  0xac   : > { %575 = vst [vmem:[#allocation2 + $0xd0] sm:$0xff] %v18079_v11  ;;  %v18089_v14 = vld [vmem:[%s17954_s14 + $0xc0] sm:$0xff]  ;;  %v18093_v15 = vld [vmem:[%s17954_s14 + $0xc8] sm:$0xff]  ;;  %v18097_v17 = vld [vmem:[%s17954_s14 + $0xd0] sm:$0xff] }
  0xad   : > { %795 = vperm.xlu1 %17404, %v597_v33   ;;  %790 = vperm.xlu0 %17403, %v596_v36   ;;  %576 = vst [vmem:[#allocation2 + $0xd8] sm:$0xff] %v18089_v14  ;;  %577 = vst [vmem:[#allocation2 + $0xe0] sm:$0xff] %v18093_v15  ;;  %v18100_v18 = vld [vmem:[%s17954_s14 + $0xd8] sm:$0xff]  ;;  %v1200_v19 = vld [vmem:[#allocation3 + $0x20] sm:$0xff] }
  0xae   : > { %15168 = vmatpush3.bf16.msra.mxu0 %v15165_v41  ;;  %v1201_v20 = vld [vmem:[#allocation3 + $0x28] sm:$0xff]  ;;  %578 = vst [vmem:[#allocation2 + $0xe8] sm:$0xff] %v18097_v17  ;;  %579 = vst [vmem:[#allocation2 + $0xf0] sm:$0xff] %v18100_v18  ;;  %v606_v22 = vld [vmem:[%s21818_s7 + $0xb0] sm:$0xff] }
  0xaf   : > { %15170 = vmatprep.subr.bf16.mxu0 %v15169_v51  ;;  %v607_v21 = vld [vmem:[%s21818_s7 + $0xb8] sm:$0xff]  ;;  %v18112_v23 = vld [vmem:[%s17954_s14 + $0xe0] sm:$0xff]  ;;  %v18117_v24 = vld [vmem:[%s17954_s14 + $0xe8] sm:$0xff]  ;;  %v15185_v25 = vpack.c.bf16 %v1201_v20, %v1200_v19 }
  0xb0   : > { %580 = vst [vmem:[#allocation2 + $0xf8] sm:$0xff] %v18112_v23  ;;  %581 = vst [vmem:[#allocation2 + $0x100] sm:$0xff] %v18117_v24  ;;  %v1202_v26 = vld [vmem:[#allocation3 + $0x30] sm:$0xff]  ;;  %v1203_v27 = vld [vmem:[#allocation3 + $0x38] sm:$0xff] }
  0xb1   : > { %805 = vperm.xlu1 %17404, %v599_v46   ;;  %800 = vperm.xlu0 %17403, %v598_v47   ;;  %v15189_v30 = vpack.c.bf16 %v1203_v27, %v1202_v26  ;;  %v1204_v33 = vld [vmem:[#allocation3 + $0x40] sm:$0xff]  ;;  %v1205_v34 = vld [vmem:[#allocation3 + $0x48] sm:$0xff]  ;;  %v1207_v41 = vld [vmem:[#allocation3 + $0x58] sm:$0xff] }
  0xb2   : > { %15172 = vmatpush3.bf16.msra.mxu0 %v15169_v51  ;;  %v611_v35 = vld [vmem:[%s21818_s7 + $0xd8] sm:$0xff]  ;;  %v610_v36 = vld [vmem:[%s21818_s7 + $0xd0] sm:$0xff]  ;;  %v613_v42 = vld [vmem:[%s21818_s7 + $0xe8] sm:$0xff] }
  0xb3   : > { %15174 = vmatprep.subr.bf16.mxu0 %v15173_v59  ;;  %v612_v43 = vld [vmem:[%s21818_s7 + $0xe0] sm:$0xff]  ;;  %v1209_v46 = vld [vmem:[#allocation3 + $0x68] sm:$0xff]  ;;  %v1211_v51 = vld [vmem:[#allocation3 + $0x78] sm:$0xff] }
  0xb4   : > { %v615_v47 = vld [vmem:[%s21818_s7 + $0xf8] sm:$0xff]  ;;  %v621_v53 = vld [vmem:[%s21819_s8 + $0x8] sm:$0xff]  ;;  %v620_v54 = vld [vmem:[%s21819_s8] sm:$0xff] }
  0xb5   : > { %815 = vperm.xlu1 %17404, %v601_v50   ;;  %810 = vperm.xlu0 %17403, %v600_v56   ;;  %v614_v50 = vld [vmem:[%s21818_s7 + $0xf0] sm:$0xff]  ;;  %v1681_v56 = vld [vmem:[#allocation3 + $0x108] sm:$0xff]  ;;  %v624_v63 = vld [vmem:[%s21819_s8 + $0x20] sm:$0xff] }
  0xb6   : > { %15176 = vmatpush3.bf16.msra.mxu0 %v15173_v59  ;;  %v623_v59 = vld [vmem:[%s21819_s8 + $0x18] sm:$0xff]  ;;  %v622_v60 = vld [vmem:[%s21819_s8 + $0x10] sm:$0xff]  ;;  %v640_v9 = vld [vmem:[%s21819_s8 + $0xa0] sm:$0xff] }
  0xb7   : > { %15178 = vmatprep.subr.bf16.mxu0 %v15177_v7  ;;  %v643_v10 = vld [vmem:[%s21819_s8 + $0xb8] sm:$0xff] }
  0xb8   : > { %v551_v19 = vld [vmem:[%s17954_s14 + $0xf8] sm:$0xff] }
  0xb9   : > { %825 = vperm.xlu1 %17404, %v603_v3   ;;  %820 = vperm.xlu0 %17403, %v602_v4   ;;  %v634_v3 = vld [vmem:[%s21819_s8 + $0x70] sm:$0xff]  ;;  %v637_v4 = vld [vmem:[%s21819_s8 + $0x88] sm:$0xff]  ;;  %583 = vst [vmem:[#allocation2 + $0x110] sm:$0xff] %v551_v19  ;;  %v651_v20 = vld [vmem:[%s21819_s8 + $0xf8] sm:$0xff] }
  0xba   : > { %13018 = vmatmul.mubr.f32.vlgmr.msra.gmra.mrb[0].mxu0 %v17672_v1  ;;  %v609_v1 = vld [vmem:[%s21818_s7 + $0xc8] sm:$0xff]  ;;  %v694_v27 = vld [vmem:[#allocation2 + $0x17] sm:$0xff] }
  0xbb   : > { %15180 = vmatpush3.bf16.msra.mxu0 %v15177_v7  ;;  %13020 = vmatprep.mubr.f32.mxu0 %v17963_v28  ;;  %v608_v28 = vld [vmem:[%s21818_s7 + $0xc0] sm:$0xff]  ;;  %v638_v7 = vld [vmem:[%s21819_s8 + $0x90] sm:$0xff] }
  0xbc   : > { %15182 = vmatprep.subr.bf16.mxu0 %v15181_v16 }
  0xbd   : > { %835 = vperm.xlu1 %17404, %v605_v12   ;;  %830 = vperm.xlu0 %17403, %v604_v13   ;;  %v645_v12 = vld [vmem:[%s21819_s8 + $0xc8] sm:$0xff]  ;;  %v644_v13 = vld [vmem:[%s21819_s8 + $0xc0] sm:$0xff] }
  0xbe   : > { %13021 = vmatmul.mubr.f32.gmra.mrb[2].mxu0 %v17967_v29  ;;  %v15193_v29 = vpack.c.bf16 %v1205_v34, %v1204_v33  ;;  %v652_v33 = vld [vmem:[%s21819_s8 + $0x100] sm:$0xff] }
  0xbf   : > { %13023 = vmatprep.mubr.f32.mxu0 %v17971_v31  ;;  %15184 = vmatpush3.bf16.msra.mxu0 %v15181_v16  ;;  %v1206_v31 = vld [vmem:[#allocation3 + $0x50] sm:$0xff]  ;;  %v550_v16 = vld [vmem:[%s17954_s14 + $0xf0] sm:$0xff] }
  0xc0   : > { %15186 = vmatprep.subr.bf16.mxu0 %v15185_v25  ;;  %582 = vst [vmem:[#allocation2 + $0x108] sm:$0xff] %v550_v16  ;;  %v1682_v34 = vld [vmem:[#allocation3 + $0x110] sm:$0xff] }
  0xc1   : > { %845 = vperm.xlu1 %17404, %v607_v21   ;;  %840 = vperm.xlu0 %17403, %v606_v22   ;;  %v650_v21 = vld [vmem:[%s21819_s8 + $0xf0] sm:$0xff]  ;;  %v692_v22 = vld [vmem:[#allocation2 + $0x7] sm:$0xff] }
  0xc2   : > { %13024 = vmatmul.mubr.f32.gmra.mrb[4].mxu0 %v17974_v32  ;;  %v15197_v32 = vpack.c.bf16 %v1207_v41, %v1206_v31  ;;  %v695_v41 = vld [vmem:[#allocation2 + $0x1f] sm:$0xff]  ;;  %v704_v16 = vld [vmem:[#allocation2 + $0x67] sm:$0xff] }
  0xc3   : > { %13026 = vmatprep.mubr.f32.mxu0 %v17985_v37  ;;  %15188 = vmatpush3.bf16.msra.mxu0 %v15185_v25  ;;  %v1208_v37 = vld [vmem:[#allocation3 + $0x60] sm:$0xff] }
  0xc4   : > { %15190 = vmatprep.subr.bf16.mxu0 %v15189_v30 }
  0xc5   : > { %855 = vperm.xlu1 %17404, %v609_v1   ;;  %850 = vperm.xlu0 %17403, %v608_v28   ;;  %v693_v28 = vld [vmem:[#allocation2 + $0xf] sm:$0xff] }
  0xc6   : > { %13027 = vmatmul.mubr.f32.gmra.mrb[6].mxu0 %v17988_v38  ;;  %v15201_v38 = vpack.c.bf16 %v1209_v46, %v1208_v37  ;;  %v618_v37 = vld [vmem:[%s21818_s7 + $0x110] sm:$0xff] }
  0xc7   : > { %13029 = vmatprep.mubr.f32.mxu0 %v17993_v39  ;;  %15192 = vmatpush3.bf16.msra.mxu0 %v15189_v30  ;;  %v1210_v39 = vld [vmem:[#allocation3 + $0x70] sm:$0xff]  ;;  %v653_v30 = vld [vmem:[%s21819_s8 + $0x108] sm:$0xff] }
  0xc8   : > { %15194 = vmatprep.subr.bf16.mxu0 %v15193_v29 }
  0xc9   : > { %865 = vperm.xlu1 %17404, %v611_v35   ;;  %860 = vperm.xlu0 %17403, %v610_v36   ;;  %v1683_v35 = vld [vmem:[#allocation3 + $0x118] sm:$0xff] }
  0xca   : > { %13030 = vmatmul.mubr.f32.gmra.mrb[8].mxu0 %v17996_v40  ;;  %v15205_v40 = vpack.c.bf16 %v1211_v51, %v1210_v39  ;;  %v15213_v46 = vpack.c.bf16 %v1683_v35, %v1682_v34  ;;  %v707_v35 = vld [vmem:[#allocation2 + $0x7f] sm:$0xff] }
  0xcb   : > { %13032 = vmatprep.mubr.f32.mxu0 %v18001_v44  ;;  %15196 = vmatpush3.bf16.msra.mxu0 %v15193_v29  ;;  %v1680_v44 = vld [vmem:[#allocation3 + $0x100] sm:$0xff] }
  0xcc   : > { %15198 = vmatprep.subr.bf16.mxu0 %v15197_v32 }
  0xcd   : > { %875 = vperm.xlu1 %17404, %v613_v42   ;;  %870 = vperm.xlu0 %17403, %v612_v43   ;;  %v696_v43 = vld [vmem:[#allocation2 + $0x27] sm:$0xff] }
  0xce   : > { %13033 = vmatmul.mubr.f32.gmra.mrb[10].mxu0 %v18004_v45  ;;  %v18168_v45 = vpack.c.bf16 %v1681_v56, %v1680_v44  ;;  %v655_v44 = vld [vmem:[%s21819_s8 + $0x118] sm:$0xff]  ;;  %v654_v56 = vld [vmem:[%s21819_s8 + $0x110] sm:$0xff] }
  0xcf   : > { %13035 = vmatprep.mubr.f32.mxu0 %v18015_v48  ;;  %15200 = vmatpush3.bf16.msra.mxu0 %v15197_v32  ;;  %v625_v48 = vld [vmem:[%s21819_s8 + $0x28] sm:$0xff]  ;;  %v619_v32 = vld [vmem:[%s21818_s7 + $0x118] sm:$0xff] }
  0xd0   : > { %15202 = vmatprep.subr.bf16.mxu0 %v15201_v38 }
  0xd1   : > { %885 = vperm.xlu1 %17404, %v615_v47   ;;  %880 = vperm.xlu0 %17403, %v614_v50   ;;  %v1684_v47 = vld [vmem:[#allocation3 + $0x120] sm:$0xff]  ;;  %v1685_v50 = vld [vmem:[#allocation3 + $0x128] sm:$0xff] }
  0xd2   : > { %13036 = vmatmul.mubr.f32.gmra.mrb[12].mxu0 %v18019_v49  ;;  %v627_v49 = vld [vmem:[%s21819_s8 + $0x38] sm:$0xff] }
  0xd3   : > { %13038 = vmatprep.mubr.f32.mxu0 %v18026_v52  ;;  %15204 = vmatpush3.bf16.msra.mxu0 %v15201_v38  ;;  %v626_v52 = vld [vmem:[%s21819_s8 + $0x30] sm:$0xff] }
  0xd4   : > { %15206 = vmatprep.subr.bf16.mxu0 %v15205_v40 }
  0xd5   : > { %987 = vperm.xlu1 %17404, %v621_v53   ;;  %982 = vperm.xlu0 %17403, %v620_v54   ;;  %v697_v53 = vld [vmem:[#allocation2 + $0x2f] sm:$0xff] }
  0xd6   : > { %13039 = vmatmul.mubr.f32.gmra.mrb[14].mxu0 %v18030_v55  ;;  %v629_v55 = vld [vmem:[%s21819_s8 + $0x48] sm:$0xff] }
  0xd7   : > { %13041 = vmatprep.mubr.f32.mxu0 %v18037_v57  ;;  %15208 = vmatpush3.bf16.msra.mxu0 %v15205_v40  ;;  %v628_v57 = vld [vmem:[%s21819_s8 + $0x40] sm:$0xff]  ;;  %v698_v40 = vld [vmem:[#allocation2 + $0x37] sm:$0xff] }
  0xd8   : > { %15210 = vmatprep.subr.bf16.mxu0 %v18168_v45 }
  0xd9   : > { %997 = vperm.xlu1 %17404, %v623_v59   ;;  %992 = vperm.xlu0 %17403, %v622_v60   ;;  %v15217_v59 = vpack.c.bf16 %v1685_v50, %v1684_v47  ;;  %v1686_v60 = vld [vmem:[#allocation3 + $0x130] sm:$0xff] }
  0xda   : > { %13042 = vmatmul.mubr.f32.gmra.mrb[16].mxu0 %v18040_v58  ;;  %v631_v58 = vld [vmem:[%s21819_s8 + $0x58] sm:$0xff] }
  0xdb   : > { %13044 = vmatprep.mubr.f32.mxu0 %v18045_v61  ;;  %v630_v61 = vld [vmem:[%s21819_s8 + $0x50] sm:$0xff] }
  0xdd   : > { %1007 = vperm.xlu1 %17404, %v625_v48   ;;  %1002 = vperm.xlu0 %17403, %v624_v63  }
  0xde   : > { %13045 = vmatmul.mubr.f32.gmra.mrb[18].mxu0 %v18048_v62  ;;  %v633_v62 = vld [vmem:[%s21819_s8 + $0x68] sm:$0xff] }
  0xdf   : > { %13047 = vmatprep.mubr.f32.mxu0 %v18053_v0  ;;  %v632_v0 = vld [vmem:[%s21819_s8 + $0x60] sm:$0xff] }
  0xe1   : > { %1017 = vperm.xlu1 %17404, %v627_v49   ;;  %1012 = vperm.xlu0 %17403, %v626_v52   ;;  %v699_v52 = vld [vmem:[#allocation2 + $0x3f] sm:$0xff] }
  0xe2   : > { %13048 = vmatmul.mubr.f32.gmra.mrb[20].mxu0 %v18056_v2  ;;  %v635_v2 = vld [vmem:[%s21819_s8 + $0x78] sm:$0xff] }
  0xe3   : > { %13050 = vmatprep.mubr.f32.mxu0 %v18067_v5  ;;  %v636_v5 = vld [vmem:[%s21819_s8 + $0x80] sm:$0xff] }
  0xe5   : > { %1027 = vperm.xlu1 %17404, %v629_v55   ;;  %1022 = vperm.xlu0 %17403, %v628_v57  }
  0xe6   : > { %13051 = vmatmul.mubr.f32.gmra.mrb[22].mxu0 %v18070_v6  ;;  %v639_v6 = vld [vmem:[%s21819_s8 + $0x98] sm:$0xff] }
  0xe7   : > { %13053 = vmatprep.mubr.f32.mxu0 %v18075_v8  ;;  %v641_v8 = vld [vmem:[%s21819_s8 + $0xa8] sm:$0xff] }
  0xe9   : > { %1037 = vperm.xlu1 %17404, %v631_v58   ;;  %1032 = vperm.xlu0 %17403, %v630_v61   ;;  %v700_v58 = vld [vmem:[#allocation2 + $0x47] sm:$0xff]  ;;  %v1688_v61 = vld [vmem:[#allocation3 + $0x140] sm:$0xff] }
  0xea   : > { %13054 = vmatmul.mubr.f32.gmra.mrb[24].mxu0 %v18079_v11  ;;  %v642_v11 = vld [vmem:[%s21819_s8 + $0xb0] sm:$0xff] }
  0xeb   : > { %13056 = vmatprep.mubr.f32.mxu0 %v18089_v14  ;;  %v647_v14 = vld [vmem:[%s21819_s8 + $0xd8] sm:$0xff] }
  0xed   : > { %1047 = vperm.xlu1 %17404, %v633_v62   ;;  %1042 = vperm.xlu0 %17403, %v632_v0   ;;  %v1689_v62 = vld [vmem:[#allocation3 + $0x148] sm:$0xff] }
  0xee   : > { %13057 = vmatmul.mubr.f32.gmra.mrb[26].mxu0 %v18093_v15  ;;  %v646_v15 = vld [vmem:[%s21819_s8 + $0xd0] sm:$0xff] }
  0xef   : > { %13059 = vmatprep.mubr.f32.mxu0 %v18097_v17  ;;  %v649_v17 = vld [vmem:[%s21819_s8 + $0xe8] sm:$0xff] }
  0xf1   : > { %1057 = vperm.xlu1 %17404, %v635_v2   ;;  %1052 = vperm.xlu0 %17403, %v634_v3  }
  0xf2   : > { %13060 = vmatmul.mubr.f32.gmra.mrb[28].mxu0 %v18100_v18  ;;  %v648_v18 = vld [vmem:[%s21819_s8 + $0xe0] sm:$0xff] }
  0xf3   : > { %13062 = vmatprep.mubr.f32.mxu0 %v18112_v23  ;;  %v617_v23 = vld [vmem:[%s21818_s7 + $0x108] sm:$0xff] }
  0xf5   : > { %1067 = vperm.xlu1 %17404, %v637_v4   ;;  %1062 = vperm.xlu0 %17403, %v636_v5   ;;  %v701_v4 = vld [vmem:[#allocation2 + $0x4f] sm:$0xff] }
  0xf6   : > { %13063 = vmatmul.mubr.f32.gmra.mrb[30].mxu0 %v18117_v24  ;;  %v616_v24 = vld [vmem:[%s21818_s7 + $0x100] sm:$0xff] }
  0xf9   : > { %1077 = vperm.xlu1 %17404, %v639_v6   ;;  %1072 = vperm.xlu0 %17403, %v638_v7   ;;  %v15225_v6 = vpack.c.bf16 %v1689_v62, %v1688_v61  ;;  %v702_v7 = vld [vmem:[#allocation2 + $0x57] sm:$0xff] }
  0xfd   : > { %1087 = vperm.xlu1 %17404, %v641_v8   ;;  %1082 = vperm.xlu0 %17403, %v640_v9   ;;  %v1690_v8 = vld [vmem:[#allocation3 + $0x150] sm:$0xff]  ;;  %v1691_v9 = vld [vmem:[#allocation3 + $0x158] sm:$0xff] }
 0x101   : > { %1097 = vperm.xlu1 %17404, %v643_v10   ;;  %1092 = vperm.xlu0 %17403, %v642_v11  }
 0x105   : > { %1107 = vperm.xlu1 %17404, %v645_v12   ;;  %1102 = vperm.xlu0 %17403, %v644_v13   ;;  %v703_v13 = vld [vmem:[#allocation2 + $0x5f] sm:$0xff] }
 0x109   : > { %1117 = vperm.xlu1 %17404, %v647_v14   ;;  %1112 = vperm.xlu0 %17403, %v646_v15   ;;  %v15229_v15 = vpack.c.bf16 %v1691_v9, %v1690_v8  ;;  %v714_v8 = vld [vmem:[#allocation2 + $0xb7] sm:$0xff] }
 0x10d   : > { %1127 = vperm.xlu1 %17404, %v649_v17   ;;  %1122 = vperm.xlu0 %17403, %v648_v18   ;;  %v1692_v17 = vld [vmem:[#allocation3 + $0x160] sm:$0xff]  ;;  %v1693_v18 = vld [vmem:[#allocation3 + $0x168] sm:$0xff] }
 0x111   : > { %1137 = vperm.xlu1 %17404, %v651_v20   ;;  %1132 = vperm.xlu0 %17403, %v650_v21  }
 0x114   : > { %v18280_v25 = vpop.permute.xlu1 %740  ;;  %v731_v26 = vpop.permute.xlu0 %730 }
 0x115   : > { %22176 = vst [vmem:[#allocation15_spill] sm:$0xff] %v18280_v25  ;;  %v18282_v1 = vmul.f32 %v731_v26, %v692_v22  ;;  %895 = vperm.xlu1 %17404, %v617_v23   ;;  %890 = vperm.xlu0 %17403, %v616_v24   ;;  %v18292_v36 = vmul.f32 %v18280_v25, %v694_v27  ;;  %v705_v22 = vld [vmem:[#allocation2 + $0x6f] sm:$0xff]  ;;  %v706_v26 = vld [vmem:[#allocation2 + $0x77] sm:$0xff]  ;;  %v1694_v27 = vld [vmem:[#allocation3 + $0x170] sm:$0xff] }
 0x116   : > { %v15233_v24 = vpack.c.bf16 %v1693_v18, %v1692_v17  ;;  %v715_v17 = vld [vmem:[#allocation2 + $0xbf] sm:$0xff]  ;;  %v716_v18 = vld [vmem:[#allocation2 + $0xc7] sm:$0xff] }
 0x117   : > { %22177 = vst [vmem:[#allocation16_spill] sm:$0xff] %v18282_v1  ;;  %13097 = vmatprep.mubr.f32.mxu0 %v18282_v1 }
 0x118   : > { %v18294_v29 = vpop.permute.xlu1 %745  ;;  %v736_v31 = vpop.permute.xlu0 %735 }
 0x119   : > { %22178 = vst [vmem:[#allocation17_spill] sm:$0xff] %v18294_v29  ;;  %v18296_v42 = vmul.f32 %v736_v31, %v693_v28  ;;  %1147 = vperm.xlu1 %17404, %v653_v30   ;;  %1142 = vperm.xlu0 %17403, %v652_v33   ;;  %v18312_v51 = vmul.f32 %v18294_v29, %v695_v41  ;;  %v1695_v28 = vld [vmem:[#allocation3 + $0x178] sm:$0xff] }
 0x11a   : > { %v15237_v41 = vpack.c.bf16 %v1695_v28, %v1694_v27  ;;  %v717_v28 = vld [vmem:[#allocation2 + $0xcf] sm:$0xff] }
 0x11b   : > { %22179 = vst [vmem:[#allocation18_spill] sm:$0xff] %v18296_v42  ;;  %13098 = vmatmul.mubr.f32.vlgmr.msra.gmra.mrb[0].mxu0 %v18296_v42 }
 0x11c   : > { %15212 = vmatpush3.bf16.msra.mxu0 %v18168_v45  ;;  %v18306_v38 = vpop.permute.xlu1 %755  ;;  %v18308_v39 = vpop.permute.xlu0 %750  ;;  %13100 = vmatprep.mubr.f32.mxu0 %v18292_v36  ;;  %v1687_v45 = vld [vmem:[#allocation3 + $0x138] sm:$0xff] }
 0x11d   : > { %22180 = vst [vmem:[#allocation19_spill] sm:$0xff] %v18306_v38  ;;  %22181 = vst [vmem:[#allocation20_spill] sm:$0xff] %v18308_v39  ;;  %v18315_v54 = vmul.f32 %v18308_v39, %v696_v43  ;;  %905 = vperm.xlu1 %17404, %v619_v32   ;;  %900 = vperm.xlu0 %17403, %v618_v37   ;;  %v18330_v49 = vmul.f32 %v18306_v38, %v697_v53  ;;  %v708_v43 = vld [vmem:[#allocation2 + $0x87] sm:$0xff]  ;;  %v1954_v32 = vld [vmem:[#allocation3 + $0x180] sm:$0xff] }
 0x11e   : > { %15214 = vmatprep.subr.bf16.mxu0 %v15213_v46  ;;  %v15221_v57 = vpack.c.bf16 %v1687_v45, %v1686_v60  ;;  %v1955_v37 = vld [vmem:[#allocation3 + $0x188] sm:$0xff] }
 0x11f   : > { %13101 = vmatmul.mubr.f32.gmra.mrb[2].mxu0 %v18312_v51 }
 0x120   : > { %v18324_v48 = vpop.permute.xlu1 %765  ;;  %v18326_v63 = vpop.permute.xlu0 %760  ;;  %13103 = vmatprep.mubr.f32.mxu0 %v18315_v54  ;;  %15216 = vmatpush3.bf16.msra.mxu0 %v15213_v46 }
 0x121   : > { %22182 = vst [vmem:[#allocation21_spill] sm:$0xff] %v18324_v48  ;;  %22183 = vst [vmem:[#allocation22_spill] sm:$0xff] %v18326_v63  ;;  %v18333_v55 = vmul.f32 %v18326_v63, %v698_v40  ;;  %1157 = vperm.xlu1 %17404, %v655_v44   ;;  %1152 = vperm.xlu0 %17403, %v654_v56   ;;  %v18342_v3 = vmul.f32 %v18324_v48, %v699_v52  ;;  %v709_v44 = vld [vmem:[#allocation2 + $0x8f] sm:$0xff]  ;;  %v710_v56 = vld [vmem:[#allocation2 + $0x97] sm:$0xff] }
 0x122   : > { %15218 = vmatprep.subr.bf16.mxu0 %v15217_v59  ;;  %v18395_v40 = vpack.c.bf16 %v1955_v37, %v1954_v32 }
 0x123   : > { %13104 = vmatmul.mubr.f32.gmra.mrb[4].mxu0 %v18330_v49 }
 0x124   : > { %v18336_v0 = vpop.permute.xlu1 %775  ;;  %v18338_v2 = vpop.permute.xlu0 %770  ;;  %13106 = vmatprep.mubr.f32.mxu0 %v18333_v55  ;;  %15220 = vmatpush3.bf16.msra.mxu0 %v15217_v59 }
 0x125   : > { %22184 = vst [vmem:[#allocation23_spill] sm:$0xff] %v18336_v0  ;;  %22185 = vst [vmem:[#allocation24_spill] sm:$0xff] %v18338_v2  ;;  %v18345_v5 = vmul.f32 %v18338_v2, %v700_v58  ;;  %15222 = vmatprep.subr.bf16.mxu0 %v15221_v57  ;;  %v18354_v12 = vmul.f32 %v18336_v0, %v701_v4  ;;  %v712_v58 = vld [vmem:[#allocation2 + $0xa7] sm:$0xff] }
 0x127   : > { %13107 = vmatmul.mubr.f32.gmra.mrb[6].mxu0 %v18342_v3 }
 0x128   : > { %v18348_v10 = vpop.permute.xlu1 %785  ;;  %v18350_v11 = vpop.permute.xlu0 %780  ;;  %13109 = vmatprep.mubr.f32.mxu0 %v18345_v5  ;;  %15224 = vmatpush3.bf16.msra.mxu0 %v15221_v57  ;;  %v711_v57 = vld [vmem:[#allocation2 + $0x9f] sm:$0xff] }
 0x129   : > { %22186 = vst [vmem:[#allocation25_spill] sm:$0xff] %v18348_v10  ;;  %22187 = vst [vmem:[#allocation26_spill] sm:$0xff] %v18350_v11  ;;  %v18357_v14 = vmul.f32 %v18350_v11, %v702_v7  ;;  %15226 = vmatprep.subr.bf16.mxu0 %v15225_v6  ;;  %v18366_v21 = vmul.f32 %v18348_v10, %v703_v13  ;;  %v713_v7 = vld [vmem:[#allocation2 + $0xaf] sm:$0xff] }
 0x12b   : > { %13110 = vmatmul.mubr.f32.gmra.mrb[8].mxu0 %v18354_v12 }
 0x12c   : > { %v18360_v19 = vpop.permute.xlu1 %795  ;;  %v18362_v20 = vpop.permute.xlu0 %790  ;;  %13112 = vmatprep.mubr.f32.mxu0 %v18357_v14  ;;  %15228 = vmatpush3.bf16.msra.mxu0 %v15225_v6 }
 0x12d   : > { %22188 = vst [vmem:[#allocation27_spill] sm:$0xff] %v18360_v19  ;;  %22189 = vst [vmem:[#allocation28_spill] sm:$0xff] %v18362_v20  ;;  %v18369_v23 = vmul.f32 %v18362_v20, %v704_v16  ;;  %15230 = vmatprep.subr.bf16.mxu0 %v15229_v15  ;;  %v18378_v34 = vmul.f32 %v18360_v19, %v705_v22 }
 0x12f   : > { %13113 = vmatmul.mubr.f32.gmra.mrb[10].mxu0 %v18366_v21 }
 0x130   : > { %v18372_v30 = vpop.permute.xlu1 %805  ;;  %v18374_v33 = vpop.permute.xlu0 %800  ;;  %13115 = vmatprep.mubr.f32.mxu0 %v18369_v23  ;;  %15232 = vmatpush3.bf16.msra.mxu0 %v15229_v15 }
 0x131   : > { %22190 = vst [vmem:[#allocation29_spill] sm:$0xff] %v18372_v30  ;;  %22191 = vst [vmem:[#allocation30_spill] sm:$0xff] %v18374_v33  ;;  %v18381_v31 = vmul.f32 %v18374_v33, %v706_v26  ;;  %15234 = vmatprep.subr.bf16.mxu0 %v15233_v24  ;;  %v18390_v50 = vmul.f32 %v18372_v30, %v707_v35  ;;  %v718_v35 = vld [vmem:[#allocation2 + $0xd7] sm:$0xff] }
 0x132   : > { %v1963_v30 = vld [vmem:[#allocation3 + $0x1c8] sm:$0xff] }
 0x133   : > { %13116 = vmatmul.mubr.f32.gmra.mrb[12].mxu0 %v18378_v34 }
 0x134   : > { %v18384_v46 = vpop.permute.xlu1 %815  ;;  %v18386_v47 = vpop.permute.xlu0 %810  ;;  %13118 = vmatprep.mubr.f32.mxu0 %v18381_v31  ;;  %15236 = vmatpush3.bf16.msra.mxu0 %v15233_v24 }
 0x135   : > { %22192 = vst [vmem:[#allocation31_spill] sm:$0xff] %v18384_v46  ;;  %22193 = vst [vmem:[#allocation32_spill] sm:$0xff] %v18386_v47  ;;  %v18393_v53 = vmul.f32 %v18386_v47, %v708_v43  ;;  %15238 = vmatprep.subr.bf16.mxu0 %v15237_v41  ;;  %v18404_v45 = vmul.f32 %v18384_v46, %v709_v44  ;;  %v719_v44 = vld [vmem:[#allocation2 + $0xdf] sm:$0xff] }
 0x137   : > { %13119 = vmatmul.mubr.f32.gmra.mrb[14].mxu0 %v18390_v50 }
 0x138   : > { %v18398_v59 = vpop.permute.xlu1 %825  ;;  %v18400_v60 = vpop.permute.xlu0 %820  ;;  %13121 = vmatprep.mubr.f32.mxu0 %v18393_v53  ;;  %15240 = vmatpush3.bf16.msra.mxu0 %v15237_v41 }
 0x139   : > { %22194 = vst [vmem:[#allocation33_spill] sm:$0xff] %v18398_v59  ;;  %22195 = vst [vmem:[#allocation34_spill] sm:$0xff] %v18400_v60  ;;  %v18407_v52 = vmul.f32 %v18400_v60, %v710_v56  ;;  %15242 = vmatprep.subr.bf16.mxu0 %v18395_v40  ;;  %v18417_v4 = vmul.f32 %v18398_v59, %v711_v57  ;;  %v720_v56 = vld [vmem:[#allocation2 + $0xe7] sm:$0xff]  ;;  %v1959_v60 = vld [vmem:[#allocation3 + $0x1a8] sm:$0xff] }
 0x13a   : > { %v947_v59 = vld [vmem:[#allocation2 + $0x21] sm:$0xff] }
 0x13b   : > { %13122 = vmatmul.mubr.f32.gmra.mrb[16].mxu0 %v18404_v45 }
 0x13c   : > { %v18411_v61 = vpop.permute.xlu1 %835  ;;  %v18413_v62 = vpop.permute.xlu0 %830  ;;  %13124 = vmatprep.mubr.f32.mxu0 %v18407_v52 }
 0x13d   : > { %22196 = vst [vmem:[#allocation35_spill] sm:$0xff] %v18411_v61  ;;  %22197 = vst [vmem:[#allocation36_spill] sm:$0xff] %v18413_v62  ;;  %v18420_v6 = vmul.f32 %v18413_v62, %v712_v58  ;;  %v18429_v15 = vmul.f32 %v18411_v61, %v713_v7  ;;  %v1957_v61 = vld [vmem:[#allocation3 + $0x198] sm:$0xff] }
 0x13f   : > { %13125 = vmatmul.mubr.f32.gmra.mrb[18].mxu0 %v18417_v4 }
 0x140   : > { %v18423_v9 = vpop.permute.xlu1 %845  ;;  %v18425_v13 = vpop.permute.xlu0 %840  ;;  %13127 = vmatprep.mubr.f32.mxu0 %v18420_v6 }
 0x141   : > { %22198 = vst [vmem:[#allocation37_spill] sm:$0xff] %v18423_v9  ;;  %22199 = vst [vmem:[#allocation38_spill] sm:$0xff] %v18425_v13  ;;  %v18432_v16 = vmul.f32 %v18425_v13, %v714_v8  ;;  %v18441_v26 = vmul.f32 %v18423_v9, %v715_v17  ;;  %v721_v17 = vld [vmem:[#allocation2 + $0xef] sm:$0xff] }
 0x142   : > { %v945_v9 = vld [vmem:[#allocation2 + $0x11] sm:$0xff] }
 0x143   : > { %13128 = vmatmul.mubr.f32.gmra.mrb[20].mxu0 %v18429_v15 }
 0x144   : > { %v18435_v22 = vpop.permute.xlu1 %855  ;;  %v18437_v24 = vpop.permute.xlu0 %850  ;;  %13130 = vmatprep.mubr.f32.mxu0 %v18432_v16 }
 0x145   : > { %22200 = vst [vmem:[#allocation39_spill] sm:$0xff] %v18435_v22  ;;  %22201 = vst [vmem:[#allocation40_spill] sm:$0xff] %v18437_v24  ;;  %v18444_v27 = vmul.f32 %v18437_v24, %v716_v18  ;;  %v18453_v32 = vmul.f32 %v18435_v22, %v717_v28  ;;  %v722_v18 = vld [vmem:[#allocation2 + $0xf7] sm:$0xff] }
 0x147   : > { %13131 = vmatmul.mubr.f32.gmra.mrb[22].mxu0 %v18441_v26 }
 0x148   : > { %v18447_v41 = vpop.permute.xlu1 %865  ;;  %v18449_v43 = vpop.permute.xlu0 %860  ;;  %13133 = vmatprep.mubr.f32.mxu0 %v18444_v27 }
 0x149   : > { %22202 = vst [vmem:[#allocation41_spill] sm:$0xff] %v18447_v41  ;;  %22203 = vst [vmem:[#allocation42_spill] sm:$0xff] %v18449_v43  ;;  %v18456_v37 = vmul.f32 %v18449_v43, %v718_v35  ;;  %v18465_v7 = vmul.f32 %v18447_v41, %v719_v44  ;;  %v723_v44 = vld [vmem:[#allocation2 + $0xff] sm:$0xff]  ;;  %v944_v41 = vld [vmem:[#allocation2 + $0x9] sm:$0xff] }
 0x14b   : > { %13134 = vmatmul.mubr.f32.gmra.mrb[24].mxu0 %v18453_v32 }
 0x14c   : > { %v18459_v57 = vpop.permute.xlu1 %875  ;;  %v18461_v58 = vpop.permute.xlu0 %870  ;;  %13136 = vmatprep.mubr.f32.mxu0 %v18456_v37 }
 0x14d   : > { %22204 = vst [vmem:[#allocation43_spill] sm:$0xff] %v18459_v57  ;;  %22205 = vst [vmem:[#allocation44_spill] sm:$0xff] %v18461_v58  ;;  %v18468_v8 = vmul.f32 %v18461_v58, %v720_v56  ;;  %v18477_v43 = vmul.f32 %v18459_v57, %v721_v17  ;;  %v946_v17 = vld [vmem:[#allocation2 + $0x19] sm:$0xff] }
 0x14e   : > { %v1956_v57 = vld [vmem:[#allocation3 + $0x190] sm:$0xff] }
 0x14f   : > { %13137 = vmatmul.mubr.f32.gmra.mrb[26].mxu0 %v18465_v7 }
 0x150   : > { %v18471_v28 = vpop.permute.xlu1 %885  ;;  %v18473_v35 = vpop.permute.xlu0 %880  ;;  %13139 = vmatprep.mubr.f32.mxu0 %v18468_v8 }
 0x151   : > { %22206 = vst [vmem:[#allocation45_spill] sm:$0xff] %v18471_v28  ;;  %22207 = vst [vmem:[#allocation46_spill] sm:$0xff] %v18473_v35  ;;  %v18480_v22 = vmul.f32 %v18473_v35, %v722_v18  ;;  %v18487_v24 = vmul.f32 %v18471_v28, %v723_v44  ;;  %v15245_v28 = vpack.c.bf16 %v1957_v61, %v1956_v57  ;;  %v950_v57 = vld [vmem:[#allocation2 + $0x39] sm:$0xff] }
 0x153   : > { %13140 = vmatmul.mubr.f32.gmra.mrb[28].mxu0 %v18477_v43 }
 0x154   : > { %v18483_v56 = vpop.permute.xlu1 %987  ;;  %v983_v58 = vpop.permute.xlu0 %982  ;;  %13142 = vmatprep.mubr.f32.mxu0 %v18480_v22 }
 0x155   : > { %22208 = vst [vmem:[#allocation47_spill] sm:$0xff] %v18483_v56  ;;  %v18489_v13 = vmul.f32 %v983_v58, %v944_v41  ;;  %v1161_v62 = vmul.f32 %v18483_v56, %v945_v9  ;;  %v948_v41 = vld [vmem:[#allocation2 + $0x29] sm:$0xff]  ;;  %v949_v9 = vld [vmem:[#allocation2 + $0x31] sm:$0xff] }
 0x156   : > { %v1958_v58 = vld [vmem:[#allocation3 + $0x1a0] sm:$0xff] }
 0x157   : > { %22209 = vst [vmem:[#allocation48_spill] sm:$0xff] %v18489_v13  ;;  %13143 = vmatmul.mubr.f32.gmra.mrb[30].mxu0 %v18487_v24  ;;  %v15249_v61 = vpack.c.bf16 %v1959_v60, %v1958_v58  ;;  %v952_v58 = vld [vmem:[#allocation2 + $0x49] sm:$0xff] }
 0x158   : > { %v18492_v18 = vpop.permute.xlu1 %997  ;;  %v18494_v35 = vpop.permute.xlu0 %992  ;;  %13177 = vmatprep.mubr.f32.mxu0 %v18489_v13 }
 0x159   : > { %22210 = vst [vmem:[#allocation49_spill] sm:$0xff] %v18492_v18  ;;  %22211 = vst [vmem:[#allocation50_spill] sm:$0xff] %v18494_v35  ;;  %v18499_v44 = vmul.f32 %v18494_v35, %v946_v17  ;;  %v18508_v13 = vmul.f32 %v18492_v18, %v947_v59  ;;  %v1960_v35 = vld [vmem:[#allocation3 + $0x1b0] sm:$0xff] }
 0x15a   : > { %v951_v18 = vld [vmem:[#allocation2 + $0x41] sm:$0xff] }
 0x15b   : > { %13178 = vmatmul.mubr.f32.vlgmr.msra.gmra.mrb[0].mxu0 %v1161_v62  ;;  %v1961_v62 = vld [vmem:[#allocation3 + $0x1b8] sm:$0xff] }
 0x15c   : > { %15244 = vmatpush3.bf16.msra.mxu0 %v18395_v40  ;;  %v18502_v46 = vpop.permute.xlu1 %1007  ;;  %v18504_v47 = vpop.permute.xlu0 %1002  ;;  %13180 = vmatprep.mubr.f32.mxu0 %v18499_v44  ;;  %v15253_v60 = vpack.c.bf16 %v1961_v62, %v1960_v35  ;;  %v954_v62 = vld [vmem:[#allocation2 + $0x59] sm:$0xff] }
 0x15d   : > { %22212 = vst [vmem:[#allocation51_spill] sm:$0xff] %v18502_v46  ;;  %22213 = vst [vmem:[#allocation52_spill] sm:$0xff] %v18504_v47  ;;  %v18511_v17 = vmul.f32 %v18504_v47, %v948_v41  ;;  %15246 = vmatprep.subr.bf16.mxu0 %v15245_v28  ;;  %v18520_v59 = vmul.f32 %v18502_v46, %v949_v9  ;;  %v1962_v47 = vld [vmem:[#allocation3 + $0x1c0] sm:$0xff]  ;;  %v1965_v46 = vld [vmem:[#allocation3 + $0x1d8] sm:$0xff] }
 0x15e   : > { %v953_v9 = vld [vmem:[#allocation2 + $0x51] sm:$0xff]  ;;  %v15257_v35 = vpack.c.bf16 %v1963_v30, %v1962_v47  ;;  %v956_v47 = vld [vmem:[#allocation2 + $0x69] sm:$0xff] }
 0x15f   : > { %13181 = vmatmul.mubr.f32.gmra.mrb[2].mxu0 %v18508_v13 }
 0x160   : > { %v18514_v40 = vpop.permute.xlu1 %1017  ;;  %v18516_v56 = vpop.permute.xlu0 %1012  ;;  %13183 = vmatprep.mubr.f32.mxu0 %v18511_v17  ;;  %15248 = vmatpush3.bf16.msra.mxu0 %v15245_v28 }
 0x161   : > { %22214 = vst [vmem:[#allocation53_spill] sm:$0xff] %v18514_v40  ;;  %22215 = vst [vmem:[#allocation54_spill] sm:$0xff] %v18516_v56  ;;  %v18523_v41 = vmul.f32 %v18516_v56, %v950_v57  ;;  %15250 = vmatprep.subr.bf16.mxu0 %v15249_v61  ;;  %v18532_v28 = vmul.f32 %v18514_v40, %v951_v18  ;;  %v1964_v56 = vld [vmem:[#allocation3 + $0x1d0] sm:$0xff]  ;;  %v1967_v40 = vld [vmem:[#allocation3 + $0x1e8] sm:$0xff] }
 0x162   : > { %v15261_v30 = vpack.c.bf16 %v1965_v46, %v1964_v56  ;;  %v958_v56 = vld [vmem:[#allocation2 + $0x79] sm:$0xff] }
 0x163   : > { %13184 = vmatmul.mubr.f32.gmra.mrb[4].mxu0 %v18520_v59 }
 0x164   : > { %v18526_v33 = vpop.permute.xlu1 %1027  ;;  %v18528_v19 = vpop.permute.xlu0 %1022  ;;  %13186 = vmatprep.mubr.f32.mxu0 %v18523_v41  ;;  %15252 = vmatpush3.bf16.msra.mxu0 %v15249_v61  ;;  %v955_v61 = vld [vmem:[#allocation2 + $0x61] sm:$0xff] }
 0x165   : > { %22216 = vst [vmem:[#allocation55_spill] sm:$0xff] %v18526_v33  ;;  %22217 = vst [vmem:[#allocation56_spill] sm:$0xff] %v18528_v19  ;;  %v18535_v57 = vmul.f32 %v18528_v19, %v952_v58  ;;  %15254 = vmatprep.subr.bf16.mxu0 %v15253_v60  ;;  %v18544_v18 = vmul.f32 %v18526_v33, %v953_v9  ;;  %v1966_v19 = vld [vmem:[#allocation3 + $0x1e0] sm:$0xff]  ;;  %v1969_v33 = vld [vmem:[#allocation3 + $0x1f8] sm:$0xff] }
 0x166   : > { %v957_v9 = vld [vmem:[#allocation2 + $0x71] sm:$0xff]  ;;  %v15265_v46 = vpack.c.bf16 %v1967_v40, %v1966_v19  ;;  %v960_v40 = vld [vmem:[#allocation2 + $0x89] sm:$0xff] }
 0x167   : > { %13187 = vmatmul.mubr.f32.gmra.mrb[6].mxu0 %v18532_v28 }
 0x168   : > { %v18538_v20 = vpop.permute.xlu1 %1037  ;;  %v18540_v10 = vpop.permute.xlu0 %1032  ;;  %13189 = vmatprep.mubr.f32.mxu0 %v18535_v57  ;;  %15256 = vmatpush3.bf16.msra.mxu0 %v15253_v60 }
 0x169   : > { %22218 = vst [vmem:[#allocation57_spill] sm:$0xff] %v18538_v20  ;;  %22219 = vst [vmem:[#allocation58_spill] sm:$0xff] %v18540_v10  ;;  %v18547_v58 = vmul.f32 %v18540_v10, %v954_v62  ;;  %15258 = vmatprep.subr.bf16.mxu0 %v15257_v35  ;;  %v18556_v60 = vmul.f32 %v18538_v20, %v955_v61  ;;  %v1968_v10 = vld [vmem:[#allocation3 + $0x1f0] sm:$0xff]  ;;  %v2229_v20 = vld [vmem:[#allocation3 + $0x208] sm:$0xff] }
 0x16a   : > { %v959_v61 = vld [vmem:[#allocation2 + $0x81] sm:$0xff]  ;;  %v15269_v19 = vpack.c.bf16 %v1969_v33, %v1968_v10  ;;  %v961_v33 = vld [vmem:[#allocation2 + $0x91] sm:$0xff] }
 0x16b   : > { %13190 = vmatmul.mubr.f32.gmra.mrb[8].mxu0 %v18544_v18 }
 0x16c   : > { %v18550_v11 = vpop.permute.xlu1 %1047  ;;  %v18552_v0 = vpop.permute.xlu0 %1042  ;;  %13192 = vmatprep.mubr.f32.mxu0 %v18547_v58  ;;  %15260 = vmatpush3.bf16.msra.mxu0 %v15257_v35 }
 0x16d   : > { %22220 = vst [vmem:[#allocation59_spill] sm:$0xff] %v18550_v11  ;;  %22221 = vst [vmem:[#allocation60_spill] sm:$0xff] %v18552_v0  ;;  %v18559_v62 = vmul.f32 %v18552_v0, %v956_v47  ;;  %15262 = vmatprep.subr.bf16.mxu0 %v15261_v30  ;;  %v18568_v35 = vmul.f32 %v18550_v11, %v957_v9  ;;  %v2228_v0 = vld [vmem:[#allocation3 + $0x200] sm:$0xff] }
 0x16e   : > { %v18585_v10 = vpack.c.bf16 %v2229_v20, %v2228_v0  ;;  %v963_v0 = vld [vmem:[#allocation2 + $0xa1] sm:$0xff]  ;;  %v964_v20 = vld [vmem:[#allocation2 + $0xa9] sm:$0xff] }
 0x16f   : > { %13193 = vmatmul.mubr.f32.gmra.mrb[10].mxu0 %v18556_v60 }
 0x170   : > { %v18562_v2 = vpop.permute.xlu1 %1057  ;;  %v18564_v48 = vpop.permute.xlu0 %1052  ;;  %13195 = vmatprep.mubr.f32.mxu0 %v18559_v62  ;;  %15264 = vmatpush3.bf16.msra.mxu0 %v15261_v30 }
 0x171   : > { %22222 = vst [vmem:[#allocation61_spill] sm:$0xff] %v18562_v2  ;;  %22223 = vst [vmem:[#allocation62_spill] sm:$0xff] %v18564_v48  ;;  %v18571_v47 = vmul.f32 %v18564_v48, %v958_v56  ;;  %15266 = vmatprep.subr.bf16.mxu0 %v15265_v46  ;;  %v18580_v30 = vmul.f32 %v18562_v2, %v959_v61  ;;  %v962_v56 = vld [vmem:[#allocation2 + $0x99] sm:$0xff] }
 0x173   : > { %13196 = vmatmul.mubr.f32.gmra.mrb[12].mxu0 %v18568_v35 }
 0x174   : > { %v18574_v63 = vpop.permute.xlu1 %1067  ;;  %v18576_v38 = vpop.permute.xlu0 %1062  ;;  %13198 = vmatprep.mubr.f32.mxu0 %v18571_v47  ;;  %15268 = vmatpush3.bf16.msra.mxu0 %v15265_v46 }
 0x175   : > { %22224 = vst [vmem:[#allocation63_spill] sm:$0xff] %v18574_v63  ;;  %22225 = vst [vmem:[#allocation64_spill] sm:$0xff] %v18576_v38  ;;  %v18583_v9 = vmul.f32 %v18576_v38, %v960_v40  ;;  %15270 = vmatprep.subr.bf16.mxu0 %v15269_v19  ;;  %v18594_v46 = vmul.f32 %v18574_v63, %v961_v33 }
 0x177   : > { %13199 = vmatmul.mubr.f32.gmra.mrb[14].mxu0 %v18580_v30 }
 0x178   : > { %v18588_v48 = vpop.permute.xlu1 %1077  ;;  %v18590_v11 = vpop.permute.xlu0 %1072  ;;  %13201 = vmatprep.mubr.f32.mxu0 %v18583_v9  ;;  %15272 = vmatpush3.bf16.msra.mxu0 %v15269_v19 }
 0x179   : > { %22226 = vst [vmem:[#allocation65_spill] sm:$0xff] %v18588_v48  ;;  %22227 = vst [vmem:[#allocation66_spill] sm:$0xff] %v18590_v11  ;;  %v18597_v61 = vmul.f32 %v18590_v11, %v962_v56  ;;  %15274 = vmatprep.subr.bf16.mxu0 %v18585_v10  ;;  %v18607_v19 = vmul.f32 %v18588_v48, %v963_v0  ;;  %v965_v56 = vld [vmem:[#allocation2 + $0xb1] sm:$0xff]  ;;  %v966_v11 = vld [vmem:[#allocation2 + $0xb9] sm:$0xff] }
 0x17a   : > { %v967_v0 = vld [vmem:[#allocation2 + $0xc1] sm:$0xff]  ;;  %v968_v48 = vld [vmem:[#allocation2 + $0xc9] sm:$0xff] }
 0x17b   : > { %13202 = vmatmul.mubr.f32.gmra.mrb[16].mxu0 %v18594_v46  ;;  %22230 = vst [vmem:[#allocation69_spill] sm:$0xff] %v18607_v19 }
 0x17c   : > { %v18601_v40 = vpop.permute.xlu1 %1087  ;;  %v18603_v38 = vpop.permute.xlu0 %1082  ;;  %13204 = vmatprep.mubr.f32.mxu0 %v18597_v61 }
 0x17d   : > { %22228 = vst [vmem:[#allocation67_spill] sm:$0xff] %v18601_v40  ;;  %22229 = vst [vmem:[#allocation68_spill] sm:$0xff] %v18603_v38  ;;  %v18610_v33 = vmul.f32 %v18603_v38, %v964_v20  ;;  %v18619_v39 = vmul.f32 %v18601_v40, %v965_v56  ;;  %v969_v56 = vld [vmem:[#allocation2 + $0xd1] sm:$0xff]  ;;  %v970_v40 = vld [vmem:[#allocation2 + $0xd9] sm:$0xff] }
 0x17f   : > { %22231 = vst [vmem:[#allocation70_spill] sm:$0xff] %v18610_v33  ;;  %13205 = vmatmul.mubr.f32.gmra.mrb[18].mxu0 %v18607_v19  ;;  %22234 = vst [vmem:[#allocation73_spill] sm:$0xff] %v18619_v39 }
 0x180   : > { %v18613_v63 = vpop.permute.xlu1 %1097  ;;  %v18615_v2 = vpop.permute.xlu0 %1092  ;;  %13207 = vmatprep.mubr.f32.mxu0 %v18610_v33 }
 0x181   : > { %22232 = vst [vmem:[#allocation71_spill] sm:$0xff] %v18613_v63  ;;  %22233 = vst [vmem:[#allocation72_spill] sm:$0xff] %v18615_v2  ;;  %v18622_v29 = vmul.f32 %v18615_v2, %v966_v11  ;;  %v18631_v42 = vmul.f32 %v18613_v63, %v967_v0  ;;  %v971_v0 = vld [vmem:[#allocation2 + $0xe1] sm:$0xff]  ;;  %v972_v63 = vld [vmem:[#allocation2 + $0xe9] sm:$0xff] }
 0x183   : > { %22235 = vst [vmem:[#allocation74_spill] sm:$0xff] %v18622_v29  ;;  %13208 = vmatmul.mubr.f32.gmra.mrb[20].mxu0 %v18619_v39  ;;  %22238 = vst [vmem:[#allocation77_spill] sm:$0xff] %v18631_v42  ;;  %v2233_v39 = vld [vmem:[#allocation3 + $0x228] sm:$0xff] }
 0x184   : > { %v18625_v20 = vpop.permute.xlu1 %1107  ;;  %v18627_v38 = vpop.permute.xlu0 %1102  ;;  %13210 = vmatprep.mubr.f32.mxu0 %v18622_v29 }
 0x185   : > { %22236 = vst [vmem:[#allocation75_spill] sm:$0xff] %v18625_v20  ;;  %22237 = vst [vmem:[#allocation76_spill] sm:$0xff] %v18627_v38  ;;  %v18634_v25 = vmul.f32 %v18627_v38, %v968_v48  ;;  %v18643_v1 = vmul.f32 %v18625_v20, %v969_v56  ;;  %v973_v56 = vld [vmem:[#allocation2 + $0xf1] sm:$0xff]  ;;  %v974_v20 = vld [vmem:[#allocation2 + $0xf9] sm:$0xff] }
 0x187   : > { %22239 = vst [vmem:[#allocation78_spill] sm:$0xff] %v18634_v25  ;;  %13211 = vmatmul.mubr.f32.gmra.mrb[22].mxu0 %v18631_v42  ;;  %22242 = vst [vmem:[#allocation81_spill] sm:$0xff] %v18643_v1 }
 0x188   : > { %v18637_v11 = vpop.permute.xlu1 %1117  ;;  %v18639_v2 = vpop.permute.xlu0 %1112  ;;  %13213 = vmatprep.mubr.f32.mxu0 %v18634_v25 }
 0x189   : > { %22240 = vst [vmem:[#allocation79_spill] sm:$0xff] %v18637_v11  ;;  %22241 = vst [vmem:[#allocation80_spill] sm:$0xff] %v18639_v2  ;;  %v18646_v29 = vmul.f32 %v18639_v2, %v970_v40  ;;  %v18655_v42 = vmul.f32 %v18637_v11, %v971_v0  ;;  %v975_v0 = vld [vmem:[#allocation2 + $0x101] sm:$0xff] }
 0x18b   : > { %22243 = vst [vmem:[#allocation82_spill] sm:$0xff] %v18646_v29  ;;  %13214 = vmatmul.mubr.f32.gmra.mrb[24].mxu0 %v18643_v1  ;;  %22246 = vst [vmem:[#allocation85_spill] sm:$0xff] %v18655_v42 }
 0x18c   : > { %v18649_v48 = vpop.permute.xlu1 %1127  ;;  %v18651_v38 = vpop.permute.xlu0 %1122  ;;  %13216 = vmatprep.mubr.f32.mxu0 %v18646_v29 }
 0x18d   : > { %22244 = vst [vmem:[#allocation83_spill] sm:$0xff] %v18649_v48  ;;  %22245 = vst [vmem:[#allocation84_spill] sm:$0xff] %v18651_v38  ;;  %v18658_v25 = vmul.f32 %v18651_v38, %v972_v63  ;;  %v18667_v1 = vmul.f32 %v18649_v48, %v973_v56  ;;  %v727_v48 = vld [vmem:[#allocation2 + $0x11f] sm:$0xff] }
 0x18f   : > { %22247 = vst [vmem:[#allocation86_spill] sm:$0xff] %v18658_v25  ;;  %13217 = vmatmul.mubr.f32.gmra.mrb[26].mxu0 %v18655_v42  ;;  %22250 = vst [vmem:[#allocation89_spill] sm:$0xff] %v18667_v1  ;;  %v2230_v42 = vld [vmem:[#allocation3 + $0x210] sm:$0xff] }
 0x190   : > { %v18661_v40 = vpop.permute.xlu1 %1137  ;;  %v18663_v2 = vpop.permute.xlu0 %1132  ;;  %13219 = vmatprep.mubr.f32.mxu0 %v18658_v25  ;;  %v2231_v25 = vld [vmem:[#allocation3 + $0x218] sm:$0xff] }
 0x191   : > { %22248 = vst [vmem:[#allocation87_spill] sm:$0xff] %v18661_v40  ;;  %22249 = vst [vmem:[#allocation88_spill] sm:$0xff] %v18663_v2  ;;  %v18670_v29 = vmul.f32 %v18663_v2, %v974_v20  ;;  %v18679_v11 = vmul.f32 %v18661_v40, %v975_v0  ;;  %v15277_v2 = vpack.c.bf16 %v2231_v25, %v2230_v42  ;;  %v2235_v25 = vld [vmem:[#allocation3 + $0x238] sm:$0xff] }
 0x193   : > { %22251 = vst [vmem:[#allocation90_spill] sm:$0xff] %v18670_v29  ;;  %13220 = vmatmul.mubr.f32.gmra.mrb[28].mxu0 %v18667_v1  ;;  %22254 = vst [vmem:[#allocation93_spill] sm:$0xff] %v18679_v11  ;;  %v2232_v1 = vld [vmem:[#allocation3 + $0x220] sm:$0xff] }
 0x194   : > { %v18673_v63 = vpop.permute.xlu1 %895  ;;  %v18675_v38 = vpop.permute.xlu0 %890  ;;  %13222 = vmatprep.mubr.f32.mxu0 %v18670_v29  ;;  %v978_v29 = vld [vmem:[#allocation2 + $0x119] sm:$0xff] }
 0x195   : > { %22252 = vst [vmem:[#allocation91_spill] sm:$0xff] %v18673_v63  ;;  %22253 = vst [vmem:[#allocation92_spill] sm:$0xff] %v18675_v38 }
 0x197   : > { %13223 = vmatmul.mubr.f32.gmra.mrb[30].mxu0 %v18679_v11 }
 0x198   : > { %v18682_v56 = vpop.permute.xlu1 %1147  ;;  %v18684_v20 = vpop.permute.xlu0 %1142  ;;  %13257 = vmatprep.mubr.f32.mxu0 %v18292_v36  ;;  %v2234_v36 = vld [vmem:[#allocation3 + $0x230] sm:$0xff] }
 0x199   : > { %22255 = vst [vmem:[#allocation94_spill] sm:$0xff] %v18682_v56  ;;  %22256 = vst [vmem:[#allocation95_spill] sm:$0xff] %v18684_v20  ;;  %v979_v56 = vld [vmem:[#allocation2 + $0x121] sm:$0xff]  ;;  %v15281_v20 = vpack.c.bf16 %v2233_v39, %v2232_v1 }
 0x19a   : > { %v2238_v39 = vld [vmem:[#allocation3 + $0x250] sm:$0xff] }
 0x19b   : > { %13258 = vmatmul.mubr.f32.vlgmr.msra.gmra.mrb[0].mxu0 %v18312_v51 }
 0x19c   : > { %15276 = vmatpush3.bf16.msra.mxu0 %v18585_v10  ;;  %v906_v0 = vpop.permute.xlu1 %905  ;;  %v18689_v40 = vpop.permute.xlu0 %900  ;;  %13260 = vmatprep.mubr.f32.mxu0 %v18315_v54 }
 0x19d   : > { %22257 = vst [vmem:[#allocation96_spill] sm:$0xff] %v18689_v40  ;;  %v18692_v11 = vmul.f32 %v906_v0, %v727_v48  ;;  %15278 = vmatprep.subr.bf16.mxu0 %v15277_v2  ;;  %v15285_v48 = vpack.c.bf16 %v2235_v25, %v2234_v36  ;;  %v2236_v0 = vld [vmem:[#allocation3 + $0x240] sm:$0xff]  ;;  %v2239_v40 = vld [vmem:[#allocation3 + $0x258] sm:$0xff] }
 0x19e   : > { %v2502_v25 = vld [vmem:[#allocation3 + $0x280] sm:$0xff] }
 0x19f   : > { %22258 = vst [vmem:[#allocation97_spill] sm:$0xff] %v18692_v11  ;;  %13261 = vmatmul.mubr.f32.gmra.mrb[2].mxu0 %v18330_v49  ;;  %v2237_v11 = vld [vmem:[#allocation3 + $0x248] sm:$0xff] }
 0x1a0   : > { %v1158_v42 = vpop.permute.xlu1 %1157  ;;  %v1153_v33 = vpop.permute.xlu0 %1152  ;;  %13263 = vmatprep.mubr.f32.mxu0 %v18333_v55  ;;  %15280 = vmatpush3.bf16.msra.mxu0 %v15277_v2  ;;  %v15289_v1 = vpack.c.bf16 %v2237_v11, %v2236_v0  ;;  %v2240_v2 = vld [vmem:[#allocation3 + $0x260] sm:$0xff]  ;;  %v2243_v11 = vld [vmem:[#allocation3 + $0x278] sm:$0xff] }
 0x1a1   : > { %v18696_v51 = vmul.f32 %v1158_v42, %v979_v56  ;;  %v18698_v10 = vmul.f32 %v1153_v33, %v978_v29  ;;  %15282 = vmatprep.subr.bf16.mxu0 %v15281_v20  ;;  %v15293_v29 = vpack.c.bf16 %v2239_v40, %v2238_v39  ;;  %v2241_v33 = vld [vmem:[#allocation3 + $0x268] sm:$0xff]  ;;  %v725_v0 = vld [vmem:[#allocation2 + $0x10f] sm:$0xff] }
 0x1a2   : > { %v15297_v56 = vpack.c.bf16 %v2241_v33, %v2240_v2  ;;  %v2503_v40 = vld [vmem:[#allocation3 + $0x288] sm:$0xff]  ;;  %v18730_v39 = vmul.f32 %v18673_v63, %v725_v0  ;;  %v2505_v2 = vld [vmem:[#allocation3 + $0x298] sm:$0xff]  ;;  %v18736_v63 = vld [vmem:[#allocation2 + $0x30] sm:$0xff] }
 0x1a3   : > { %22259 = vst [vmem:[#allocation98_spill] sm:$0xff] %v18696_v51  ;;  %22260 = vst [vmem:[#allocation99_spill] sm:$0xff] %v18698_v10  ;;  %13264 = vmatmul.mubr.f32.gmra.mrb[4].mxu0 %v18342_v3  ;;  %v15305_v42 = vpack.c.bf16 %v2503_v40, %v2502_v25  ;;  %v17405_v33 = vld [vmem:[#allocation2 + $0x18] sm:$0xff]  ;;  %v18733_v25 = vld [vmem:[#allocation2 + $0x28] sm:$0xff] }
 0x1a4   : > { %13266 = vmatprep.mubr.f32.mxu0 %v18345_v5  ;;  %15284 = vmatpush3.bf16.msra.mxu0 %v15281_v20  ;;  %v2242_v20 = vld [vmem:[#allocation3 + $0x270] sm:$0xff]  ;;  %v2509_v0 = vld [vmem:[#allocation3 + $0x2b8] sm:$0xff]  ;;  %v18748_v10 = vld [vmem:[#allocation2 + $0x50] sm:$0xff] }
 0x1a5   : > { %15286 = vmatprep.subr.bf16.mxu0 %v15285_v48  ;;  %v15301_v36 = vpack.c.bf16 %v2243_v11, %v2242_v20  ;;  %v2506_v20 = vld [vmem:[#allocation3 + $0x2a0] sm:$0xff]  ;;  %v2507_v11 = vld [vmem:[#allocation3 + $0x2a8] sm:$0xff]  ;;  %v2513_v51 = vld [vmem:[#allocation3 + $0x2d8] sm:$0xff]  ;;  %22264 = vst [vmem:[#allocation103_spill] sm:$0xff] %v18748_v10 }
 0x1a6   : > { %v15313_v40 = vpack.c.bf16 %v2507_v11, %v2506_v20  ;;  %v18745_v20 = vld [vmem:[#allocation2 + $0x48] sm:$0xff] }
 0x1a7   : > { %13267 = vmatmul.mubr.f32.gmra.mrb[6].mxu0 %v18354_v12  ;;  %22263 = vst [vmem:[#allocation102_spill] sm:$0xff] %v18745_v20 }
 0x1a8   : > { %13269 = vmatprep.mubr.f32.mxu0 %v18357_v14  ;;  %15288 = vmatpush3.bf16.msra.mxu0 %v15285_v48  ;;  %v724_v48 = vld [vmem:[#allocation2 + $0x107] sm:$0xff] }
 0x1a9   : > { %15290 = vmatprep.subr.bf16.mxu0 %v15289_v1 }
 0x1ab   : > { %13270 = vmatmul.mubr.f32.gmra.mrb[8].mxu0 %v18366_v21 }
 0x1ac   : > { %13272 = vmatprep.mubr.f32.mxu0 %v18369_v23  ;;  %15292 = vmatpush3.bf16.msra.mxu0 %v15289_v1  ;;  %v18725_v1 = vmul.f32 %v18675_v38, %v724_v48  ;;  %v2508_v48 = vld [vmem:[#allocation3 + $0x2b0] sm:$0xff]  ;;  %v18739_v38 = vld [vmem:[#allocation2 + $0x38] sm:$0xff] }
 0x1ad   : > { %15294 = vmatprep.subr.bf16.mxu0 %v15293_v29  ;;  %22261 = vst [vmem:[#allocation100_spill] sm:$0xff] %v18739_v38 }
 0x1af   : > { %13273 = vmatmul.mubr.f32.gmra.mrb[10].mxu0 %v18378_v34 }
 0x1b0   : > { %13275 = vmatprep.mubr.f32.mxu0 %v18381_v31  ;;  %15296 = vmatpush3.bf16.msra.mxu0 %v15293_v29  ;;  %v2504_v29 = vld [vmem:[#allocation3 + $0x290] sm:$0xff] }
 0x1b1   : > { %15298 = vmatprep.subr.bf16.mxu0 %v15297_v56 }
 0x1b3   : > { %13276 = vmatmul.mubr.f32.gmra.mrb[12].mxu0 %v18390_v50 }
 0x1b4   : > { %13278 = vmatprep.mubr.f32.mxu0 %v18393_v53  ;;  %15300 = vmatpush3.bf16.msra.mxu0 %v15297_v56  ;;  %v15309_v56 = vpack.c.bf16 %v2505_v2, %v2504_v29  ;;  %v15317_v29 = vpack.c.bf16 %v2509_v0, %v2508_v48  ;;  %v2511_v2 = vld [vmem:[#allocation3 + $0x2c8] sm:$0xff]  ;;  %v2514_v0 = vld [vmem:[#allocation3 + $0x2e0] sm:$0xff] }
 0x1b5   : > { %15302 = vmatprep.subr.bf16.mxu0 %v15301_v36 }
 0x1b7   : > { %13279 = vmatmul.mubr.f32.gmra.mrb[14].mxu0 %v18404_v45 }
 0x1b8   : > { %13281 = vmatprep.mubr.f32.mxu0 %v18407_v52  ;;  %15304 = vmatpush3.bf16.msra.mxu0 %v15301_v36  ;;  %v17406_v36 = vld [vmem:[#allocation2 + $0x20] sm:$0xff] }
 0x1b9   : > { %15306 = vmatprep.subr.bf16.mxu0 %v15305_v42 }
 0x1bb   : > { %13282 = vmatmul.mubr.f32.gmra.mrb[16].mxu0 %v18417_v4 }
 0x1bc   : > { %13284 = vmatprep.mubr.f32.mxu0 %v18420_v6 }
 0x1bf   : > { %13285 = vmatmul.mubr.f32.gmra.mrb[18].mxu0 %v18429_v15 }
 0x1c0   : > { %13287 = vmatprep.mubr.f32.mxu0 %v18432_v16 }
 0x1c3   : > { %13288 = vmatmul.mubr.f32.gmra.mrb[20].mxu0 %v18441_v26 }
 0x1c4   : > { %13290 = vmatprep.mubr.f32.mxu0 %v18444_v27 }
 0x1c7   : > { %13291 = vmatmul.mubr.f32.gmra.mrb[22].mxu0 %v18453_v32 }
 0x1c8   : > { %13293 = vmatprep.mubr.f32.mxu0 %v18456_v37 }
 0x1cb   : > { %13294 = vmatmul.mubr.f32.gmra.mrb[24].mxu0 %v18465_v7 }
 0x1cc   : > { %13296 = vmatprep.mubr.f32.mxu0 %v18468_v8 }
 0x1cf   : > { %13297 = vmatmul.mubr.f32.gmra.mrb[26].mxu0 %v18477_v43 }
 0x1d0   : > { %13299 = vmatprep.mubr.f32.mxu0 %v18480_v22 }
 0x1d3   : > { %13300 = vmatmul.mubr.f32.gmra.mrb[28].mxu0 %v18487_v24 }
 0x1d4   : > { %13302 = vmatprep.mubr.f32.mxu0 %v18725_v1 }
 0x1d7   : > { %13303 = vmatmul.mubr.f32.gmra.mrb[30].mxu0 %v18730_v39 }
 0x1d8   : > { %13337 = vmatprep.mubr.f32.mxu0 %v17405_v33  ;;  %v18742_v33 = vld [vmem:[#allocation2 + $0x40] sm:$0xff] }
 0x1d9   : > { %22262 = vst [vmem:[#allocation101_spill] sm:$0xff] %v18742_v33 }
 0x1db   : > { %13338 = vmatmul.mubr.f32.vlgmr.msra.gmra.mrb[0].mxu0 %v17406_v36  ;;  %v2512_v36 = vld [vmem:[#allocation3 + $0x2d0] sm:$0xff] }
 0x1dc   : > { %15308 = vmatpush3.bf16.msra.mxu0 %v15305_v42  ;;  %13340 = vmatprep.mubr.f32.mxu0 %v18733_v25  ;;  %v2510_v42 = vld [vmem:[#allocation3 + $0x2c0] sm:$0xff]  ;;  %v15325_v48 = vpack.c.bf16 %v2513_v51, %v2512_v36  ;;  %v18763_v51 = vld [vmem:[#allocation2 + $0x78] sm:$0xff] }
 0x1dd   : > { %15310 = vmatprep.subr.bf16.mxu0 %v15309_v56  ;;  %v15321_v11 = vpack.c.bf16 %v2511_v2, %v2510_v42  ;;  %v2516_v2 = vld [vmem:[#allocation3 + $0x2f0] sm:$0xff]  ;;  %v2776_v36 = vld [vmem:[#allocation3 + $0x300] sm:$0xff] }
 0x1df   : > { %13341 = vmatmul.mubr.f32.gmra.mrb[2].mxu0 %v18736_v63 }
 0x1e0   : > { %13343 = vmatprep.mubr.f32.mxu0 %v18739_v38  ;;  %15312 = vmatpush3.bf16.msra.mxu0 %v15309_v56  ;;  %v18751_v56 = vld [vmem:[#allocation2 + $0x58] sm:$0xff]  ;;  %v18754_v38 = vld [vmem:[#allocation2 + $0x60] sm:$0xff] }
 0x1e1   : > { %15314 = vmatprep.subr.bf16.mxu0 %v15313_v40  ;;  %22265 = vst [vmem:[#allocation104_spill] sm:$0xff] %v18751_v56  ;;  %22266 = vst [vmem:[#allocation105_spill] sm:$0xff] %v18754_v38 }
 0x1e3   : > { %13344 = vmatmul.mubr.f32.gmra.mrb[4].mxu0 %v18742_v33  ;;  %v2515_v33 = vld [vmem:[#allocation3 + $0x2e8] sm:$0xff] }
 0x1e4   : > { %13346 = vmatprep.mubr.f32.mxu0 %v18745_v20  ;;  %15316 = vmatpush3.bf16.msra.mxu0 %v15313_v40  ;;  %v18757_v40 = vld [vmem:[#allocation2 + $0x68] sm:$0xff]  ;;  %v15329_v42 = vpack.c.bf16 %v2515_v33, %v2514_v0  ;;  %v18760_v20 = vld [vmem:[#allocation2 + $0x70] sm:$0xff] }
 0x1e5   : > { %15318 = vmatprep.subr.bf16.mxu0 %v15317_v29  ;;  %v18769_v33 = vld [vmem:[#allocation2 + $0x88] sm:$0xff]  ;;  %v18772_v0 = vld [vmem:[#allocation2 + $0x90] sm:$0xff] }
 0x1e6   : > { %22267 = vst [vmem:[#allocation106_spill] sm:$0xff] %v18769_v33  ;;  %22268 = vst [vmem:[#allocation107_spill] sm:$0xff] %v18772_v0 }
 0x1e7   : > { %13347 = vmatmul.mubr.f32.gmra.mrb[6].mxu0 %v18748_v10  ;;  %v2517_v10 = vld [vmem:[#allocation3 + $0x2f8] sm:$0xff] }
 0x1e8   : > { %13349 = vmatprep.mubr.f32.mxu0 %v18751_v56  ;;  %15320 = vmatpush3.bf16.msra.mxu0 %v15317_v29  ;;  %v15333_v29 = vpack.c.bf16 %v2517_v10, %v2516_v2  ;;  %v18766_v56 = vld [vmem:[#allocation2 + $0x80] sm:$0xff]  ;;  %v18781_v2 = vld [vmem:[#allocation2 + $0xa8] sm:$0xff] }
 0x1e9   : > { %15322 = vmatprep.subr.bf16.mxu0 %v15321_v11  ;;  %v18778_v10 = vld [vmem:[#allocation2 + $0xa0] sm:$0xff]  ;;  %22271 = vst [vmem:[#allocation110_spill] sm:$0xff] %v18781_v2 }
 0x1ea   : > { %22270 = vst [vmem:[#allocation109_spill] sm:$0xff] %v18778_v10 }
 0x1eb   : > { %13350 = vmatmul.mubr.f32.gmra.mrb[8].mxu0 %v18754_v38  ;;  %v2777_v38 = vld [vmem:[#allocation3 + $0x308] sm:$0xff] }
 0x1ec   : > { %13352 = vmatprep.mubr.f32.mxu0 %v18757_v40  ;;  %15324 = vmatpush3.bf16.msra.mxu0 %v15321_v11  ;;  %v15337_v11 = vpack.c.bf16 %v2777_v38, %v2776_v36  ;;  %v18787_v38 = vld [vmem:[#allocation2 + $0xb8] sm:$0xff]  ;;  %v18790_v36 = vld [vmem:[#allocation2 + $0xc0] sm:$0xff] }
 0x1ed   : > { %15326 = vmatprep.subr.bf16.mxu0 %v15325_v48  ;;  %22273 = vst [vmem:[#allocation112_spill] sm:$0xff] %v18787_v38  ;;  %22274 = vst [vmem:[#allocation113_spill] sm:$0xff] %v18790_v36 }
 0x1ef   : > { %13353 = vmatmul.mubr.f32.gmra.mrb[10].mxu0 %v18760_v20 }
 0x1f0   : > { %13355 = vmatprep.mubr.f32.mxu0 %v18763_v51  ;;  %15328 = vmatpush3.bf16.msra.mxu0 %v15325_v48  ;;  %v18775_v48 = vld [vmem:[#allocation2 + $0x98] sm:$0xff] }
 0x1f1   : > { %15330 = vmatprep.subr.bf16.mxu0 %v15329_v42  ;;  %22269 = vst [vmem:[#allocation108_spill] sm:$0xff] %v18775_v48 }
 0x1f3   : > { %13356 = vmatmul.mubr.f32.gmra.mrb[12].mxu0 %v18766_v56 }
 0x1f4   : > { %13358 = vmatprep.mubr.f32.mxu0 %v18769_v33  ;;  %15332 = vmatpush3.bf16.msra.mxu0 %v15329_v42  ;;  %v18784_v42 = vld [vmem:[#allocation2 + $0xb0] sm:$0xff]  ;;  %v2781_v33 = vld [vmem:[#allocation3 + $0x328] sm:$0xff] }
 0x1f5   : > { %15334 = vmatprep.subr.bf16.mxu0 %v15333_v29  ;;  %22272 = vst [vmem:[#allocation111_spill] sm:$0xff] %v18784_v42 }
 0x1f7   : > { %13359 = vmatmul.mubr.f32.gmra.mrb[14].mxu0 %v18772_v0  ;;  %v18820_v0 = vld [vmem:[#allocation2 + $0x110] sm:$0xff] }
 0x1f8   : > { %13361 = vmatprep.mubr.f32.mxu0 %v18775_v48  ;;  %15336 = vmatpush3.bf16.msra.mxu0 %v15333_v29  ;;  %v18793_v29 = vld [vmem:[#allocation2 + $0xc8] sm:$0xff]  ;;  %22284 = vst [vmem:[#allocation123_spill] sm:$0xff] %v18820_v0 }
 0x1f9   : > { %15338 = vmatprep.subr.bf16.mxu0 %v15337_v11  ;;  %22275 = vst [vmem:[#allocation114_spill] sm:$0xff] %v18793_v29  ;;  %v2779_v48 = vld [vmem:[#allocation3 + $0x318] sm:$0xff] }
 0x1fb   : > { %13362 = vmatmul.mubr.f32.gmra.mrb[16].mxu0 %v18778_v10  ;;  %v18796_v10 = vld [vmem:[#allocation2 + $0xd0] sm:$0xff] }
 0x1fc   : > { %13364 = vmatprep.mubr.f32.mxu0 %v18781_v2  ;;  %22276 = vst [vmem:[#allocation115_spill] sm:$0xff] %v18796_v10  ;;  %v18799_v2 = vld [vmem:[#allocation2 + $0xd8] sm:$0xff] }
 0x1fd   : > { %22277 = vst [vmem:[#allocation116_spill] sm:$0xff] %v18799_v2 }
 0x1ff   : > { %13365 = vmatmul.mubr.f32.gmra.mrb[18].mxu0 %v18784_v42  ;;  %v18802_v42 = vld [vmem:[#allocation2 + $0xe0] sm:$0xff] }
 0x200   : > { %13367 = vmatprep.mubr.f32.mxu0 %v18787_v38  ;;  %22278 = vst [vmem:[#allocation117_spill] sm:$0xff] %v18802_v42  ;;  %v18805_v38 = vld [vmem:[#allocation2 + $0xe8] sm:$0xff] }
 0x201   : > { %22279 = vst [vmem:[#allocation118_spill] sm:$0xff] %v18805_v38 }
 0x203   : > { %13368 = vmatmul.mubr.f32.gmra.mrb[20].mxu0 %v18790_v36  ;;  %v18808_v36 = vld [vmem:[#allocation2 + $0xf0] sm:$0xff] }
 0x204   : > { %13370 = vmatprep.mubr.f32.mxu0 %v18793_v29  ;;  %22280 = vst [vmem:[#allocation119_spill] sm:$0xff] %v18808_v36  ;;  %v18811_v29 = vld [vmem:[#allocation2 + $0xf8] sm:$0xff] }
 0x205   : > { %22281 = vst [vmem:[#allocation120_spill] sm:$0xff] %v18811_v29 }
 0x207   : > { %13371 = vmatmul.mubr.f32.gmra.mrb[22].mxu0 %v18796_v10  ;;  %v18814_v10 = vld [vmem:[#allocation2 + $0x100] sm:$0xff] }
 0x208   : > { %13373 = vmatprep.mubr.f32.mxu0 %v18799_v2  ;;  %22282 = vst [vmem:[#allocation121_spill] sm:$0xff] %v18814_v10  ;;  %v18817_v2 = vld [vmem:[#allocation2 + $0x108] sm:$0xff] }
 0x209   : > { %22283 = vst [vmem:[#allocation122_spill] sm:$0xff] %v18817_v2 }
 0x20b   : > { %13374 = vmatmul.mubr.f32.gmra.mrb[24].mxu0 %v18802_v42  ;;  %v2778_v42 = vld [vmem:[#allocation3 + $0x310] sm:$0xff] }
 0x20c   : > { %13376 = vmatprep.mubr.f32.mxu0 %v18805_v38  ;;  %v2780_v38 = vld [vmem:[#allocation3 + $0x320] sm:$0xff] }
 0x20f   : > { %13377 = vmatmul.mubr.f32.gmra.mrb[26].mxu0 %v18808_v36  ;;  %v15341_v36 = vpack.c.bf16 %v2779_v48, %v2778_v42  ;;  %v2785_v48 = vld [vmem:[#allocation3 + $0x348] sm:$0xff] }
 0x210   : > { %13379 = vmatprep.mubr.f32.mxu0 %v18811_v29  ;;  %v2782_v29 = vld [vmem:[#allocation3 + $0x330] sm:$0xff] }
 0x213   : > { %13380 = vmatmul.mubr.f32.gmra.mrb[28].mxu0 %v18814_v10  ;;  %v15345_v10 = vpack.c.bf16 %v2781_v33, %v2780_v38  ;;  %v2787_v33 = vld [vmem:[#allocation3 + $0x358] sm:$0xff]  ;;  %v2788_v38 = vld [vmem:[#allocation3 + $0x360] sm:$0xff] }
 0x214   : > { %13382 = vmatprep.mubr.f32.mxu0 %v18817_v2  ;;  %v2783_v2 = vld [vmem:[#allocation3 + $0x338] sm:$0xff] }
 0x217   : > { %13383 = vmatmul.mubr.f32.gmra.mrb[30].mxu0 %v18820_v0  ;;  %v15349_v0 = vpack.c.bf16 %v2783_v2, %v2782_v29  ;;  %v2789_v2 = vld [vmem:[#allocation3 + $0x368] sm:$0xff]  ;;  %v2791_v29 = vld [vmem:[#allocation3 + $0x378] sm:$0xff] }
 0x218   : > { %13417 = vmatprep.mubr.f32.mxu0 %v18499_v44  ;;  %v2784_v44 = vld [vmem:[#allocation3 + $0x340] sm:$0xff] }
 0x21b   : > { %13418 = vmatmul.mubr.f32.vlgmr.msra.gmra.mrb[0].mxu0 %v18508_v13  ;;  %v15353_v13 = vpack.c.bf16 %v2785_v48, %v2784_v44  ;;  %v3050_v44 = vld [vmem:[#allocation3 + $0x380] sm:$0xff]  ;;  %v3051_v48 = vld [vmem:[#allocation3 + $0x388] sm:$0xff] }
 0x21c   : > { %15340 = vmatpush3.bf16.msra.mxu0 %v15337_v11  ;;  %13420 = vmatprep.mubr.f32.mxu0 %v18511_v17  ;;  %v2786_v11 = vld [vmem:[#allocation3 + $0x350] sm:$0xff] }
 0x21d   : > { %15342 = vmatprep.subr.bf16.mxu0 %v15341_v36  ;;  %v15357_v42 = vpack.c.bf16 %v2787_v33, %v2786_v11  ;;  %v22285_v11 = vld [vmem:[#allocation70_spill] sm:$0xff]  ;;  %v22286_v33 = vld [vmem:[#allocation73_spill] sm:$0xff] }
 0x21f   : > { %13421 = vmatmul.mubr.f32.gmra.mrb[2].mxu0 %v18520_v59 }
 0x220   : > { %13423 = vmatprep.mubr.f32.mxu0 %v18523_v41  ;;  %15344 = vmatpush3.bf16.msra.mxu0 %v15341_v36  ;;  %v2790_v36 = vld [vmem:[#allocation3 + $0x370] sm:$0xff] }
 0x221   : > { %15346 = vmatprep.subr.bf16.mxu0 %v15345_v10 }
 0x223   : > { %13424 = vmatmul.mubr.f32.gmra.mrb[4].mxu0 %v18532_v28 }
 0x224   : > { %13426 = vmatprep.mubr.f32.mxu0 %v18535_v57  ;;  %15348 = vmatpush3.bf16.msra.mxu0 %v15345_v10  ;;  %v15361_v10 = vpack.c.bf16 %v2789_v2, %v2788_v38  ;;  %v22288_v38 = vld [vmem:[#allocation77_spill] sm:$0xff]  ;;  %v22289_v2 = vld [vmem:[#allocation78_spill] sm:$0xff] }
 0x225   : > { %15350 = vmatprep.subr.bf16.mxu0 %v15349_v0 }
 0x227   : > { %13427 = vmatmul.mubr.f32.gmra.mrb[6].mxu0 %v18544_v18 }
 0x228   : > { %13429 = vmatprep.mubr.f32.mxu0 %v18547_v58  ;;  %15352 = vmatpush3.bf16.msra.mxu0 %v15349_v0  ;;  %v15365_v0 = vpack.c.bf16 %v2791_v29, %v2790_v36  ;;  %v22291_v36 = vld [vmem:[#allocation82_spill] sm:$0xff]  ;;  %v22292_v29 = vld [vmem:[#allocation85_spill] sm:$0xff] }
 0x229   : > { %15354 = vmatprep.subr.bf16.mxu0 %v15353_v13 }
 0x22b   : > { %13430 = vmatmul.mubr.f32.gmra.mrb[8].mxu0 %v18556_v60 }
 0x22c   : > { %13432 = vmatprep.mubr.f32.mxu0 %v18559_v62  ;;  %15356 = vmatpush3.bf16.msra.mxu0 %v15353_v13  ;;  %v15369_v13 = vpack.c.bf16 %v3051_v48, %v3050_v44  ;;  %v976_v44 = vld [vmem:[#allocation2 + $0x109] sm:$0xff]  ;;  %v22294_v48 = vld [vmem:[#allocation89_spill] sm:$0xff] }
 0x22d   : > { %15358 = vmatprep.subr.bf16.mxu0 %v15357_v42 }
 0x22f   : > { %13433 = vmatmul.mubr.f32.gmra.mrb[10].mxu0 %v18568_v35 }
 0x230   : > { %13435 = vmatprep.mubr.f32.mxu0 %v18571_v47  ;;  %15360 = vmatpush3.bf16.msra.mxu0 %v15357_v42  ;;  %v22287_v42 = vld [vmem:[#allocation74_spill] sm:$0xff] }
 0x231   : > { %15362 = vmatprep.subr.bf16.mxu0 %v15361_v10 }
 0x233   : > { %13436 = vmatmul.mubr.f32.gmra.mrb[12].mxu0 %v18580_v30 }
 0x234   : > { %13438 = vmatprep.mubr.f32.mxu0 %v18583_v9  ;;  %15364 = vmatpush3.bf16.msra.mxu0 %v15361_v10  ;;  %v22290_v10 = vld [vmem:[#allocation81_spill] sm:$0xff] }
 0x235   : > { %15366 = vmatprep.subr.bf16.mxu0 %v15365_v0 }
 0x237   : > { %13439 = vmatmul.mubr.f32.gmra.mrb[14].mxu0 %v18594_v46 }
 0x238   : > { %13441 = vmatprep.mubr.f32.mxu0 %v18597_v61  ;;  %15368 = vmatpush3.bf16.msra.mxu0 %v15365_v0  ;;  %v22293_v0 = vld [vmem:[#allocation86_spill] sm:$0xff] }
 0x239   : > { %15370 = vmatprep.subr.bf16.mxu0 %v15369_v13 }
 0x23b   : > { %13442 = vmatmul.mubr.f32.gmra.mrb[16].mxu0 %v18607_v19  ;;  %v22296_v19 = vld [vmem:[#allocation95_spill] sm:$0xff] }
 0x23c   : > { %13444 = vmatprep.mubr.f32.mxu0 %v22285_v11  ;;  %v22295_v11 = vld [vmem:[#allocation90_spill] sm:$0xff] }
 0x23f   : > { %13445 = vmatmul.mubr.f32.gmra.mrb[18].mxu0 %v22286_v33  ;;  %v977_v33 = vld [vmem:[#allocation2 + $0x111] sm:$0xff] }
 0x240   : > { %13447 = vmatprep.mubr.f32.mxu0 %v22287_v42  ;;  %v18853_v42 = vmul.f32 %v22296_v19, %v976_v44  ;;  %v3056_v19 = vld [vmem:[#allocation3 + $0x3b0] sm:$0xff] }
 0x242   : > { %22297 = vst [vmem:[#allocation124_spill] sm:$0xff] %v18853_v42 }
 0x243   : > { %13448 = vmatmul.mubr.f32.gmra.mrb[20].mxu0 %v22288_v38  ;;  %v22298_v38 = vld [vmem:[#allocation93_spill] sm:$0xff] }
 0x244   : > { %13450 = vmatprep.mubr.f32.mxu0 %v22289_v2 }
 0x247   : > { %13451 = vmatmul.mubr.f32.gmra.mrb[22].mxu0 %v22290_v10  ;;  %v22299_v10 = vld [vmem:[#allocation94_spill] sm:$0xff] }
 0x248   : > { %13453 = vmatprep.mubr.f32.mxu0 %v22291_v36  ;;  %v18858_v2 = vmul.f32 %v22299_v10, %v977_v33  ;;  %v3052_v36 = vld [vmem:[#allocation3 + $0x390] sm:$0xff] }
 0x24b   : > { %13454 = vmatmul.mubr.f32.gmra.mrb[24].mxu0 %v22292_v29  ;;  %v3053_v29 = vld [vmem:[#allocation3 + $0x398] sm:$0xff] }
 0x24c   : > { %13456 = vmatprep.mubr.f32.mxu0 %v22293_v0  ;;  %v3054_v0 = vld [vmem:[#allocation3 + $0x3a0] sm:$0xff] }
 0x24f   : > { %13457 = vmatmul.mubr.f32.gmra.mrb[26].mxu0 %v22294_v48  ;;  %v15373_v48 = vpack.c.bf16 %v3053_v29, %v3052_v36  ;;  %v3059_v36 = vld [vmem:[#allocation3 + $0x3c8] sm:$0xff]  ;;  %v3331_v29 = vld [vmem:[#allocation3 + $0x438] sm:$0xff] }
 0x250   : > { %13459 = vmatprep.mubr.f32.mxu0 %v22295_v11  ;;  %v3055_v11 = vld [vmem:[#allocation3 + $0x3a8] sm:$0xff] }
 0x251   : > { %v15377_v44 = vpack.c.bf16 %v3055_v11, %v3054_v0  ;;  %v3065_v11 = vld [vmem:[#allocation3 + $0x3f8] sm:$0xff]  ;;  %v3903_v0 = vld [vmem:[#allocation5 + $0xb0] sm:$0xff] }
 0x253   : > { %13460 = vmatmul.mubr.f32.gmra.mrb[28].mxu0 %v22298_v38 }
 0x254   : > { %13462 = vmatprep.mubr.f32.mxu0 %v18853_v42  ;;  %v3057_v42 = vld [vmem:[#allocation3 + $0x3b8] sm:$0xff] }
 0x255   : > { %v15381_v33 = vpack.c.bf16 %v3057_v42, %v3056_v19  ;;  %v3063_v19 = vld [vmem:[#allocation3 + $0x3e8] sm:$0xff] }
 0x256   : > { %v3325_v42 = vld [vmem:[#allocation3 + $0x408] sm:$0xff] }
 0x257   : > { %13463 = vmatmul.mubr.f32.gmra.mrb[30].mxu0 %v18858_v2 }
 0x258   : > { %13497 = vmatprep.mubr.f32.mxu0 %v18315_v54  ;;  %v3058_v54 = vld [vmem:[#allocation3 + $0x3c0] sm:$0xff] }
 0x25b   : > { %13498 = vmatmul.mubr.f32.vlgmr.msra.gmra.mrb[0].mxu0 %v18330_v49  ;;  %v15385_v49 = vpack.c.bf16 %v3059_v36, %v3058_v54  ;;  %v3332_v54 = vld [vmem:[#allocation3 + $0x440] sm:$0xff] }
 0x25c   : > { %15372 = vmatpush3.bf16.msra.mxu0 %v15369_v13  ;;  %13500 = vmatprep.mubr.f32.mxu0 %v18333_v55  ;;  %v3060_v55 = vld [vmem:[#allocation3 + $0x3d0] sm:$0xff]  ;;  %v3061_v13 = vld [vmem:[#allocation3 + $0x3d8] sm:$0xff] }
 0x25d   : > { %15374 = vmatprep.subr.bf16.mxu0 %v15373_v48 }
 0x25f   : > { %13501 = vmatmul.mubr.f32.gmra.mrb[2].mxu0 %v18342_v3  ;;  %v15389_v3 = vpack.c.bf16 %v3061_v13, %v3060_v55  ;;  %v3905_v55 = vld [vmem:[#allocation5 + $0xc0] sm:$0xff]  ;;  %v3906_v13 = vld [vmem:[#allocation5 + $0xc8] sm:$0xff] }
 0x260   : > { %13503 = vmatprep.mubr.f32.mxu0 %v18345_v5  ;;  %15376 = vmatpush3.bf16.msra.mxu0 %v15373_v48  ;;  %v3062_v5 = vld [vmem:[#allocation3 + $0x3e0] sm:$0xff]  ;;  %v3904_v48 = vld [vmem:[#allocation5 + $0xb8] sm:$0xff] }
 0x261   : > { %15378 = vmatprep.subr.bf16.mxu0 %v15377_v44  ;;  %v15445_v36 = vpack.c.bf16 %v3904_v48, %v3903_v0  ;;  %v22325_v0 = vld [vmem:[#allocation123_spill] sm:$0xff]  ;;  %v17437_v48 = vld [vmem:[#allocation2 + $0x8] sm:$0xff] }
 0x263   : > { %13504 = vmatmul.mubr.f32.gmra.mrb[4].mxu0 %v18354_v12  ;;  %v15393_v12 = vpack.c.bf16 %v3063_v19, %v3062_v5  ;;  %v22306_v5 = vld [vmem:[#allocation104_spill] sm:$0xff] }
 0x264   : > { %13506 = vmatprep.mubr.f32.mxu0 %v18357_v14  ;;  %15380 = vmatpush3.bf16.msra.mxu0 %v15377_v44  ;;  %v3064_v14 = vld [vmem:[#allocation3 + $0x3f0] sm:$0xff] }
 0x265   : > { %15382 = vmatprep.subr.bf16.mxu0 %v15381_v33  ;;  %v22303_v44 = vld [vmem:[#allocation101_spill] sm:$0xff] }
 0x267   : > { %13507 = vmatmul.mubr.f32.gmra.mrb[6].mxu0 %v18366_v21  ;;  %v15397_v21 = vpack.c.bf16 %v3065_v11, %v3064_v14  ;;  %v15449_v14 = vpack.c.bf16 %v3906_v13, %v3905_v55  ;;  %v3335_v11 = vld [vmem:[#allocation3 + $0x458] sm:$0xff]  ;;  %v3881_v55 = vld [vmem:[#allocation5 + $0x8] sm:$0xff] }
 0x268   : > { %13509 = vmatprep.mubr.f32.mxu0 %v18369_v23  ;;  %15384 = vmatpush3.bf16.msra.mxu0 %v15381_v33  ;;  %v3324_v23 = vld [vmem:[#allocation3 + $0x400] sm:$0xff]  ;;  %v22304_v33 = vld [vmem:[#allocation102_spill] sm:$0xff] }
 0x269   : > { %15386 = vmatprep.subr.bf16.mxu0 %v15385_v49 }
 0x26b   : > { %13510 = vmatmul.mubr.f32.gmra.mrb[8].mxu0 %v18378_v34  ;;  %v15401_v34 = vpack.c.bf16 %v3325_v42, %v3324_v23  ;;  %v3908_v23 = vld [vmem:[#allocation5 + $0xd8] sm:$0xff]  ;;  %v22307_v42 = vld [vmem:[#allocation105_spill] sm:$0xff] }
 0x26c   : > { %13512 = vmatprep.mubr.f32.mxu0 %v18381_v31  ;;  %15388 = vmatpush3.bf16.msra.mxu0 %v15385_v49  ;;  %v726_v31 = vld [vmem:[#allocation2 + $0x117] sm:$0xff] }
 0x26d   : > { %15390 = vmatprep.subr.bf16.mxu0 %v15389_v3  ;;  %v3333_v49 = vld [vmem:[#allocation3 + $0x448] sm:$0xff] }
 0x26e   : > { %v15417_v19 = vpack.c.bf16 %v3333_v49, %v3332_v54  ;;  %v3911_v54 = vld [vmem:[#allocation5 + $0xf0] sm:$0xff] }
 0x26f   : > { %13513 = vmatmul.mubr.f32.gmra.mrb[10].mxu0 %v18390_v50  ;;  %v22300_v50 = vld [vmem:[#allocation96_spill] sm:$0xff] }
 0x270   : > { %13515 = vmatprep.mubr.f32.mxu0 %v18393_v53  ;;  %15392 = vmatpush3.bf16.msra.mxu0 %v15389_v3  ;;  %v942_v53 = vmul.f32 %v22300_v50, %v726_v31  ;;  %v22305_v3 = vld [vmem:[#allocation103_spill] sm:$0xff] }
 0x271   : > { %15394 = vmatprep.subr.bf16.mxu0 %v15393_v12 }
 0x273   : > { %13516 = vmatmul.mubr.f32.gmra.mrb[12].mxu0 %v18404_v45  ;;  %v3326_v45 = vld [vmem:[#allocation3 + $0x410] sm:$0xff] }
 0x274   : > { %13518 = vmatprep.mubr.f32.mxu0 %v18407_v52  ;;  %15396 = vmatpush3.bf16.msra.mxu0 %v15393_v12  ;;  %v3327_v52 = vld [vmem:[#allocation3 + $0x418] sm:$0xff]  ;;  %v3334_v12 = vld [vmem:[#allocation3 + $0x450] sm:$0xff] }
 0x275   : > { %15398 = vmatprep.subr.bf16.mxu0 %v15397_v21 }
 0x277   : > { %13519 = vmatmul.mubr.f32.gmra.mrb[14].mxu0 %v18417_v4  ;;  %v22301_v4 = vld [vmem:[#allocation97_spill] sm:$0xff] }
 0x278   : > { %13521 = vmatprep.mubr.f32.mxu0 %v18420_v6  ;;  %15400 = vmatpush3.bf16.msra.mxu0 %v15397_v21  ;;  %v3897_v6 = vld [vmem:[#allocation5 + $0x80] sm:$0xff]  ;;  %v3907_v21 = vld [vmem:[#allocation5 + $0xd0] sm:$0xff] }
 0x279   : > { %15402 = vmatprep.subr.bf16.mxu0 %v15401_v34  ;;  %v15453_v31 = vpack.c.bf16 %v3908_v23, %v3907_v21  ;;  %v3887_v21 = vld [vmem:[#allocation5 + $0x38] sm:$0xff] }
 0x27b   : > { %13522 = vmatmul.mubr.f32.gmra.mrb[16].mxu0 %v18429_v15  ;;  %v3898_v15 = vld [vmem:[#allocation5 + $0x88] sm:$0xff] }
 0x27c   : > { %13524 = vmatprep.mubr.f32.mxu0 %v18432_v16  ;;  %v3899_v16 = vld [vmem:[#allocation5 + $0x90] sm:$0xff] }
 0x27f   : > { %13525 = vmatmul.mubr.f32.gmra.mrb[18].mxu0 %v18441_v26  ;;  %v3900_v26 = vld [vmem:[#allocation5 + $0x98] sm:$0xff] }
 0x280   : > { %13527 = vmatprep.mubr.f32.mxu0 %v18444_v27  ;;  %v15405_v27 = vpack.c.bf16 %v3327_v52, %v3326_v45  ;;  %v3337_v45 = vld [vmem:[#allocation3 + $0x468] sm:$0xff] }
 0x283   : > { %13528 = vmatmul.mubr.f32.gmra.mrb[20].mxu0 %v18453_v32  ;;  %v3329_v32 = vld [vmem:[#allocation3 + $0x428] sm:$0xff] }
 0x284   : > { %13530 = vmatprep.mubr.f32.mxu0 %v18456_v37  ;;  %v3901_v37 = vld [vmem:[#allocation5 + $0xa0] sm:$0xff] }
 0x287   : > { %13531 = vmatmul.mubr.f32.gmra.mrb[22].mxu0 %v18465_v7  ;;  %v3902_v7 = vld [vmem:[#allocation5 + $0xa8] sm:$0xff] }
 0x288   : > { %13533 = vmatprep.mubr.f32.mxu0 %v18468_v8  ;;  %v22302_v8 = vld [vmem:[#allocation100_spill] sm:$0xff] }
 0x28b   : > { %13534 = vmatmul.mubr.f32.gmra.mrb[24].mxu0 %v18477_v43  ;;  %v15437_v43 = vpack.c.bf16 %v3900_v26, %v3899_v16  ;;  %v22312_v26 = vld [vmem:[#allocation110_spill] sm:$0xff] }
 0x28c   : > { %13536 = vmatprep.mubr.f32.mxu0 %v18480_v22  ;;  %v15433_v22 = vpack.c.bf16 %v3898_v15, %v3897_v6  ;;  %v3338_v6 = vld [vmem:[#allocation3 + $0x470] sm:$0xff]  ;;  %v3339_v15 = vld [vmem:[#allocation3 + $0x478] sm:$0xff] }
 0x28d   : > { %v15429_v16 = vpack.c.bf16 %v3339_v15, %v3338_v6  ;;  %v3892_v6 = vld [vmem:[#allocation5 + $0x60] sm:$0xff]  ;;  %v3893_v15 = vld [vmem:[#allocation5 + $0x68] sm:$0xff] }
 0x28e   : > { %15434 = vmatprep.subr.bf16.mxu1 %v15433_v22 }
 0x28f   : > { %13537 = vmatmul.mubr.f32.gmra.mrb[26].mxu0 %v18487_v24  ;;  %v3328_v24 = vld [vmem:[#allocation3 + $0x420] sm:$0xff]  ;;  %15436 = vmatpush3.bf16.msra.mxu1 %v15433_v22 }
 0x290   : > { %13539 = vmatprep.mubr.f32.mxu0 %v18725_v1  ;;  %v15409_v1 = vpack.c.bf16 %v3329_v32, %v3328_v24  ;;  %15438 = vmatprep.subr.bf16.mxu1 %v15437_v43  ;;  %v22309_v22 = vld [vmem:[#allocation107_spill] sm:$0xff]  ;;  %v22315_v24 = vld [vmem:[#allocation113_spill] sm:$0xff] }
 0x291   : > { %v22317_v32 = vld [vmem:[#allocation115_spill] sm:$0xff] }
 0x293   : > { %13540 = vmatmul.mubr.f32.gmra.mrb[28].mxu0 %v18730_v39  ;;  %v3330_v39 = vld [vmem:[#allocation3 + $0x430] sm:$0xff]  ;;  %15440 = vmatpush3.bf16.msra.mxu1 %v15437_v43  ;;  %v22316_v43 = vld [vmem:[#allocation114_spill] sm:$0xff] }
 0x294   : > { %13542 = vmatprep.mubr.f32.mxu0 %v942_v53  ;;  %v3336_v53 = vld [vmem:[#allocation3 + $0x460] sm:$0xff] }
 0x295   : > { %v15425_v52 = vpack.c.bf16 %v3337_v45, %v3336_v53  ;;  %v3890_v53 = vld [vmem:[#allocation5 + $0x50] sm:$0xff]  ;;  %v3891_v45 = vld [vmem:[#allocation5 + $0x58] sm:$0xff] }
 0x297   : > { %13543 = vmatmul.mubr.f32.gmra.mrb[30].mxu0 %v22301_v4 }
 0x298   : > { %13577 = vmatprep.mubr.f32.mxu0 %v18733_v25  ;;  %v15441_v25 = vpack.c.bf16 %v3902_v7, %v3901_v37  ;;  %v22318_v37 = vld [vmem:[#allocation116_spill] sm:$0xff]  ;;  %v22319_v7 = vld [vmem:[#allocation117_spill] sm:$0xff] }
 0x29a   : > { %15442 = vmatprep.subr.bf16.mxu1 %v15441_v25 }
 0x29b   : > { %13578 = vmatmul.mubr.f32.vlgmr.msra.gmra.mrb[0].mxu0 %v18736_v63  ;;  %v15413_v63 = vpack.c.bf16 %v3331_v29, %v3330_v39  ;;  %15444 = vmatpush3.bf16.msra.mxu1 %v15441_v25  ;;  %v22322_v39 = vld [vmem:[#allocation120_spill] sm:$0xff]  ;;  %v22323_v25 = vld [vmem:[#allocation121_spill] sm:$0xff]  ;;  %v22324_v29 = vld [vmem:[#allocation122_spill] sm:$0xff] }
 0x29c   : > { %15404 = vmatpush3.bf16.msra.mxu0 %v15401_v34  ;;  %13580 = vmatprep.mubr.f32.mxu0 %v22302_v8  ;;  %v15421_v34 = vpack.c.bf16 %v3335_v11, %v3334_v12  ;;  %v22320_v8 = vld [vmem:[#allocation118_spill] sm:$0xff]  ;;  %v3885_v12 = vld [vmem:[#allocation5 + $0x28] sm:$0xff]  ;;  %v3886_v11 = vld [vmem:[#allocation5 + $0x30] sm:$0xff] }
 0x29d   : > { %15406 = vmatprep.subr.bf16.mxu0 %v15405_v27  ;;  %15446 = vmatprep.subr.bf16.mxu1 %v15445_v36  ;;  %v15477_v23 = vpack.c.bf16 %v3887_v21, %v3886_v11 }
 0x29f   : > { %13581 = vmatmul.mubr.f32.gmra.mrb[2].mxu0 %v22303_v44  ;;  %15448 = vmatpush3.bf16.msra.mxu1 %v15445_v36  ;;  %v3909_v44 = vld [vmem:[#allocation5 + $0xe0] sm:$0xff]  ;;  %v3912_v36 = vld [vmem:[#allocation5 + $0xf8] sm:$0xff] }
 0x2a0   : > { %13583 = vmatprep.mubr.f32.mxu0 %v22304_v33  ;;  %15408 = vmatpush3.bf16.msra.mxu0 %v15405_v27  ;;  %v22313_v27 = vld [vmem:[#allocation111_spill] sm:$0xff]  ;;  %v3910_v33 = vld [vmem:[#allocation5 + $0xe8] sm:$0xff]  ;;  %v15461_v49 = vpack.c.bf16 %v3912_v36, %v3911_v54 }
 0x2a1   : > { %15410 = vmatprep.subr.bf16.mxu0 %v15409_v1  ;;  %15450 = vmatprep.subr.bf16.mxu1 %v15449_v14 }
 0x2a3   : > { %13584 = vmatmul.mubr.f32.gmra.mrb[4].mxu0 %v22305_v3  ;;  %15452 = vmatpush3.bf16.msra.mxu1 %v15449_v14  ;;  %v3883_v3 = vld [vmem:[#allocation5 + $0x18] sm:$0xff] }
 0x2a4   : > { %13586 = vmatprep.mubr.f32.mxu0 %v22306_v5  ;;  %15412 = vmatpush3.bf16.msra.mxu0 %v15409_v1  ;;  %v22321_v1 = vld [vmem:[#allocation119_spill] sm:$0xff] }
 0x2a5   : > { %15414 = vmatprep.subr.bf16.mxu0 %v15413_v63  ;;  %15454 = vmatprep.subr.bf16.mxu1 %v15453_v31 }
 0x2a7   : > { %13587 = vmatmul.mubr.f32.gmra.mrb[6].mxu0 %v22307_v42  ;;  %15456 = vmatpush3.bf16.msra.mxu1 %v15453_v31  ;;  %v3888_v42 = vld [vmem:[#allocation5 + $0x40] sm:$0xff] }
 0x2a8   : > { %13589 = vmatprep.mubr.f32.mxu0 %v18757_v40  ;;  %15416 = vmatpush3.bf16.msra.mxu0 %v15413_v63  ;;  %v22308_v40 = vld [vmem:[#allocation106_spill] sm:$0xff]  ;;  %v15457_v63 = vpack.c.bf16 %v3910_v33, %v3909_v44 }
 0x2a9   : > { %15418 = vmatprep.subr.bf16.mxu0 %v15417_v19 }
 0x2aa   : > { %15458 = vmatprep.subr.bf16.mxu1 %v15457_v63 }
 0x2ab   : > { %13590 = vmatmul.mubr.f32.gmra.mrb[8].mxu0 %v18760_v20  ;;  %v22310_v20 = vld [vmem:[#allocation108_spill] sm:$0xff]  ;;  %15460 = vmatpush3.bf16.msra.mxu1 %v15457_v63 }
 0x2ac   : > { %13592 = vmatprep.mubr.f32.mxu0 %v18763_v51  ;;  %15420 = vmatpush3.bf16.msra.mxu0 %v15417_v19  ;;  %v22311_v51 = vld [vmem:[#allocation109_spill] sm:$0xff]  ;;  %v3884_v19 = vld [vmem:[#allocation5 + $0x20] sm:$0xff] }
 0x2ad   : > { %15422 = vmatprep.subr.bf16.mxu0 %v15421_v34  ;;  %15462 = vmatprep.subr.bf16.mxu1 %v15461_v49  ;;  %v15473_v14 = vpack.c.bf16 %v3885_v12, %v3884_v19 }
 0x2af   : > { %13593 = vmatmul.mubr.f32.gmra.mrb[10].mxu0 %v18766_v56  ;;  %v22314_v56 = vld [vmem:[#allocation112_spill] sm:$0xff]  ;;  %15464 = vmatpush3.bf16.msra.mxu1 %v15461_v49 }
 0x2b0   : > { %13595 = vmatprep.mubr.f32.mxu0 %v22308_v40  ;;  %15424 = vmatpush3.bf16.msra.mxu0 %v15421_v34  ;;  %v3889_v34 = vld [vmem:[#allocation5 + $0x48] sm:$0xff]  ;;  %v15489_v40 = vpack.c.bf16 %v3893_v15, %v3892_v6 }
 0x2b1   : > { %15426 = vmatprep.subr.bf16.mxu0 %v15425_v52  ;;  %v15481_v31 = vpack.c.bf16 %v3889_v34, %v3888_v42 }
 0x2b2   : > { %13738 = vmatmul.mubr.f32.vlgmr.msra.gmra.mrb[0].mxu1 %v17437_v48 }
 0x2b3   : > { %13596 = vmatmul.mubr.f32.gmra.mrb[12].mxu0 %v22309_v22  ;;  %v3895_v22 = vld [vmem:[#allocation5 + $0x78] sm:$0xff] }
 0x2b4   : > { %13598 = vmatprep.mubr.f32.mxu0 %v22310_v20  ;;  %15428 = vmatpush3.bf16.msra.mxu0 %v15425_v52  ;;  %v15485_v52 = vpack.c.bf16 %v3891_v45, %v3890_v53 }
 0x2b5   : > { %15430 = vmatprep.subr.bf16.mxu0 %v15429_v16 }
 0x2b7   : > { %13599 = vmatmul.mubr.f32.gmra.mrb[14].mxu0 %v22311_v51  ;;  %v4364_v51 = vld [vmem:[#allocation5 + $0x100] sm:$0xff] }
 0x2b8   : > { %13601 = vmatprep.mubr.f32.mxu0 %v22312_v26  ;;  %15432 = vmatpush3.bf16.msra.mxu0 %v15429_v16  ;;  %v3894_v16 = vld [vmem:[#allocation5 + $0x70] sm:$0xff]  ;;  %v4365_v26 = vld [vmem:[#allocation5 + $0x108] sm:$0xff] }
 0x2b9   : > { %v15493_v20 = vpack.c.bf16 %v3895_v22, %v3894_v16 }
 0x2bb   : > { %13602 = vmatmul.mubr.f32.gmra.mrb[16].mxu0 %v22313_v27  ;;  %v18955_v27 = vpack.c.bf16 %v4365_v26, %v4364_v51 }
 0x2bc   : > { %13604 = vmatprep.mubr.f32.mxu0 %v22314_v56  ;;  %v18961_v56 = vld [vmem:[%s21813_s2] ss:$0 sm:$0xff] }
 0x2bf   : > { %13605 = vmatmul.mubr.f32.gmra.mrb[18].mxu0 %v22315_v24 }
 0x2c0   : > { %13607 = vmatprep.mubr.f32.mxu0 %v22316_v43 }
 0x2c3   : > { %13608 = vmatmul.mubr.f32.gmra.mrb[20].mxu0 %v22317_v32 }
 0x2c4   : > { %13610 = vmatprep.mubr.f32.mxu0 %v22318_v37 }
 0x2c7   : > { %13611 = vmatmul.mubr.f32.gmra.mrb[22].mxu0 %v22319_v7 }
 0x2c8   : > { %13613 = vmatprep.mubr.f32.mxu0 %v22320_v8 }
 0x2cb   : > { %13614 = vmatmul.mubr.f32.gmra.mrb[24].mxu0 %v22321_v1 }
 0x2cc   : > { %13616 = vmatprep.mubr.f32.mxu0 %v22322_v39 }
 0x2cf   : > { %13617 = vmatmul.mubr.f32.gmra.mrb[26].mxu0 %v22323_v25 }
 0x2d0   : > { %13619 = vmatprep.mubr.f32.mxu0 %v22324_v29 }
 0x2d3   : > { %13620 = vmatmul.mubr.f32.gmra.mrb[28].mxu0 %v22325_v0 }
 0x2d4   : > { %13622 = vmatprep.mubr.f32.mxu0 %v17437_v48 }
 0x2d7   : > { %13623 = vmatmul.mubr.f32.gmra.mrb[30].mxu0 %v17437_v48 }
 0x2d8   : > { %13657 = vmatprep.mubr.f32.mxu0 %v18511_v17  ;;  %v22326_v17 = vld [vmem:[#allocation69_spill] sm:$0xff] }
 0x2db   : > { %13658 = vmatmul.mubr.f32.vlgmr.msra.gmra.mrb[0].mxu0 %v18520_v59  ;;  %v22327_v59 = vld [vmem:[#allocation70_spill] sm:$0xff] }
 0x2dc   : > { %13660 = vmatprep.mubr.f32.mxu0 %v18523_v41  ;;  %v22328_v41 = vld [vmem:[#allocation73_spill] sm:$0xff] }
 0x2df   : > { %13661 = vmatmul.mubr.f32.gmra.mrb[2].mxu0 %v18532_v28  ;;  %v22329_v28 = vld [vmem:[#allocation74_spill] sm:$0xff] }
 0x2e0   : > { %13663 = vmatprep.mubr.f32.mxu0 %v18535_v57  ;;  %v22330_v57 = vld [vmem:[#allocation77_spill] sm:$0xff] }
 0x2e3   : > { %13664 = vmatmul.mubr.f32.gmra.mrb[4].mxu0 %v18544_v18  ;;  %v22331_v18 = vld [vmem:[#allocation78_spill] sm:$0xff] }
 0x2e4   : > { %13666 = vmatprep.mubr.f32.mxu0 %v18547_v58  ;;  %v22332_v58 = vld [vmem:[#allocation81_spill] sm:$0xff] }
 0x2e7   : > { %13667 = vmatmul.mubr.f32.gmra.mrb[6].mxu0 %v18556_v60  ;;  %v22333_v60 = vld [vmem:[#allocation82_spill] sm:$0xff] }
 0x2e8   : > { %13669 = vmatprep.mubr.f32.mxu0 %v18559_v62  ;;  %v22334_v62 = vld [vmem:[#allocation85_spill] sm:$0xff] }
 0x2eb   : > { %13670 = vmatmul.mubr.f32.gmra.mrb[8].mxu0 %v18568_v35  ;;  %v22335_v35 = vld [vmem:[#allocation86_spill] sm:$0xff] }
 0x2ec   : > { %13672 = vmatprep.mubr.f32.mxu0 %v18571_v47  ;;  %v22336_v47 = vld [vmem:[#allocation89_spill] sm:$0xff] }
 0x2ef   : > { %13673 = vmatmul.mubr.f32.gmra.mrb[10].mxu0 %v18580_v30  ;;  %v22337_v30 = vld [vmem:[#allocation90_spill] sm:$0xff] }
 0x2f0   : > { %13675 = vmatprep.mubr.f32.mxu0 %v18583_v9  ;;  %v22338_v9 = vld [vmem:[#allocation124_spill] sm:$0xff] }
 0x2f3   : > { %13676 = vmatmul.mubr.f32.gmra.mrb[12].mxu0 %v18594_v46  ;;  %v22339_v46 = vld [vmem:[#allocation99_spill] sm:$0xff] }
 0x2f4   : > { %13678 = vmatprep.mubr.f32.mxu0 %v18597_v61  ;;  %v22340_v61 = vld [vmem:[#allocation98_spill] sm:$0xff] }
 0x2f7   : > { %13679 = vmatmul.mubr.f32.gmra.mrb[14].mxu0 %v22326_v17 }
 0x2f8   : > { %13681 = vmatprep.mubr.f32.mxu0 %v22327_v59 }
 0x2fb   : > { %13682 = vmatmul.mubr.f32.gmra.mrb[16].mxu0 %v22328_v41 }
 0x2fc   : > { %13684 = vmatprep.mubr.f32.mxu0 %v22329_v28 }
 0x2ff   : > { %13685 = vmatmul.mubr.f32.gmra.mrb[18].mxu0 %v22330_v57 }
 0x300   : > { %13687 = vmatprep.mubr.f32.mxu0 %v22331_v18 }
 0x303   : > { %13688 = vmatmul.mubr.f32.gmra.mrb[20].mxu0 %v22332_v58 }
 0x304   : > { %13690 = vmatprep.mubr.f32.mxu0 %v22333_v60 }
 0x307   : > { %13691 = vmatmul.mubr.f32.gmra.mrb[22].mxu0 %v22334_v62 }
 0x308   : > { %13693 = vmatprep.mubr.f32.mxu0 %v22335_v35 }
 0x30b   : > { %13694 = vmatmul.mubr.f32.gmra.mrb[24].mxu0 %v22336_v47 }
 0x30c   : > { %13696 = vmatprep.mubr.f32.mxu0 %v22337_v30 }
 0x30f   : > { %13697 = vmatmul.mubr.f32.gmra.mrb[26].mxu0 %v22298_v38  ;;  %v3880_v38 = vld [vmem:[#allocation5] sm:$0xff] }
 0x310   : > { %13699 = vmatprep.mubr.f32.mxu0 %v22338_v9  ;;  %v15465_v13 = vpack.c.bf16 %v3881_v55, %v3880_v38 }
 0x312   : > { %15466 = vmatprep.subr.bf16.mxu1 %v15465_v13 }
 0x313   : > { %13700 = vmatmul.mubr.f32.gmra.mrb[28].mxu0 %v18858_v2  ;;  %15468 = vmatpush3.bf16.msra.mxu1 %v15465_v13  ;;  %v3882_v2 = vld [vmem:[#allocation5 + $0x10] sm:$0xff] }
 0x314   : > { %13702 = vmatprep.mubr.f32.mxu0 %v22339_v46  ;;  %v15469_v5 = vpack.c.bf16 %v3883_v3, %v3882_v2 }
 0x316   : > { %15470 = vmatprep.subr.bf16.mxu1 %v15469_v5 }
 0x317   : > { %13703 = vmatmul.mubr.f32.gmra.mrb[30].mxu0 %v22340_v61  ;;  %15472 = vmatpush3.bf16.msra.mxu1 %v15469_v5 }
 0x318   : > { %14457 = vmatprep.mubr.f32.mxu0 %v17437_v48  ;;  %15474 = vmatprep.subr.bf16.mxu1 %v15473_v14 }
 0x31b   : > { %15476 = vmatpush3.bf16.msra.mxu1 %v15473_v14 }
 0x31c   : > { %15478 = vmatprep.subr.bf16.mxu1 %v15477_v23 }
 0x31f   : > { %15480 = vmatpush3.bf16.msra.mxu1 %v15477_v23 }
 0x320   : > { %15482 = vmatprep.subr.bf16.mxu1 %v15481_v31 }
 0x323   : > { %15484 = vmatpush3.bf16.msra.mxu1 %v15481_v31 }
 0x324   : > { %15486 = vmatprep.subr.bf16.mxu1 %v15485_v52 }
 0x327   : > { %15488 = vmatpush3.bf16.msra.mxu1 %v15485_v52 }
 0x328   : > { %15490 = vmatprep.subr.bf16.mxu1 %v15489_v40 }
 0x32b   : > { %15492 = vmatpush3.bf16.msra.mxu1 %v15489_v40 }
 0x32c   : > { %15494 = vmatprep.subr.bf16.mxu1 %v15493_v20 }
 0x32f   : > { %15496 = vmatpush3.bf16.msra.mxu1 %v15493_v20 }
 0x330   : > { %15498 = vmatprep.subr.bf16.mxu1 %v18955_v27 }
 0x3ae   : > { %v13659_v24 = vpop.f32.mrb[0].mxu0 }
 0x3af   : > { %v3605_v43 = vadd.f32 %v13659_v24, %v18961_v56  ;;  %v3406_v32 = vpop.f32.mrb[1].mxu0 }
 0x3b0   : > { %v3604_v37 = vadd.f32 %v18961_v56, %v3406_v32 }
 0x3b1   : > { %v18965_v7 = vmax.f32 %v3605_v43, 0.0 }
 0x3b2   : > { %v18967_v8 = vmax.f32 %v3604_v37, 0.0  ;;  %v13662_v1 = vpop.f32.mrb[2].mxu0 }
 0x3b3   : > { %3669 = vst [vmem:[#allocation2 + $0x20] sm:$0xff] %v18965_v7  ;;  %v3607_v39 = vadd.f32 %v13662_v1, %v18961_v56  ;;  %v3416_v25 = vpop.f32.mrb[3].mxu0 }
 0x3b4   : > { %3668 = vst [vmem:[#allocation2 + $0x18] sm:$0xff] %v18967_v8  ;;  %v3606_v29 = vadd.f32 %v18961_v56, %v3416_v25  ;;  %13740 = vmatprep.mubr.f32.mxu1 %v18967_v8 }
 0x3b5   : > { %v18974_v0 = vmax.f32 %v3607_v39, 0.0  ;;  %13741 = vmatmul.mubr.f32.gmra.mrb[2].mxu1 %v18965_v7 }
 0x3b6   : > { %v18977_v48 = vmax.f32 %v3606_v29, 0.0  ;;  %v13665_v17 = vpop.f32.mrb[4].mxu0 }
 0x3b7   : > { %3671 = vst [vmem:[#allocation2 + $0x30] sm:$0xff] %v18974_v0  ;;  %v3609_v59 = vadd.f32 %v13665_v17, %v18961_v56  ;;  %v3426_v41 = vpop.f32.mrb[5].mxu0 }
 0x3b8   : > { %3670 = vst [vmem:[#allocation2 + $0x28] sm:$0xff] %v18977_v48  ;;  %v3608_v28 = vadd.f32 %v18961_v56, %v3426_v41  ;;  %13743 = vmatprep.mubr.f32.mxu1 %v18977_v48 }
 0x3b9   : > { %v18984_v57 = vmax.f32 %v3609_v59, 0.0  ;;  %13744 = vmatmul.mubr.f32.gmra.mrb[4].mxu1 %v18974_v0 }
 0x3ba   : > { %v18987_v18 = vmax.f32 %v3608_v28, 0.0  ;;  %v13668_v58 = vpop.f32.mrb[6].mxu0 }
 0x3bb   : > { %3673 = vst [vmem:[#allocation2 + $0x40] sm:$0xff] %v18984_v57  ;;  %v3611_v60 = vadd.f32 %v13668_v58, %v18961_v56  ;;  %v3436_v62 = vpop.f32.mrb[7].mxu0 }
 0x3bc   : > { %3672 = vst [vmem:[#allocation2 + $0x38] sm:$0xff] %v18987_v18  ;;  %v3610_v35 = vadd.f32 %v18961_v56, %v3436_v62  ;;  %13746 = vmatprep.mubr.f32.mxu1 %v18987_v18 }
 0x3bd   : > { %v18994_v47 = vmax.f32 %v3611_v60, 0.0  ;;  %13747 = vmatmul.mubr.f32.gmra.mrb[6].mxu1 %v18984_v57 }
 0x3be   : > { %v18997_v30 = vmax.f32 %v3610_v35, 0.0  ;;  %v13671_v9 = vpop.f32.mrb[8].mxu0 }
 0x3bf   : > { %3675 = vst [vmem:[#allocation2 + $0x50] sm:$0xff] %v18994_v47  ;;  %v3613_v44 = vadd.f32 %v13671_v9, %v18961_v56  ;;  %v3446_v33 = vpop.f32.mrb[9].mxu0 }
 0x3c0   : > { %3674 = vst [vmem:[#allocation2 + $0x48] sm:$0xff] %v18997_v30  ;;  %v3612_v63 = vadd.f32 %v18961_v56, %v3446_v33  ;;  %13749 = vmatprep.mubr.f32.mxu1 %v18997_v30 }
 0x3c1   : > { %v19004_v54 = vmax.f32 %v3613_v44, 0.0  ;;  %13750 = vmatmul.mubr.f32.gmra.mrb[8].mxu1 %v18994_v47 }
 0x3c2   : > { %v19007_v36 = vmax.f32 %v3612_v63, 0.0  ;;  %v13674_v49 = vpop.f32.mrb[10].mxu0 }
 0x3c3   : > { %3677 = vst [vmem:[#allocation2 + $0x60] sm:$0xff] %v19004_v54  ;;  %v3615_v38 = vadd.f32 %v13674_v49, %v18961_v56  ;;  %v3456_v55 = vpop.f32.mrb[11].mxu0 }
 0x3c4   : > { %3676 = vst [vmem:[#allocation2 + $0x58] sm:$0xff] %v19007_v36  ;;  %v3614_v13 = vadd.f32 %v18961_v56, %v3456_v55  ;;  %13752 = vmatprep.mubr.f32.mxu1 %v19007_v36 }
 0x3c5   : > { %v19014_v2 = vmax.f32 %v3615_v38, 0.0  ;;  %13753 = vmatmul.mubr.f32.gmra.mrb[10].mxu1 %v19004_v54 }
 0x3c6   : > { %v19017_v3 = vmax.f32 %v3614_v13, 0.0  ;;  %v13677_v5 = vpop.f32.mrb[12].mxu0 }
 0x3c7   : > { %3679 = vst [vmem:[#allocation2 + $0x70] sm:$0xff] %v19014_v2  ;;  %v3617_v19 = vadd.f32 %v13677_v5, %v18961_v56  ;;  %v3466_v12 = vpop.f32.mrb[13].mxu0 }
 0x3c8   : > { %3678 = vst [vmem:[#allocation2 + $0x68] sm:$0xff] %v19017_v3  ;;  %v3616_v14 = vadd.f32 %v18961_v56, %v3466_v12  ;;  %13755 = vmatprep.mubr.f32.mxu1 %v19017_v3 }
 0x3c9   : > { %v19024_v11 = vmax.f32 %v3617_v19, 0.0  ;;  %13756 = vmatmul.mubr.f32.gmra.mrb[12].mxu1 %v19014_v2 }
 0x3ca   : > { %v19027_v21 = vmax.f32 %v3616_v14, 0.0  ;;  %v13680_v23 = vpop.f32.mrb[14].mxu0 }
 0x3cb   : > { %3681 = vst [vmem:[#allocation2 + $0x80] sm:$0xff] %v19024_v11  ;;  %v3619_v42 = vadd.f32 %v13680_v23, %v18961_v56  ;;  %v3476_v34 = vpop.f32.mrb[15].mxu0 }
 0x3cc   : > { %3680 = vst [vmem:[#allocation2 + $0x78] sm:$0xff] %v19027_v21  ;;  %v3618_v31 = vadd.f32 %v18961_v56, %v3476_v34  ;;  %13758 = vmatprep.mubr.f32.mxu1 %v19027_v21 }
 0x3cd   : > { %v19034_v53 = vmax.f32 %v3619_v42, 0.0  ;;  %13759 = vmatmul.mubr.f32.gmra.mrb[14].mxu1 %v19024_v11 }
 0x3ce   : > { %v19037_v45 = vmax.f32 %v3618_v31, 0.0  ;;  %v13683_v52 = vpop.f32.mrb[16].mxu0 }
 0x3cf   : > { %3683 = vst [vmem:[#allocation2 + $0x90] sm:$0xff] %v19034_v53  ;;  %v3621_v6 = vadd.f32 %v13683_v52, %v18961_v56  ;;  %v3486_v15 = vpop.f32.mrb[17].mxu0 }
 0x3d0   : > { %3682 = vst [vmem:[#allocation2 + $0x88] sm:$0xff] %v19037_v45  ;;  %v3620_v40 = vadd.f32 %v18961_v56, %v3486_v15  ;;  %13761 = vmatprep.mubr.f32.mxu1 %v19037_v45 }
 0x3d1   : > { %v19044_v16 = vmax.f32 %v3621_v6, 0.0  ;;  %13762 = vmatmul.mubr.f32.gmra.mrb[16].mxu1 %v19034_v53 }
 0x3d2   : > { %v19047_v22 = vmax.f32 %v3620_v40, 0.0  ;;  %v13686_v20 = vpop.f32.mrb[18].mxu0 }
 0x3d3   : > { %22341 = vst [vmem:[#allocation93_spill] sm:$0xff] %v19044_v16  ;;  %3685 = vst [vmem:[#allocation2 + $0xa0] sm:$0xff] %v19044_v16  ;;  %v3623_v51 = vadd.f32 %v13686_v20, %v18961_v56  ;;  %v3496_v26 = vpop.f32.mrb[19].mxu0 }
 0x3d4   : > { %22342 = vst [vmem:[#allocation100_spill] sm:$0xff] %v19047_v22  ;;  %3684 = vst [vmem:[#allocation2 + $0x98] sm:$0xff] %v19047_v22  ;;  %v3622_v24 = vadd.f32 %v18961_v56, %v3496_v26  ;;  %13764 = vmatprep.mubr.f32.mxu1 %v19047_v22  ;;  %v4367_v26 = vld [vmem:[#allocation5 + $0x118] sm:$0xff]  ;;  %v22394_v22 = vld [vmem:[#allocation52_spill] sm:$0xff] }
 0x3d5   : > { %v19054_v43 = vmax.f32 %v3623_v51, 0.0  ;;  %13765 = vmatmul.mubr.f32.gmra.mrb[18].mxu1 %v19044_v16  ;;  %v4366_v51 = vld [vmem:[#allocation5 + $0x110] sm:$0xff] }
 0x3d6   : > { %v19057_v32 = vmax.f32 %v3622_v24, 0.0  ;;  %v13689_v37 = vpop.f32.mrb[20].mxu0 }
 0x3d7   : > { %22343 = vst [vmem:[#allocation101_spill] sm:$0xff] %v19054_v43  ;;  %3687 = vst [vmem:[#allocation2 + $0xb0] sm:$0xff] %v19054_v43  ;;  %v3625_v1 = vadd.f32 %v13689_v37, %v18961_v56  ;;  %v3506_v39 = vpop.f32.mrb[21].mxu0  ;;  %v3738_v37 = vld [vmem:[#allocation2 + $0x17] sm:$0xff] }
 0x3d8   : > { %22344 = vst [vmem:[#allocation102_spill] sm:$0xff] %v19057_v32  ;;  %3686 = vst [vmem:[#allocation2 + $0xa8] sm:$0xff] %v19057_v32  ;;  %v3624_v25 = vadd.f32 %v18961_v56, %v3506_v39  ;;  %13767 = vmatprep.mubr.f32.mxu1 %v19057_v32  ;;  %v22357_v39 = vld [vmem:[#allocation16_spill] sm:$0xff] }
 0x3d9   : > { %v19064_v29 = vmax.f32 %v3625_v1, 0.0  ;;  %13768 = vmatmul.mubr.f32.gmra.mrb[20].mxu1 %v19054_v43  ;;  %v4642_v43 = vld [vmem:[#allocation5 + $0x1a0] sm:$0xff]  ;;  %v4643_v32 = vld [vmem:[#allocation5 + $0x1a8] sm:$0xff] }
 0x3da   : > { %v19067_v17 = vmax.f32 %v3624_v25, 0.0  ;;  %v13692_v59 = vpop.f32.mrb[22].mxu0  ;;  %v15501_v25 = vpack.c.bf16 %v4367_v26, %v4366_v51  ;;  %v3743_v26 = vld [vmem:[#allocation2 + $0x3f] sm:$0xff] }
 0x3db   : > { %22345 = vst [vmem:[#allocation103_spill] sm:$0xff] %v19064_v29  ;;  %3689 = vst [vmem:[#allocation2 + $0xc0] sm:$0xff] %v19064_v29  ;;  %v3627_v41 = vadd.f32 %v13692_v59, %v18961_v56  ;;  %v3516_v28 = vpop.f32.mrb[23].mxu0 }
 0x3dc   : > { %22346 = vst [vmem:[#allocation104_spill] sm:$0xff] %v19067_v17  ;;  %3688 = vst [vmem:[#allocation2 + $0xb8] sm:$0xff] %v19067_v17  ;;  %v3626_v58 = vadd.f32 %v18961_v56, %v3516_v28  ;;  %13770 = vmatprep.mubr.f32.mxu1 %v19067_v17  ;;  %v4368_v28 = vld [vmem:[#allocation5 + $0x120] sm:$0xff]  ;;  %v3811_v17 = vld [vmem:[#allocation2 + $0x21] sm:$0xff] }
 0x3dd   : > { %v19074_v60 = vmax.f32 %v3627_v41, 0.0  ;;  %13771 = vmatmul.mubr.f32.gmra.mrb[22].mxu1 %v19064_v29  ;;  %v3739_v41 = vld [vmem:[#allocation2 + $0x1f] sm:$0xff] }
 0x3de   : > { %v19077_v62 = vmax.f32 %v3626_v58, 0.0  ;;  %v13695_v35 = vpop.f32.mrb[24].mxu0  ;;  %v4369_v58 = vld [vmem:[#allocation5 + $0x128] sm:$0xff] }
 0x3df   : > { %22347 = vst [vmem:[#allocation105_spill] sm:$0xff] %v19074_v60  ;;  %3691 = vst [vmem:[#allocation2 + $0xd0] sm:$0xff] %v19074_v60  ;;  %v3629_v9 = vadd.f32 %v13695_v35, %v18961_v56  ;;  %v3526_v44 = vpop.f32.mrb[25].mxu0  ;;  %v22359_v35 = vld [vmem:[#allocation18_spill] sm:$0xff] }
 0x3e0   : > { %22348 = vst [vmem:[#allocation106_spill] sm:$0xff] %v19077_v62  ;;  %3690 = vst [vmem:[#allocation2 + $0xc8] sm:$0xff] %v19077_v62  ;;  %v3628_v33 = vadd.f32 %v18961_v56, %v3526_v44  ;;  %13773 = vmatprep.mubr.f32.mxu1 %v19077_v62  ;;  %v22360_v44 = vld [vmem:[#allocation17_spill] sm:$0xff]  ;;  %v22389_v62 = vld [vmem:[#allocation48_spill] sm:$0xff] }
 0x3e1   : > { %v19084_v63 = vmax.f32 %v3629_v9, 0.0  ;;  %13774 = vmatmul.mubr.f32.gmra.mrb[24].mxu1 %v19074_v60  ;;  %v3740_v9 = vld [vmem:[#allocation2 + $0x27] sm:$0xff]  ;;  %v3810_v60 = vld [vmem:[#allocation2 + $0x19] sm:$0xff] }
 0x3e2   : > { %v19087_v49 = vmax.f32 %v3628_v33, 0.0  ;;  %v13698_v38 = vpop.f32.mrb[26].mxu0  ;;  %v19133_v33 = vmul.f32 %v3739_v41, %v22360_v44  ;;  %v4373_v41 = vld [vmem:[#allocation5 + $0x148] sm:$0xff] }
 0x3e3   : > { %22349 = vst [vmem:[#allocation107_spill] sm:$0xff] %v19084_v63  ;;  %3693 = vst [vmem:[#allocation2 + $0xe0] sm:$0xff] %v19084_v63  ;;  %v3631_v55 = vadd.f32 %v13698_v38, %v18961_v56  ;;  %v3536_v13 = vpop.f32.mrb[27].mxu0  ;;  %v15505_v38 = vpack.c.bf16 %v4369_v58, %v4368_v28  ;;  %v3744_v28 = vld [vmem:[#allocation2 + $0x47] sm:$0xff]  ;;  %v3759_v50 = vld [vmem:[#allocation2 + $0xbf] sm:$0xff] }
 0x3e4   : > { %22350 = vst [vmem:[#allocation108_spill] sm:$0xff] %v19087_v49  ;;  %3692 = vst [vmem:[#allocation2 + $0xd8] sm:$0xff] %v19087_v49  ;;  %v3630_v5 = vadd.f32 %v18961_v56, %v3536_v13  ;;  %13776 = vmatprep.mubr.f32.mxu1 %v19087_v49  ;;  %v22364_v58 = vld [vmem:[#allocation21_spill] sm:$0xff]  ;;  %v4641_v49 = vld [vmem:[#allocation5 + $0x198] sm:$0xff] }
 0x3e5   : > { %v19094_v19 = vmax.f32 %v3631_v55, 0.0  ;;  %13777 = vmatmul.mubr.f32.gmra.mrb[26].mxu1 %v19084_v63  ;;  %v22361_v55 = vld [vmem:[#allocation20_spill] sm:$0xff] }
 0x3e6   : > { %v19097_v12 = vmax.f32 %v3630_v5, 0.0  ;;  %v13701_v14 = vpop.f32.mrb[28].mxu0  ;;  %v19136_v13 = vmul.f32 %v3740_v9, %v22361_v55  ;;  %v3741_v5 = vld [vmem:[#allocation2 + $0x2f] sm:$0xff]  ;;  %v19149_v9 = vmul.f32 %v3743_v26, %v22364_v58  ;;  %v22368_v55 = vld [vmem:[#allocation25_spill] sm:$0xff] }
 0x3e7   : > { %22351 = vst [vmem:[#allocation109_spill] sm:$0xff] %v19094_v19  ;;  %3695 = vst [vmem:[#allocation2 + $0xf0] sm:$0xff] %v19094_v19  ;;  %v3633_v23 = vadd.f32 %v13701_v14, %v18961_v56  ;;  %v3546_v42 = vpop.f32.mrb[29].mxu0  ;;  %v4370_v14 = vld [vmem:[#allocation5 + $0x130] sm:$0xff]  ;;  %v22367_v26 = vld [vmem:[#allocation26_spill] sm:$0xff] }
 0x3e8   : > { %22352 = vst [vmem:[#allocation110_spill] sm:$0xff] %v19097_v12  ;;  %3694 = vst [vmem:[#allocation2 + $0xe8] sm:$0xff] %v19097_v12  ;;  %v3632_v34 = vadd.f32 %v18961_v56, %v3546_v42  ;;  %13779 = vmatprep.mubr.f32.mxu1 %v19097_v12  ;;  %v3742_v42 = vld [vmem:[#allocation2 + $0x37] sm:$0xff] }
 0x3e9   : > { %v19104_v31 = vmax.f32 %v3633_v23, 0.0  ;;  %13780 = vmatmul.mubr.f32.gmra.mrb[28].mxu1 %v19094_v19  ;;  %v4371_v23 = vld [vmem:[#allocation5 + $0x138] sm:$0xff] }
 0x3ea   : > { %v19107_v52 = vmax.f32 %v3632_v34, 0.0  ;;  %v13704_v6 = vpop.f32.mrb[30].mxu0 }
 0x3eb   : > { %22353 = vst [vmem:[#allocation111_spill] sm:$0xff] %v19104_v31  ;;  %3697 = vst [vmem:[#allocation2 + $0x100] sm:$0xff] %v19104_v31  ;;  %v19111_v15 = vadd.f32 %v13704_v6, %v18961_v56  ;;  %v3556_v40 = vpop.f32.mrb[31].mxu0  ;;  %v15509_v6 = vpack.c.bf16 %v4371_v23, %v4370_v14  ;;  %v3745_v14 = vld [vmem:[#allocation2 + $0x4f] sm:$0xff]  ;;  %v4374_v23 = vld [vmem:[#allocation5 + $0x150] sm:$0xff] }
 0x3ec   : > { %22354 = vst [vmem:[#allocation112_spill] sm:$0xff] %v19107_v52  ;;  %3696 = vst [vmem:[#allocation2 + $0xf8] sm:$0xff] %v19107_v52  ;;  %v19115_v20 = vadd.f32 %v18961_v56, %v3556_v40  ;;  %13782 = vmatprep.mubr.f32.mxu1 %v19107_v52  ;;  %v22358_v56 = vld [vmem:[#allocation15_spill] sm:$0xff]  ;;  %v22363_v40 = vld [vmem:[#allocation22_spill] sm:$0xff] }
 0x3ed   : > { %22355 = vst [vmem:[#allocation113_spill] sm:$0xff] %v19111_v15  ;;  %v22020_v24 = vmax.f32 %v19111_v15, 0.0  ;;  %13783 = vmatmul.mubr.f32.gmra.mrb[30].mxu1 %v19104_v31  ;;  %v19127_v59 = vmul.f32 %v3738_v37, %v22358_v56  ;;  %v19144_v51 = vmul.f32 %v3742_v42, %v22363_v40  ;;  %v4372_v37 = vld [vmem:[#allocation5 + $0x140] sm:$0xff]  ;;  %v4375_v42 = vld [vmem:[#allocation5 + $0x158] sm:$0xff]  ;;  %v3763_v31 = vld [vmem:[#allocation2 + $0xdf] sm:$0xff] }
 0x3ee   : > { %22356 = vst [vmem:[#allocation114_spill] sm:$0xff] %v19115_v20  ;;  %v22021_v1 = vmax.f32 %v19115_v20, 0.0  ;;  %13817 = vmatprep.mubr.f32.mxu1 %v22357_v39  ;;  %v22366_v40 = vld [vmem:[#allocation23_spill] sm:$0xff]  ;;  %v22372_v39 = vld [vmem:[#allocation29_spill] sm:$0xff] }
 0x3ef   : > { %3699 = vst [vmem:[#allocation2 + $0x110] sm:$0xff] %v22020_v24  ;;  %v3761_v15 = vld [vmem:[#allocation2 + $0xcf] sm:$0xff] }
 0x3f0   : > { %3698 = vst [vmem:[#allocation2 + $0x108] sm:$0xff] %v22021_v1  ;;  %v3746_v1 = vld [vmem:[#allocation2 + $0x57] sm:$0xff]  ;;  %v3765_v19 = vld [vmem:[#allocation2 + $0xef] sm:$0xff] }
 0x3f1   : > { %13818 = vmatmul.mubr.f32.vlgmr.msra.gmra.mrb[0].mxu1 %v22359_v35  ;;  %v19160_v58 = vmul.f32 %v3746_v1, %v22367_v26  ;;  %v4378_v1 = vld [vmem:[#allocation5 + $0x170] sm:$0xff]  ;;  %v3750_v26 = vld [vmem:[#allocation2 + $0x77] sm:$0xff] }
 0x3f2   : > { %15500 = vmatpush3.bf16.msra.mxu1 %v18955_v27  ;;  %13820 = vmatprep.mubr.f32.mxu1 %v19127_v59  ;;  %v22362_v27 = vld [vmem:[#allocation19_spill] sm:$0xff] }
 0x3f3   : > { %15502 = vmatprep.subr.bf16.mxu1 %v15501_v25  ;;  %v19141_v34 = vmul.f32 %v3741_v5, %v22362_v27  ;;  %v22365_v5 = vld [vmem:[#allocation24_spill] sm:$0xff]  ;;  %v19157_v27 = vmul.f32 %v3745_v14, %v22366_v40  ;;  %v22370_v35 = vld [vmem:[#allocation27_spill] sm:$0xff] }
 0x3f4   : > { %v19152_v24 = vmul.f32 %v3744_v28, %v22365_v5  ;;  %v4377_v28 = vld [vmem:[#allocation5 + $0x168] sm:$0xff]  ;;  %v3748_v5 = vld [vmem:[#allocation2 + $0x67] sm:$0xff] }
 0x3f5   : > { %13821 = vmatmul.mubr.f32.gmra.mrb[2].mxu1 %v19133_v33  ;;  %v22369_v14 = vld [vmem:[#allocation28_spill] sm:$0xff] }
 0x3f6   : > { %13823 = vmatprep.mubr.f32.mxu1 %v19136_v13  ;;  %15504 = vmatpush3.bf16.msra.mxu1 %v15501_v25  ;;  %v15513_v25 = vpack.c.bf16 %v4373_v41, %v4372_v37  ;;  %v3747_v37 = vld [vmem:[#allocation2 + $0x5f] sm:$0xff]  ;;  %v4376_v41 = vld [vmem:[#allocation5 + $0x160] sm:$0xff]  ;;  %v19168_v40 = vmul.f32 %v3748_v5, %v22369_v14  ;;  %v3752_v14 = vld [vmem:[#allocation2 + $0x87] sm:$0xff] }
 0x3f7   : > { %15506 = vmatprep.subr.bf16.mxu1 %v15505_v38  ;;  %v19165_v44 = vmul.f32 %v3747_v37, %v22368_v55  ;;  %v22371_v37 = vld [vmem:[#allocation30_spill] sm:$0xff]  ;;  %v4638_v5 = vld [vmem:[#allocation5 + $0x180] sm:$0xff]  ;;  %v3767_v63 = vld [vmem:[#allocation2 + $0xff] sm:$0xff] }
 0x3f8   : > { %v19176_v55 = vmul.f32 %v3750_v26, %v22371_v37  ;;  %v3753_v26 = vld [vmem:[#allocation2 + $0x8f] sm:$0xff] }
 0x3f9   : > { %13824 = vmatmul.mubr.f32.gmra.mrb[4].mxu1 %v19141_v34  ;;  %v22374_v37 = vld [vmem:[#allocation31_spill] sm:$0xff] }
 0x3fa   : > { %13826 = vmatprep.mubr.f32.mxu1 %v19144_v51  ;;  %15508 = vmatpush3.bf16.msra.mxu1 %v15505_v38  ;;  %v15517_v38 = vpack.c.bf16 %v4375_v42, %v4374_v23  ;;  %v3749_v23 = vld [vmem:[#allocation2 + $0x6f] sm:$0xff] }
 0x3fb   : > { %15510 = vmatprep.subr.bf16.mxu1 %v15509_v6  ;;  %v4379_v42 = vld [vmem:[#allocation5 + $0x178] sm:$0xff]  ;;  %v19173_v56 = vmul.f32 %v3749_v23, %v22370_v35  ;;  %v22373_v23 = vld [vmem:[#allocation32_spill] sm:$0xff]  ;;  %v19191_v35 = vmul.f32 %v3753_v26, %v22374_v37 }
 0x3fc   : > { %v3758_v26 = vld [vmem:[#allocation2 + $0xb7] sm:$0xff]  ;;  %v22379_v37 = vld [vmem:[#allocation38_spill] sm:$0xff] }
 0x3fd   : > { %13827 = vmatmul.mubr.f32.gmra.mrb[6].mxu1 %v19149_v9  ;;  %v19211_v4 = vmul.f32 %v3758_v26, %v22379_v37  ;;  %v22382_v26 = vld [vmem:[#allocation39_spill] sm:$0xff] }
 0x3fe   : > { %13829 = vmatprep.mubr.f32.mxu1 %v19152_v24  ;;  %15512 = vmatpush3.bf16.msra.mxu1 %v15509_v6  ;;  %v15521_v6 = vpack.c.bf16 %v4377_v28, %v4376_v41  ;;  %v3751_v41 = vld [vmem:[#allocation2 + $0x7f] sm:$0xff]  ;;  %v19224_v37 = vmul.f32 %v3761_v15, %v22382_v26  ;;  %v3766_v15 = vld [vmem:[#allocation2 + $0xf7] sm:$0xff]  ;;  %v22387_v26 = vld [vmem:[#allocation46_spill] sm:$0xff] }
 0x3ff   : > { %15514 = vmatprep.subr.bf16.mxu1 %v15513_v25  ;;  %v4639_v28 = vld [vmem:[#allocation5 + $0x188] sm:$0xff]  ;;  %v19181_v61 = vmul.f32 %v3751_v41, %v22372_v39  ;;  %v19243_v12 = vmul.f32 %v3766_v15, %v22387_v26  ;;  %v22391_v26 = vld [vmem:[#allocation50_spill] sm:$0xff] }
 0x400   : > { %v22377_v39 = vld [vmem:[#allocation36_spill] sm:$0xff]  ;;  %v19254_v29 = vmul.f32 %v3810_v60, %v22391_v26  ;;  %v4644_v60 = vld [vmem:[#allocation5 + $0x1b0] sm:$0xff] }
 0x401   : > { %13830 = vmatmul.mubr.f32.gmra.mrb[8].mxu1 %v19157_v27  ;;  %v3814_v26 = vld [vmem:[#allocation2 + $0x39] sm:$0xff] }
 0x402   : > { %13832 = vmatprep.mubr.f32.mxu1 %v19160_v58  ;;  %15516 = vmatpush3.bf16.msra.mxu1 %v15513_v25  ;;  %v15525_v25 = vpack.c.bf16 %v4379_v42, %v4378_v1  ;;  %v19186_v1 = vmul.f32 %v3752_v14, %v22373_v23  ;;  %v3754_v42 = vld [vmem:[#allocation2 + $0x97] sm:$0xff]  ;;  %v3756_v14 = vld [vmem:[#allocation2 + $0xa7] sm:$0xff] }
 0x403   : > { %15518 = vmatprep.subr.bf16.mxu1 %v15517_v38  ;;  %v19203_v46 = vmul.f32 %v3756_v14, %v22377_v39  ;;  %v22380_v14 = vld [vmem:[#allocation37_spill] sm:$0xff] }
 0x404   : > { %v19216_v39 = vmul.f32 %v3759_v50, %v22380_v14  ;;  %v3764_v50 = vld [vmem:[#allocation2 + $0xe7] sm:$0xff]  ;;  %v22385_v14 = vld [vmem:[#allocation44_spill] sm:$0xff] }
 0x405   : > { %13833 = vmatmul.mubr.f32.gmra.mrb[10].mxu1 %v19165_v44  ;;  %v19235_v52 = vmul.f32 %v3764_v50, %v22385_v14  ;;  %v3809_v14 = vld [vmem:[#allocation2 + $0x11] sm:$0xff] }
 0x406   : > { %13835 = vmatprep.mubr.f32.mxu1 %v19168_v40  ;;  %15520 = vmatpush3.bf16.msra.mxu1 %v15517_v38  ;;  %v19183_v38 = vpack.c.bf16 %v4639_v28, %v4638_v5  ;;  %v3755_v5 = vld [vmem:[#allocation2 + $0x9f] sm:$0xff] }
 0x407   : > { %15522 = vmatprep.subr.bf16.mxu1 %v15521_v6  ;;  %v22376_v28 = vld [vmem:[#allocation33_spill] sm:$0xff] }
 0x408   : > { %v19200_v23 = vmul.f32 %v3755_v5, %v22376_v28  ;;  %v3760_v5 = vld [vmem:[#allocation2 + $0xc7] sm:$0xff]  ;;  %v22381_v28 = vld [vmem:[#allocation40_spill] sm:$0xff] }
 0x409   : > { %13836 = vmatmul.mubr.f32.gmra.mrb[12].mxu1 %v19173_v56  ;;  %v19219_v10 = vmul.f32 %v3760_v5, %v22381_v28  ;;  %v22384_v5 = vld [vmem:[#allocation41_spill] sm:$0xff] }
 0x40a   : > { %13838 = vmatprep.mubr.f32.mxu1 %v19176_v55  ;;  %15524 = vmatpush3.bf16.msra.mxu1 %v15521_v6  ;;  %v22375_v6 = vld [vmem:[#allocation34_spill] sm:$0xff]  ;;  %v19232_v28 = vmul.f32 %v3763_v31, %v22384_v5  ;;  %v22388_v31 = vld [vmem:[#allocation45_spill] sm:$0xff] }
 0x40b   : > { %15526 = vmatprep.subr.bf16.mxu1 %v15525_v25  ;;  %v19195_v41 = vmul.f32 %v3754_v42, %v22375_v6  ;;  %v22378_v42 = vld [vmem:[#allocation35_spill] sm:$0xff]  ;;  %v19248_v50 = vmul.f32 %v3767_v63, %v22388_v31  ;;  %v4640_v5 = vld [vmem:[#allocation5 + $0x190] sm:$0xff] }
 0x40c   : > { %v15533_v15 = vpack.c.bf16 %v4641_v49, %v4640_v5  ;;  %v3812_v63 = vld [vmem:[#allocation2 + $0x29] sm:$0xff]  ;;  %v22392_v31 = vld [vmem:[#allocation49_spill] sm:$0xff]  ;;  %v3813_v49 = vld [vmem:[#allocation2 + $0x31] sm:$0xff] }
 0x40d   : > { %13839 = vmatmul.mubr.f32.gmra.mrb[14].mxu1 %v19181_v61  ;;  %v19259_v16 = vmul.f32 %v3811_v17, %v22392_v31  ;;  %v4645_v5 = vld [vmem:[#allocation5 + $0x1b8] sm:$0xff] }
 0x40e   : > { %13841 = vmatprep.mubr.f32.mxu1 %v19186_v1  ;;  %15528 = vmatpush3.bf16.msra.mxu1 %v15525_v25  ;;  %v3757_v25 = vld [vmem:[#allocation2 + $0xaf] sm:$0xff]  ;;  %v15541_v17 = vpack.c.bf16 %v4645_v5, %v4644_v60 }
 0x40f   : > { %15530 = vmatprep.subr.bf16.mxu1 %v19183_v38  ;;  %v19208_v6 = vmul.f32 %v3757_v25, %v22378_v42  ;;  %v3762_v25 = vld [vmem:[#allocation2 + $0xd7] sm:$0xff]  ;;  %v22383_v42 = vld [vmem:[#allocation42_spill] sm:$0xff]  ;;  %22393 = vst [vmem:[#allocation115_spill] sm:$0xff] %v19259_v16 }
 0x410   : > { %v19227_v20 = vmul.f32 %v3762_v25, %v22383_v42  ;;  %v22386_v25 = vld [vmem:[#allocation43_spill] sm:$0xff]  ;;  %v22398_v31 = vld [vmem:[#allocation54_spill] sm:$0xff] }
 0x411   : > { %13842 = vmatmul.mubr.f32.gmra.mrb[16].mxu1 %v19191_v35  ;;  %v19240_v42 = vmul.f32 %v3765_v19, %v22386_v25  ;;  %v22390_v19 = vld [vmem:[#allocation47_spill] sm:$0xff]  ;;  %v4649_v5 = vld [vmem:[#allocation5 + $0x1d8] sm:$0xff] }
 0x412   : > { %13844 = vmatprep.mubr.f32.mxu1 %v19195_v41  ;;  %v3845_v25 = vmul.f32 %v3809_v14, %v22390_v19  ;;  %v19262_v14 = vmul.f32 %v3812_v63, %v22394_v22  ;;  %v19270_v19 = vmul.f32 %v3814_v26, %v22398_v31  ;;  %v4647_v63 = vld [vmem:[#allocation5 + $0x1c8] sm:$0xff]  ;;  %v3816_v22 = vld [vmem:[#allocation2 + $0x49] sm:$0xff]  ;;  %v4648_v26 = vld [vmem:[#allocation5 + $0x1d0] sm:$0xff] }
 0x413   : > { %v3817_v60 = vld [vmem:[#allocation2 + $0x51] sm:$0xff]  ;;  %v3818_v31 = vld [vmem:[#allocation2 + $0x59] sm:$0xff] }
 0x414   : > { %22395 = vst [vmem:[#allocation116_spill] sm:$0xff] %v19262_v14  ;;  %22399 = vst [vmem:[#allocation118_spill] sm:$0xff] %v19270_v19 }
 0x415   : > { %13845 = vmatmul.mubr.f32.gmra.mrb[18].mxu1 %v19200_v23 }
 0x416   : > { %13847 = vmatprep.mubr.f32.mxu1 %v19203_v46 }
 0x419   : > { %13848 = vmatmul.mubr.f32.gmra.mrb[20].mxu1 %v19208_v6 }
 0x41a   : > { %13850 = vmatprep.mubr.f32.mxu1 %v19211_v4 }
 0x41d   : > { %13851 = vmatmul.mubr.f32.gmra.mrb[22].mxu1 %v19216_v39 }
 0x41e   : > { %13853 = vmatprep.mubr.f32.mxu1 %v19219_v10 }
 0x421   : > { %13854 = vmatmul.mubr.f32.gmra.mrb[24].mxu1 %v19224_v37 }
 0x422   : > { %13856 = vmatprep.mubr.f32.mxu1 %v19227_v20 }
 0x425   : > { %13857 = vmatmul.mubr.f32.gmra.mrb[26].mxu1 %v19232_v28 }
 0x426   : > { %13859 = vmatprep.mubr.f32.mxu1 %v19235_v52 }
 0x429   : > { %13860 = vmatmul.mubr.f32.gmra.mrb[28].mxu1 %v19240_v42 }
 0x42a   : > { %13862 = vmatprep.mubr.f32.mxu1 %v19243_v12 }
 0x42d   : > { %13863 = vmatmul.mubr.f32.gmra.mrb[30].mxu1 %v19248_v50 }
 0x42e   : > { %13897 = vmatprep.mubr.f32.mxu1 %v22389_v62  ;;  %v15537_v62 = vpack.c.bf16 %v4643_v32, %v4642_v43  ;;  %v3815_v43 = vld [vmem:[#allocation2 + $0x41] sm:$0xff]  ;;  %v4646_v32 = vld [vmem:[#allocation5 + $0x1c0] sm:$0xff] }
 0x431   : > { %13898 = vmatmul.mubr.f32.vlgmr.msra.gmra.mrb[0].mxu1 %v3845_v25 }
 0x432   : > { %15532 = vmatpush3.bf16.msra.mxu1 %v19183_v38  ;;  %13900 = vmatprep.mubr.f32.mxu1 %v19254_v29  ;;  %v22396_v38 = vld [vmem:[#allocation51_spill] sm:$0xff] }
 0x433   : > { %15534 = vmatprep.subr.bf16.mxu1 %v15533_v15  ;;  %v19267_v25 = vmul.f32 %v3813_v49, %v22396_v38  ;;  %v22402_v49 = vld [vmem:[#allocation56_spill] sm:$0xff] }
 0x434   : > { %v19278_v38 = vmul.f32 %v3816_v22, %v22402_v49  ;;  %v4650_v22 = vld [vmem:[#allocation5 + $0x1e0] sm:$0xff] }
 0x435   : > { %13901 = vmatmul.mubr.f32.gmra.mrb[2].mxu1 %v19259_v16  ;;  %22397 = vst [vmem:[#allocation117_spill] sm:$0xff] %v19267_v25  ;;  %v22400_v16 = vld [vmem:[#allocation53_spill] sm:$0xff]  ;;  %v3820_v49 = vld [vmem:[#allocation2 + $0x69] sm:$0xff] }
 0x436   : > { %13903 = vmatprep.mubr.f32.mxu1 %v19262_v14  ;;  %15536 = vmatpush3.bf16.msra.mxu1 %v15533_v15  ;;  %v19275_v14 = vmul.f32 %v3815_v43, %v22400_v16  ;;  %v15545_v15 = vpack.c.bf16 %v4647_v63, %v4646_v32  ;;  %22403 = vst [vmem:[#allocation120_spill] sm:$0xff] %v19278_v38  ;;  %v22406_v43 = vld [vmem:[#allocation58_spill] sm:$0xff]  ;;  %v4651_v63 = vld [vmem:[#allocation5 + $0x1e8] sm:$0xff] }
 0x437   : > { %15538 = vmatprep.subr.bf16.mxu1 %v15537_v62  ;;  %v19286_v16 = vmul.f32 %v3818_v31, %v22406_v43  ;;  %v3819_v32 = vld [vmem:[#allocation2 + $0x61] sm:$0xff]  ;;  %v3822_v43 = vld [vmem:[#allocation2 + $0x79] sm:$0xff] }
 0x438   : > { %22401 = vst [vmem:[#allocation119_spill] sm:$0xff] %v19275_v14  ;;  %v4652_v31 = vld [vmem:[#allocation5 + $0x1f0] sm:$0xff] }
 0x439   : > { %13904 = vmatmul.mubr.f32.gmra.mrb[4].mxu1 %v19267_v25  ;;  %v22404_v25 = vld [vmem:[#allocation55_spill] sm:$0xff]  ;;  %22407 = vst [vmem:[#allocation122_spill] sm:$0xff] %v19286_v16 }
 0x43a   : > { %13906 = vmatprep.mubr.f32.mxu1 %v19270_v19  ;;  %15540 = vmatpush3.bf16.msra.mxu1 %v15537_v62  ;;  %v19283_v19 = vmul.f32 %v3817_v60, %v22404_v25  ;;  %v15549_v62 = vpack.c.bf16 %v4649_v5, %v4648_v26  ;;  %v22410_v60 = vld [vmem:[#allocation60_spill] sm:$0xff]  ;;  %v4653_v5 = vld [vmem:[#allocation5 + $0x1f8] sm:$0xff] }
 0x43b   : > { %15542 = vmatprep.subr.bf16.mxu1 %v15541_v17  ;;  %v19294_v25 = vmul.f32 %v3820_v49, %v22410_v60  ;;  %v3821_v26 = vld [vmem:[#allocation2 + $0x71] sm:$0xff]  ;;  %v3824_v60 = vld [vmem:[#allocation2 + $0x89] sm:$0xff] }
 0x43c   : > { %22405 = vst [vmem:[#allocation121_spill] sm:$0xff] %v19283_v19  ;;  %v4912_v49 = vld [vmem:[#allocation5 + $0x200] sm:$0xff] }
 0x43d   : > { %13907 = vmatmul.mubr.f32.gmra.mrb[6].mxu1 %v19275_v14  ;;  %v22408_v14 = vld [vmem:[#allocation57_spill] sm:$0xff]  ;;  %22411 = vst [vmem:[#allocation69_spill] sm:$0xff] %v19294_v25 }
 0x43e   : > { %13909 = vmatprep.mubr.f32.mxu1 %v19278_v38  ;;  %15544 = vmatpush3.bf16.msra.mxu1 %v15541_v17  ;;  %v19291_v38 = vmul.f32 %v3819_v32, %v22408_v14  ;;  %v15553_v17 = vpack.c.bf16 %v4651_v63, %v4650_v22  ;;  %v22413_v32 = vld [vmem:[#allocation62_spill] sm:$0xff]  ;;  %v4913_v63 = vld [vmem:[#allocation5 + $0x208] sm:$0xff] }
 0x43f   : > { %15546 = vmatprep.subr.bf16.mxu1 %v15545_v15  ;;  %v19302_v14 = vmul.f32 %v3822_v43, %v22413_v32  ;;  %v3823_v22 = vld [vmem:[#allocation2 + $0x81] sm:$0xff]  ;;  %v3826_v43 = vld [vmem:[#allocation2 + $0x99] sm:$0xff] }
 0x440   : > { %22409 = vst [vmem:[#allocation123_spill] sm:$0xff] %v19291_v38 }
 0x441   : > { %13910 = vmatmul.mubr.f32.gmra.mrb[8].mxu1 %v19283_v19  ;;  %v22412_v19 = vld [vmem:[#allocation59_spill] sm:$0xff]  ;;  %22414 = vst [vmem:[#allocation70_spill] sm:$0xff] %v19302_v14 }
 0x442   : > { %13912 = vmatprep.mubr.f32.mxu1 %v19286_v16  ;;  %15548 = vmatpush3.bf16.msra.mxu1 %v15545_v15  ;;  %v19299_v16 = vmul.f32 %v3821_v26, %v22412_v19  ;;  %v15557_v15 = vpack.c.bf16 %v4653_v5, %v4652_v31  ;;  %v22416_v26 = vld [vmem:[#allocation64_spill] sm:$0xff]  ;;  %v22418_v5 = vld [vmem:[#allocation63_spill] sm:$0xff] }
 0x443   : > { %15550 = vmatprep.subr.bf16.mxu1 %v15549_v62  ;;  %v19310_v19 = vmul.f32 %v3824_v60, %v22416_v26  ;;  %v3825_v31 = vld [vmem:[#allocation2 + $0x91] sm:$0xff]  ;;  %v22422_v60 = vld [vmem:[#allocation65_spill] sm:$0xff] }
 0x444   : > { %v19315_v32 = vmul.f32 %v3825_v31, %v22418_v5  ;;  %v22424_v26 = vld [vmem:[#allocation68_spill] sm:$0xff] }
 0x445   : > { %13913 = vmatmul.mubr.f32.gmra.mrb[10].mxu1 %v19291_v38  ;;  %v22415_v38 = vld [vmem:[#allocation61_spill] sm:$0xff]  ;;  %22417 = vst [vmem:[#allocation73_spill] sm:$0xff] %v19310_v19  ;;  %v22428_v5 = vld [vmem:[#allocation72_spill] sm:$0xff] }
 0x446   : > { %13915 = vmatprep.mubr.f32.mxu1 %v19294_v25  ;;  %15552 = vmatpush3.bf16.msra.mxu1 %v15549_v62  ;;  %v19307_v25 = vmul.f32 %v3823_v22, %v22415_v38  ;;  %v15561_v62 = vpack.c.bf16 %v4913_v63, %v4912_v49  ;;  %22419 = vst [vmem:[#allocation74_spill] sm:$0xff] %v19315_v32  ;;  %v3827_v22 = vld [vmem:[#allocation2 + $0xa1] sm:$0xff]  ;;  %v3828_v49 = vld [vmem:[#allocation2 + $0xa9] sm:$0xff]  ;;  %v3830_v31 = vld [vmem:[#allocation2 + $0xb9] sm:$0xff] }
 0x447   : > { %15554 = vmatprep.subr.bf16.mxu1 %v15553_v17  ;;  %v19323_v63 = vmul.f32 %v3827_v22, %v22422_v60  ;;  %v19326_v38 = vmul.f32 %v3828_v49, %v22424_v26  ;;  %v3832_v22 = vld [vmem:[#allocation2 + $0xc9] sm:$0xff]  ;;  %v22432_v60 = vld [vmem:[#allocation76_spill] sm:$0xff] }
 0x448   : > { %v22430_v49 = vld [vmem:[#allocation71_spill] sm:$0xff] }
 0x449   : > { %13916 = vmatmul.mubr.f32.gmra.mrb[12].mxu1 %v19299_v16  ;;  %22423 = vst [vmem:[#allocation78_spill] sm:$0xff] %v19323_v63  ;;  %22425 = vst [vmem:[#allocation81_spill] sm:$0xff] %v19326_v38 }
 0x44a   : > { %13918 = vmatprep.mubr.f32.mxu1 %v19302_v14  ;;  %15556 = vmatpush3.bf16.msra.mxu1 %v15553_v17  ;;  %v22420_v17 = vld [vmem:[#allocation66_spill] sm:$0xff] }
 0x44b   : > { %15558 = vmatprep.subr.bf16.mxu1 %v15557_v15  ;;  %v19318_v14 = vmul.f32 %v3826_v43, %v22420_v17  ;;  %v22426_v43 = vld [vmem:[#allocation67_spill] sm:$0xff] }
 0x44d   : > { %13919 = vmatmul.mubr.f32.gmra.mrb[14].mxu1 %v19307_v25  ;;  %22421 = vst [vmem:[#allocation77_spill] sm:$0xff] %v19318_v14 }
 0x44e   : > { %13921 = vmatprep.mubr.f32.mxu1 %v19310_v19  ;;  %15560 = vmatpush3.bf16.msra.mxu1 %v15557_v15  ;;  %v3829_v15 = vld [vmem:[#allocation2 + $0xb1] sm:$0xff]  ;;  %v3831_v19 = vld [vmem:[#allocation2 + $0xc1] sm:$0xff] }
 0x44f   : > { %15562 = vmatprep.subr.bf16.mxu1 %v15561_v62  ;;  %v19331_v17 = vmul.f32 %v3829_v15, %v22426_v43  ;;  %v19339_v26 = vmul.f32 %v3831_v19, %v22430_v49  ;;  %v3834_v15 = vld [vmem:[#allocation2 + $0xd9] sm:$0xff]  ;;  %v3836_v19 = vld [vmem:[#allocation2 + $0xe9] sm:$0xff] }
 0x450   : > { %v22436_v43 = vld [vmem:[#allocation80_spill] sm:$0xff] }
 0x451   : > { %13922 = vmatmul.mubr.f32.gmra.mrb[16].mxu1 %v19315_v32  ;;  %22427 = vst [vmem:[#allocation82_spill] sm:$0xff] %v19331_v17  ;;  %v19334_v32 = vmul.f32 %v3830_v31, %v22428_v5  ;;  %22431 = vst [vmem:[#allocation86_spill] sm:$0xff] %v19339_v26  ;;  %v22434_v31 = vld [vmem:[#allocation75_spill] sm:$0xff]  ;;  %v22440_v49 = vld [vmem:[#allocation84_spill] sm:$0xff] }
 0x452   : > { %13924 = vmatprep.mubr.f32.mxu1 %v19318_v14  ;;  %v3833_v14 = vld [vmem:[#allocation2 + $0xd1] sm:$0xff] }
 0x453   : > { %22429 = vst [vmem:[#allocation85_spill] sm:$0xff] %v19334_v32  ;;  %v19347_v5 = vmul.f32 %v3833_v14, %v22434_v31  ;;  %v3838_v14 = vld [vmem:[#allocation2 + $0xf9] sm:$0xff] }
 0x454   : > { %v22444_v31 = vld [vmem:[#allocation88_spill] sm:$0xff] }
 0x455   : > { %13925 = vmatmul.mubr.f32.gmra.mrb[18].mxu1 %v19323_v63  ;;  %v19342_v63 = vmul.f32 %v3832_v22, %v22432_v60  ;;  %22435 = vst [vmem:[#allocation90_spill] sm:$0xff] %v19347_v5  ;;  %v22438_v22 = vld [vmem:[#allocation79_spill] sm:$0xff] }
 0x456   : > { %13927 = vmatprep.mubr.f32.mxu1 %v19326_v38  ;;  %v3835_v38 = vld [vmem:[#allocation2 + $0xe1] sm:$0xff] }
 0x457   : > { %22433 = vst [vmem:[#allocation89_spill] sm:$0xff] %v19342_v63  ;;  %v19355_v60 = vmul.f32 %v3835_v38, %v22438_v22  ;;  %v22446_v38 = vld [vmem:[#allocation87_spill] sm:$0xff]  ;;  %v4915_v22 = vld [vmem:[#allocation5 + $0x218] sm:$0xff] }
 0x459   : > { %13928 = vmatmul.mubr.f32.gmra.mrb[20].mxu1 %v19331_v17  ;;  %v19350_v17 = vmul.f32 %v3834_v15, %v22436_v43  ;;  %22439 = vst [vmem:[#allocation125_spill] sm:$0xff] %v19355_v60  ;;  %v22442_v15 = vld [vmem:[#allocation83_spill] sm:$0xff] }
 0x45a   : > { %13930 = vmatprep.mubr.f32.mxu1 %v19334_v32  ;;  %v3837_v32 = vld [vmem:[#allocation2 + $0xf1] sm:$0xff] }
 0x45b   : > { %22437 = vst [vmem:[#allocation124_spill] sm:$0xff] %v19350_v17  ;;  %v19363_v43 = vmul.f32 %v3837_v32, %v22442_v15  ;;  %v4916_v32 = vld [vmem:[#allocation5 + $0x220] sm:$0xff]  ;;  %v4917_v15 = vld [vmem:[#allocation5 + $0x228] sm:$0xff] }
 0x45d   : > { %13931 = vmatmul.mubr.f32.gmra.mrb[22].mxu1 %v19339_v26  ;;  %v19358_v26 = vmul.f32 %v3836_v19, %v22440_v49  ;;  %22443 = vst [vmem:[#allocation127_spill] sm:$0xff] %v19363_v43  ;;  %v4914_v49 = vld [vmem:[#allocation5 + $0x210] sm:$0xff] }
 0x45e   : > { %13933 = vmatprep.mubr.f32.mxu1 %v19342_v63  ;;  %v3839_v63 = vld [vmem:[#allocation2 + $0x101] sm:$0xff] }
 0x45f   : > { %22441 = vst [vmem:[#allocation126_spill] sm:$0xff] %v19358_v26  ;;  %v19371_v19 = vmul.f32 %v3839_v63, %v22446_v38  ;;  %v5193_v38 = vld [vmem:[#allocation5 + $0x2b8] sm:$0xff] }
 0x461   : > { %13934 = vmatmul.mubr.f32.gmra.mrb[24].mxu1 %v19347_v5  ;;  %v19366_v5 = vmul.f32 %v3838_v14, %v22444_v31  ;;  %v15569_v14 = vpack.c.bf16 %v4917_v15, %v4916_v32  ;;  %v4918_v31 = vld [vmem:[#allocation5 + $0x230] sm:$0xff]  ;;  %v4924_v15 = vld [vmem:[#allocation5 + $0x260] sm:$0xff] }
 0x462   : > { %13936 = vmatprep.mubr.f32.mxu1 %v19350_v17  ;;  %v4926_v32 = vld [vmem:[#allocation5 + $0x270] sm:$0xff] }
 0x463   : > { %22445 = vst [vmem:[#allocation128_spill] sm:$0xff] %v19366_v5 }
 0x465   : > { %13937 = vmatmul.mubr.f32.gmra.mrb[26].mxu1 %v19355_v60 }
 0x466   : > { %13939 = vmatprep.mubr.f32.mxu1 %v19358_v26  ;;  %v15565_v26 = vpack.c.bf16 %v4915_v22, %v4914_v49  ;;  %v4921_v49 = vld [vmem:[#allocation5 + $0x248] sm:$0xff]  ;;  %v4923_v22 = vld [vmem:[#allocation5 + $0x258] sm:$0xff] }
 0x469   : > { %13940 = vmatmul.mubr.f32.gmra.mrb[28].mxu1 %v19363_v43 }
 0x46a   : > { %13942 = vmatprep.mubr.f32.mxu1 %v19366_v5  ;;  %v4919_v5 = vld [vmem:[#allocation5 + $0x238] sm:$0xff] }
 0x46b   : > { %v15573_v63 = vpack.c.bf16 %v4919_v5, %v4918_v31  ;;  %v4925_v5 = vld [vmem:[#allocation5 + $0x268] sm:$0xff] }
 0x46c   : > { %v15585_v31 = vpack.c.bf16 %v4925_v5, %v4924_v15  ;;  %v3769_v15 = vld [vmem:[#allocation2 + $0x10f] sm:$0xff] }
 0x46d   : > { %13943 = vmatmul.mubr.f32.gmra.mrb[30].mxu1 %v19371_v19  ;;  %v22448_v5 = vld [vmem:[#allocation91_spill] sm:$0xff] }
 0x46e   : > { %13977 = vmatprep.mubr.f32.mxu1 %v19127_v59  ;;  %v4920_v59 = vld [vmem:[#allocation5 + $0x240] sm:$0xff] }
 0x471   : > { %13978 = vmatmul.mubr.f32.vlgmr.msra.gmra.mrb[0].mxu1 %v19133_v33  ;;  %v15577_v33 = vpack.c.bf16 %v4921_v49, %v4920_v59  ;;  %v5186_v59 = vld [vmem:[#allocation5 + $0x280] sm:$0xff]  ;;  %v5187_v49 = vld [vmem:[#allocation5 + $0x288] sm:$0xff] }
 0x472   : > { %15564 = vmatpush3.bf16.msra.mxu1 %v15561_v62  ;;  %13980 = vmatprep.mubr.f32.mxu1 %v19136_v13  ;;  %v4922_v62 = vld [vmem:[#allocation5 + $0x250] sm:$0xff] }
 0x473   : > { %15566 = vmatprep.subr.bf16.mxu1 %v15565_v26 }
 0x475   : > { %13981 = vmatmul.mubr.f32.gmra.mrb[2].mxu1 %v19141_v34 }
 0x476   : > { %13983 = vmatprep.mubr.f32.mxu1 %v19144_v51  ;;  %15568 = vmatpush3.bf16.msra.mxu1 %v15565_v26  ;;  %v15581_v26 = vpack.c.bf16 %v4923_v22, %v4922_v62  ;;  %v3768_v62 = vld [vmem:[#allocation2 + $0x107] sm:$0xff]  ;;  %v22447_v22 = vld [vmem:[#allocation92_spill] sm:$0xff] }
 0x477   : > { %15570 = vmatprep.subr.bf16.mxu1 %v15569_v14 }
 0x479   : > { %13984 = vmatmul.mubr.f32.gmra.mrb[4].mxu1 %v19149_v9 }
 0x47a   : > { %13986 = vmatprep.mubr.f32.mxu1 %v19152_v24  ;;  %15572 = vmatpush3.bf16.msra.mxu1 %v15569_v14  ;;  %v4927_v14 = vld [vmem:[#allocation5 + $0x278] sm:$0xff] }
 0x47b   : > { %15574 = vmatprep.subr.bf16.mxu1 %v15573_v63 }
 0x47d   : > { %13987 = vmatmul.mubr.f32.gmra.mrb[6].mxu1 %v19157_v27 }
 0x47e   : > { %13989 = vmatprep.mubr.f32.mxu1 %v19160_v58  ;;  %15576 = vmatpush3.bf16.msra.mxu1 %v15573_v63  ;;  %v15589_v63 = vpack.c.bf16 %v4927_v14, %v4926_v32  ;;  %v5188_v32 = vld [vmem:[#allocation5 + $0x290] sm:$0xff]  ;;  %v5189_v14 = vld [vmem:[#allocation5 + $0x298] sm:$0xff] }
 0x47f   : > { %15578 = vmatprep.subr.bf16.mxu1 %v15577_v33 }
 0x481   : > { %13990 = vmatmul.mubr.f32.gmra.mrb[8].mxu1 %v19165_v44 }
 0x482   : > { %13992 = vmatprep.mubr.f32.mxu1 %v19168_v40  ;;  %15580 = vmatpush3.bf16.msra.mxu1 %v15577_v33  ;;  %v15593_v33 = vpack.c.bf16 %v5187_v49, %v5186_v59  ;;  %v5190_v59 = vld [vmem:[#allocation5 + $0x2a0] sm:$0xff]  ;;  %v5191_v49 = vld [vmem:[#allocation5 + $0x2a8] sm:$0xff] }
 0x483   : > { %15582 = vmatprep.subr.bf16.mxu1 %v15581_v26 }
 0x485   : > { %13993 = vmatmul.mubr.f32.gmra.mrb[10].mxu1 %v19173_v56 }
 0x486   : > { %13995 = vmatprep.mubr.f32.mxu1 %v19176_v55  ;;  %15584 = vmatpush3.bf16.msra.mxu1 %v15581_v26  ;;  %v19404_v26 = vmul.f32 %v3768_v62, %v22447_v22  ;;  %v15601_v62 = vpack.c.bf16 %v5191_v49, %v5190_v59  ;;  %v5192_v22 = vld [vmem:[#allocation5 + $0x2b0] sm:$0xff]  ;;  %v22453_v59 = vld [vmem:[#allocation104_spill] sm:$0xff] }
 0x487   : > { %15586 = vmatprep.subr.bf16.mxu1 %v15585_v31  ;;  %v22456_v49 = vld [vmem:[#allocation105_spill] sm:$0xff] }
 0x489   : > { %13996 = vmatmul.mubr.f32.gmra.mrb[12].mxu1 %v19181_v61 }
 0x48a   : > { %13998 = vmatprep.mubr.f32.mxu1 %v19186_v1  ;;  %15588 = vmatpush3.bf16.msra.mxu1 %v15585_v31  ;;  %v19409_v31 = vmul.f32 %v3769_v15, %v22448_v5  ;;  %v15605_v15 = vpack.c.bf16 %v5193_v38, %v5192_v22  ;;  %v5199_v38 = vld [vmem:[#allocation5 + $0x2e8] sm:$0xff]  ;;  %v5201_v22 = vld [vmem:[#allocation5 + $0x2f8] sm:$0xff] }
 0x48b   : > { %15590 = vmatprep.subr.bf16.mxu1 %v15589_v63  ;;  %v22492_v5 = vld [vmem:[#allocation94_spill] sm:$0xff] }
 0x48d   : > { %13999 = vmatmul.mubr.f32.gmra.mrb[14].mxu1 %v19191_v35 }
 0x48e   : > { %14001 = vmatprep.mubr.f32.mxu1 %v19195_v41  ;;  %15592 = vmatpush3.bf16.msra.mxu1 %v15589_v63  ;;  %v15597_v63 = vpack.c.bf16 %v5189_v14, %v5188_v32  ;;  %v5195_v32 = vld [vmem:[#allocation5 + $0x2c8] sm:$0xff] }
 0x48f   : > { %15594 = vmatprep.subr.bf16.mxu1 %v15593_v33  ;;  %v5461_v14 = vld [vmem:[#allocation5 + $0x308] sm:$0xff] }
 0x491   : > { %14002 = vmatmul.mubr.f32.gmra.mrb[16].mxu1 %v19200_v23 }
 0x492   : > { %14004 = vmatprep.mubr.f32.mxu1 %v19203_v46 }
 0x495   : > { %14005 = vmatmul.mubr.f32.gmra.mrb[18].mxu1 %v19208_v6 }
 0x496   : > { %14007 = vmatprep.mubr.f32.mxu1 %v19211_v4 }
 0x499   : > { %14008 = vmatmul.mubr.f32.gmra.mrb[20].mxu1 %v19216_v39 }
 0x49a   : > { %14010 = vmatprep.mubr.f32.mxu1 %v19219_v10 }
 0x49d   : > { %14011 = vmatmul.mubr.f32.gmra.mrb[22].mxu1 %v19224_v37 }
 0x49e   : > { %14013 = vmatprep.mubr.f32.mxu1 %v19227_v20 }
 0x4a1   : > { %14014 = vmatmul.mubr.f32.gmra.mrb[24].mxu1 %v19232_v28 }
 0x4a2   : > { %14016 = vmatprep.mubr.f32.mxu1 %v19235_v52 }
 0x4a5   : > { %14017 = vmatmul.mubr.f32.gmra.mrb[26].mxu1 %v19240_v42 }
 0x4a6   : > { %14019 = vmatprep.mubr.f32.mxu1 %v19243_v12 }
 0x4a9   : > { %14020 = vmatmul.mubr.f32.gmra.mrb[28].mxu1 %v19248_v50 }
 0x4aa   : > { %14022 = vmatprep.mubr.f32.mxu1 %v19404_v26 }
 0x4ad   : > { %14023 = vmatmul.mubr.f32.gmra.mrb[30].mxu1 %v19409_v31 }
 0x4ae   : > { %14057 = vmatprep.mubr.f32.mxu1 %v18967_v8  ;;  %v5194_v8 = vld [vmem:[#allocation5 + $0x2c0] sm:$0xff] }
 0x4b1   : > { %14058 = vmatmul.mubr.f32.vlgmr.msra.gmra.mrb[0].mxu1 %v18965_v7  ;;  %v15609_v7 = vpack.c.bf16 %v5195_v32, %v5194_v8  ;;  %v22460_v8 = vld [vmem:[#allocation109_spill] sm:$0xff]  ;;  %v22461_v32 = vld [vmem:[#allocation112_spill] sm:$0xff] }
 0x4b2   : > { %15596 = vmatpush3.bf16.msra.mxu1 %v15593_v33  ;;  %14060 = vmatprep.mubr.f32.mxu1 %v18977_v48  ;;  %v5196_v48 = vld [vmem:[#allocation5 + $0x2d0] sm:$0xff]  ;;  %v5197_v33 = vld [vmem:[#allocation5 + $0x2d8] sm:$0xff] }
 0x4b3   : > { %15598 = vmatprep.subr.bf16.mxu1 %v15597_v63 }
 0x4b5   : > { %14061 = vmatmul.mubr.f32.gmra.mrb[2].mxu1 %v18974_v0  ;;  %v15613_v0 = vpack.c.bf16 %v5197_v33, %v5196_v48  ;;  %v22463_v48 = vld [vmem:[#allocation114_spill] sm:$0xff] }
 0x4b6   : > { %14063 = vmatprep.mubr.f32.mxu1 %v18987_v18  ;;  %15600 = vmatpush3.bf16.msra.mxu1 %v15597_v63  ;;  %v5198_v18 = vld [vmem:[#allocation5 + $0x2e0] sm:$0xff]  ;;  %v22452_v63 = vld [vmem:[#allocation101_spill] sm:$0xff]  ;;  %v22464_v33 = vmax.f32 %v22463_v48, 0.0 }
 0x4b7   : > { %15602 = vmatprep.subr.bf16.mxu1 %v15601_v62  ;;  %v5472_v48 = vld [vmem:[#allocation5 + $0x360] sm:$0xff] }
 0x4b9   : > { %14064 = vmatmul.mubr.f32.gmra.mrb[4].mxu1 %v18984_v57  ;;  %v15617_v57 = vpack.c.bf16 %v5199_v38, %v5198_v18  ;;  %v5463_v18 = vld [vmem:[#allocation5 + $0x318] sm:$0xff]  ;;  %v22465_v38 = vld [vmem:[#allocation113_spill] sm:$0xff] }
 0x4ba   : > { %14066 = vmatprep.mubr.f32.mxu1 %v18997_v30  ;;  %15604 = vmatpush3.bf16.msra.mxu1 %v15601_v62  ;;  %v5200_v30 = vld [vmem:[#allocation5 + $0x2f0] sm:$0xff]  ;;  %v22457_v62 = vld [vmem:[#allocation108_spill] sm:$0xff] }
 0x4bb   : > { %15606 = vmatprep.subr.bf16.mxu1 %v15605_v15 }
 0x4bd   : > { %14067 = vmatmul.mubr.f32.gmra.mrb[6].mxu1 %v18994_v47  ;;  %v15621_v47 = vpack.c.bf16 %v5201_v22, %v5200_v30  ;;  %v5464_v22 = vld [vmem:[#allocation5 + $0x320] sm:$0xff] }
 0x4be   : > { %14069 = vmatprep.mubr.f32.mxu1 %v19007_v36  ;;  %15608 = vmatpush3.bf16.msra.mxu1 %v15605_v15  ;;  %v5460_v36 = vld [vmem:[#allocation5 + $0x300] sm:$0xff]  ;;  %v22459_v15 = vld [vmem:[#allocation110_spill] sm:$0xff] }
 0x4bf   : > { %15610 = vmatprep.subr.bf16.mxu1 %v15609_v7 }
 0x4c1   : > { %14070 = vmatmul.mubr.f32.gmra.mrb[8].mxu1 %v19004_v54  ;;  %v15625_v54 = vpack.c.bf16 %v5461_v14, %v5460_v36  ;;  %v22467_v36 = vld [vmem:[#allocation115_spill] sm:$0xff]  ;;  %v22468_v14 = vld [vmem:[#allocation116_spill] sm:$0xff] }
 0x4c2   : > { %14072 = vmatprep.mubr.f32.mxu1 %v19017_v3  ;;  %15612 = vmatpush3.bf16.msra.mxu1 %v15609_v7  ;;  %v22449_v3 = vld [vmem:[#allocation100_spill] sm:$0xff]  ;;  %v22462_v7 = vld [vmem:[#allocation111_spill] sm:$0xff] }
 0x4c3   : > { %15614 = vmatprep.subr.bf16.mxu1 %v15613_v0 }
 0x4c5   : > { %14073 = vmatmul.mubr.f32.gmra.mrb[10].mxu1 %v19014_v2  ;;  %v22450_v2 = vld [vmem:[#allocation93_spill] sm:$0xff] }
 0x4c6   : > { %14075 = vmatprep.mubr.f32.mxu1 %v19027_v21  ;;  %15616 = vmatpush3.bf16.msra.mxu1 %v15613_v0  ;;  %v22451_v21 = vld [vmem:[#allocation102_spill] sm:$0xff]  ;;  %v5462_v0 = vld [vmem:[#allocation5 + $0x310] sm:$0xff] }
 0x4c7   : > { %15618 = vmatprep.subr.bf16.mxu1 %v15617_v57  ;;  %v15629_v30 = vpack.c.bf16 %v5463_v18, %v5462_v0  ;;  %v22475_v0 = vld [vmem:[#allocation123_spill] sm:$0xff]  ;;  %v22476_v18 = vld [vmem:[#allocation69_spill] sm:$0xff] }
 0x4c9   : > { %14076 = vmatmul.mubr.f32.gmra.mrb[12].mxu1 %v19024_v11  ;;  %v22454_v11 = vld [vmem:[#allocation103_spill] sm:$0xff] }
 0x4ca   : > { %14078 = vmatprep.mubr.f32.mxu1 %v19037_v45  ;;  %15620 = vmatpush3.bf16.msra.mxu1 %v15617_v57  ;;  %v22455_v45 = vld [vmem:[#allocation106_spill] sm:$0xff]  ;;  %v22466_v57 = vmax.f32 %v22465_v38, 0.0 }
 0x4cb   : > { %15622 = vmatprep.subr.bf16.mxu1 %v15621_v47 }
 0x4cd   : > { %14079 = vmatmul.mubr.f32.gmra.mrb[14].mxu1 %v19034_v53  ;;  %v22458_v53 = vld [vmem:[#allocation107_spill] sm:$0xff] }
 0x4ce   : > { %14081 = vmatprep.mubr.f32.mxu1 %v22449_v3  ;;  %15624 = vmatpush3.bf16.msra.mxu1 %v15621_v47  ;;  %v5465_v47 = vld [vmem:[#allocation5 + $0x328] sm:$0xff] }
 0x4cf   : > { %15626 = vmatprep.subr.bf16.mxu1 %v15625_v54  ;;  %v15633_v3 = vpack.c.bf16 %v5465_v47, %v5464_v22  ;;  %v22477_v22 = vld [vmem:[#allocation70_spill] sm:$0xff] }
 0x4d1   : > { %14082 = vmatmul.mubr.f32.gmra.mrb[16].mxu1 %v22450_v2  ;;  %v5466_v2 = vld [vmem:[#allocation5 + $0x330] sm:$0xff] }
 0x4d2   : > { %14084 = vmatprep.mubr.f32.mxu1 %v22451_v21  ;;  %v5467_v21 = vld [vmem:[#allocation5 + $0x338] sm:$0xff] }
 0x4d5   : > { %14085 = vmatmul.mubr.f32.gmra.mrb[18].mxu1 %v22452_v63  ;;  %v22469_v63 = vld [vmem:[#allocation117_spill] sm:$0xff] }
 0x4d6   : > { %14087 = vmatprep.mubr.f32.mxu1 %v22453_v59  ;;  %v22470_v59 = vld [vmem:[#allocation118_spill] sm:$0xff] }
 0x4d9   : > { %14088 = vmatmul.mubr.f32.gmra.mrb[20].mxu1 %v22454_v11  ;;  %v15637_v11 = vpack.c.bf16 %v5467_v21, %v5466_v2  ;;  %v22478_v2 = vld [vmem:[#allocation73_spill] sm:$0xff] }
 0x4da   : > { %14090 = vmatprep.mubr.f32.mxu1 %v22455_v45  ;;  %v5469_v45 = vld [vmem:[#allocation5 + $0x348] sm:$0xff] }
 0x4dd   : > { %14091 = vmatmul.mubr.f32.gmra.mrb[22].mxu1 %v22456_v49  ;;  %v22471_v49 = vld [vmem:[#allocation119_spill] sm:$0xff] }
 0x4de   : > { %14093 = vmatprep.mubr.f32.mxu1 %v22457_v62  ;;  %v22472_v62 = vld [vmem:[#allocation120_spill] sm:$0xff] }
 0x4e1   : > { %14094 = vmatmul.mubr.f32.gmra.mrb[24].mxu1 %v22458_v53  ;;  %v5470_v53 = vld [vmem:[#allocation5 + $0x350] sm:$0xff] }
 0x4e2   : > { %14096 = vmatprep.mubr.f32.mxu1 %v22459_v15  ;;  %v5471_v15 = vld [vmem:[#allocation5 + $0x358] sm:$0xff] }
 0x4e5   : > { %14097 = vmatmul.mubr.f32.gmra.mrb[26].mxu1 %v22460_v8  ;;  %v22473_v8 = vld [vmem:[#allocation121_spill] sm:$0xff] }
 0x4e6   : > { %14099 = vmatprep.mubr.f32.mxu1 %v22461_v32  ;;  %v22474_v32 = vld [vmem:[#allocation122_spill] sm:$0xff] }
 0x4e9   : > { %14100 = vmatmul.mubr.f32.gmra.mrb[28].mxu1 %v22462_v7  ;;  %v15645_v7 = vpack.c.bf16 %v5471_v15, %v5470_v53  ;;  %v22483_v53 = vld [vmem:[#allocation82_spill] sm:$0xff]  ;;  %v22484_v15 = vld [vmem:[#allocation85_spill] sm:$0xff] }
 0x4ea   : > { %14102 = vmatprep.mubr.f32.mxu1 %v22464_v33  ;;  %v5473_v33 = vld [vmem:[#allocation5 + $0x368] sm:$0xff] }
 0x4eb   : > { %v15649_v38 = vpack.c.bf16 %v5473_v33, %v5472_v48  ;;  %v22486_v48 = vld [vmem:[#allocation89_spill] sm:$0xff]  ;;  %v22487_v33 = vld [vmem:[#allocation90_spill] sm:$0xff] }
 0x4ed   : > { %14103 = vmatmul.mubr.f32.gmra.mrb[30].mxu1 %v22466_v57  ;;  %v5474_v57 = vld [vmem:[#allocation5 + $0x370] sm:$0xff] }
 0x4ee   : > { %14137 = vmatprep.mubr.f32.mxu1 %v19254_v29  ;;  %v5468_v29 = vld [vmem:[#allocation5 + $0x340] sm:$0xff] }
 0x4f1   : > { %14138 = vmatmul.mubr.f32.vlgmr.msra.gmra.mrb[0].mxu1 %v22467_v36  ;;  %v5734_v36 = vld [vmem:[#allocation5 + $0x380] sm:$0xff] }
 0x4f2   : > { %15628 = vmatpush3.bf16.msra.mxu1 %v15625_v54  ;;  %14140 = vmatprep.mubr.f32.mxu1 %v22468_v14  ;;  %v15641_v54 = vpack.c.bf16 %v5469_v45, %v5468_v29  ;;  %v22480_v29 = vld [vmem:[#allocation77_spill] sm:$0xff]  ;;  %v22481_v45 = vld [vmem:[#allocation78_spill] sm:$0xff] }
 0x4f3   : > { %15630 = vmatprep.subr.bf16.mxu1 %v15629_v30 }
 0x4f5   : > { %14141 = vmatmul.mubr.f32.gmra.mrb[2].mxu1 %v22469_v63 }
 0x4f6   : > { %14143 = vmatprep.mubr.f32.mxu1 %v22470_v59  ;;  %15632 = vmatpush3.bf16.msra.mxu1 %v15629_v30  ;;  %v5475_v30 = vld [vmem:[#allocation5 + $0x378] sm:$0xff] }
 0x4f7   : > { %15634 = vmatprep.subr.bf16.mxu1 %v15633_v3  ;;  %v15653_v47 = vpack.c.bf16 %v5475_v30, %v5474_v57  ;;  %v3840_v57 = vld [vmem:[#allocation2 + $0x109] sm:$0xff]  ;;  %v22489_v30 = vld [vmem:[#allocation128_spill] sm:$0xff] }
 0x4f9   : > { %14144 = vmatmul.mubr.f32.gmra.mrb[4].mxu1 %v22471_v49 }
 0x4fa   : > { %14146 = vmatprep.mubr.f32.mxu1 %v22472_v62  ;;  %15636 = vmatpush3.bf16.msra.mxu1 %v15633_v3  ;;  %v5735_v3 = vld [vmem:[#allocation5 + $0x388] sm:$0xff] }
 0x4fb   : > { %15638 = vmatprep.subr.bf16.mxu1 %v15637_v11  ;;  %v15657_v21 = vpack.c.bf16 %v5735_v3, %v5734_v36  ;;  %v3841_v3 = vld [vmem:[#allocation2 + $0x111] sm:$0xff] }
 0x4fd   : > { %14147 = vmatmul.mubr.f32.gmra.mrb[6].mxu1 %v22473_v8 }
 0x4fe   : > { %14149 = vmatprep.mubr.f32.mxu1 %v22474_v32  ;;  %15640 = vmatpush3.bf16.msra.mxu1 %v15637_v11  ;;  %v22479_v11 = vld [vmem:[#allocation74_spill] sm:$0xff] }
 0x4ff   : > { %15642 = vmatprep.subr.bf16.mxu1 %v15641_v54 }
 0x501   : > { %14150 = vmatmul.mubr.f32.gmra.mrb[8].mxu1 %v22475_v0 }
 0x502   : > { %14152 = vmatprep.mubr.f32.mxu1 %v22476_v18  ;;  %15644 = vmatpush3.bf16.msra.mxu1 %v15641_v54  ;;  %v22482_v54 = vld [vmem:[#allocation81_spill] sm:$0xff] }
 0x503   : > { %15646 = vmatprep.subr.bf16.mxu1 %v15645_v7 }
 0x505   : > { %14153 = vmatmul.mubr.f32.gmra.mrb[10].mxu1 %v19299_v16 }
 0x506   : > { %14155 = vmatprep.mubr.f32.mxu1 %v22477_v22  ;;  %15648 = vmatpush3.bf16.msra.mxu1 %v15645_v7  ;;  %v22485_v7 = vld [vmem:[#allocation86_spill] sm:$0xff] }
 0x507   : > { %15650 = vmatprep.subr.bf16.mxu1 %v15649_v38 }
 0x509   : > { %14156 = vmatmul.mubr.f32.gmra.mrb[12].mxu1 %v19307_v25 }
 0x50a   : > { %14158 = vmatprep.mubr.f32.mxu1 %v22478_v2  ;;  %15652 = vmatpush3.bf16.msra.mxu1 %v15649_v38  ;;  %v22488_v38 = vld [vmem:[#allocation126_spill] sm:$0xff] }
 0x50b   : > { %15654 = vmatprep.subr.bf16.mxu1 %v15653_v47 }
 0x50d   : > { %14159 = vmatmul.mubr.f32.gmra.mrb[14].mxu1 %v22479_v11 }
 0x50e   : > { %14161 = vmatprep.mubr.f32.mxu1 %v22480_v29  ;;  %15656 = vmatpush3.bf16.msra.mxu1 %v15653_v47  ;;  %v22490_v47 = vld [vmem:[#allocation95_spill] sm:$0xff] }
 0x50f   : > { %15658 = vmatprep.subr.bf16.mxu1 %v15657_v21  ;;  %v19476_v36 = vmul.f32 %v3840_v57, %v22490_v47  ;;  %v5740_v47 = vld [vmem:[#allocation5 + $0x3b0] sm:$0xff] }
 0x511   : > { %14162 = vmatmul.mubr.f32.gmra.mrb[16].mxu1 %v22481_v45  ;;  %22491 = vst [vmem:[#allocation100_spill] sm:$0xff] %v19476_v36 }
 0x512   : > { %14164 = vmatprep.mubr.f32.mxu1 %v22482_v54 }
 0x515   : > { %14165 = vmatmul.mubr.f32.gmra.mrb[18].mxu1 %v22483_v53 }
 0x516   : > { %14167 = vmatprep.mubr.f32.mxu1 %v22484_v15 }
 0x519   : > { %14168 = vmatmul.mubr.f32.gmra.mrb[20].mxu1 %v22485_v7 }
 0x51a   : > { %14170 = vmatprep.mubr.f32.mxu1 %v22486_v48 }
 0x51d   : > { %14171 = vmatmul.mubr.f32.gmra.mrb[22].mxu1 %v22487_v33  ;;  %v19481_v33 = vmul.f32 %v3841_v3, %v22492_v5 }
 0x51e   : > { %14173 = vmatprep.mubr.f32.mxu1 %v19350_v17  ;;  %v5736_v17 = vld [vmem:[#allocation5 + $0x390] sm:$0xff] }
 0x521   : > { %14174 = vmatmul.mubr.f32.gmra.mrb[24].mxu1 %v19355_v60  ;;  %v5737_v60 = vld [vmem:[#allocation5 + $0x398] sm:$0xff] }
 0x522   : > { %14176 = vmatprep.mubr.f32.mxu1 %v22488_v38  ;;  %v5738_v38 = vld [vmem:[#allocation5 + $0x3a0] sm:$0xff] }
 0x525   : > { %14177 = vmatmul.mubr.f32.gmra.mrb[26].mxu1 %v19363_v43  ;;  %v15661_v43 = vpack.c.bf16 %v5737_v60, %v5736_v17  ;;  %v5743_v17 = vld [vmem:[#allocation5 + $0x3c8] sm:$0xff]  ;;  %v5745_v60 = vld [vmem:[#allocation5 + $0x3d8] sm:$0xff] }
 0x526   : > { %14179 = vmatprep.mubr.f32.mxu1 %v22489_v30  ;;  %v5739_v30 = vld [vmem:[#allocation5 + $0x3a8] sm:$0xff] }
 0x527   : > { %v15665_v57 = vpack.c.bf16 %v5739_v30, %v5738_v38  ;;  %v6009_v38 = vld [vmem:[#allocation5 + $0x408] sm:$0xff] }
 0x529   : > { %14180 = vmatmul.mubr.f32.gmra.mrb[28].mxu1 %v19371_v19 }
 0x52a   : > { %14182 = vmatprep.mubr.f32.mxu1 %v19476_v36  ;;  %v5741_v36 = vld [vmem:[#allocation5 + $0x3b8] sm:$0xff] }
 0x52b   : > { %v15669_v3 = vpack.c.bf16 %v5741_v36, %v5740_v47  ;;  %v6014_v47 = vld [vmem:[#allocation5 + $0x430] sm:$0xff] }
 0x52d   : > { %14183 = vmatmul.mubr.f32.gmra.mrb[30].mxu1 %v19481_v33 }
 0x52e   : > { %14217 = vmatprep.mubr.f32.mxu1 %v19136_v13  ;;  %v5742_v13 = vld [vmem:[#allocation5 + $0x3c0] sm:$0xff] }
 0x531   : > { %14218 = vmatmul.mubr.f32.vlgmr.msra.gmra.mrb[0].mxu1 %v19141_v34  ;;  %v15673_v34 = vpack.c.bf16 %v5743_v17, %v5742_v13  ;;  %v6588_v13 = vld [vmem:[#allocation7 + $0xb8] sm:$0xff]  ;;  %v17441_v17 = vld [vmem:[#allocation2 + $0x40] sm:$0xff] }
 0x532   : > { %15660 = vmatpush3.bf16.msra.mxu1 %v15657_v21  ;;  %14220 = vmatprep.mubr.f32.mxu1 %v19144_v51  ;;  %v5744_v51 = vld [vmem:[#allocation5 + $0x3d0] sm:$0xff]  ;;  %v5749_v21 = vld [vmem:[#allocation5 + $0x3f8] sm:$0xff] }
 0x533   : > { %15662 = vmatprep.subr.bf16.mxu1 %v15661_v43 }
 0x535   : > { %14221 = vmatmul.mubr.f32.gmra.mrb[2].mxu1 %v19149_v9  ;;  %v5746_v9 = vld [vmem:[#allocation5 + $0x3e0] sm:$0xff] }
 0x536   : > { %14223 = vmatprep.mubr.f32.mxu1 %v19152_v24  ;;  %15664 = vmatpush3.bf16.msra.mxu1 %v15661_v43  ;;  %v15677_v24 = vpack.c.bf16 %v5745_v60, %v5744_v51  ;;  %v5747_v43 = vld [vmem:[#allocation5 + $0x3e8] sm:$0xff]  ;;  %v6016_v60 = vld [vmem:[#allocation5 + $0x440] sm:$0xff] }
 0x537   : > { %15666 = vmatprep.subr.bf16.mxu1 %v15665_v57 }
 0x539   : > { %14224 = vmatmul.mubr.f32.gmra.mrb[4].mxu1 %v19157_v27  ;;  %v15681_v27 = vpack.c.bf16 %v5747_v43, %v5746_v9  ;;  %v6017_v9 = vld [vmem:[#allocation5 + $0x448] sm:$0xff]  ;;  %v6589_v43 = vld [vmem:[#allocation7 + $0xc0] sm:$0xff] }
 0x53a   : > { %14226 = vmatprep.mubr.f32.mxu1 %v19160_v58  ;;  %15668 = vmatpush3.bf16.msra.mxu1 %v15665_v57  ;;  %v5748_v58 = vld [vmem:[#allocation5 + $0x3f0] sm:$0xff]  ;;  %v6015_v57 = vld [vmem:[#allocation5 + $0x438] sm:$0xff] }
 0x53b   : > { %15670 = vmatprep.subr.bf16.mxu1 %v15669_v3  ;;  %v15701_v51 = vpack.c.bf16 %v6015_v57, %v6014_v47  ;;  %v17451_v47 = vld [vmem:[#allocation2 + $0x90] sm:$0xff]  ;;  %v17453_v57 = vld [vmem:[#allocation2 + $0xa0] sm:$0xff] }
 0x53d   : > { %14227 = vmatmul.mubr.f32.gmra.mrb[6].mxu1 %v19165_v44  ;;  %v15685_v44 = vpack.c.bf16 %v5749_v21, %v5748_v58  ;;  %v17443_v58 = vld [vmem:[#allocation2 + $0x50] sm:$0xff]  ;;  %v17444_v21 = vld [vmem:[#allocation2 + $0x58] sm:$0xff] }
 0x53e   : > { %14229 = vmatprep.mubr.f32.mxu1 %v19168_v40  ;;  %15672 = vmatpush3.bf16.msra.mxu1 %v15669_v3  ;;  %v6008_v40 = vld [vmem:[#allocation5 + $0x400] sm:$0xff]  ;;  %v6587_v3 = vld [vmem:[#allocation7 + $0xb0] sm:$0xff] }
 0x53f   : > { %15674 = vmatprep.subr.bf16.mxu1 %v15673_v34 }
 0x541   : > { %14230 = vmatmul.mubr.f32.gmra.mrb[8].mxu1 %v19173_v56  ;;  %v15689_v56 = vpack.c.bf16 %v6009_v38, %v6008_v40  ;;  %v6018_v40 = vld [vmem:[#allocation5 + $0x450] sm:$0xff] }
 0x542   : > { %14232 = vmatprep.mubr.f32.mxu1 %v19176_v55  ;;  %15676 = vmatpush3.bf16.msra.mxu1 %v15673_v34  ;;  %v6583_v55 = vld [vmem:[#allocation7 + $0x90] sm:$0xff]  ;;  %v17442_v34 = vld [vmem:[#allocation2 + $0x48] sm:$0xff] }
 0x543   : > { %15678 = vmatprep.subr.bf16.mxu1 %v15677_v24 }
 0x545   : > { %14233 = vmatmul.mubr.f32.gmra.mrb[10].mxu1 %v19181_v61 }
 0x546   : > { %14235 = vmatprep.mubr.f32.mxu1 %v19186_v1  ;;  %15680 = vmatpush3.bf16.msra.mxu1 %v15677_v24  ;;  %v15733_v24 = vpack.c.bf16 %v6588_v13, %v6587_v3  ;;  %v17454_v3 = vld [vmem:[#allocation2 + $0xa8] sm:$0xff]  ;;  %v17455_v13 = vld [vmem:[#allocation2 + $0xb0] sm:$0xff] }
 0x547   : > { %15682 = vmatprep.subr.bf16.mxu1 %v15681_v27 }
 0x549   : > { %14236 = vmatmul.mubr.f32.gmra.mrb[12].mxu1 %v19191_v35  ;;  %v6581_v35 = vld [vmem:[#allocation7 + $0x80] sm:$0xff] }
 0x54a   : > { %14238 = vmatprep.mubr.f32.mxu1 %v19195_v41  ;;  %15684 = vmatpush3.bf16.msra.mxu1 %v15681_v27  ;;  %v6590_v27 = vld [vmem:[#allocation7 + $0xc8] sm:$0xff] }
 0x54b   : > { %15686 = vmatprep.subr.bf16.mxu1 %v15685_v44  ;;  %v15737_v38 = vpack.c.bf16 %v6590_v27, %v6589_v43  ;;  %v17462_v43 = vld [vmem:[#allocation2 + $0xe8] sm:$0xff]  ;;  %v17463_v27 = vld [vmem:[#allocation2 + $0xf0] sm:$0xff] }
 0x54d   : > { %14239 = vmatmul.mubr.f32.gmra.mrb[14].mxu1 %v19200_v23  ;;  %v6584_v23 = vld [vmem:[#allocation7 + $0x98] sm:$0xff] }
 0x54e   : > { %14241 = vmatprep.mubr.f32.mxu1 %v19203_v46  ;;  %15688 = vmatpush3.bf16.msra.mxu1 %v15685_v44  ;;  %v3770_v46 = vld [vmem:[#allocation2 + $0x117] sm:$0xff]  ;;  %v15725_v41 = vpack.c.bf16 %v6584_v23, %v6583_v55  ;;  %v15705_v44 = vpack.c.bf16 %v6017_v9, %v6016_v60  ;;  %v17461_v9 = vld [vmem:[#allocation2 + $0xe0] sm:$0xff] }
 0x54f   : > { %15690 = vmatprep.subr.bf16.mxu1 %v15689_v56  ;;  %v6594_v23 = vld [vmem:[#allocation7 + $0xe8] sm:$0xff]  ;;  %v17459_v60 = vld [vmem:[#allocation2 + $0xd0] sm:$0xff] }
 0x551   : > { %14242 = vmatmul.mubr.f32.gmra.mrb[16].mxu1 %v19208_v6  ;;  %v6012_v6 = vld [vmem:[#allocation5 + $0x420] sm:$0xff] }
 0x552   : > { %14244 = vmatprep.mubr.f32.mxu1 %v19211_v4  ;;  %v22493_v4 = vld [vmem:[#allocation96_spill] sm:$0xff] }
 0x553   : > { %v3806_v61 = vmul.f32 %v3770_v46, %v22493_v4  ;;  %v6591_v46 = vld [vmem:[#allocation7 + $0xd0] sm:$0xff] }
 0x555   : > { %14245 = vmatmul.mubr.f32.gmra.mrb[18].mxu1 %v19216_v39  ;;  %v22494_v39 = vld [vmem:[#allocation97_spill] sm:$0xff] }
 0x556   : > { %14247 = vmatprep.mubr.f32.mxu1 %v19219_v10  ;;  %v6010_v10 = vld [vmem:[#allocation5 + $0x410] sm:$0xff] }
 0x559   : > { %14248 = vmatmul.mubr.f32.gmra.mrb[20].mxu1 %v19224_v37  ;;  %v17438_v37 = vld [vmem:[#allocation2 + $0x28] sm:$0xff] }
 0x55a   : > { %14250 = vmatprep.mubr.f32.mxu1 %v19227_v20  ;;  %v6011_v20 = vld [vmem:[#allocation5 + $0x418] sm:$0xff] }
 0x55b   : > { %v15693_v1 = vpack.c.bf16 %v6011_v20, %v6010_v10  ;;  %v17445_v10 = vld [vmem:[#allocation2 + $0x60] sm:$0xff]  ;;  %v17446_v20 = vld [vmem:[#allocation2 + $0x68] sm:$0xff] }
 0x55d   : > { %14251 = vmatmul.mubr.f32.gmra.mrb[22].mxu1 %v19232_v28  ;;  %v6013_v28 = vld [vmem:[#allocation5 + $0x428] sm:$0xff] }
 0x55e   : > { %14253 = vmatprep.mubr.f32.mxu1 %v19235_v52  ;;  %v6582_v52 = vld [vmem:[#allocation7 + $0x88] sm:$0xff]  ;;  %v15697_v30 = vpack.c.bf16 %v6013_v28, %v6012_v6 }
 0x55f   : > { %v17448_v6 = vld [vmem:[#allocation2 + $0x78] sm:$0xff] }
 0x561   : > { %14254 = vmatmul.mubr.f32.gmra.mrb[24].mxu1 %v19240_v42  ;;  %v6585_v42 = vld [vmem:[#allocation7 + $0xa0] sm:$0xff] }
 0x562   : > { %14256 = vmatprep.mubr.f32.mxu1 %v19243_v12  ;;  %v15721_v12 = vpack.c.bf16 %v6582_v52, %v6581_v35  ;;  %v6020_v52 = vld [vmem:[#allocation5 + $0x460] sm:$0xff] }
 0x564   : > { %15722 = vmatprep.subr.bf16.mxu0 %v15721_v12 }
 0x565   : > { %14257 = vmatmul.mubr.f32.gmra.mrb[26].mxu1 %v19248_v50  ;;  %v6586_v50 = vld [vmem:[#allocation7 + $0xa8] sm:$0xff]  ;;  %15724 = vmatpush3.bf16.msra.mxu0 %v15721_v12  ;;  %v6593_v12 = vld [vmem:[#allocation7 + $0xe0] sm:$0xff] }
 0x566   : > { %14259 = vmatprep.mubr.f32.mxu1 %v19404_v26  ;;  %v17439_v26 = vld [vmem:[#allocation2 + $0x30] sm:$0xff]  ;;  %15726 = vmatprep.subr.bf16.mxu0 %v15725_v41  ;;  %v15729_v36 = vpack.c.bf16 %v6586_v50, %v6585_v42  ;;  %v15745_v28 = vpack.c.bf16 %v6594_v23, %v6593_v12  ;;  %v6022_v42 = vld [vmem:[#allocation5 + $0x470] sm:$0xff]  ;;  %v6023_v50 = vld [vmem:[#allocation5 + $0x478] sm:$0xff] }
 0x567   : > { %v6578_v23 = vld [vmem:[#allocation7 + $0x70] sm:$0xff] }
 0x569   : > { %14260 = vmatmul.mubr.f32.gmra.mrb[28].mxu1 %v19409_v31  ;;  %v17440_v31 = vld [vmem:[#allocation2 + $0x38] sm:$0xff]  ;;  %15728 = vmatpush3.bf16.msra.mxu0 %v15725_v41 }
 0x56a   : > { %14262 = vmatprep.mubr.f32.mxu1 %v3806_v61  ;;  %15730 = vmatprep.subr.bf16.mxu0 %v15729_v36  ;;  %v6592_v61 = vld [vmem:[#allocation7 + $0xd8] sm:$0xff] }
 0x56b   : > { %v15741_v55 = vpack.c.bf16 %v6592_v61, %v6591_v46  ;;  %v6572_v46 = vld [vmem:[#allocation7 + $0x40] sm:$0xff]  ;;  %v6573_v61 = vld [vmem:[#allocation7 + $0x48] sm:$0xff] }
 0x56d   : > { %14263 = vmatmul.mubr.f32.gmra.mrb[30].mxu1 %v22494_v39  ;;  %15732 = vmatpush3.bf16.msra.mxu0 %v15729_v36  ;;  %v17452_v36 = vld [vmem:[#allocation2 + $0x98] sm:$0xff] }
 0x56e   : > { %14297 = vmatprep.mubr.f32.mxu1 %v17438_v37  ;;  %15734 = vmatprep.subr.bf16.mxu0 %v15733_v24  ;;  %v6021_v37 = vld [vmem:[#allocation5 + $0x468] sm:$0xff] }
 0x56f   : > { %v15713_v41 = vpack.c.bf16 %v6021_v37, %v6020_v52  ;;  %v6577_v37 = vld [vmem:[#allocation7 + $0x68] sm:$0xff] }
 0x571   : > { %14298 = vmatmul.mubr.f32.vlgmr.msra.gmra.mrb[0].mxu1 %v17439_v26  ;;  %15736 = vmatpush3.bf16.msra.mxu0 %v15733_v24  ;;  %v17449_v26 = vld [vmem:[#allocation2 + $0x80] sm:$0xff]  ;;  %v17460_v24 = vld [vmem:[#allocation2 + $0xd8] sm:$0xff] }
 0x572   : > { %15692 = vmatpush3.bf16.msra.mxu1 %v15689_v56  ;;  %14300 = vmatprep.mubr.f32.mxu1 %v17440_v31  ;;  %v6019_v56 = vld [vmem:[#allocation5 + $0x458] sm:$0xff] }
 0x573   : > { %15694 = vmatprep.subr.bf16.mxu1 %v15693_v1  ;;  %v15709_v35 = vpack.c.bf16 %v6019_v56, %v6018_v40  ;;  %15738 = vmatprep.subr.bf16.mxu0 %v15737_v38  ;;  %v17450_v31 = vld [vmem:[#allocation2 + $0x88] sm:$0xff]  ;;  %v17467_v40 = vld [vmem:[#allocation2 + $0x110] sm:$0xff] }
 0x575   : > { %14301 = vmatmul.mubr.f32.gmra.mrb[2].mxu1 %v17441_v17  ;;  %15740 = vmatpush3.bf16.msra.mxu0 %v15737_v38  ;;  %v17456_v17 = vld [vmem:[#allocation2 + $0xb8] sm:$0xff]  ;;  %v17468_v38 = vld [vmem:[#allocation2 + $0x8] sm:$0xff] }
 0x576   : > { %14303 = vmatprep.mubr.f32.mxu1 %v17442_v34  ;;  %15696 = vmatpush3.bf16.msra.mxu1 %v15693_v1  ;;  %v17447_v1 = vld [vmem:[#allocation2 + $0x70] sm:$0xff]  ;;  %v17457_v34 = vld [vmem:[#allocation2 + $0xc0] sm:$0xff] }
 0x577   : > { %15698 = vmatprep.subr.bf16.mxu1 %v15697_v30  ;;  %15742 = vmatprep.subr.bf16.mxu0 %v15741_v55 }
 0x579   : > { %14304 = vmatmul.mubr.f32.gmra.mrb[4].mxu1 %v17443_v58  ;;  %15744 = vmatpush3.bf16.msra.mxu0 %v15741_v55  ;;  %v17464_v58 = vld [vmem:[#allocation2 + $0xf8] sm:$0xff]  ;;  %v6576_v55 = vld [vmem:[#allocation7 + $0x60] sm:$0xff] }
 0x57a   : > { %14306 = vmatprep.mubr.f32.mxu1 %v17444_v21  ;;  %15700 = vmatpush3.bf16.msra.mxu1 %v15697_v30  ;;  %v15717_v30 = vpack.c.bf16 %v6023_v50, %v6022_v42  ;;  %v17465_v21 = vld [vmem:[#allocation2 + $0x100] sm:$0xff]  ;;  %v15777_v12 = vpack.c.bf16 %v6577_v37, %v6576_v55 }
 0x57b   : > { %15702 = vmatprep.subr.bf16.mxu1 %v15701_v51  ;;  %15746 = vmatprep.subr.bf16.mxu0 %v15745_v28  ;;  %v19554_v50 = vld [vmem:[%s21815_s4] ss:$0 sm:$0xff] }
 0x57d   : > { %14307 = vmatmul.mubr.f32.gmra.mrb[6].mxu1 %v17445_v10  ;;  %15748 = vmatpush3.bf16.msra.mxu0 %v15745_v28  ;;  %v15769_v10 = vpack.c.bf16 %v6573_v61, %v6572_v46  ;;  %v7049_v28 = vld [vmem:[#allocation7 + $0x108] sm:$0xff] }
 0x57e   : > { %14309 = vmatprep.mubr.f32.mxu1 %v17446_v20  ;;  %15704 = vmatpush3.bf16.msra.mxu1 %v15701_v51  ;;  %v17458_v51 = vld [vmem:[#allocation2 + $0xc8] sm:$0xff]  ;;  %v6574_v20 = vld [vmem:[#allocation7 + $0x50] sm:$0xff] }
 0x57f   : > { %15706 = vmatprep.subr.bf16.mxu1 %v15705_v44 }
 0x581   : > { %14310 = vmatmul.mubr.f32.gmra.mrb[8].mxu1 %v17447_v1  ;;  %v6579_v1 = vld [vmem:[#allocation7 + $0x78] sm:$0xff] }
 0x582   : > { %14312 = vmatprep.mubr.f32.mxu1 %v17448_v6  ;;  %15708 = vmatpush3.bf16.msra.mxu1 %v15705_v44  ;;  %v17466_v44 = vld [vmem:[#allocation2 + $0x108] sm:$0xff]  ;;  %v15781_v6 = vpack.c.bf16 %v6579_v1, %v6578_v23 }
 0x583   : > { %15710 = vmatprep.subr.bf16.mxu1 %v15709_v35 }
 0x585   : > { %14313 = vmatmul.mubr.f32.gmra.mrb[10].mxu1 %v17449_v26 }
 0x586   : > { %14315 = vmatprep.mubr.f32.mxu1 %v17450_v31  ;;  %15712 = vmatpush3.bf16.msra.mxu1 %v15709_v35  ;;  %v6575_v35 = vld [vmem:[#allocation7 + $0x58] sm:$0xff] }
 0x587   : > { %15714 = vmatprep.subr.bf16.mxu1 %v15713_v41  ;;  %v15773_v52 = vpack.c.bf16 %v6575_v35, %v6574_v20 }
 0x589   : > { %14316 = vmatmul.mubr.f32.gmra.mrb[12].mxu1 %v17451_v47 }
 0x58a   : > { %14318 = vmatprep.mubr.f32.mxu1 %v17452_v36  ;;  %15716 = vmatpush3.bf16.msra.mxu1 %v15713_v41  ;;  %v7048_v41 = vld [vmem:[#allocation7 + $0x100] sm:$0xff] }
 0x58b   : > { %15718 = vmatprep.subr.bf16.mxu1 %v15717_v30  ;;  %v19548_v42 = vpack.c.bf16 %v7049_v28, %v7048_v41 }
 0x58d   : > { %14319 = vmatmul.mubr.f32.gmra.mrb[14].mxu1 %v17453_v57 }
 0x58e   : > { %14321 = vmatprep.mubr.f32.mxu1 %v17454_v3  ;;  %15720 = vmatpush3.bf16.msra.mxu1 %v15717_v30 }
 0x591   : > { %14322 = vmatmul.mubr.f32.gmra.mrb[16].mxu1 %v17455_v13 }
 0x592   : > { %14324 = vmatprep.mubr.f32.mxu1 %v17456_v17 }
 0x595   : > { %14325 = vmatmul.mubr.f32.gmra.mrb[18].mxu1 %v17457_v34 }
 0x596   : > { %14327 = vmatprep.mubr.f32.mxu1 %v17458_v51 }
 0x599   : > { %14328 = vmatmul.mubr.f32.gmra.mrb[20].mxu1 %v17459_v60 }
 0x59a   : > { %14330 = vmatprep.mubr.f32.mxu1 %v17460_v24 }
 0x59d   : > { %14331 = vmatmul.mubr.f32.gmra.mrb[22].mxu1 %v17461_v9 }
 0x59e   : > { %14333 = vmatprep.mubr.f32.mxu1 %v17462_v43 }
 0x5a1   : > { %14334 = vmatmul.mubr.f32.gmra.mrb[24].mxu1 %v17463_v27 }
 0x5a2   : > { %14336 = vmatprep.mubr.f32.mxu1 %v17464_v58 }
 0x5a5   : > { %14337 = vmatmul.mubr.f32.gmra.mrb[26].mxu1 %v17465_v21 }
 0x5a6   : > { %14339 = vmatprep.mubr.f32.mxu1 %v17466_v44 }
 0x5a9   : > { %14340 = vmatmul.mubr.f32.gmra.mrb[28].mxu1 %v17467_v40 }
 0x5aa   : > { %14342 = vmatprep.mubr.f32.mxu1 %v17468_v38 }
 0x5ad   : > { %14343 = vmatmul.mubr.f32.gmra.mrb[30].mxu1 %v17468_v38 }
 0x5ae   : > { %14377 = vmatprep.mubr.f32.mxu1 %v22468_v14  ;;  %v22497_v14 = vld [vmem:[#allocation125_spill] sm:$0xff] }
 0x5b1   : > { %14378 = vmatmul.mubr.f32.vlgmr.msra.gmra.mrb[0].mxu1 %v22469_v63  ;;  %v22498_v63 = vld [vmem:[#allocation126_spill] sm:$0xff] }
 0x5b2   : > { %14380 = vmatprep.mubr.f32.mxu1 %v22470_v59  ;;  %v22499_v59 = vld [vmem:[#allocation127_spill] sm:$0xff] }
 0x5b5   : > { %14381 = vmatmul.mubr.f32.gmra.mrb[2].mxu1 %v22471_v49  ;;  %v22500_v49 = vld [vmem:[#allocation128_spill] sm:$0xff] }
 0x5b6   : > { %14383 = vmatprep.mubr.f32.mxu1 %v22472_v62  ;;  %v22501_v62 = vld [vmem:[#allocation100_spill] sm:$0xff] }
 0x5b9   : > { %14384 = vmatmul.mubr.f32.gmra.mrb[4].mxu1 %v22473_v8  ;;  %v22502_v8 = vld [vmem:[#allocation99_spill] sm:$0xff] }
 0x5ba   : > { %14386 = vmatprep.mubr.f32.mxu1 %v22474_v32  ;;  %v22503_v32 = vld [vmem:[#allocation98_spill] sm:$0xff] }
 0x5bd   : > { %14387 = vmatmul.mubr.f32.gmra.mrb[6].mxu1 %v22475_v0  ;;  %v6595_v0 = vld [vmem:[#allocation7 + $0xf0] sm:$0xff] }
 0x5be   : > { %14389 = vmatprep.mubr.f32.mxu1 %v22476_v18  ;;  %v6596_v18 = vld [vmem:[#allocation7 + $0xf8] sm:$0xff] }
 0x5c1   : > { %14390 = vmatmul.mubr.f32.gmra.mrb[8].mxu1 %v19299_v16  ;;  %v22495_v16 = vld [vmem:[#allocation90_spill] sm:$0xff] }
 0x5c2   : > { %14392 = vmatprep.mubr.f32.mxu1 %v22477_v22  ;;  %v15749_v22 = vpack.c.bf16 %v6596_v18, %v6595_v0 }
 0x5c4   : > { %15750 = vmatprep.subr.bf16.mxu0 %v15749_v22 }
 0x5c5   : > { %14393 = vmatmul.mubr.f32.gmra.mrb[10].mxu1 %v19307_v25  ;;  %v22496_v25 = vld [vmem:[#allocation124_spill] sm:$0xff]  ;;  %15752 = vmatpush3.bf16.msra.mxu0 %v15749_v22 }
 0x5c6   : > { %14395 = vmatprep.mubr.f32.mxu1 %v22478_v2  ;;  %v6564_v2 = vld [vmem:[#allocation7] sm:$0xff] }
 0x5c8   : > { %14458 = vmatmul.mubr.f32.vlgmr.msra.gmra.mrb[32].mxu0 %v17468_v38 }
 0x5c9   : > { %14396 = vmatmul.mubr.f32.gmra.mrb[12].mxu1 %v22479_v11  ;;  %v6565_v11 = vld [vmem:[#allocation7 + $0x8] sm:$0xff] }
 0x5ca   : > { %14398 = vmatprep.mubr.f32.mxu1 %v22480_v29  ;;  %v15753_v29 = vpack.c.bf16 %v6565_v11, %v6564_v2 }
 0x5cc   : > { %15754 = vmatprep.subr.bf16.mxu0 %v15753_v29 }
 0x5cd   : > { %14399 = vmatmul.mubr.f32.gmra.mrb[14].mxu1 %v22481_v45  ;;  %15756 = vmatpush3.bf16.msra.mxu0 %v15753_v29  ;;  %v6567_v45 = vld [vmem:[#allocation7 + $0x18] sm:$0xff] }
 0x5ce   : > { %14401 = vmatprep.mubr.f32.mxu1 %v22482_v54 }
 0x5d1   : > { %14402 = vmatmul.mubr.f32.gmra.mrb[16].mxu1 %v22483_v53  ;;  %v6568_v53 = vld [vmem:[#allocation7 + $0x20] sm:$0xff] }
 0x5d2   : > { %14404 = vmatprep.mubr.f32.mxu1 %v22484_v15  ;;  %v6569_v15 = vld [vmem:[#allocation7 + $0x28] sm:$0xff] }
 0x5d5   : > { %14405 = vmatmul.mubr.f32.gmra.mrb[18].mxu1 %v22485_v7  ;;  %v15761_v7 = vpack.c.bf16 %v6569_v15, %v6568_v53 }
 0x5d6   : > { %14407 = vmatprep.mubr.f32.mxu1 %v22486_v48  ;;  %v6570_v48 = vld [vmem:[#allocation7 + $0x30] sm:$0xff] }
 0x5d9   : > { %14408 = vmatmul.mubr.f32.gmra.mrb[20].mxu1 %v22495_v16 }
 0x5da   : > { %14410 = vmatprep.mubr.f32.mxu1 %v22496_v25 }
 0x5dd   : > { %14411 = vmatmul.mubr.f32.gmra.mrb[22].mxu1 %v22497_v14 }
 0x5de   : > { %14413 = vmatprep.mubr.f32.mxu1 %v22498_v63 }
 0x5e1   : > { %14414 = vmatmul.mubr.f32.gmra.mrb[24].mxu1 %v22499_v59 }
 0x5e2   : > { %14416 = vmatprep.mubr.f32.mxu1 %v22500_v49 }
 0x5e5   : > { %14417 = vmatmul.mubr.f32.gmra.mrb[26].mxu1 %v19371_v19  ;;  %v6566_v19 = vld [vmem:[#allocation7 + $0x10] sm:$0xff] }
 0x5e6   : > { %14419 = vmatprep.mubr.f32.mxu1 %v22501_v62  ;;  %v15757_v54 = vpack.c.bf16 %v6567_v45, %v6566_v19 }
 0x5e8   : > { %15758 = vmatprep.subr.bf16.mxu0 %v15757_v54 }
 0x5e9   : > { %14420 = vmatmul.mubr.f32.gmra.mrb[28].mxu1 %v19481_v33  ;;  %15760 = vmatpush3.bf16.msra.mxu0 %v15757_v54  ;;  %v6571_v33 = vld [vmem:[#allocation7 + $0x38] sm:$0xff] }
 0x5ea   : > { %14422 = vmatprep.mubr.f32.mxu1 %v22502_v8  ;;  %15762 = vmatprep.subr.bf16.mxu0 %v15761_v7  ;;  %v15765_v56 = vpack.c.bf16 %v6571_v33, %v6570_v48 }
 0x5ed   : > { %14423 = vmatmul.mubr.f32.gmra.mrb[30].mxu1 %v22503_v32  ;;  %15764 = vmatpush3.bf16.msra.mxu0 %v15761_v7 }
 0x5ee   : > { %9671 = vmatprep.mubr.f32.mxu1 %v17468_v38  ;;  %15766 = vmatprep.subr.bf16.mxu0 %v15765_v56 }
 0x5f1   : > { %15768 = vmatpush3.bf16.msra.mxu0 %v15765_v56 }
 0x5f2   : > { %15770 = vmatprep.subr.bf16.mxu0 %v15769_v10 }
 0x5f5   : > { %15772 = vmatpush3.bf16.msra.mxu0 %v15769_v10 }
 0x5f6   : > { %15774 = vmatprep.subr.bf16.mxu0 %v15773_v52 }
 0x5f9   : > { %15776 = vmatpush3.bf16.msra.mxu0 %v15773_v52 }
 0x5fa   : > { %15778 = vmatprep.subr.bf16.mxu0 %v15777_v12 }
 0x5fd   : > { %15780 = vmatpush3.bf16.msra.mxu0 %v15777_v12 }
 0x5fe   : > { %15782 = vmatprep.subr.bf16.mxu0 %v15781_v6 }
 0x601   : > { %15784 = vmatpush3.bf16.msra.mxu0 %v15781_v6 }
 0x602   : > { %15786 = vmatprep.subr.bf16.mxu0 %v19548_v42 }
 0x684   : > { %v14379_v26 = vpop.f32.mrb[0].mxu1 }
 0x685   : > { %v6289_v31 = vadd.f32 %v14379_v26, %v19554_v50  ;;  %v6090_v30 = vpop.f32.mrb[1].mxu1 }
 0x686   : > { %v6288_v47 = vadd.f32 %v19554_v50, %v6090_v30 }
 0x687   : > { %v19558_v36 = vmax.f32 %v6289_v31, 0.0 }
 0x688   : > { %v19560_v57 = vmax.f32 %v6288_v47, 0.0  ;;  %v14382_v3 = vpop.f32.mrb[2].mxu1 }
 0x689   : > { %6353 = vst [vmem:[#allocation2 + $0x20] sm:$0xff] %v19558_v36  ;;  %v6291_v13 = vadd.f32 %v14382_v3, %v19554_v50  ;;  %v6100_v17 = vpop.f32.mrb[3].mxu1 }
 0x68a   : > { %6352 = vst [vmem:[#allocation2 + $0x18] sm:$0xff] %v19560_v57  ;;  %v6290_v34 = vadd.f32 %v19554_v50, %v6100_v17  ;;  %14460 = vmatprep.mubr.f32.mxu0 %v19560_v57 }
 0x68b   : > { %v19567_v51 = vmax.f32 %v6291_v13, 0.0  ;;  %14461 = vmatmul.mubr.f32.gmra.mrb[34].mxu0 %v19558_v36 }
 0x68c   : > { %v19570_v60 = vmax.f32 %v6290_v34, 0.0  ;;  %v14385_v24 = vpop.f32.mrb[4].mxu1 }
 0x68d   : > { %6355 = vst [vmem:[#allocation2 + $0x30] sm:$0xff] %v19567_v51  ;;  %v6293_v9 = vadd.f32 %v14385_v24, %v19554_v50  ;;  %v6110_v43 = vpop.f32.mrb[5].mxu1 }
 0x68e   : > { %6354 = vst [vmem:[#allocation2 + $0x28] sm:$0xff] %v19570_v60  ;;  %v6292_v27 = vadd.f32 %v19554_v50, %v6110_v43  ;;  %14463 = vmatprep.mubr.f32.mxu0 %v19570_v60 }
 0x68f   : > { %v19577_v58 = vmax.f32 %v6293_v9, 0.0  ;;  %14464 = vmatmul.mubr.f32.gmra.mrb[36].mxu0 %v19567_v51 }
 0x690   : > { %v19580_v21 = vmax.f32 %v6292_v27, 0.0  ;;  %v14388_v44 = vpop.f32.mrb[6].mxu1 }
 0x691   : > { %6357 = vst [vmem:[#allocation2 + $0x40] sm:$0xff] %v19577_v58  ;;  %v6295_v40 = vadd.f32 %v14388_v44, %v19554_v50  ;;  %v6120_v38 = vpop.f32.mrb[7].mxu1 }
 0x692   : > { %6356 = vst [vmem:[#allocation2 + $0x38] sm:$0xff] %v19580_v21  ;;  %v6294_v16 = vadd.f32 %v19554_v50, %v6120_v38  ;;  %14466 = vmatprep.mubr.f32.mxu0 %v19580_v21 }
 0x693   : > { %v19587_v25 = vmax.f32 %v6295_v40, 0.0  ;;  %14467 = vmatmul.mubr.f32.gmra.mrb[38].mxu0 %v19577_v58 }
 0x694   : > { %v19590_v14 = vmax.f32 %v6294_v16, 0.0  ;;  %v14391_v63 = vpop.f32.mrb[8].mxu1 }
 0x695   : > { %6359 = vst [vmem:[#allocation2 + $0x50] sm:$0xff] %v19587_v25  ;;  %v6297_v59 = vadd.f32 %v14391_v63, %v19554_v50  ;;  %v6130_v49 = vpop.f32.mrb[9].mxu1 }
 0x696   : > { %6358 = vst [vmem:[#allocation2 + $0x48] sm:$0xff] %v19590_v14  ;;  %v6296_v62 = vadd.f32 %v19554_v50, %v6130_v49  ;;  %14469 = vmatprep.mubr.f32.mxu0 %v19590_v14 }
 0x697   : > { %v19597_v0 = vmax.f32 %v6297_v59, 0.0  ;;  %14470 = vmatmul.mubr.f32.gmra.mrb[40].mxu0 %v19587_v25 }
 0x698   : > { %v19600_v18 = vmax.f32 %v6296_v62, 0.0  ;;  %v14394_v22 = vpop.f32.mrb[10].mxu1 }
 0x699   : > { %6361 = vst [vmem:[#allocation2 + $0x60] sm:$0xff] %v19597_v0  ;;  %v6299_v2 = vadd.f32 %v14394_v22, %v19554_v50  ;;  %v6140_v11 = vpop.f32.mrb[11].mxu1 }
 0x69a   : > { %6360 = vst [vmem:[#allocation2 + $0x58] sm:$0xff] %v19600_v18  ;;  %v6298_v29 = vadd.f32 %v19554_v50, %v6140_v11  ;;  %14472 = vmatprep.mubr.f32.mxu0 %v19600_v18 }
 0x69b   : > { %v19607_v19 = vmax.f32 %v6299_v2, 0.0  ;;  %14473 = vmatmul.mubr.f32.gmra.mrb[42].mxu0 %v19597_v0 }
 0x69c   : > { %v19610_v45 = vmax.f32 %v6298_v29, 0.0  ;;  %v14397_v54 = vpop.f32.mrb[12].mxu1 }
 0x69d   : > { %6363 = vst [vmem:[#allocation2 + $0x70] sm:$0xff] %v19607_v19  ;;  %v6301_v53 = vadd.f32 %v14397_v54, %v19554_v50  ;;  %v6150_v15 = vpop.f32.mrb[13].mxu1 }
 0x69e   : > { %6362 = vst [vmem:[#allocation2 + $0x68] sm:$0xff] %v19610_v45  ;;  %v6300_v7 = vadd.f32 %v19554_v50, %v6150_v15  ;;  %14475 = vmatprep.mubr.f32.mxu0 %v19610_v45 }
 0x69f   : > { %v19617_v48 = vmax.f32 %v6301_v53, 0.0  ;;  %14476 = vmatmul.mubr.f32.gmra.mrb[44].mxu0 %v19607_v19 }
 0x6a0   : > { %v19620_v33 = vmax.f32 %v6300_v7, 0.0  ;;  %v14400_v56 = vpop.f32.mrb[14].mxu1 }
 0x6a1   : > { %6365 = vst [vmem:[#allocation2 + $0x80] sm:$0xff] %v19617_v48  ;;  %v6303_v46 = vadd.f32 %v14400_v56, %v19554_v50  ;;  %v6160_v61 = vpop.f32.mrb[15].mxu1 }
 0x6a2   : > { %6364 = vst [vmem:[#allocation2 + $0x78] sm:$0xff] %v19620_v33  ;;  %v6302_v10 = vadd.f32 %v19554_v50, %v6160_v61  ;;  %14478 = vmatprep.mubr.f32.mxu0 %v19620_v33 }
 0x6a3   : > { %v19627_v20 = vmax.f32 %v6303_v46, 0.0  ;;  %14479 = vmatmul.mubr.f32.gmra.mrb[46].mxu0 %v19617_v48 }
 0x6a4   : > { %v19630_v35 = vmax.f32 %v6302_v10, 0.0  ;;  %v14403_v52 = vpop.f32.mrb[16].mxu1 }
 0x6a5   : > { %6367 = vst [vmem:[#allocation2 + $0x90] sm:$0xff] %v19627_v20  ;;  %v6305_v55 = vadd.f32 %v14403_v52, %v19554_v50  ;;  %v6170_v37 = vpop.f32.mrb[17].mxu1 }
 0x6a6   : > { %6366 = vst [vmem:[#allocation2 + $0x88] sm:$0xff] %v19630_v35  ;;  %v6304_v12 = vadd.f32 %v19554_v50, %v6170_v37  ;;  %14481 = vmatprep.mubr.f32.mxu0 %v19630_v35 }
 0x6a7   : > { %v19637_v23 = vmax.f32 %v6305_v55, 0.0  ;;  %14482 = vmatmul.mubr.f32.gmra.mrb[48].mxu0 %v19627_v20 }
 0x6a8   : > { %v19640_v1 = vmax.f32 %v6304_v12, 0.0  ;;  %v14406_v6 = vpop.f32.mrb[18].mxu1 }
 0x6a9   : > { %22504 = vst [vmem:[#allocation93_spill] sm:$0xff] %v19637_v23  ;;  %6369 = vst [vmem:[#allocation2 + $0xa0] sm:$0xff] %v19637_v23  ;;  %v6307_v41 = vadd.f32 %v14406_v6, %v19554_v50  ;;  %v6180_v28 = vpop.f32.mrb[19].mxu1 }
 0x6aa   : > { %22505 = vst [vmem:[#allocation102_spill] sm:$0xff] %v19640_v1  ;;  %6368 = vst [vmem:[#allocation2 + $0x98] sm:$0xff] %v19640_v1  ;;  %v6306_v26 = vadd.f32 %v19554_v50, %v6180_v28  ;;  %14484 = vmatprep.mubr.f32.mxu0 %v19640_v1  ;;  %v7051_v28 = vld [vmem:[#allocation7 + $0x118] sm:$0xff]  ;;  %v22557_v1 = vld [vmem:[#allocation52_spill] sm:$0xff] }
 0x6ab   : > { %v19647_v31 = vmax.f32 %v6307_v41, 0.0  ;;  %14485 = vmatmul.mubr.f32.gmra.mrb[50].mxu0 %v19637_v23  ;;  %v7050_v41 = vld [vmem:[#allocation7 + $0x110] sm:$0xff] }
 0x6ac   : > { %v19650_v30 = vmax.f32 %v6306_v26, 0.0  ;;  %v14409_v47 = vpop.f32.mrb[20].mxu1 }
 0x6ad   : > { %22506 = vst [vmem:[#allocation101_spill] sm:$0xff] %v19647_v31  ;;  %6371 = vst [vmem:[#allocation2 + $0xb0] sm:$0xff] %v19647_v31  ;;  %v6309_v3 = vadd.f32 %v14409_v47, %v19554_v50  ;;  %v6190_v13 = vpop.f32.mrb[21].mxu1  ;;  %v6422_v47 = vld [vmem:[#allocation2 + $0x17] sm:$0xff] }
 0x6ae   : > { %22507 = vst [vmem:[#allocation104_spill] sm:$0xff] %v19650_v30  ;;  %6370 = vst [vmem:[#allocation2 + $0xa8] sm:$0xff] %v19650_v30  ;;  %v6308_v17 = vadd.f32 %v19554_v50, %v6190_v13  ;;  %14487 = vmatprep.mubr.f32.mxu0 %v19650_v30  ;;  %v22520_v13 = vld [vmem:[#allocation16_spill] sm:$0xff] }
 0x6af   : > { %v19657_v34 = vmax.f32 %v6309_v3, 0.0  ;;  %14488 = vmatmul.mubr.f32.gmra.mrb[52].mxu0 %v19647_v31  ;;  %v7326_v31 = vld [vmem:[#allocation7 + $0x1a0] sm:$0xff]  ;;  %v7327_v30 = vld [vmem:[#allocation7 + $0x1a8] sm:$0xff] }
 0x6b0   : > { %v19660_v24 = vmax.f32 %v6308_v17, 0.0  ;;  %v14412_v9 = vpop.f32.mrb[22].mxu1  ;;  %v15789_v17 = vpack.c.bf16 %v7051_v28, %v7050_v41  ;;  %v6427_v28 = vld [vmem:[#allocation2 + $0x3f] sm:$0xff] }
 0x6b1   : > { %22508 = vst [vmem:[#allocation103_spill] sm:$0xff] %v19657_v34  ;;  %6373 = vst [vmem:[#allocation2 + $0xc0] sm:$0xff] %v19657_v34  ;;  %v6311_v43 = vadd.f32 %v14412_v9, %v19554_v50  ;;  %v6200_v27 = vpop.f32.mrb[23].mxu1 }
 0x6b2   : > { %22509 = vst [vmem:[#allocation106_spill] sm:$0xff] %v19660_v24  ;;  %6372 = vst [vmem:[#allocation2 + $0xb8] sm:$0xff] %v19660_v24  ;;  %v6310_v44 = vadd.f32 %v19554_v50, %v6200_v27  ;;  %14490 = vmatprep.mubr.f32.mxu0 %v19660_v24  ;;  %v7052_v27 = vld [vmem:[#allocation7 + $0x120] sm:$0xff]  ;;  %v6495_v24 = vld [vmem:[#allocation2 + $0x21] sm:$0xff] }
 0x6b3   : > { %v19667_v40 = vmax.f32 %v6311_v43, 0.0  ;;  %14491 = vmatmul.mubr.f32.gmra.mrb[54].mxu0 %v19657_v34  ;;  %v6423_v43 = vld [vmem:[#allocation2 + $0x1f] sm:$0xff] }
 0x6b4   : > { %v19670_v38 = vmax.f32 %v6310_v44, 0.0  ;;  %v14415_v16 = vpop.f32.mrb[24].mxu1  ;;  %v7053_v44 = vld [vmem:[#allocation7 + $0x128] sm:$0xff] }
 0x6b5   : > { %22510 = vst [vmem:[#allocation105_spill] sm:$0xff] %v19667_v40  ;;  %6375 = vst [vmem:[#allocation2 + $0xd0] sm:$0xff] %v19667_v40  ;;  %v6313_v63 = vadd.f32 %v14415_v16, %v19554_v50  ;;  %v6210_v59 = vpop.f32.mrb[25].mxu1  ;;  %v22522_v16 = vld [vmem:[#allocation18_spill] sm:$0xff] }
 0x6b6   : > { %22511 = vst [vmem:[#allocation108_spill] sm:$0xff] %v19670_v38  ;;  %6374 = vst [vmem:[#allocation2 + $0xc8] sm:$0xff] %v19670_v38  ;;  %v6312_v49 = vadd.f32 %v19554_v50, %v6210_v59  ;;  %14493 = vmatprep.mubr.f32.mxu0 %v19670_v38  ;;  %v22523_v59 = vld [vmem:[#allocation17_spill] sm:$0xff]  ;;  %v22552_v38 = vld [vmem:[#allocation48_spill] sm:$0xff] }
 0x6b7   : > { %v19677_v62 = vmax.f32 %v6313_v63, 0.0  ;;  %14494 = vmatmul.mubr.f32.gmra.mrb[56].mxu0 %v19667_v40  ;;  %v6424_v63 = vld [vmem:[#allocation2 + $0x27] sm:$0xff]  ;;  %v6494_v40 = vld [vmem:[#allocation2 + $0x19] sm:$0xff] }
 0x6b8   : > { %v19680_v22 = vmax.f32 %v6312_v49, 0.0  ;;  %v14418_v2 = vpop.f32.mrb[26].mxu1  ;;  %v19726_v49 = vmul.f32 %v6423_v43, %v22523_v59  ;;  %v22527_v43 = vld [vmem:[#allocation21_spill] sm:$0xff] }
 0x6b9   : > { %22512 = vst [vmem:[#allocation107_spill] sm:$0xff] %v19677_v62  ;;  %6377 = vst [vmem:[#allocation2 + $0xe0] sm:$0xff] %v19677_v62  ;;  %v6315_v11 = vadd.f32 %v14418_v2, %v19554_v50  ;;  %v6220_v29 = vpop.f32.mrb[27].mxu1  ;;  %v15793_v2 = vpack.c.bf16 %v7053_v44, %v7052_v27  ;;  %v19742_v27 = vmul.f32 %v6427_v28, %v22527_v43  ;;  %v22528_v44 = vld [vmem:[#allocation24_spill] sm:$0xff]  ;;  %v7058_v59 = vld [vmem:[#allocation7 + $0x150] sm:$0xff] }
 0x6ba   : > { %22513 = vst [vmem:[#allocation110_spill] sm:$0xff] %v19680_v22  ;;  %6376 = vst [vmem:[#allocation2 + $0xd8] sm:$0xff] %v19680_v22  ;;  %v6314_v54 = vadd.f32 %v19554_v50, %v6220_v29  ;;  %14496 = vmatprep.mubr.f32.mxu0 %v19680_v22  ;;  %v7060_v28 = vld [vmem:[#allocation7 + $0x160] sm:$0xff]  ;;  %v6443_v4 = vld [vmem:[#allocation2 + $0xbf] sm:$0xff] }
 0x6bb   : > { %v19687_v53 = vmax.f32 %v6315_v11, 0.0  ;;  %14497 = vmatmul.mubr.f32.gmra.mrb[58].mxu0 %v19677_v62  ;;  %v22524_v11 = vld [vmem:[#allocation20_spill] sm:$0xff]  ;;  %v7325_v22 = vld [vmem:[#allocation7 + $0x198] sm:$0xff] }
 0x6bc   : > { %v19690_v15 = vmax.f32 %v6314_v54, 0.0  ;;  %v14421_v7 = vpop.f32.mrb[28].mxu1  ;;  %v19729_v29 = vmul.f32 %v6424_v63, %v22524_v11  ;;  %v6425_v54 = vld [vmem:[#allocation2 + $0x2f] sm:$0xff] }
 0x6bd   : > { %22514 = vst [vmem:[#allocation109_spill] sm:$0xff] %v19687_v53  ;;  %6379 = vst [vmem:[#allocation2 + $0xf0] sm:$0xff] %v19687_v53  ;;  %v6317_v56 = vadd.f32 %v14421_v7, %v19554_v50  ;;  %v6230_v46 = vpop.f32.mrb[29].mxu1  ;;  %v7054_v7 = vld [vmem:[#allocation7 + $0x130] sm:$0xff]  ;;  %v6429_v63 = vld [vmem:[#allocation2 + $0x4f] sm:$0xff] }
 0x6be   : > { %22515 = vst [vmem:[#allocation112_spill] sm:$0xff] %v19690_v15  ;;  %6378 = vst [vmem:[#allocation2 + $0xe8] sm:$0xff] %v19690_v15  ;;  %v6316_v61 = vadd.f32 %v19554_v50, %v6230_v46  ;;  %14499 = vmatprep.mubr.f32.mxu0 %v19690_v15  ;;  %v6426_v46 = vld [vmem:[#allocation2 + $0x37] sm:$0xff]  ;;  %v7059_v11 = vld [vmem:[#allocation7 + $0x158] sm:$0xff] }
 0x6bf   : > { %v19697_v10 = vmax.f32 %v6317_v56, 0.0  ;;  %14500 = vmatmul.mubr.f32.gmra.mrb[60].mxu0 %v19687_v53  ;;  %v7055_v56 = vld [vmem:[#allocation7 + $0x138] sm:$0xff] }
 0x6c0   : > { %v19700_v52 = vmax.f32 %v6316_v61, 0.0  ;;  %v14424_v55 = vpop.f32.mrb[30].mxu1 }
 0x6c1   : > { %22516 = vst [vmem:[#allocation111_spill] sm:$0xff] %v19697_v10  ;;  %6381 = vst [vmem:[#allocation2 + $0x100] sm:$0xff] %v19697_v10  ;;  %v19704_v37 = vadd.f32 %v14424_v55, %v19554_v50  ;;  %v6240_v12 = vpop.f32.mrb[31].mxu1  ;;  %v15797_v55 = vpack.c.bf16 %v7055_v56, %v7054_v7  ;;  %v22529_v7 = vld [vmem:[#allocation23_spill] sm:$0xff] }
 0x6c2   : > { %22517 = vst [vmem:[#allocation114_spill] sm:$0xff] %v19700_v52  ;;  %6380 = vst [vmem:[#allocation2 + $0xf8] sm:$0xff] %v19700_v52  ;;  %v19708_v6 = vadd.f32 %v19554_v50, %v6240_v12  ;;  %14502 = vmatprep.mubr.f32.mxu0 %v19700_v52  ;;  %v22521_v50 = vld [vmem:[#allocation15_spill] sm:$0xff]  ;;  %v22526_v12 = vld [vmem:[#allocation22_spill] sm:$0xff]  ;;  %v19750_v56 = vmul.f32 %v6429_v63, %v22529_v7 }
 0x6c3   : > { %22518 = vst [vmem:[#allocation113_spill] sm:$0xff] %v19704_v37  ;;  %v22087_v26 = vmax.f32 %v19704_v37, 0.0  ;;  %14503 = vmatmul.mubr.f32.gmra.mrb[62].mxu0 %v19697_v10  ;;  %v19720_v9 = vmul.f32 %v6422_v47, %v22521_v50  ;;  %v19737_v41 = vmul.f32 %v6426_v46, %v22526_v12  ;;  %v7056_v47 = vld [vmem:[#allocation7 + $0x140] sm:$0xff]  ;;  %v6428_v50 = vld [vmem:[#allocation2 + $0x47] sm:$0xff]  ;;  %v6431_v12 = vld [vmem:[#allocation2 + $0x5f] sm:$0xff] }
 0x6c4   : > { %22519 = vst [vmem:[#allocation115_spill] sm:$0xff] %v19708_v6  ;;  %v22088_v3 = vmax.f32 %v19708_v6, 0.0  ;;  %14537 = vmatprep.mubr.f32.mxu0 %v22520_v13  ;;  %v7057_v13 = vld [vmem:[#allocation7 + $0x148] sm:$0xff]  ;;  %v22530_v46 = vld [vmem:[#allocation26_spill] sm:$0xff] }
 0x6c5   : > { %6383 = vst [vmem:[#allocation2 + $0x110] sm:$0xff] %v22087_v26  ;;  %v6434_v7 = vld [vmem:[#allocation2 + $0x77] sm:$0xff]  ;;  %v6445_v37 = vld [vmem:[#allocation2 + $0xcf] sm:$0xff]  ;;  %v6447_v10 = vld [vmem:[#allocation2 + $0xdf] sm:$0xff] }
 0x6c6   : > { %6382 = vst [vmem:[#allocation2 + $0x108] sm:$0xff] %v22088_v3  ;;  %v22535_v3 = vld [vmem:[#allocation29_spill] sm:$0xff]  ;;  %v6449_v53 = vld [vmem:[#allocation2 + $0xef] sm:$0xff] }
 0x6c7   : > { %14538 = vmatmul.mubr.f32.vlgmr.msra.gmra.mrb[32].mxu0 %v22522_v16  ;;  %v19745_v16 = vmul.f32 %v6428_v50, %v22528_v44  ;;  %v22531_v50 = vld [vmem:[#allocation25_spill] sm:$0xff]  ;;  %v22532_v44 = vld [vmem:[#allocation28_spill] sm:$0xff] }
 0x6c8   : > { %15788 = vmatpush3.bf16.msra.mxu0 %v19548_v42  ;;  %14540 = vmatprep.mubr.f32.mxu0 %v19720_v9  ;;  %v22525_v42 = vld [vmem:[#allocation19_spill] sm:$0xff]  ;;  %v19758_v43 = vmul.f32 %v6431_v12, %v22531_v50  ;;  %v22534_v12 = vld [vmem:[#allocation30_spill] sm:$0xff] }
 0x6c9   : > { %15790 = vmatprep.subr.bf16.mxu0 %v15789_v17  ;;  %v19734_v61 = vmul.f32 %v6425_v54, %v22525_v42  ;;  %v6430_v54 = vld [vmem:[#allocation2 + $0x57] sm:$0xff]  ;;  %v19769_v50 = vmul.f32 %v6434_v7, %v22534_v12  ;;  %v6451_v62 = vld [vmem:[#allocation2 + $0xff] sm:$0xff] }
 0x6ca   : > { %v19753_v42 = vmul.f32 %v6430_v54, %v22530_v46  ;;  %v7063_v54 = vld [vmem:[#allocation7 + $0x178] sm:$0xff]  ;;  %v22533_v46 = vld [vmem:[#allocation27_spill] sm:$0xff] }
 0x6cb   : > { %14541 = vmatmul.mubr.f32.gmra.mrb[34].mxu0 %v19726_v49  ;;  %v6438_v7 = vld [vmem:[#allocation2 + $0x97] sm:$0xff] }
 0x6cc   : > { %14543 = vmatprep.mubr.f32.mxu0 %v19729_v29  ;;  %15792 = vmatpush3.bf16.msra.mxu0 %v15789_v17  ;;  %v15801_v17 = vpack.c.bf16 %v7057_v13, %v7056_v47  ;;  %v7061_v47 = vld [vmem:[#allocation7 + $0x168] sm:$0xff]  ;;  %v6432_v13 = vld [vmem:[#allocation2 + $0x67] sm:$0xff] }
 0x6cd   : > { %15794 = vmatprep.subr.bf16.mxu0 %v15793_v2  ;;  %v19761_v63 = vmul.f32 %v6432_v13, %v22532_v44  ;;  %v7323_v13 = vld [vmem:[#allocation7 + $0x188] sm:$0xff]  ;;  %v6436_v44 = vld [vmem:[#allocation2 + $0x87] sm:$0xff] }
 0x6cf   : > { %14544 = vmatmul.mubr.f32.gmra.mrb[36].mxu0 %v19734_v61 }
 0x6d0   : > { %14546 = vmatprep.mubr.f32.mxu0 %v19737_v41  ;;  %15796 = vmatpush3.bf16.msra.mxu0 %v15793_v2  ;;  %v15805_v2 = vpack.c.bf16 %v7059_v11, %v7058_v59  ;;  %v6433_v59 = vld [vmem:[#allocation2 + $0x6f] sm:$0xff]  ;;  %v7062_v11 = vld [vmem:[#allocation7 + $0x170] sm:$0xff] }
 0x6d1   : > { %15798 = vmatprep.subr.bf16.mxu0 %v15797_v55  ;;  %v19766_v26 = vmul.f32 %v6433_v59, %v22533_v46  ;;  %v22536_v59 = vld [vmem:[#allocation32_spill] sm:$0xff]  ;;  %v22537_v46 = vld [vmem:[#allocation31_spill] sm:$0xff] }
 0x6d3   : > { %14547 = vmatmul.mubr.f32.gmra.mrb[38].mxu0 %v19742_v27 }
 0x6d4   : > { %14549 = vmatprep.mubr.f32.mxu0 %v19745_v16  ;;  %15800 = vmatpush3.bf16.msra.mxu0 %v15797_v55  ;;  %v15809_v55 = vpack.c.bf16 %v7061_v47, %v7060_v28  ;;  %v6435_v28 = vld [vmem:[#allocation2 + $0x7f] sm:$0xff]  ;;  %v7322_v47 = vld [vmem:[#allocation7 + $0x180] sm:$0xff] }
 0x6d5   : > { %15802 = vmatprep.subr.bf16.mxu0 %v15801_v17  ;;  %v19774_v32 = vmul.f32 %v6435_v28, %v22535_v3  ;;  %v22538_v3 = vld [vmem:[#allocation34_spill] sm:$0xff]  ;;  %v6439_v28 = vld [vmem:[#allocation2 + $0x9f] sm:$0xff] }
 0x6d7   : > { %14550 = vmatmul.mubr.f32.gmra.mrb[40].mxu0 %v19750_v56 }
 0x6d8   : > { %14552 = vmatprep.mubr.f32.mxu0 %v19753_v42  ;;  %15804 = vmatpush3.bf16.msra.mxu0 %v15801_v17  ;;  %v15813_v17 = vpack.c.bf16 %v7063_v54, %v7062_v11  ;;  %v19779_v11 = vmul.f32 %v6436_v44, %v22536_v59  ;;  %v6437_v54 = vld [vmem:[#allocation2 + $0x8f] sm:$0xff]  ;;  %v22540_v59 = vld [vmem:[#allocation36_spill] sm:$0xff] }
 0x6d9   : > { %15806 = vmatprep.subr.bf16.mxu0 %v15805_v2  ;;  %v19784_v12 = vmul.f32 %v6437_v54, %v22537_v46  ;;  %v6442_v54 = vld [vmem:[#allocation2 + $0xb7] sm:$0xff] }
 0x6db   : > { %14553 = vmatmul.mubr.f32.gmra.mrb[42].mxu0 %v19758_v43 }
 0x6dc   : > { %14555 = vmatprep.mubr.f32.mxu0 %v19761_v63  ;;  %15808 = vmatpush3.bf16.msra.mxu0 %v15805_v2  ;;  %v19776_v2 = vpack.c.bf16 %v7323_v13, %v7322_v47  ;;  %v6440_v47 = vld [vmem:[#allocation2 + $0xa7] sm:$0xff] }
 0x6dd   : > { %15810 = vmatprep.subr.bf16.mxu0 %v15809_v55  ;;  %v22539_v13 = vld [vmem:[#allocation33_spill] sm:$0xff]  ;;  %v19796_v8 = vmul.f32 %v6440_v47, %v22540_v59  ;;  %v22544_v59 = vld [vmem:[#allocation40_spill] sm:$0xff] }
 0x6de   : > { %v19793_v44 = vmul.f32 %v6439_v28, %v22539_v13  ;;  %v6444_v28 = vld [vmem:[#allocation2 + $0xc7] sm:$0xff] }
 0x6df   : > { %14556 = vmatmul.mubr.f32.gmra.mrb[44].mxu0 %v19766_v26  ;;  %v22543_v47 = vld [vmem:[#allocation37_spill] sm:$0xff]  ;;  %v19812_v5 = vmul.f32 %v6444_v28, %v22544_v59  ;;  %v22548_v59 = vld [vmem:[#allocation44_spill] sm:$0xff] }
 0x6e0   : > { %14558 = vmatprep.mubr.f32.mxu0 %v19769_v50  ;;  %15812 = vmatpush3.bf16.msra.mxu0 %v15809_v55  ;;  %v19788_v55 = vmul.f32 %v6438_v7, %v22538_v3  ;;  %v22541_v7 = vld [vmem:[#allocation35_spill] sm:$0xff]  ;;  %v22542_v3 = vld [vmem:[#allocation38_spill] sm:$0xff]  ;;  %v19809_v13 = vmul.f32 %v6443_v4, %v22543_v47  ;;  %v22547_v28 = vld [vmem:[#allocation41_spill] sm:$0xff] }
 0x6e1   : > { %15814 = vmatprep.subr.bf16.mxu0 %v15813_v17  ;;  %v19804_v39 = vmul.f32 %v6442_v54, %v22542_v3  ;;  %v22545_v54 = vld [vmem:[#allocation39_spill] sm:$0xff]  ;;  %v22546_v3 = vld [vmem:[#allocation42_spill] sm:$0xff]  ;;  %v19825_v47 = vmul.f32 %v6447_v10, %v22547_v28  ;;  %v22551_v10 = vld [vmem:[#allocation45_spill] sm:$0xff] }
 0x6e2   : > { %v6448_v4 = vld [vmem:[#allocation2 + $0xe7] sm:$0xff]  ;;  %v6493_v28 = vld [vmem:[#allocation2 + $0x11] sm:$0xff] }
 0x6e3   : > { %14559 = vmatmul.mubr.f32.gmra.mrb[46].mxu0 %v19774_v32  ;;  %v19828_v52 = vmul.f32 %v6448_v4, %v22548_v59  ;;  %v19841_v4 = vmul.f32 %v6451_v62, %v22551_v10  ;;  %v7324_v59 = vld [vmem:[#allocation7 + $0x190] sm:$0xff]  ;;  %v6496_v62 = vld [vmem:[#allocation2 + $0x29] sm:$0xff] }
 0x6e4   : > { %14561 = vmatprep.mubr.f32.mxu0 %v19779_v11  ;;  %15816 = vmatpush3.bf16.msra.mxu0 %v15813_v17  ;;  %v6441_v17 = vld [vmem:[#allocation2 + $0xaf] sm:$0xff]  ;;  %v22555_v10 = vld [vmem:[#allocation49_spill] sm:$0xff] }
 0x6e5   : > { %15818 = vmatprep.subr.bf16.mxu0 %v19776_v2  ;;  %v19801_v46 = vmul.f32 %v6441_v17, %v22541_v7  ;;  %v6446_v17 = vld [vmem:[#allocation2 + $0xd7] sm:$0xff]  ;;  %v19817_v7 = vmul.f32 %v6445_v37, %v22545_v54  ;;  %v19852_v23 = vmul.f32 %v6495_v24, %v22555_v10 }
 0x6e6   : > { %v19820_v6 = vmul.f32 %v6446_v17, %v22546_v3  ;;  %v6450_v37 = vld [vmem:[#allocation2 + $0xf7] sm:$0xff]  ;;  %v22550_v3 = vld [vmem:[#allocation46_spill] sm:$0xff] }
 0x6e7   : > { %14562 = vmatmul.mubr.f32.gmra.mrb[48].mxu0 %v19784_v12  ;;  %v22549_v17 = vld [vmem:[#allocation43_spill] sm:$0xff]  ;;  %v19836_v15 = vmul.f32 %v6450_v37, %v22550_v3  ;;  %v15821_v37 = vpack.c.bf16 %v7325_v22, %v7324_v59  ;;  %v22554_v3 = vld [vmem:[#allocation50_spill] sm:$0xff]  ;;  %22556 = vst [vmem:[#allocation116_spill] sm:$0xff] %v19852_v23 }
 0x6e8   : > { %14564 = vmatprep.mubr.f32.mxu0 %v19788_v55  ;;  %v19833_v54 = vmul.f32 %v6449_v53, %v22549_v17  ;;  %v22553_v53 = vld [vmem:[#allocation47_spill] sm:$0xff]  ;;  %v19847_v34 = vmul.f32 %v6494_v40, %v22554_v3  ;;  %v7328_v40 = vld [vmem:[#allocation7 + $0x1b0] sm:$0xff]  ;;  %v7329_v59 = vld [vmem:[#allocation7 + $0x1b8] sm:$0xff] }
 0x6e9   : > { %v6529_v17 = vmul.f32 %v6493_v28, %v22553_v53  ;;  %v19855_v28 = vmul.f32 %v6496_v62, %v22557_v1  ;;  %v6497_v22 = vld [vmem:[#allocation2 + $0x31] sm:$0xff]  ;;  %v6498_v53 = vld [vmem:[#allocation2 + $0x39] sm:$0xff]  ;;  %v15829_v24 = vpack.c.bf16 %v7329_v59, %v7328_v40  ;;  %v22561_v3 = vld [vmem:[#allocation54_spill] sm:$0xff] }
 0x6ea   : > { %v19863_v10 = vmul.f32 %v6498_v53, %v22561_v3  ;;  %v7330_v1 = vld [vmem:[#allocation7 + $0x1c0] sm:$0xff]  ;;  %v7332_v59 = vld [vmem:[#allocation7 + $0x1d0] sm:$0xff]  ;;  %v7333_v53 = vld [vmem:[#allocation7 + $0x1d8] sm:$0xff] }
 0x6eb   : > { %14565 = vmatmul.mubr.f32.gmra.mrb[50].mxu0 %v19793_v44  ;;  %22558 = vst [vmem:[#allocation117_spill] sm:$0xff] %v19855_v28  ;;  %v6500_v62 = vld [vmem:[#allocation2 + $0x49] sm:$0xff]  ;;  %v6501_v40 = vld [vmem:[#allocation2 + $0x51] sm:$0xff]  ;;  %v6502_v3 = vld [vmem:[#allocation2 + $0x59] sm:$0xff] }
 0x6ec   : > { %14567 = vmatprep.mubr.f32.mxu0 %v19796_v8  ;;  %22562 = vst [vmem:[#allocation119_spill] sm:$0xff] %v19863_v10 }
 0x6ef   : > { %14568 = vmatmul.mubr.f32.gmra.mrb[52].mxu0 %v19801_v46 }
 0x6f0   : > { %14570 = vmatprep.mubr.f32.mxu0 %v19804_v39 }
 0x6f3   : > { %14571 = vmatmul.mubr.f32.gmra.mrb[54].mxu0 %v19809_v13 }
 0x6f4   : > { %14573 = vmatprep.mubr.f32.mxu0 %v19812_v5 }
 0x6f7   : > { %14574 = vmatmul.mubr.f32.gmra.mrb[56].mxu0 %v19817_v7 }
 0x6f8   : > { %14576 = vmatprep.mubr.f32.mxu0 %v19820_v6 }
 0x6fb   : > { %14577 = vmatmul.mubr.f32.gmra.mrb[58].mxu0 %v19825_v47 }
 0x6fc   : > { %14579 = vmatprep.mubr.f32.mxu0 %v19828_v52 }
 0x6ff   : > { %14580 = vmatmul.mubr.f32.gmra.mrb[60].mxu0 %v19833_v54 }
 0x700   : > { %14582 = vmatprep.mubr.f32.mxu0 %v19836_v15 }
 0x703   : > { %14583 = vmatmul.mubr.f32.gmra.mrb[62].mxu0 %v19841_v4 }
 0x704   : > { %14617 = vmatprep.mubr.f32.mxu0 %v22552_v38  ;;  %v15825_v38 = vpack.c.bf16 %v7327_v30, %v7326_v31  ;;  %v6499_v31 = vld [vmem:[#allocation2 + $0x41] sm:$0xff]  ;;  %v7331_v30 = vld [vmem:[#allocation7 + $0x1c8] sm:$0xff] }
 0x707   : > { %14618 = vmatmul.mubr.f32.vlgmr.msra.gmra.mrb[32].mxu0 %v6529_v17 }
 0x708   : > { %15820 = vmatpush3.bf16.msra.mxu0 %v19776_v2  ;;  %14620 = vmatprep.mubr.f32.mxu0 %v19847_v34  ;;  %v22559_v2 = vld [vmem:[#allocation51_spill] sm:$0xff] }
 0x709   : > { %15822 = vmatprep.subr.bf16.mxu0 %v15821_v37  ;;  %v19860_v17 = vmul.f32 %v6497_v22, %v22559_v2  ;;  %v22565_v22 = vld [vmem:[#allocation56_spill] sm:$0xff] }
 0x70a   : > { %v19871_v2 = vmul.f32 %v6500_v62, %v22565_v22  ;;  %v7335_v62 = vld [vmem:[#allocation7 + $0x1e8] sm:$0xff]  ;;  %v6504_v22 = vld [vmem:[#allocation2 + $0x69] sm:$0xff] }
 0x70b   : > { %14621 = vmatmul.mubr.f32.gmra.mrb[34].mxu0 %v19852_v23  ;;  %22560 = vst [vmem:[#allocation118_spill] sm:$0xff] %v19860_v17  ;;  %v22563_v23 = vld [vmem:[#allocation53_spill] sm:$0xff] }
 0x70c   : > { %14623 = vmatprep.mubr.f32.mxu0 %v19855_v28  ;;  %15824 = vmatpush3.bf16.msra.mxu0 %v15821_v37  ;;  %v19868_v28 = vmul.f32 %v6499_v31, %v22563_v23  ;;  %v15833_v37 = vpack.c.bf16 %v7331_v30, %v7330_v1  ;;  %22566 = vst [vmem:[#allocation121_spill] sm:$0xff] %v19871_v2  ;;  %v6503_v1 = vld [vmem:[#allocation2 + $0x61] sm:$0xff]  ;;  %v7334_v30 = vld [vmem:[#allocation7 + $0x1e0] sm:$0xff] }
 0x70d   : > { %15826 = vmatprep.subr.bf16.mxu0 %v15825_v38  ;;  %v15837_v23 = vpack.c.bf16 %v7333_v53, %v7332_v59  ;;  %v6505_v59 = vld [vmem:[#allocation2 + $0x71] sm:$0xff]  ;;  %v7336_v53 = vld [vmem:[#allocation7 + $0x1f0] sm:$0xff] }
 0x70e   : > { %22564 = vst [vmem:[#allocation120_spill] sm:$0xff] %v19868_v28 }
 0x70f   : > { %14624 = vmatmul.mubr.f32.gmra.mrb[36].mxu0 %v19860_v17  ;;  %v22567_v17 = vld [vmem:[#allocation55_spill] sm:$0xff] }
 0x710   : > { %14626 = vmatprep.mubr.f32.mxu0 %v19863_v10  ;;  %15828 = vmatpush3.bf16.msra.mxu0 %v15825_v38  ;;  %v19876_v10 = vmul.f32 %v6501_v40, %v22567_v17  ;;  %v22569_v38 = vld [vmem:[#allocation58_spill] sm:$0xff]  ;;  %v15841_v17 = vpack.c.bf16 %v7335_v62, %v7334_v30  ;;  %v7596_v62 = vld [vmem:[#allocation7 + $0x200] sm:$0xff] }
 0x711   : > { %15830 = vmatprep.subr.bf16.mxu0 %v15829_v24  ;;  %v19879_v31 = vmul.f32 %v6502_v3, %v22569_v38  ;;  %v7337_v3 = vld [vmem:[#allocation7 + $0x1f8] sm:$0xff]  ;;  %v6506_v38 = vld [vmem:[#allocation2 + $0x79] sm:$0xff] }
 0x712   : > { %22568 = vst [vmem:[#allocation122_spill] sm:$0xff] %v19876_v10  ;;  %v6507_v30 = vld [vmem:[#allocation2 + $0x81] sm:$0xff] }
 0x713   : > { %14627 = vmatmul.mubr.f32.gmra.mrb[38].mxu0 %v19868_v28  ;;  %22570 = vst [vmem:[#allocation123_spill] sm:$0xff] %v19879_v31  ;;  %v22571_v28 = vld [vmem:[#allocation57_spill] sm:$0xff] }
 0x714   : > { %14629 = vmatprep.mubr.f32.mxu0 %v19871_v2  ;;  %15832 = vmatpush3.bf16.msra.mxu0 %v15829_v24  ;;  %v19884_v2 = vmul.f32 %v6503_v1, %v22571_v28  ;;  %v22573_v24 = vld [vmem:[#allocation60_spill] sm:$0xff]  ;;  %v15845_v28 = vpack.c.bf16 %v7337_v3, %v7336_v53 }
 0x715   : > { %15834 = vmatprep.subr.bf16.mxu0 %v15833_v37  ;;  %v19887_v40 = vmul.f32 %v6504_v22, %v22573_v24  ;;  %v7597_v22 = vld [vmem:[#allocation7 + $0x208] sm:$0xff]  ;;  %v6508_v24 = vld [vmem:[#allocation2 + $0x89] sm:$0xff] }
 0x716   : > { %22572 = vst [vmem:[#allocation69_spill] sm:$0xff] %v19884_v2  ;;  %v6509_v53 = vld [vmem:[#allocation2 + $0x91] sm:$0xff]  ;;  %v6510_v3 = vld [vmem:[#allocation2 + $0x99] sm:$0xff] }
 0x717   : > { %14630 = vmatmul.mubr.f32.gmra.mrb[40].mxu0 %v19876_v10  ;;  %22574 = vst [vmem:[#allocation70_spill] sm:$0xff] %v19887_v40  ;;  %v22575_v10 = vld [vmem:[#allocation59_spill] sm:$0xff] }
 0x718   : > { %14632 = vmatprep.mubr.f32.mxu0 %v19879_v31  ;;  %15836 = vmatpush3.bf16.msra.mxu0 %v15833_v37  ;;  %v19892_v31 = vmul.f32 %v6505_v59, %v22575_v10  ;;  %v22576_v37 = vld [vmem:[#allocation62_spill] sm:$0xff]  ;;  %v15849_v10 = vpack.c.bf16 %v7597_v22, %v7596_v62  ;;  %v22585_v62 = vld [vmem:[#allocation65_spill] sm:$0xff] }
 0x719   : > { %15838 = vmatprep.subr.bf16.mxu0 %v15837_v23  ;;  %v19895_v1 = vmul.f32 %v6506_v38, %v22576_v37  ;;  %v22581_v38 = vld [vmem:[#allocation63_spill] sm:$0xff] }
 0x71a   : > { %v19908_v37 = vmul.f32 %v6509_v53, %v22581_v38  ;;  %v6514_v53 = vld [vmem:[#allocation2 + $0xb9] sm:$0xff] }
 0x71b   : > { %14633 = vmatmul.mubr.f32.gmra.mrb[42].mxu0 %v19884_v2  ;;  %22577 = vst [vmem:[#allocation73_spill] sm:$0xff] %v19895_v1  ;;  %v22578_v2 = vld [vmem:[#allocation61_spill] sm:$0xff] }
 0x71c   : > { %14635 = vmatprep.mubr.f32.mxu0 %v19887_v40  ;;  %15840 = vmatpush3.bf16.msra.mxu0 %v15837_v23  ;;  %v19900_v40 = vmul.f32 %v6507_v30, %v22578_v2  ;;  %v22579_v23 = vld [vmem:[#allocation64_spill] sm:$0xff]  ;;  %22582 = vst [vmem:[#allocation77_spill] sm:$0xff] %v19908_v37  ;;  %v6511_v2 = vld [vmem:[#allocation2 + $0xa1] sm:$0xff]  ;;  %v6512_v30 = vld [vmem:[#allocation2 + $0xa9] sm:$0xff] }
 0x71d   : > { %15842 = vmatprep.subr.bf16.mxu0 %v15841_v17  ;;  %v19903_v59 = vmul.f32 %v6508_v24, %v22579_v23  ;;  %v19916_v22 = vmul.f32 %v6511_v2, %v22585_v62  ;;  %v22587_v24 = vld [vmem:[#allocation68_spill] sm:$0xff]  ;;  %v6516_v2 = vld [vmem:[#allocation2 + $0xc9] sm:$0xff] }
 0x71e   : > { %v19919_v23 = vmul.f32 %v6512_v30, %v22587_v24  ;;  %v22593_v30 = vld [vmem:[#allocation71_spill] sm:$0xff]  ;;  %v22595_v24 = vld [vmem:[#allocation76_spill] sm:$0xff] }
 0x71f   : > { %14636 = vmatmul.mubr.f32.gmra.mrb[44].mxu0 %v19892_v31  ;;  %22580 = vst [vmem:[#allocation74_spill] sm:$0xff] %v19903_v59  ;;  %22586 = vst [vmem:[#allocation81_spill] sm:$0xff] %v19916_v22 }
 0x720   : > { %14638 = vmatprep.mubr.f32.mxu0 %v19895_v1  ;;  %15844 = vmatpush3.bf16.msra.mxu0 %v15841_v17  ;;  %v22583_v17 = vld [vmem:[#allocation66_spill] sm:$0xff]  ;;  %22588 = vst [vmem:[#allocation82_spill] sm:$0xff] %v19919_v23 }
 0x721   : > { %15846 = vmatprep.subr.bf16.mxu0 %v15845_v28  ;;  %v19911_v1 = vmul.f32 %v6510_v3, %v22583_v17  ;;  %v22589_v3 = vld [vmem:[#allocation67_spill] sm:$0xff]  ;;  %v22591_v17 = vld [vmem:[#allocation72_spill] sm:$0xff] }
 0x723   : > { %14639 = vmatmul.mubr.f32.gmra.mrb[46].mxu0 %v19900_v40  ;;  %22584 = vst [vmem:[#allocation78_spill] sm:$0xff] %v19911_v1 }
 0x724   : > { %14641 = vmatprep.mubr.f32.mxu0 %v19903_v59  ;;  %15848 = vmatpush3.bf16.msra.mxu0 %v15845_v28  ;;  %v6513_v28 = vld [vmem:[#allocation2 + $0xb1] sm:$0xff]  ;;  %v6515_v59 = vld [vmem:[#allocation2 + $0xc1] sm:$0xff] }
 0x725   : > { %15850 = vmatprep.subr.bf16.mxu0 %v15849_v10  ;;  %v19924_v38 = vmul.f32 %v6513_v28, %v22589_v3  ;;  %v19932_v62 = vmul.f32 %v6515_v59, %v22593_v30  ;;  %v6518_v28 = vld [vmem:[#allocation2 + $0xd9] sm:$0xff]  ;;  %v6520_v59 = vld [vmem:[#allocation2 + $0xe9] sm:$0xff] }
 0x727   : > { %14642 = vmatmul.mubr.f32.gmra.mrb[48].mxu0 %v19908_v37  ;;  %22590 = vst [vmem:[#allocation85_spill] sm:$0xff] %v19924_v38  ;;  %v19927_v37 = vmul.f32 %v6514_v53, %v22591_v17  ;;  %22594 = vst [vmem:[#allocation89_spill] sm:$0xff] %v19932_v62  ;;  %v22597_v53 = vld [vmem:[#allocation75_spill] sm:$0xff]  ;;  %v22599_v17 = vld [vmem:[#allocation80_spill] sm:$0xff] }
 0x728   : > { %14644 = vmatprep.mubr.f32.mxu0 %v19911_v1  ;;  %v6517_v1 = vld [vmem:[#allocation2 + $0xd1] sm:$0xff] }
 0x729   : > { %22592 = vst [vmem:[#allocation86_spill] sm:$0xff] %v19927_v37  ;;  %v19940_v3 = vmul.f32 %v6517_v1, %v22597_v53  ;;  %v6522_v1 = vld [vmem:[#allocation2 + $0xf9] sm:$0xff] }
 0x72b   : > { %14645 = vmatmul.mubr.f32.gmra.mrb[50].mxu0 %v19916_v22  ;;  %v19935_v22 = vmul.f32 %v6516_v2, %v22595_v24  ;;  %22598 = vst [vmem:[#allocation124_spill] sm:$0xff] %v19940_v3  ;;  %v22601_v2 = vld [vmem:[#allocation79_spill] sm:$0xff]  ;;  %v22603_v24 = vld [vmem:[#allocation84_spill] sm:$0xff] }
 0x72c   : > { %14647 = vmatprep.mubr.f32.mxu0 %v19919_v23  ;;  %v6519_v23 = vld [vmem:[#allocation2 + $0xe1] sm:$0xff] }
 0x72d   : > { %22596 = vst [vmem:[#allocation90_spill] sm:$0xff] %v19935_v22  ;;  %v19948_v30 = vmul.f32 %v6519_v23, %v22601_v2  ;;  %v22609_v23 = vld [vmem:[#allocation87_spill] sm:$0xff]  ;;  %v7598_v2 = vld [vmem:[#allocation7 + $0x210] sm:$0xff] }
 0x72f   : > { %14648 = vmatmul.mubr.f32.gmra.mrb[52].mxu0 %v19924_v38  ;;  %v19943_v38 = vmul.f32 %v6518_v28, %v22599_v17  ;;  %22602 = vst [vmem:[#allocation126_spill] sm:$0xff] %v19948_v30  ;;  %v22605_v28 = vld [vmem:[#allocation83_spill] sm:$0xff]  ;;  %v22607_v17 = vld [vmem:[#allocation88_spill] sm:$0xff] }
 0x730   : > { %14650 = vmatprep.mubr.f32.mxu0 %v19927_v37  ;;  %v6521_v37 = vld [vmem:[#allocation2 + $0xf1] sm:$0xff] }
 0x731   : > { %22600 = vst [vmem:[#allocation125_spill] sm:$0xff] %v19943_v38  ;;  %v19956_v53 = vmul.f32 %v6521_v37, %v22605_v28  ;;  %v7600_v37 = vld [vmem:[#allocation7 + $0x220] sm:$0xff]  ;;  %v7601_v28 = vld [vmem:[#allocation7 + $0x228] sm:$0xff] }
 0x733   : > { %14651 = vmatmul.mubr.f32.gmra.mrb[54].mxu0 %v19932_v62  ;;  %v19951_v62 = vmul.f32 %v6520_v59, %v22603_v24  ;;  %22606 = vst [vmem:[#allocation128_spill] sm:$0xff] %v19956_v53  ;;  %v7599_v24 = vld [vmem:[#allocation7 + $0x218] sm:$0xff] }
 0x734   : > { %14653 = vmatprep.mubr.f32.mxu0 %v19935_v22  ;;  %v6523_v22 = vld [vmem:[#allocation2 + $0x101] sm:$0xff] }
 0x735   : > { %22604 = vst [vmem:[#allocation127_spill] sm:$0xff] %v19951_v62  ;;  %v19964_v59 = vmul.f32 %v6523_v22, %v22609_v23  ;;  %v7605_v23 = vld [vmem:[#allocation7 + $0x248] sm:$0xff] }
 0x737   : > { %14654 = vmatmul.mubr.f32.gmra.mrb[56].mxu0 %v19940_v3  ;;  %v19959_v3 = vmul.f32 %v6522_v1, %v22607_v17  ;;  %v15857_v1 = vpack.c.bf16 %v7601_v28, %v7600_v37  ;;  %v7602_v17 = vld [vmem:[#allocation7 + $0x230] sm:$0xff] }
 0x738   : > { %14656 = vmatprep.mubr.f32.mxu0 %v19943_v38  ;;  %v7610_v28 = vld [vmem:[#allocation7 + $0x270] sm:$0xff] }
 0x739   : > { %22608 = vst [vmem:[#allocation100_spill] sm:$0xff] %v19959_v3 }
 0x73b   : > { %14657 = vmatmul.mubr.f32.gmra.mrb[58].mxu0 %v19948_v30 }
 0x73c   : > { %14659 = vmatprep.mubr.f32.mxu0 %v19951_v62  ;;  %v15853_v62 = vpack.c.bf16 %v7599_v24, %v7598_v2  ;;  %v7607_v2 = vld [vmem:[#allocation7 + $0x258] sm:$0xff]  ;;  %v7608_v24 = vld [vmem:[#allocation7 + $0x260] sm:$0xff] }
 0x73f   : > { %14660 = vmatmul.mubr.f32.gmra.mrb[60].mxu0 %v19956_v53 }
 0x740   : > { %14662 = vmatprep.mubr.f32.mxu0 %v19959_v3  ;;  %v7603_v3 = vld [vmem:[#allocation7 + $0x238] sm:$0xff] }
 0x741   : > { %v15861_v22 = vpack.c.bf16 %v7603_v3, %v7602_v17  ;;  %v7609_v3 = vld [vmem:[#allocation7 + $0x268] sm:$0xff] }
 0x742   : > { %v15873_v37 = vpack.c.bf16 %v7609_v3, %v7608_v24  ;;  %v22611_v24 = vld [vmem:[#allocation91_spill] sm:$0xff] }
 0x743   : > { %14663 = vmatmul.mubr.f32.gmra.mrb[62].mxu0 %v19964_v59 }
 0x744   : > { %14697 = vmatprep.mubr.f32.mxu0 %v19720_v9  ;;  %v7604_v9 = vld [vmem:[#allocation7 + $0x240] sm:$0xff] }
 0x747   : > { %14698 = vmatmul.mubr.f32.vlgmr.msra.gmra.mrb[32].mxu0 %v19726_v49  ;;  %v15865_v49 = vpack.c.bf16 %v7605_v23, %v7604_v9  ;;  %v7871_v9 = vld [vmem:[#allocation7 + $0x288] sm:$0xff] }
 0x748   : > { %15852 = vmatpush3.bf16.msra.mxu0 %v15849_v10  ;;  %14700 = vmatprep.mubr.f32.mxu0 %v19729_v29  ;;  %v7606_v10 = vld [vmem:[#allocation7 + $0x250] sm:$0xff] }
 0x749   : > { %15854 = vmatprep.subr.bf16.mxu0 %v15853_v62 }
 0x74b   : > { %14701 = vmatmul.mubr.f32.gmra.mrb[34].mxu0 %v19734_v61 }
 0x74c   : > { %14703 = vmatprep.mubr.f32.mxu0 %v19737_v41  ;;  %15856 = vmatpush3.bf16.msra.mxu0 %v15853_v62  ;;  %v15869_v62 = vpack.c.bf16 %v7607_v2, %v7606_v10  ;;  %v22610_v10 = vld [vmem:[#allocation92_spill] sm:$0xff] }
 0x74d   : > { %15858 = vmatprep.subr.bf16.mxu0 %v15857_v1 }
 0x74f   : > { %14704 = vmatmul.mubr.f32.gmra.mrb[36].mxu0 %v19742_v27 }
 0x750   : > { %14706 = vmatprep.mubr.f32.mxu0 %v19745_v16  ;;  %15860 = vmatpush3.bf16.msra.mxu0 %v15857_v1  ;;  %v7611_v1 = vld [vmem:[#allocation7 + $0x278] sm:$0xff] }
 0x751   : > { %15862 = vmatprep.subr.bf16.mxu0 %v15861_v22  ;;  %v15877_v17 = vpack.c.bf16 %v7611_v1, %v7610_v28  ;;  %v7873_v28 = vld [vmem:[#allocation7 + $0x298] sm:$0xff] }
 0x753   : > { %14707 = vmatmul.mubr.f32.gmra.mrb[38].mxu0 %v19750_v56 }
 0x754   : > { %14709 = vmatprep.mubr.f32.mxu0 %v19753_v42  ;;  %15864 = vmatpush3.bf16.msra.mxu0 %v15861_v22  ;;  %v7870_v22 = vld [vmem:[#allocation7 + $0x280] sm:$0xff] }
 0x755   : > { %15866 = vmatprep.subr.bf16.mxu0 %v15865_v49  ;;  %v15881_v23 = vpack.c.bf16 %v7871_v9, %v7870_v22  ;;  %v7875_v22 = vld [vmem:[#allocation7 + $0x2a8] sm:$0xff] }
 0x757   : > { %14710 = vmatmul.mubr.f32.gmra.mrb[40].mxu0 %v19758_v43 }
 0x758   : > { %14712 = vmatprep.mubr.f32.mxu0 %v19761_v63  ;;  %15868 = vmatpush3.bf16.msra.mxu0 %v15865_v49  ;;  %v6452_v49 = vld [vmem:[#allocation2 + $0x107] sm:$0xff] }
 0x759   : > { %15870 = vmatprep.subr.bf16.mxu0 %v15869_v62  ;;  %v19997_v2 = vmul.f32 %v6452_v49, %v22610_v10  ;;  %v7876_v49 = vld [vmem:[#allocation7 + $0x2b0] sm:$0xff]  ;;  %v7877_v10 = vld [vmem:[#allocation7 + $0x2b8] sm:$0xff] }
 0x75b   : > { %14713 = vmatmul.mubr.f32.gmra.mrb[42].mxu0 %v19766_v26 }
 0x75c   : > { %14715 = vmatprep.mubr.f32.mxu0 %v19769_v50  ;;  %15872 = vmatpush3.bf16.msra.mxu0 %v15869_v62  ;;  %v6453_v62 = vld [vmem:[#allocation2 + $0x10f] sm:$0xff] }
 0x75d   : > { %15874 = vmatprep.subr.bf16.mxu0 %v15873_v37  ;;  %v20002_v3 = vmul.f32 %v6453_v62, %v22611_v24  ;;  %v15893_v62 = vpack.c.bf16 %v7877_v10, %v7876_v49  ;;  %v7879_v24 = vld [vmem:[#allocation7 + $0x2c8] sm:$0xff]  ;;  %v22620_v49 = vld [vmem:[#allocation110_spill] sm:$0xff] }
 0x75e   : > { %v22622_v10 = vld [vmem:[#allocation112_spill] sm:$0xff] }
 0x75f   : > { %14716 = vmatmul.mubr.f32.gmra.mrb[44].mxu0 %v19774_v32 }
 0x760   : > { %14718 = vmatprep.mubr.f32.mxu0 %v19779_v11  ;;  %15876 = vmatpush3.bf16.msra.mxu0 %v15873_v37  ;;  %v7872_v37 = vld [vmem:[#allocation7 + $0x290] sm:$0xff] }
 0x761   : > { %15878 = vmatprep.subr.bf16.mxu0 %v15877_v17  ;;  %v15885_v1 = vpack.c.bf16 %v7873_v28, %v7872_v37  ;;  %v7883_v37 = vld [vmem:[#allocation7 + $0x2e8] sm:$0xff]  ;;  %v7885_v28 = vld [vmem:[#allocation7 + $0x2f8] sm:$0xff] }
 0x763   : > { %14719 = vmatmul.mubr.f32.gmra.mrb[46].mxu0 %v19784_v12 }
 0x764   : > { %14721 = vmatprep.mubr.f32.mxu0 %v19788_v55  ;;  %15880 = vmatpush3.bf16.msra.mxu0 %v15877_v17  ;;  %v7874_v17 = vld [vmem:[#allocation7 + $0x2a0] sm:$0xff] }
 0x765   : > { %15882 = vmatprep.subr.bf16.mxu0 %v15881_v23  ;;  %v15889_v9 = vpack.c.bf16 %v7875_v22, %v7874_v17  ;;  %v22615_v17 = vld [vmem:[#allocation101_spill] sm:$0xff]  ;;  %v22616_v22 = vld [vmem:[#allocation106_spill] sm:$0xff] }
 0x767   : > { %14722 = vmatmul.mubr.f32.gmra.mrb[48].mxu0 %v19793_v44 }
 0x768   : > { %14724 = vmatprep.mubr.f32.mxu0 %v19796_v8 }
 0x76b   : > { %14725 = vmatmul.mubr.f32.gmra.mrb[50].mxu0 %v19801_v46 }
 0x76c   : > { %14727 = vmatprep.mubr.f32.mxu0 %v19804_v39 }
 0x76f   : > { %14728 = vmatmul.mubr.f32.gmra.mrb[52].mxu0 %v19809_v13 }
 0x770   : > { %14730 = vmatprep.mubr.f32.mxu0 %v19812_v5 }
 0x773   : > { %14731 = vmatmul.mubr.f32.gmra.mrb[54].mxu0 %v19817_v7 }
 0x774   : > { %14733 = vmatprep.mubr.f32.mxu0 %v19820_v6 }
 0x777   : > { %14734 = vmatmul.mubr.f32.gmra.mrb[56].mxu0 %v19825_v47 }
 0x778   : > { %14736 = vmatprep.mubr.f32.mxu0 %v19828_v52 }
 0x77b   : > { %14737 = vmatmul.mubr.f32.gmra.mrb[58].mxu0 %v19833_v54 }
 0x77c   : > { %14739 = vmatprep.mubr.f32.mxu0 %v19836_v15 }
 0x77f   : > { %14740 = vmatmul.mubr.f32.gmra.mrb[60].mxu0 %v19841_v4 }
 0x780   : > { %14742 = vmatprep.mubr.f32.mxu0 %v19997_v2 }
 0x783   : > { %14743 = vmatmul.mubr.f32.gmra.mrb[62].mxu0 %v20002_v3 }
 0x784   : > { %14777 = vmatprep.mubr.f32.mxu0 %v19560_v57  ;;  %v7878_v57 = vld [vmem:[#allocation7 + $0x2c0] sm:$0xff] }
 0x787   : > { %14778 = vmatmul.mubr.f32.vlgmr.msra.gmra.mrb[32].mxu0 %v19558_v36  ;;  %v15897_v36 = vpack.c.bf16 %v7879_v24, %v7878_v57  ;;  %v22624_v57 = vld [vmem:[#allocation114_spill] sm:$0xff]  ;;  %v22625_v24 = vld [vmem:[#allocation111_spill] sm:$0xff] }
 0x788   : > { %15884 = vmatpush3.bf16.msra.mxu0 %v15881_v23  ;;  %14780 = vmatprep.mubr.f32.mxu0 %v19570_v60  ;;  %v7880_v60 = vld [vmem:[#allocation7 + $0x2d0] sm:$0xff]  ;;  %v7881_v23 = vld [vmem:[#allocation7 + $0x2d8] sm:$0xff] }
 0x789   : > { %15886 = vmatprep.subr.bf16.mxu0 %v15885_v1 }
 0x78b   : > { %14781 = vmatmul.mubr.f32.gmra.mrb[34].mxu0 %v19567_v51  ;;  %v15901_v51 = vpack.c.bf16 %v7881_v23, %v7880_v60  ;;  %v8146_v23 = vld [vmem:[#allocation7 + $0x310] sm:$0xff] }
 0x78c   : > { %14783 = vmatprep.mubr.f32.mxu0 %v19580_v21  ;;  %15888 = vmatpush3.bf16.msra.mxu0 %v15885_v1  ;;  %v7882_v21 = vld [vmem:[#allocation7 + $0x2e0] sm:$0xff]  ;;  %v8145_v1 = vld [vmem:[#allocation7 + $0x308] sm:$0xff] }
 0x78d   : > { %15890 = vmatprep.subr.bf16.mxu0 %v15889_v9 }
 0x78f   : > { %14784 = vmatmul.mubr.f32.gmra.mrb[36].mxu0 %v19577_v58  ;;  %v15905_v58 = vpack.c.bf16 %v7883_v37, %v7882_v21  ;;  %v22628_v21 = vld [vmem:[#allocation113_spill] sm:$0xff] }
 0x790   : > { %14786 = vmatprep.mubr.f32.mxu0 %v19590_v14  ;;  %15892 = vmatpush3.bf16.msra.mxu0 %v15889_v9  ;;  %v7884_v14 = vld [vmem:[#allocation7 + $0x2f0] sm:$0xff]  ;;  %v22629_v37 = vmax.f32 %v22628_v21, 0.0 }
 0x791   : > { %15894 = vmatprep.subr.bf16.mxu0 %v15893_v62  ;;  %v22619_v9 = vld [vmem:[#allocation105_spill] sm:$0xff] }
 0x792   : > { %v8158_v21 = vld [vmem:[#allocation7 + $0x370] sm:$0xff] }
 0x793   : > { %14787 = vmatmul.mubr.f32.gmra.mrb[38].mxu0 %v19587_v25  ;;  %v15909_v25 = vpack.c.bf16 %v7885_v28, %v7884_v14  ;;  %v8148_v14 = vld [vmem:[#allocation7 + $0x320] sm:$0xff]  ;;  %v8149_v28 = vld [vmem:[#allocation7 + $0x328] sm:$0xff] }
 0x794   : > { %14789 = vmatprep.mubr.f32.mxu0 %v19600_v18  ;;  %15896 = vmatpush3.bf16.msra.mxu0 %v15893_v62  ;;  %v8144_v18 = vld [vmem:[#allocation7 + $0x300] sm:$0xff]  ;;  %v22623_v62 = vld [vmem:[#allocation109_spill] sm:$0xff] }
 0x795   : > { %15898 = vmatprep.subr.bf16.mxu0 %v15897_v36 }
 0x797   : > { %14790 = vmatmul.mubr.f32.gmra.mrb[40].mxu0 %v19597_v0  ;;  %v15913_v0 = vpack.c.bf16 %v8145_v1, %v8144_v18  ;;  %v22631_v18 = vld [vmem:[#allocation117_spill] sm:$0xff]  ;;  %v15921_v1 = vpack.c.bf16 %v8149_v28, %v8148_v14  ;;  %v8418_v28 = vld [vmem:[#allocation7 + $0x380] sm:$0xff] }
 0x798   : > { %14792 = vmatprep.mubr.f32.mxu0 %v19610_v45  ;;  %15900 = vmatpush3.bf16.msra.mxu0 %v15897_v36  ;;  %v22612_v45 = vld [vmem:[#allocation102_spill] sm:$0xff]  ;;  %v22626_v36 = vld [vmem:[#allocation115_spill] sm:$0xff] }
 0x799   : > { %15902 = vmatprep.subr.bf16.mxu0 %v15901_v51  ;;  %v22627_v60 = vmax.f32 %v22626_v36, 0.0  ;;  %v8157_v36 = vld [vmem:[#allocation7 + $0x368] sm:$0xff] }
 0x79b   : > { %14793 = vmatmul.mubr.f32.gmra.mrb[42].mxu0 %v19607_v19  ;;  %v22613_v19 = vld [vmem:[#allocation93_spill] sm:$0xff] }
 0x79c   : > { %14795 = vmatprep.mubr.f32.mxu0 %v19620_v33  ;;  %15904 = vmatpush3.bf16.msra.mxu0 %v15901_v51  ;;  %v22614_v33 = vld [vmem:[#allocation104_spill] sm:$0xff]  ;;  %v8147_v51 = vld [vmem:[#allocation7 + $0x318] sm:$0xff] }
 0x79d   : > { %15906 = vmatprep.subr.bf16.mxu0 %v15905_v58 }
 0x79f   : > { %14796 = vmatmul.mubr.f32.gmra.mrb[44].mxu0 %v19617_v48  ;;  %v22617_v48 = vld [vmem:[#allocation103_spill] sm:$0xff] }
 0x7a0   : > { %14798 = vmatprep.mubr.f32.mxu0 %v19630_v35  ;;  %15908 = vmatpush3.bf16.msra.mxu0 %v15905_v58  ;;  %v22618_v35 = vld [vmem:[#allocation108_spill] sm:$0xff]  ;;  %v15917_v58 = vpack.c.bf16 %v8147_v51, %v8146_v23  ;;  %v22639_v23 = vld [vmem:[#allocation70_spill] sm:$0xff] }
 0x7a1   : > { %15910 = vmatprep.subr.bf16.mxu0 %v15909_v25 }
 0x7a3   : > { %14799 = vmatmul.mubr.f32.gmra.mrb[46].mxu0 %v19627_v20  ;;  %v22621_v20 = vld [vmem:[#allocation107_spill] sm:$0xff] }
 0x7a4   : > { %14801 = vmatprep.mubr.f32.mxu0 %v22612_v45  ;;  %15912 = vmatpush3.bf16.msra.mxu0 %v15909_v25  ;;  %v22630_v25 = vld [vmem:[#allocation116_spill] sm:$0xff]  ;;  %v8150_v45 = vld [vmem:[#allocation7 + $0x330] sm:$0xff] }
 0x7a5   : > { %15914 = vmatprep.subr.bf16.mxu0 %v15913_v0 }
 0x7a7   : > { %14802 = vmatmul.mubr.f32.gmra.mrb[48].mxu0 %v22613_v19  ;;  %v8151_v19 = vld [vmem:[#allocation7 + $0x338] sm:$0xff] }
 0x7a8   : > { %14804 = vmatprep.mubr.f32.mxu0 %v22614_v33  ;;  %v22632_v33 = vld [vmem:[#allocation118_spill] sm:$0xff] }
 0x7ab   : > { %14805 = vmatmul.mubr.f32.gmra.mrb[50].mxu0 %v22615_v17  ;;  %v22633_v17 = vld [vmem:[#allocation119_spill] sm:$0xff] }
 0x7ac   : > { %14807 = vmatprep.mubr.f32.mxu0 %v22616_v22  ;;  %v15925_v22 = vpack.c.bf16 %v8151_v19, %v8150_v45  ;;  %v22642_v19 = vld [vmem:[#allocation77_spill] sm:$0xff] }
 0x7af   : > { %14808 = vmatmul.mubr.f32.gmra.mrb[52].mxu0 %v22617_v48  ;;  %v8153_v48 = vld [vmem:[#allocation7 + $0x348] sm:$0xff] }
 0x7b0   : > { %14810 = vmatprep.mubr.f32.mxu0 %v22618_v35  ;;  %v22634_v35 = vld [vmem:[#allocation120_spill] sm:$0xff] }
 0x7b3   : > { %14811 = vmatmul.mubr.f32.gmra.mrb[54].mxu0 %v22619_v9  ;;  %v22635_v9 = vld [vmem:[#allocation121_spill] sm:$0xff] }
 0x7b4   : > { %14813 = vmatprep.mubr.f32.mxu0 %v22620_v49  ;;  %v8154_v49 = vld [vmem:[#allocation7 + $0x350] sm:$0xff] }
 0x7b7   : > { %14814 = vmatmul.mubr.f32.gmra.mrb[56].mxu0 %v22621_v20  ;;  %v8155_v20 = vld [vmem:[#allocation7 + $0x358] sm:$0xff] }
 0x7b8   : > { %14816 = vmatprep.mubr.f32.mxu0 %v22622_v10  ;;  %v22636_v10 = vld [vmem:[#allocation122_spill] sm:$0xff] }
 0x7bb   : > { %14817 = vmatmul.mubr.f32.gmra.mrb[58].mxu0 %v22623_v62  ;;  %v22637_v62 = vld [vmem:[#allocation123_spill] sm:$0xff] }
 0x7bc   : > { %14819 = vmatprep.mubr.f32.mxu0 %v22624_v57  ;;  %v15933_v57 = vpack.c.bf16 %v8155_v20, %v8154_v49  ;;  %v22647_v49 = vld [vmem:[#allocation86_spill] sm:$0xff]  ;;  %v22648_v20 = vld [vmem:[#allocation89_spill] sm:$0xff] }
 0x7bf   : > { %14820 = vmatmul.mubr.f32.gmra.mrb[60].mxu0 %v22625_v24  ;;  %v8156_v24 = vld [vmem:[#allocation7 + $0x360] sm:$0xff] }
 0x7c0   : > { %14822 = vmatprep.mubr.f32.mxu0 %v22627_v60  ;;  %v22638_v60 = vld [vmem:[#allocation69_spill] sm:$0xff]  ;;  %v15937_v51 = vpack.c.bf16 %v8157_v36, %v8156_v24  ;;  %v22650_v24 = vld [vmem:[#allocation124_spill] sm:$0xff]  ;;  %v22651_v36 = vld [vmem:[#allocation127_spill] sm:$0xff] }
 0x7c3   : > { %14823 = vmatmul.mubr.f32.gmra.mrb[62].mxu0 %v22629_v37  ;;  %v8159_v37 = vld [vmem:[#allocation7 + $0x378] sm:$0xff] }
 0x7c4   : > { %14857 = vmatprep.mubr.f32.mxu0 %v19847_v34  ;;  %v8152_v34 = vld [vmem:[#allocation7 + $0x340] sm:$0xff]  ;;  %v15941_v14 = vpack.c.bf16 %v8159_v37, %v8158_v21  ;;  %v22652_v21 = vld [vmem:[#allocation100_spill] sm:$0xff] }
 0x7c5   : > { %v22653_v37 = vld [vmem:[#allocation95_spill] sm:$0xff] }
 0x7c7   : > { %14858 = vmatmul.mubr.f32.vlgmr.msra.gmra.mrb[32].mxu0 %v22630_v25  ;;  %v8419_v25 = vld [vmem:[#allocation7 + $0x388] sm:$0xff] }
 0x7c8   : > { %15916 = vmatpush3.bf16.msra.mxu0 %v15913_v0  ;;  %14860 = vmatprep.mubr.f32.mxu0 %v22631_v18  ;;  %v15929_v0 = vpack.c.bf16 %v8153_v48, %v8152_v34  ;;  %v15945_v45 = vpack.c.bf16 %v8419_v25, %v8418_v28  ;;  %v22644_v34 = vld [vmem:[#allocation81_spill] sm:$0xff]  ;;  %v22645_v48 = vld [vmem:[#allocation82_spill] sm:$0xff]  ;;  %v6525_v28 = vld [vmem:[#allocation2 + $0x111] sm:$0xff] }
 0x7c9   : > { %15918 = vmatprep.subr.bf16.mxu0 %v15917_v58  ;;  %v22655_v25 = vld [vmem:[#allocation94_spill] sm:$0xff] }
 0x7cb   : > { %14861 = vmatmul.mubr.f32.gmra.mrb[34].mxu0 %v22632_v33 }
 0x7cc   : > { %14863 = vmatprep.mubr.f32.mxu0 %v22633_v17  ;;  %15920 = vmatpush3.bf16.msra.mxu0 %v15917_v58  ;;  %v22640_v58 = vld [vmem:[#allocation73_spill] sm:$0xff] }
 0x7cd   : > { %15922 = vmatprep.subr.bf16.mxu0 %v15921_v1 }
 0x7cf   : > { %14864 = vmatmul.mubr.f32.gmra.mrb[36].mxu0 %v22634_v35 }
 0x7d0   : > { %14866 = vmatprep.mubr.f32.mxu0 %v22635_v9  ;;  %15924 = vmatpush3.bf16.msra.mxu0 %v15921_v1  ;;  %v22641_v1 = vld [vmem:[#allocation74_spill] sm:$0xff] }
 0x7d1   : > { %15926 = vmatprep.subr.bf16.mxu0 %v15925_v22 }
 0x7d3   : > { %14867 = vmatmul.mubr.f32.gmra.mrb[38].mxu0 %v22636_v10 }
 0x7d4   : > { %14869 = vmatprep.mubr.f32.mxu0 %v22637_v62  ;;  %15928 = vmatpush3.bf16.msra.mxu0 %v15925_v22  ;;  %v22643_v22 = vld [vmem:[#allocation78_spill] sm:$0xff] }
 0x7d5   : > { %15930 = vmatprep.subr.bf16.mxu0 %v15929_v0 }
 0x7d7   : > { %14870 = vmatmul.mubr.f32.gmra.mrb[40].mxu0 %v22638_v60 }
 0x7d8   : > { %14872 = vmatprep.mubr.f32.mxu0 %v22639_v23  ;;  %15932 = vmatpush3.bf16.msra.mxu0 %v15929_v0  ;;  %v22646_v0 = vld [vmem:[#allocation85_spill] sm:$0xff] }
 0x7d9   : > { %15934 = vmatprep.subr.bf16.mxu0 %v15933_v57 }
 0x7db   : > { %14873 = vmatmul.mubr.f32.gmra.mrb[42].mxu0 %v19892_v31 }
 0x7dc   : > { %14875 = vmatprep.mubr.f32.mxu0 %v22640_v58  ;;  %15936 = vmatpush3.bf16.msra.mxu0 %v15933_v57  ;;  %v22649_v57 = vld [vmem:[#allocation90_spill] sm:$0xff] }
 0x7dd   : > { %15938 = vmatprep.subr.bf16.mxu0 %v15937_v51 }
 0x7df   : > { %14876 = vmatmul.mubr.f32.gmra.mrb[44].mxu0 %v19900_v40 }
 0x7e0   : > { %14878 = vmatprep.mubr.f32.mxu0 %v22641_v1  ;;  %15940 = vmatpush3.bf16.msra.mxu0 %v15937_v51  ;;  %v6524_v51 = vld [vmem:[#allocation2 + $0x109] sm:$0xff] }
 0x7e1   : > { %15942 = vmatprep.subr.bf16.mxu0 %v15941_v14 }
 0x7e3   : > { %14879 = vmatmul.mubr.f32.gmra.mrb[46].mxu0 %v22642_v19 }
 0x7e4   : > { %14881 = vmatprep.mubr.f32.mxu0 %v22643_v22  ;;  %15944 = vmatpush3.bf16.msra.mxu0 %v15941_v14  ;;  %v20069_v14 = vmul.f32 %v6524_v51, %v22653_v37  ;;  %v8424_v37 = vld [vmem:[#allocation7 + $0x3b0] sm:$0xff] }
 0x7e5   : > { %15946 = vmatprep.subr.bf16.mxu0 %v15945_v45 }
 0x7e6   : > { %22654 = vst [vmem:[#allocation16_spill] sm:$0xff] %v20069_v14 }
 0x7e7   : > { %14882 = vmatmul.mubr.f32.gmra.mrb[48].mxu0 %v22644_v34 }
 0x7e8   : > { %14884 = vmatprep.mubr.f32.mxu0 %v22645_v48 }
 0x7eb   : > { %14885 = vmatmul.mubr.f32.gmra.mrb[50].mxu0 %v22646_v0 }
 0x7ec   : > { %14887 = vmatprep.mubr.f32.mxu0 %v22647_v49 }
 0x7ef   : > { %14888 = vmatmul.mubr.f32.gmra.mrb[52].mxu0 %v22648_v20 }
 0x7f0   : > { %14890 = vmatprep.mubr.f32.mxu0 %v22649_v57 }
 0x7f3   : > { %14891 = vmatmul.mubr.f32.gmra.mrb[54].mxu0 %v22650_v24  ;;  %v20074_v24 = vmul.f32 %v6525_v28, %v22655_v25  ;;  %v17473_v25 = vld [vmem:[#allocation2 + $0x48] sm:$0xff] }
 0x7f4   : > { %14893 = vmatprep.mubr.f32.mxu0 %v19943_v38  ;;  %v8420_v38 = vld [vmem:[#allocation7 + $0x390] sm:$0xff] }
 0x7f7   : > { %14894 = vmatmul.mubr.f32.gmra.mrb[56].mxu0 %v19948_v30  ;;  %v8421_v30 = vld [vmem:[#allocation7 + $0x398] sm:$0xff] }
 0x7f8   : > { %14896 = vmatprep.mubr.f32.mxu0 %v22651_v36  ;;  %v8422_v36 = vld [vmem:[#allocation7 + $0x3a0] sm:$0xff] }
 0x7fb   : > { %14897 = vmatmul.mubr.f32.gmra.mrb[58].mxu0 %v19956_v53  ;;  %v15949_v53 = vpack.c.bf16 %v8421_v30, %v8420_v38  ;;  %v8427_v38 = vld [vmem:[#allocation7 + $0x3c8] sm:$0xff]  ;;  %v8429_v30 = vld [vmem:[#allocation7 + $0x3d8] sm:$0xff] }
 0x7fc   : > { %14899 = vmatprep.mubr.f32.mxu0 %v22652_v21  ;;  %v8423_v21 = vld [vmem:[#allocation7 + $0x3a8] sm:$0xff] }
 0x7fd   : > { %v15953_v51 = vpack.c.bf16 %v8423_v21, %v8422_v36  ;;  %v8693_v36 = vld [vmem:[#allocation7 + $0x408] sm:$0xff]  ;;  %v17472_v21 = vld [vmem:[#allocation2 + $0x40] sm:$0xff] }
 0x7ff   : > { %14900 = vmatmul.mubr.f32.gmra.mrb[60].mxu0 %v19964_v59 }
 0x800   : > { %14902 = vmatprep.mubr.f32.mxu0 %v20069_v14  ;;  %v8425_v14 = vld [vmem:[#allocation7 + $0x3b8] sm:$0xff] }
 0x801   : > { %v15957_v28 = vpack.c.bf16 %v8425_v14, %v8424_v37  ;;  %v9063_v37 = vld [vmem:[#allocation8 + $0xd8] sm:$0xff] }
 0x803   : > { %14903 = vmatmul.mubr.f32.gmra.mrb[62].mxu0 %v20074_v24 }
 0x804   : > { %14937 = vmatprep.mubr.f32.mxu0 %v19729_v29  ;;  %v8426_v29 = vld [vmem:[#allocation7 + $0x3c0] sm:$0xff] }
 0x807   : > { %14938 = vmatmul.mubr.f32.vlgmr.msra.gmra.mrb[32].mxu0 %v19734_v61  ;;  %v15961_v61 = vpack.c.bf16 %v8427_v38, %v8426_v29  ;;  %v9054_v38 = vld [vmem:[#allocation8 + $0x90] sm:$0xff] }
 0x808   : > { %15948 = vmatpush3.bf16.msra.mxu0 %v15945_v45  ;;  %14940 = vmatprep.mubr.f32.mxu0 %v19737_v41  ;;  %v8428_v41 = vld [vmem:[#allocation7 + $0x3d0] sm:$0xff]  ;;  %v8433_v45 = vld [vmem:[#allocation7 + $0x3f8] sm:$0xff] }
 0x809   : > { %15950 = vmatprep.subr.bf16.mxu0 %v15949_v53 }
 0x80b   : > { %14941 = vmatmul.mubr.f32.gmra.mrb[34].mxu0 %v19742_v27  ;;  %v15965_v27 = vpack.c.bf16 %v8429_v30, %v8428_v41  ;;  %v8701_v41 = vld [vmem:[#allocation7 + $0x448] sm:$0xff]  ;;  %v9062_v30 = vld [vmem:[#allocation8 + $0xd0] sm:$0xff] }
 0x80c   : > { %14943 = vmatprep.mubr.f32.mxu0 %v19745_v16  ;;  %15952 = vmatpush3.bf16.msra.mxu0 %v15949_v53  ;;  %v8430_v16 = vld [vmem:[#allocation7 + $0x3e0] sm:$0xff]  ;;  %v8431_v53 = vld [vmem:[#allocation7 + $0x3e8] sm:$0xff] }
 0x80d   : > { %15954 = vmatprep.subr.bf16.mxu0 %v15953_v51 }
 0x80f   : > { %14944 = vmatmul.mubr.f32.gmra.mrb[36].mxu0 %v19750_v56  ;;  %v15969_v56 = vpack.c.bf16 %v8431_v53, %v8430_v16  ;;  %v20118_v16 = vpack.c.bf16 %v9062_v30, %v9054_v38  ;;  %v17475_v53 = vld [vmem:[#allocation2 + $0x58] sm:$0xff]  ;;  %v17494_v38 = vld [vmem:[#allocation2 + $0xf0] sm:$0xff]  ;;  %v17497_v30 = vld [vmem:[#allocation2 + $0x108] sm:$0xff] }
 0x810   : > { %14946 = vmatprep.mubr.f32.mxu0 %v19753_v42  ;;  %15956 = vmatpush3.bf16.msra.mxu0 %v15953_v51  ;;  %v8432_v42 = vld [vmem:[#allocation7 + $0x3f0] sm:$0xff]  ;;  %v9055_v51 = vld [vmem:[#allocation8 + $0x98] sm:$0xff] }
 0x811   : > { %15958 = vmatprep.subr.bf16.mxu0 %v15957_v28  ;;  %v20115_v29 = vpack.c.bf16 %v9063_v37, %v9055_v51  ;;  %v17491_v51 = vld [vmem:[#allocation2 + $0xd8] sm:$0xff]  ;;  %v17492_v37 = vld [vmem:[#allocation2 + $0xe0] sm:$0xff] }
 0x813   : > { %14947 = vmatmul.mubr.f32.gmra.mrb[38].mxu0 %v19758_v43  ;;  %v15973_v43 = vpack.c.bf16 %v8433_v45, %v8432_v42  ;;  %v8702_v42 = vld [vmem:[#allocation7 + $0x450] sm:$0xff]  ;;  %v8703_v45 = vld [vmem:[#allocation7 + $0x458] sm:$0xff] }
 0x814   : > { %14949 = vmatprep.mubr.f32.mxu0 %v19761_v63  ;;  %15960 = vmatpush3.bf16.msra.mxu0 %v15957_v28  ;;  %v8692_v63 = vld [vmem:[#allocation7 + $0x400] sm:$0xff] }
 0x815   : > { %15962 = vmatprep.subr.bf16.mxu0 %v15961_v61 }
 0x817   : > { %14950 = vmatmul.mubr.f32.gmra.mrb[40].mxu0 %v19766_v26  ;;  %v15977_v26 = vpack.c.bf16 %v8693_v36, %v8692_v63  ;;  %v17477_v63 = vld [vmem:[#allocation2 + $0x68] sm:$0xff]  ;;  %v15997_v36 = vpack.c.bf16 %v8703_v45, %v8702_v42  ;;  %v9044_v42 = vld [vmem:[#allocation8 + $0x40] sm:$0xff]  ;;  %v9053_v45 = vld [vmem:[#allocation8 + $0x88] sm:$0xff] }
 0x818   : > { %14952 = vmatprep.mubr.f32.mxu0 %v19769_v50  ;;  %15964 = vmatpush3.bf16.msra.mxu0 %v15961_v61  ;;  %v22657_v50 = vld [vmem:[#allocation97_spill] sm:$0xff]  ;;  %v8700_v61 = vld [vmem:[#allocation7 + $0x440] sm:$0xff] }
 0x819   : > { %15966 = vmatprep.subr.bf16.mxu0 %v15965_v27 }
 0x81b   : > { %14953 = vmatmul.mubr.f32.gmra.mrb[42].mxu0 %v19774_v32 }
 0x81c   : > { %14955 = vmatprep.mubr.f32.mxu0 %v19779_v11  ;;  %15968 = vmatpush3.bf16.msra.mxu0 %v15965_v27  ;;  %v17469_v11 = vld [vmem:[#allocation2 + $0x28] sm:$0xff]  ;;  %v17474_v27 = vld [vmem:[#allocation2 + $0x50] sm:$0xff] }
 0x81d   : > { %15970 = vmatprep.subr.bf16.mxu0 %v15969_v56 }
 0x81f   : > { %14956 = vmatmul.mubr.f32.gmra.mrb[44].mxu0 %v19784_v12  ;;  %v8696_v12 = vld [vmem:[#allocation7 + $0x420] sm:$0xff] }
 0x820   : > { %14958 = vmatprep.mubr.f32.mxu0 %v19788_v55  ;;  %15972 = vmatpush3.bf16.msra.mxu0 %v15969_v56  ;;  %v8697_v55 = vld [vmem:[#allocation7 + $0x428] sm:$0xff]  ;;  %v15993_v56 = vpack.c.bf16 %v8701_v41, %v8700_v61  ;;  %v17496_v41 = vld [vmem:[#allocation2 + $0x100] sm:$0xff] }
 0x821   : > { %15974 = vmatprep.subr.bf16.mxu0 %v15973_v43  ;;  %v17495_v61 = vld [vmem:[#allocation2 + $0xf8] sm:$0xff] }
 0x823   : > { %14959 = vmatmul.mubr.f32.gmra.mrb[46].mxu0 %v19793_v44  ;;  %v17471_v44 = vld [vmem:[#allocation2 + $0x38] sm:$0xff] }
 0x824   : > { %14961 = vmatprep.mubr.f32.mxu0 %v19796_v8  ;;  %15976 = vmatpush3.bf16.msra.mxu0 %v15973_v43  ;;  %v6454_v8 = vld [vmem:[#allocation2 + $0x117] sm:$0xff]  ;;  %v17476_v43 = vld [vmem:[#allocation2 + $0x60] sm:$0xff] }
 0x825   : > { %15978 = vmatprep.subr.bf16.mxu0 %v15977_v26 }
 0x827   : > { %14962 = vmatmul.mubr.f32.gmra.mrb[48].mxu0 %v19801_v46  ;;  %v9039_v46 = vld [vmem:[#allocation8 + $0x18] sm:$0xff] }
 0x828   : > { %14964 = vmatprep.mubr.f32.mxu0 %v19804_v39  ;;  %v22656_v39 = vld [vmem:[#allocation96_spill] sm:$0xff] }
 0x829   : > { %v6490_v32 = vmul.f32 %v6454_v8, %v22656_v39  ;;  %v8705_v8 = vld [vmem:[#allocation7 + $0x468] sm:$0xff]  ;;  %v17478_v39 = vld [vmem:[#allocation2 + $0x70] sm:$0xff] }
 0x82b   : > { %14965 = vmatmul.mubr.f32.gmra.mrb[50].mxu0 %v19809_v13  ;;  %v9047_v13 = vld [vmem:[#allocation8 + $0x58] sm:$0xff] }
 0x82c   : > { %14967 = vmatprep.mubr.f32.mxu0 %v19812_v5  ;;  %v8694_v5 = vld [vmem:[#allocation7 + $0x410] sm:$0xff] }
 0x82f   : > { %14968 = vmatmul.mubr.f32.gmra.mrb[52].mxu0 %v19817_v7  ;;  %v15985_v7 = vpack.c.bf16 %v8697_v55, %v8696_v12  ;;  %v9037_v55 = vld [vmem:[#allocation8 + $0x8] sm:$0xff] }
 0x830   : > { %14970 = vmatprep.mubr.f32.mxu0 %v19820_v6  ;;  %v8695_v6 = vld [vmem:[#allocation7 + $0x418] sm:$0xff] }
 0x833   : > { %14971 = vmatmul.mubr.f32.gmra.mrb[54].mxu0 %v19825_v47  ;;  %v20109_v47 = vpack.c.bf16 %v9047_v13, %v9039_v46  ;;  %v17483_v46 = vld [vmem:[#allocation2 + $0x98] sm:$0xff] }
 0x834   : > { %14973 = vmatprep.mubr.f32.mxu0 %v19828_v52  ;;  %v15981_v52 = vpack.c.bf16 %v8695_v6, %v8694_v5  ;;  %v8706_v6 = vld [vmem:[#allocation7 + $0x470] sm:$0xff] }
 0x835   : > { %16329 = vmatprep.subr.bf16.mxu1 %v20109_v47 }
 0x837   : > { %14974 = vmatmul.mubr.f32.gmra.mrb[56].mxu0 %v19833_v54  ;;  %v9038_v54 = vld [vmem:[#allocation8 + $0x10] sm:$0xff] }
 0x838   : > { %14976 = vmatprep.mubr.f32.mxu0 %v19836_v15  ;;  %v17470_v15 = vld [vmem:[#allocation2 + $0x30] sm:$0xff] }
 0x83b   : > { %14977 = vmatmul.mubr.f32.gmra.mrb[58].mxu0 %v19841_v4  ;;  %v8698_v4 = vld [vmem:[#allocation7 + $0x430] sm:$0xff] }
 0x83c   : > { %14979 = vmatprep.mubr.f32.mxu0 %v19997_v2  ;;  %v8699_v2 = vld [vmem:[#allocation7 + $0x438] sm:$0xff] }
 0x83d   : > { %v15989_v28 = vpack.c.bf16 %v8699_v2, %v8698_v4  ;;  %v17486_v4 = vld [vmem:[#allocation2 + $0xb0] sm:$0xff]  ;;  %v17487_v2 = vld [vmem:[#allocation2 + $0xb8] sm:$0xff] }
 0x83f   : > { %14980 = vmatmul.mubr.f32.gmra.mrb[60].mxu0 %v20002_v3  ;;  %v9046_v3 = vld [vmem:[#allocation8 + $0x50] sm:$0xff] }
 0x840   : > { %14982 = vmatprep.mubr.f32.mxu0 %v6490_v32  ;;  %v20112_v14 = vpack.c.bf16 %v9046_v3, %v9038_v54  ;;  %v17479_v32 = vld [vmem:[#allocation2 + $0x78] sm:$0xff]  ;;  %v17485_v54 = vld [vmem:[#allocation2 + $0xa8] sm:$0xff]  ;;  %v17488_v3 = vld [vmem:[#allocation2 + $0xc0] sm:$0xff] }
 0x842   : > { %16337 = vmatpush1.bf16.msra.mxu1 %v20112_v14 }
 0x843   : > { %14983 = vmatmul.mubr.f32.gmra.mrb[62].mxu0 %v22657_v50  ;;  %16330 = vmatprep.subr.bf16.mxu1 %v20115_v29  ;;  %v8707_v50 = vld [vmem:[#allocation7 + $0x478] sm:$0xff] }
 0x844   : > { %15017 = vmatprep.mubr.f32.mxu0 %v17469_v11  ;;  %v17480_v11 = vld [vmem:[#allocation2 + $0x80] sm:$0xff]  ;;  %v16005_v12 = vpack.c.bf16 %v8707_v50, %v8706_v6  ;;  %v9068_v50 = vld [vmem:[#allocation8 + $0x100] sm:$0xff] }
 0x846   : > { %16338 = vmatpush1.bf16.msra.mxu1 %v20118_v16 }
 0x847   : > { %15018 = vmatmul.mubr.f32.vlgmr.msra.gmra.mrb[32].mxu0 %v17470_v15  ;;  %v9045_v15 = vld [vmem:[#allocation8 + $0x48] sm:$0xff] }
 0x848   : > { %15980 = vmatpush3.bf16.msra.mxu0 %v15977_v26  ;;  %15020 = vmatprep.mubr.f32.mxu0 %v17471_v44  ;;  %v8704_v26 = vld [vmem:[#allocation7 + $0x460] sm:$0xff]  ;;  %v16009_v13 = vpack.c.bf16 %v9045_v15, %v9037_v55 }
 0x849   : > { %15982 = vmatprep.subr.bf16.mxu0 %v15981_v52  ;;  %v16001_v5 = vpack.c.bf16 %v8705_v8, %v8704_v26  ;;  %v17482_v44 = vld [vmem:[#allocation2 + $0x90] sm:$0xff] }
 0x84a   : > { %v9052_v26 = vld [vmem:[#allocation8 + $0x80] sm:$0xff] }
 0x84b   : > { %15021 = vmatmul.mubr.f32.gmra.mrb[34].mxu0 %v17472_v21  ;;  %v17489_v21 = vld [vmem:[#allocation2 + $0xc8] sm:$0xff]  ;;  %v9060_v8 = vld [vmem:[#allocation8 + $0xc0] sm:$0xff] }
 0x84c   : > { %15023 = vmatprep.mubr.f32.mxu0 %v17473_v25  ;;  %15984 = vmatpush3.bf16.msra.mxu0 %v15981_v52  ;;  %v17481_v52 = vld [vmem:[#allocation2 + $0x88] sm:$0xff]  ;;  %v17490_v25 = vld [vmem:[#allocation2 + $0xd0] sm:$0xff] }
 0x84d   : > { %15986 = vmatprep.subr.bf16.mxu0 %v15985_v7  ;;  %v9084_v15 = vld [vmem:[#allocation8 + $0x180] sm:$0xff] }
 0x84f   : > { %15024 = vmatmul.mubr.f32.gmra.mrb[36].mxu0 %v17474_v27  ;;  %v17498_v27 = vld [vmem:[#allocation2 + $0x110] sm:$0xff] }
 0x850   : > { %15026 = vmatprep.mubr.f32.mxu0 %v17475_v53  ;;  %15988 = vmatpush3.bf16.msra.mxu0 %v15985_v7  ;;  %v17484_v7 = vld [vmem:[#allocation2 + $0xa0] sm:$0xff]  ;;  %v20121_v53 = vld [vmem:[#allocation2 + $0x8] sm:$0xff] }
 0x851   : > { %15990 = vmatprep.subr.bf16.mxu0 %v15989_v28 }
 0x853   : > { %15027 = vmatmul.mubr.f32.gmra.mrb[38].mxu0 %v17476_v43  ;;  %v9061_v43 = vld [vmem:[#allocation8 + $0xc8] sm:$0xff] }
 0x854   : > { %15029 = vmatprep.mubr.f32.mxu0 %v17477_v63  ;;  %15992 = vmatpush3.bf16.msra.mxu0 %v15989_v28  ;;  %v17493_v28 = vld [vmem:[#allocation2 + $0xe8] sm:$0xff] }
 0x855   : > { %15994 = vmatprep.subr.bf16.mxu0 %v15993_v56 }
 0x857   : > { %15030 = vmatmul.mubr.f32.gmra.mrb[40].mxu0 %v17478_v39  ;;  %v9069_v39 = vld [vmem:[#allocation8 + $0x108] sm:$0xff] }
 0x858   : > { %15032 = vmatprep.mubr.f32.mxu0 %v17479_v32  ;;  %15996 = vmatpush3.bf16.msra.mxu0 %v15993_v56  ;;  %v9036_v56 = vld [vmem:[#allocation8] sm:$0xff]  ;;  %v9077_v32 = vld [vmem:[#allocation8 + $0x148] sm:$0xff] }
 0x859   : > { %15998 = vmatprep.subr.bf16.mxu0 %v15997_v36  ;;  %v16011_v63 = vpack.c.bf16 %v9044_v42, %v9036_v56  ;;  %v16017_v6 = vpack.c.bf16 %v9077_v32, %v9069_v39  ;;  %v9087_v42 = vld [vmem:[#allocation8 + $0x198] sm:$0xff]  ;;  %v9102_v39 = vld [vmem:[#allocation8 + $0x210] sm:$0xff] }
 0x85b   : > { %15033 = vmatmul.mubr.f32.gmra.mrb[42].mxu0 %v17480_v11  ;;  %v9076_v11 = vld [vmem:[#allocation8 + $0x140] sm:$0xff] }
 0x85c   : > { %15035 = vmatprep.mubr.f32.mxu0 %v17481_v52  ;;  %16000 = vmatpush3.bf16.msra.mxu0 %v15997_v36  ;;  %v16013_v36 = vpack.c.bf16 %v9061_v43, %v9053_v45  ;;  %v9085_v52 = vld [vmem:[#allocation8 + $0x188] sm:$0xff]  ;;  %v9095_v45 = vld [vmem:[#allocation8 + $0x1d8] sm:$0xff]  ;;  %v9086_v43 = vld [vmem:[#allocation8 + $0x190] sm:$0xff] }
 0x85d   : > { %16002 = vmatprep.subr.bf16.mxu0 %v16001_v5 }
 0x85f   : > { %15036 = vmatmul.mubr.f32.gmra.mrb[44].mxu0 %v17482_v44  ;;  %v9101_v44 = vld [vmem:[#allocation8 + $0x208] sm:$0xff] }
 0x860   : > { %15038 = vmatprep.mubr.f32.mxu0 %v17483_v46  ;;  %16004 = vmatpush3.bf16.msra.mxu0 %v16001_v5  ;;  %v16015_v5 = vpack.c.bf16 %v9060_v8, %v9052_v26  ;;  %v9111_v8 = vld [vmem:[#allocation8 + $0x258] sm:$0xff] }
 0x861   : > { %16006 = vmatprep.subr.bf16.mxu0 %v16005_v12 }
 0x863   : > { %15039 = vmatmul.mubr.f32.gmra.mrb[46].mxu0 %v17484_v7  ;;  %v9100_v7 = vld [vmem:[#allocation8 + $0x200] sm:$0xff] }
 0x864   : > { %15041 = vmatprep.mubr.f32.mxu0 %v17485_v54  ;;  %16008 = vmatpush3.bf16.msra.mxu0 %v16005_v12  ;;  %v9093_v12 = vld [vmem:[#allocation8 + $0x1c8] sm:$0xff] }
 0x865   : > { %16010 = vmatprep.subr.bf16.mxu0 %v16009_v13  ;;  %v16021_v55 = vpack.c.bf16 %v9093_v12, %v9085_v52  ;;  %v9117_v54 = vld [vmem:[#allocation8 + $0x288] sm:$0xff]  ;;  %v9118_v52 = vld [vmem:[#allocation8 + $0x290] sm:$0xff] }
 0x867   : > { %15042 = vmatmul.mubr.f32.gmra.mrb[48].mxu0 %v17486_v4 }
 0x868   : > { %15044 = vmatprep.mubr.f32.mxu0 %v17487_v2 }
 0x86b   : > { %15045 = vmatmul.mubr.f32.gmra.mrb[50].mxu0 %v17488_v3  ;;  %v9116_v3 = vld [vmem:[#allocation8 + $0x280] sm:$0xff] }
 0x86c   : > { %15047 = vmatprep.mubr.f32.mxu0 %v17489_v21  ;;  %v9133_v21 = vld [vmem:[#allocation8 + $0x308] sm:$0xff] }
 0x86f   : > { %15048 = vmatmul.mubr.f32.gmra.mrb[52].mxu0 %v17490_v25 }
 0x870   : > { %15050 = vmatprep.mubr.f32.mxu0 %v17491_v51 }
 0x873   : > { %15051 = vmatmul.mubr.f32.gmra.mrb[54].mxu0 %v17492_v37  ;;  %v9132_v37 = vld [vmem:[#allocation8 + $0x300] sm:$0xff] }
 0x874   : > { %15053 = vmatprep.mubr.f32.mxu0 %v17493_v28  ;;  %v9148_v28 = vld [vmem:[#allocation8 + $0x380] sm:$0xff] }
 0x877   : > { %15054 = vmatmul.mubr.f32.gmra.mrb[56].mxu0 %v17494_v38  ;;  %v9156_v38 = vld [vmem:[#allocation8 + $0x3c0] sm:$0xff] }
 0x878   : > { %15056 = vmatprep.mubr.f32.mxu0 %v17495_v61  ;;  %v16039_v61 = vpack.c.bf16 %v9156_v38, %v9148_v28 }
 0x87b   : > { %15057 = vmatmul.mubr.f32.gmra.mrb[58].mxu0 %v17496_v41  ;;  %v9079_v41 = vld [vmem:[#allocation8 + $0x158] sm:$0xff] }
 0x87c   : > { %15059 = vmatprep.mubr.f32.mxu0 %v17497_v30  ;;  %v9070_v30 = vld [vmem:[#allocation8 + $0x110] sm:$0xff] }
 0x87f   : > { %15060 = vmatmul.mubr.f32.gmra.mrb[60].mxu0 %v17498_v27  ;;  %v9078_v27 = vld [vmem:[#allocation8 + $0x150] sm:$0xff] }
 0x880   : > { %15062 = vmatprep.mubr.f32.mxu0 %v20121_v53  ;;  %v20161_v56 = vpack.c.bf16 %v9078_v27, %v9070_v30 }
 0x883   : > { %15063 = vmatmul.mubr.f32.gmra.mrb[62].mxu0 %v20121_v53 }
 0x884   : > { %15097 = vmatprep.mubr.f32.mxu0 %v22631_v18  ;;  %v16019_v18 = vpack.c.bf16 %v9076_v11, %v9068_v50  ;;  %v9119_v50 = vld [vmem:[#allocation8 + $0x298] sm:$0xff] }
 0x885   : > { %v9127_v11 = vld [vmem:[#allocation8 + $0x2d8] sm:$0xff] }
 0x886   : > { %v20177_v12 = vpack.c.bf16 %v9127_v11, %v9119_v50 }
 0x887   : > { %15098 = vmatmul.mubr.f32.vlgmr.msra.gmra.mrb[32].mxu0 %v22632_v33  ;;  %v9092_v33 = vld [vmem:[#allocation8 + $0x1c0] sm:$0xff] }
 0x888   : > { %15100 = vmatprep.mubr.f32.mxu0 %v22633_v17  ;;  %16012 = vmatpush1.bf16.msra.mxu0 %v16011_v63  ;;  %v9109_v17 = vld [vmem:[#allocation8 + $0x248] sm:$0xff]  ;;  %v16023_v46 = vpack.c.bf16 %v9092_v33, %v9084_v15  ;;  %v20165_v63 = vpack.c.bf16 %v9095_v45, %v9087_v42  ;;  %v9135_v15 = vld [vmem:[#allocation8 + $0x318] sm:$0xff] }
 0x889   : > { %16014 = vmatprep.subr.bf16.mxu0 %v16013_v36  ;;  %v16025_v13 = vpack.c.bf16 %v9109_v17, %v9101_v44  ;;  %v9094_v36 = vld [vmem:[#allocation8 + $0x1d0] sm:$0xff]  ;;  %v9143_v33 = vld [vmem:[#allocation8 + $0x358] sm:$0xff] }
 0x88a   : > { %v20167_v26 = vpack.c.bf16 %v9094_v36, %v9086_v43  ;;  %v9134_v44 = vld [vmem:[#allocation8 + $0x310] sm:$0xff]  ;;  %v20183_v17 = vpack.c.bf16 %v9143_v33, %v9135_v15 }
 0x88b   : > { %15101 = vmatmul.mubr.f32.gmra.mrb[34].mxu0 %v22634_v35  ;;  %v9108_v35 = vld [vmem:[#allocation8 + $0x240] sm:$0xff] }
 0x88c   : > { %15103 = vmatprep.mubr.f32.mxu0 %v22635_v9  ;;  %16016 = vmatpush1.bf16.msra.mxu0 %v16015_v5  ;;  %v9125_v9 = vld [vmem:[#allocation8 + $0x2c8] sm:$0xff]  ;;  %v16027_v4 = vpack.c.bf16 %v9108_v35, %v9100_v7  ;;  %v9110_v5 = vld [vmem:[#allocation8 + $0x250] sm:$0xff]  ;;  %v9151_v7 = vld [vmem:[#allocation8 + $0x398] sm:$0xff] }
 0x88d   : > { %16018 = vmatprep.subr.bf16.mxu0 %v16017_v6  ;;  %v16029_v2 = vpack.c.bf16 %v9125_v9, %v9117_v54  ;;  %v20173_v6 = vpack.c.bf16 %v9110_v5, %v9102_v39  ;;  %v9159_v35 = vld [vmem:[#allocation8 + $0x3d8] sm:$0xff]  ;;  %v9150_v54 = vld [vmem:[#allocation8 + $0x390] sm:$0xff] }
 0x88e   : > { %v20189_v9 = vpack.c.bf16 %v9159_v35, %v9151_v7 }
 0x88f   : > { %15104 = vmatmul.mubr.f32.gmra.mrb[36].mxu0 %v22636_v10  ;;  %v9124_v10 = vld [vmem:[#allocation8 + $0x2c0] sm:$0xff] }
 0x890   : > { %15106 = vmatprep.mubr.f32.mxu0 %v22637_v62  ;;  %16020 = vmatpush1.bf16.msra.mxu0 %v16019_v18  ;;  %v9141_v62 = vld [vmem:[#allocation8 + $0x348] sm:$0xff]  ;;  %v16031_v25 = vpack.c.bf16 %v9124_v10, %v9116_v3  ;;  %v9126_v18 = vld [vmem:[#allocation8 + $0x2d0] sm:$0xff] }
 0x891   : > { %16022 = vmatprep.subr.bf16.mxu0 %v16021_v55  ;;  %v16033_v51 = vpack.c.bf16 %v9141_v62, %v9133_v21  ;;  %v20179_v55 = vpack.c.bf16 %v9126_v18, %v9118_v52  ;;  %v9041_v3 = vld [vmem:[#allocation8 + $0x28] sm:$0xff]  ;;  %v20198_v62 = vld [vmem:[%s21817_s6] ss:$0 sm:$0xff] }
 0x892   : > { %v9049_v10 = vld [vmem:[#allocation8 + $0x68] sm:$0xff] }
 0x893   : > { %15107 = vmatmul.mubr.f32.gmra.mrb[38].mxu0 %v22638_v60  ;;  %v9140_v60 = vld [vmem:[#allocation8 + $0x340] sm:$0xff]  ;;  %v16073_v21 = vpack.c.bf16 %v9049_v10, %v9041_v3  ;;  %v9057_v10 = vld [vmem:[#allocation8 + $0xa8] sm:$0xff] }
 0x894   : > { %15109 = vmatprep.mubr.f32.mxu0 %v22639_v23  ;;  %16024 = vmatpush1.bf16.msra.mxu0 %v16023_v46  ;;  %v16035_v23 = vpack.c.bf16 %v9140_v60, %v9132_v37  ;;  %v9142_v46 = vld [vmem:[#allocation8 + $0x350] sm:$0xff]  ;;  %v9048_v3 = vld [vmem:[#allocation8 + $0x60] sm:$0xff] }
 0x895   : > { %16026 = vmatprep.subr.bf16.mxu0 %v16025_v13  ;;  %v20185_v13 = vpack.c.bf16 %v9142_v46, %v9134_v44 }
 0x897   : > { %15110 = vmatmul.mubr.f32.gmra.mrb[40].mxu0 %v19892_v31  ;;  %v22658_v31 = vld [vmem:[#allocation124_spill] sm:$0xff] }
 0x898   : > { %15112 = vmatprep.mubr.f32.mxu0 %v22640_v58  ;;  %16028 = vmatpush1.bf16.msra.mxu0 %v16027_v4  ;;  %v22660_v58 = vld [vmem:[#allocation126_spill] sm:$0xff]  ;;  %v9158_v4 = vld [vmem:[#allocation8 + $0x3d0] sm:$0xff] }
 0x899   : > { %16030 = vmatprep.subr.bf16.mxu0 %v16029_v2  ;;  %v20191_v2 = vpack.c.bf16 %v9158_v4, %v9150_v54  ;;  %v9040_v54 = vld [vmem:[#allocation8 + $0x20] sm:$0xff] }
 0x89b   : > { %15113 = vmatmul.mubr.f32.gmra.mrb[42].mxu0 %v19900_v40  ;;  %v22659_v40 = vld [vmem:[#allocation125_spill] sm:$0xff] }
 0x89c   : > { %15115 = vmatprep.mubr.f32.mxu0 %v22641_v1  ;;  %16032 = vmatpush1.bf16.msra.mxu0 %v16031_v25  ;;  %v22661_v1 = vld [vmem:[#allocation127_spill] sm:$0xff] }
 0x89d   : > { %16034 = vmatprep.subr.bf16.mxu0 %v16033_v51 }
 0x89f   : > { %15116 = vmatmul.mubr.f32.gmra.mrb[44].mxu0 %v22642_v19  ;;  %v22662_v19 = vld [vmem:[#allocation128_spill] sm:$0xff] }
 0x8a0   : > { %15118 = vmatprep.mubr.f32.mxu0 %v22643_v22  ;;  %16036 = vmatpush1.bf16.msra.mxu0 %v16035_v23  ;;  %v22663_v22 = vld [vmem:[#allocation100_spill] sm:$0xff] }
 0x8a3   : > { %15119 = vmatmul.mubr.f32.gmra.mrb[46].mxu0 %v22644_v34  ;;  %v22664_v34 = vld [vmem:[#allocation16_spill] sm:$0xff] }
 0x8a4   : > { %15121 = vmatprep.mubr.f32.mxu0 %v22645_v48  ;;  %v22665_v48 = vld [vmem:[#allocation99_spill] sm:$0xff] }
 0x8a7   : > { %15122 = vmatmul.mubr.f32.gmra.mrb[48].mxu0 %v22646_v0  ;;  %v22666_v0 = vld [vmem:[#allocation98_spill] sm:$0xff] }
 0x8a8   : > { %15124 = vmatprep.mubr.f32.mxu0 %v22647_v49  ;;  %v9149_v49 = vld [vmem:[#allocation8 + $0x388] sm:$0xff] }
 0x8ab   : > { %15125 = vmatmul.mubr.f32.gmra.mrb[50].mxu0 %v22648_v20  ;;  %v9157_v20 = vld [vmem:[#allocation8 + $0x3c8] sm:$0xff] }
 0x8ac   : > { %15127 = vmatprep.mubr.f32.mxu0 %v22649_v57  ;;  %v16037_v57 = vpack.c.bf16 %v9157_v20, %v9149_v49 }
 0x8ae   : > { %16038 = vmatprep.subr.bf16.mxu0 %v16037_v57 }
 0x8af   : > { %15128 = vmatmul.mubr.f32.gmra.mrb[52].mxu0 %v22658_v31 }
 0x8b0   : > { %15130 = vmatprep.mubr.f32.mxu0 %v22659_v40  ;;  %16040 = vmatpush1.bf16.msra.mxu0 %v16039_v61 }
 0x8b1   : > { %16042 = vmatprep.subr.bf16.mxu0 %v20109_v47  ;;  %v9103_v47 = vld [vmem:[#allocation8 + $0x218] sm:$0xff] }
 0x8b2   : > { %v20171_v32 = vpack.c.bf16 %v9111_v8, %v9103_v47 }
 0x8b3   : > { %15131 = vmatmul.mubr.f32.gmra.mrb[54].mxu0 %v22660_v58 }
 0x8b4   : > { %15133 = vmatprep.mubr.f32.mxu0 %v22661_v1 }
 0x8b7   : > { %15134 = vmatmul.mubr.f32.gmra.mrb[56].mxu0 %v22662_v19 }
 0x8b8   : > { %15136 = vmatprep.mubr.f32.mxu0 %v22663_v22 }
 0x8bb   : > { %15137 = vmatmul.mubr.f32.gmra.mrb[58].mxu0 %v19964_v59  ;;  %v9071_v59 = vld [vmem:[#allocation8 + $0x118] sm:$0xff] }
 0x8bc   : > { %15139 = vmatprep.mubr.f32.mxu0 %v22664_v34 }
 0x8bf   : > { %15140 = vmatmul.mubr.f32.gmra.mrb[60].mxu0 %v20074_v24  ;;  %v20159_v24 = vpack.c.bf16 %v9079_v41, %v9071_v59 }
 0x8c0   : > { %15142 = vmatprep.mubr.f32.mxu0 %v22665_v48 }
 0x8c1   : > { %16331 = vmatprep.subr.bf16.mxu1 %v20159_v24 }
 0x8c2   : > { %16339 = vmatpush1.bf16.msra.mxu1 %v20161_v56 }
 0x8c3   : > { %15143 = vmatmul.mubr.f32.gmra.mrb[62].mxu0 %v22666_v0  ;;  %16332 = vmatprep.subr.bf16.mxu1 %v20165_v63 }
 0x8c4   : > { %9270 = vmatprep.mubr.f32.mxu0 %v20121_v53 }
 0x8c6   : > { %16340 = vmatpush1.bf16.msra.mxu1 %v20167_v26 }
 0x8c7   : > { %16333 = vmatprep.subr.bf16.mxu1 %v20171_v32 }
 0x8ca   : > { %16341 = vmatpush1.bf16.msra.mxu1 %v20173_v6 }
 0x8cb   : > { %16334 = vmatprep.subr.bf16.mxu1 %v20177_v12 }
 0x8ce   : > { %16342 = vmatpush1.bf16.msra.mxu1 %v20179_v55 }
 0x8cf   : > { %16335 = vmatprep.subr.bf16.mxu1 %v20183_v17 }
 0x8d2   : > { %16343 = vmatpush1.bf16.msra.mxu1 %v20185_v13 }
 0x8d3   : > { %16336 = vmatprep.subr.bf16.mxu1 %v20189_v9 }
 0x8d6   : > { %16344 = vmatpush1.bf16.msra.mxu1 %v20191_v2 }
 0x8d7   : > { %16074 = vmatprep.subr.bf16.mxu1 %v16073_v21  ;;  %v9065_v21 = vld [vmem:[#allocation8 + $0xe8] sm:$0xff] }
 0x95a   : > { %v15099_v25 = vpop.f32.mrb[32].mxu0 }
 0x95b   : > { %v8774_v51 = vpop.f32.mrb[33].mxu0  ;;  %v8973_v60 = vadd.f32 %v15099_v25, %v20198_v62 }
 0x95c   : > { %v8972_v37 = vadd.f32 %v20198_v62, %v8774_v51 }
 0x95d   : > { %v20207_v58 = vmax.f32 %v8973_v60, 0.0  ;;  %v16077_v60 = vpack.c.bf16 %v9065_v21, %v9057_v10  ;;  %v9105_v10 = vld [vmem:[#allocation8 + $0x228] sm:$0xff] }
 0x95e   : > { %v20202_v23 = vmax.f32 %v8972_v37, 0.0  ;;  %v15102_v31 = vpop.f32.mrb[34].mxu0  ;;  %v16075_v37 = vpack.c.bf16 %v9048_v3, %v9040_v54  ;;  %v9088_v54 = vld [vmem:[#allocation8 + $0x1a0] sm:$0xff]  ;;  %v9113_v21 = vld [vmem:[#allocation8 + $0x268] sm:$0xff] }
 0x95f   : > { %v8784_v40 = vpop.f32.mrb[35].mxu0  ;;  %v8975_v34 = vadd.f32 %v15102_v31, %v20198_v62  ;;  %v9056_v31 = vld [vmem:[#allocation8 + $0xa0] sm:$0xff] }
 0x960   : > { %9271 = vmatmul.mubr.f32.vlgmr.msra.gmra.mrb[64].mxu0 %v20202_v23  ;;  %v8974_v1 = vadd.f32 %v20198_v62, %v8784_v40 }
 0x961   : > { %9276 = vmatprep.mubr.f32.mxu0 %v20121_v53  ;;  %16044 = vmatpush1.bf16.msra.mxu0 %v20112_v14 }
 0x962   : > { %v15105_v19 = vpop.f32.mrb[36].mxu0  ;;  %16046 = vmatprep.subr.bf16.mxu0 %v20115_v29  ;;  %v20215_v48 = vmax.f32 %v8974_v1, 0.0  ;;  %v20221_v29 = vmax.f32 %v8975_v34, 0.0 }
 0x963   : > { %v8794_v22 = vpop.f32.mrb[37].mxu0  ;;  %v8977_v57 = vadd.f32 %v15105_v19, %v20198_v62 }
 0x964   : > { %9277 = vmatmul.mubr.f32.gmra.mrb[66].mxu0 %v20207_v58  ;;  %v8976_v49 = vadd.f32 %v20198_v62, %v8794_v22 }
 0x965   : > { %9282 = vmatprep.mubr.f32.mxu0 %v20121_v53  ;;  %16048 = vmatpush1.bf16.msra.mxu0 %v20118_v16  ;;  %v20235_v59 = vmax.f32 %v8977_v57, 0.0 }
 0x966   : > { %v15108_v0 = vpop.f32.mrb[38].mxu0  ;;  %16050 = vmatprep.subr.bf16.mxu0 %v20159_v24  ;;  %v20229_v28 = vmax.f32 %v8976_v49, 0.0  ;;  %v9081_v49 = vld [vmem:[#allocation8 + $0x168] sm:$0xff] }
 0x967   : > { %v8804_v14 = vpop.f32.mrb[39].mxu0  ;;  %v8979_v27 = vadd.f32 %v15108_v0, %v20198_v62  ;;  %v9064_v0 = vld [vmem:[#allocation8 + $0xe0] sm:$0xff] }
 0x968   : > { %9283 = vmatmul.mubr.f32.gmra.mrb[68].mxu0 %v20215_v48  ;;  %v8978_v41 = vadd.f32 %v20198_v62, %v8804_v14  ;;  %v9073_v14 = vld [vmem:[#allocation8 + $0x128] sm:$0xff] }
 0x969   : > { %9288 = vmatprep.mubr.f32.mxu0 %v20121_v53  ;;  %16052 = vmatpush1.bf16.msra.mxu0 %v20161_v56  ;;  %v20253_v43 = vmax.f32 %v8979_v27, 0.0  ;;  %v16081_v57 = vpack.c.bf16 %v9081_v49, %v9073_v14 }
 0x96a   : > { %v15111_v20 = vpop.f32.mrb[40].mxu0  ;;  %16054 = vmatprep.subr.bf16.mxu0 %v20165_v63  ;;  %v20243_v56 = vmax.f32 %v8978_v41, 0.0 }
 0x96b   : > { %v8814_v16 = vpop.f32.mrb[41].mxu0  ;;  %v8981_v39 = vadd.f32 %v15111_v20, %v20198_v62 }
 0x96c   : > { %9289 = vmatmul.mubr.f32.gmra.mrb[70].mxu0 %v20221_v29  ;;  %v8980_v63 = vadd.f32 %v20198_v62, %v8814_v16  ;;  %v16079_v16 = vpack.c.bf16 %v9064_v0, %v9056_v31  ;;  %v9104_v31 = vld [vmem:[#allocation8 + $0x220] sm:$0xff] }
 0x96d   : > { %9294 = vmatprep.mubr.f32.mxu0 %v20121_v53  ;;  %16056 = vmatpush1.bf16.msra.mxu0 %v20167_v26  ;;  %v20277_v52 = vmax.f32 %v8981_v39, 0.0 }
 0x96e   : > { %v15114_v38 = vpop.f32.mrb[42].mxu0  ;;  %16058 = vmatprep.subr.bf16.mxu0 %v20171_v32  ;;  %v20267_v32 = vmax.f32 %v8980_v63, 0.0  ;;  %v9080_v63 = vld [vmem:[#allocation8 + $0x160] sm:$0xff] }
 0x96f   : > { %v8824_v61 = vpop.f32.mrb[43].mxu0  ;;  %v8983_v44 = vadd.f32 %v15114_v38, %v20198_v62  ;;  %v9072_v38 = vld [vmem:[#allocation8 + $0x120] sm:$0xff] }
 0x970   : > { %9295 = vmatmul.mubr.f32.gmra.mrb[72].mxu0 %v20229_v28 }
 0x971   : > { %9300 = vmatprep.mubr.f32.mxu0 %v20121_v53  ;;  %16060 = vmatpush1.bf16.msra.mxu0 %v20173_v6 }
 0x972   : > { %v15117_v30 = vpop.f32.mrb[44].mxu0  ;;  %16062 = vmatprep.subr.bf16.mxu0 %v20177_v12  ;;  %v8982_v12 = vadd.f32 %v20198_v62, %v8824_v61 }
 0x973   : > { %v8834_v24 = vpop.f32.mrb[45].mxu0  ;;  %v8985_v40 = vadd.f32 %v15117_v30, %v20198_v62 }
 0x974   : > { %9301 = vmatmul.mubr.f32.gmra.mrb[74].mxu0 %v20235_v59  ;;  %v8984_v4 = vadd.f32 %v20198_v62, %v8834_v24 }
 0x975   : > { %9306 = vmatprep.mubr.f32.mxu0 %v20121_v53  ;;  %16064 = vmatpush1.bf16.msra.mxu0 %v20179_v55  ;;  %v20314_v61 = vmax.f32 %v8985_v40, 0.0  ;;  %v9112_v40 = vld [vmem:[#allocation8 + $0x260] sm:$0xff] }
 0x976   : > { %v20245_v42 = vpop.f32.mrb[46].mxu0  ;;  %16066 = vmatprep.subr.bf16.mxu0 %v20183_v17  ;;  %v20289_v17 = vmax.f32 %v8982_v12, 0.0  ;;  %v20306_v1 = vmax.f32 %v8984_v4, 0.0  ;;  %v9096_v4 = vld [vmem:[#allocation8 + $0x1e0] sm:$0xff] }
 0x977   : > { %v20248_v45 = vpop.f32.mrb[47].mxu0 }
 0x978   : > { %9307 = vmatmul.mubr.f32.gmra.mrb[76].mxu0 %v20243_v56  ;;  %v8986_v41 = vadd.f32 %v20198_v62, %v20248_v45  ;;  %v16083_v45 = vpack.c.bf16 %v9080_v63, %v9072_v38  ;;  %v9145_v38 = vld [vmem:[#allocation8 + $0x368] sm:$0xff]  ;;  %v9136_v63 = vld [vmem:[#allocation8 + $0x320] sm:$0xff] }
 0x979   : > { %9312 = vmatprep.mubr.f32.mxu0 %v20121_v53  ;;  %16068 = vmatpush1.bf16.msra.mxu0 %v20185_v13 }
 0x97a   : > { %v15123_v36 = vpop.f32.mrb[48].mxu0  ;;  %16070 = vmatprep.subr.bf16.mxu0 %v20189_v9  ;;  %v20299_v9 = vmax.f32 %v8983_v44, 0.0 }
 0x97b   : > { %v20258_v26 = vadd.f32 %v15123_v36, %v20198_v62  ;;  %v8854_v47 = vpop.f32.mrb[49].mxu0  ;;  %v9089_v36 = vld [vmem:[#allocation8 + $0x1a8] sm:$0xff] }
 0x97c   : > { %v20261_v8 = vadd.f32 %v20198_v62, %v8854_v47  ;;  %9313 = vmatmul.mubr.f32.gmra.mrb[78].mxu0 %v20253_v43  ;;  %v9097_v47 = vld [vmem:[#allocation8 + $0x1e8] sm:$0xff] }
 0x97d   : > { %9318 = vmatprep.mubr.f32.mxu0 %v20121_v53  ;;  %16072 = vmatpush1.bf16.msra.mxu0 %v20191_v2  ;;  %v16085_v12 = vpack.c.bf16 %v9097_v47, %v9089_v36  ;;  %v9144_v36 = vld [vmem:[#allocation8 + $0x360] sm:$0xff]  ;;  %v9153_v47 = vld [vmem:[#allocation8 + $0x3a8] sm:$0xff] }
 0x97e   : > { %v15126_v5 = vpop.f32.mrb[50].mxu0  ;;  %v20351_v0 = vmax.f32 %v20261_v8, 0.0  ;;  %v20360_v8 = vmax.f32 %v20258_v26, 0.0 }
 0x97f   : > { %v20270_v6 = vadd.f32 %v15126_v5, %v20198_v62  ;;  %v8864_v50 = vpop.f32.mrb[51].mxu0 }
 0x980   : > { %v20273_v11 = vadd.f32 %v20198_v62, %v8864_v50  ;;  %9319 = vmatmul.mubr.f32.gmra.mrb[80].mxu0 %v20267_v32 }
 0x981   : > { %9324 = vmatprep.mubr.f32.mxu0 %v20121_v53 }
 0x982   : > { %v15129_v18 = vpop.f32.mrb[52].mxu0  ;;  %v20369_v26 = vmax.f32 %v20273_v11, 0.0  ;;  %v20378_v11 = vmax.f32 %v20270_v6, 0.0 }
 0x983   : > { %v20281_v55 = vadd.f32 %v15129_v18, %v20198_v62  ;;  %v8874_v15 = vpop.f32.mrb[53].mxu0  ;;  %v8987_v18 = vadd.f32 %v20245_v42, %v20198_v62 }
 0x984   : > { %v20284_v33 = vadd.f32 %v20198_v62, %v8874_v15  ;;  %9325 = vmatmul.mubr.f32.gmra.mrb[82].mxu0 %v20277_v52  ;;  %v20329_v15 = vmax.f32 %v8986_v41, 0.0 }
 0x985   : > { %9330 = vmatprep.mubr.f32.mxu0 %v20121_v53 }
 0x986   : > { %v15132_v46 = vpop.f32.mrb[54].mxu0 }
 0x987   : > { %v20292_v13 = vadd.f32 %v15132_v46, %v20198_v62  ;;  %v8884_v7 = vpop.f32.mrb[55].mxu0 }
 0x988   : > { %v20295_v35 = vadd.f32 %v20198_v62, %v8884_v7  ;;  %9331 = vmatmul.mubr.f32.gmra.mrb[84].mxu0 %v20289_v17 }
 0x989   : > { %9336 = vmatprep.mubr.f32.mxu0 %v20121_v53 }
 0x98a   : > { %v15135_v2 = vpop.f32.mrb[56].mxu0 }
 0x98b   : > { %v8894_v25 = vpop.f32.mrb[57].mxu0  ;;  %v8997_v19 = vadd.f32 %v15135_v2, %v20198_v62 }
 0x98c   : > { %v8996_v51 = vadd.f32 %v20198_v62, %v8894_v25  ;;  %9337 = vmatmul.mubr.f32.gmra.mrb[86].mxu0 %v20299_v9  ;;  %v16087_v25 = vpack.c.bf16 %v9096_v4, %v9088_v54 }
 0x98d   : > { %9342 = vmatprep.mubr.f32.mxu0 %v20121_v53  ;;  %v20318_v30 = vmax.f32 %v8997_v19, 0.0  ;;  %v9121_v19 = vld [vmem:[#allocation8 + $0x2a8] sm:$0xff] }
 0x98e   : > { %v20309_v22 = vmax.f32 %v8996_v51, 0.0  ;;  %v15138_v34 = vpop.f32.mrb[58].mxu0  ;;  %v20342_v51 = vmax.f32 %v8987_v18, 0.0  ;;  %v9160_v18 = vld [vmem:[#allocation8 + $0x3e0] sm:$0xff] }
 0x98f   : > { %v8904_v20 = vpop.f32.mrb[59].mxu0  ;;  %v8999_v44 = vadd.f32 %v15138_v34, %v20198_v62  ;;  %v16091_v34 = vpack.c.bf16 %v9112_v40, %v9104_v31  ;;  %v9058_v31 = vld [vmem:[#allocation8 + $0xb0] sm:$0xff] }
 0x990   : > { %9343 = vmatmul.mubr.f32.gmra.mrb[88].mxu0 %v20306_v1  ;;  %9672 = vmatmul.mubr.f32.vlgmr.msra.gmra.mrb[32].mxu1 %v20309_v22  ;;  %v8998_v24 = vadd.f32 %v20198_v62, %v8904_v20  ;;  %v9120_v20 = vld [vmem:[#allocation8 + $0x2a0] sm:$0xff]  ;;  %v9066_v40 = vld [vmem:[#allocation8 + $0xf0] sm:$0xff] }
 0x991   : > { %16076 = vmatpush1.bf16.msra.mxu1 %v16075_v37  ;;  %9348 = vmatprep.mubr.f32.mxu0 %v20121_v53  ;;  %v20344_v37 = vmax.f32 %v8999_v44, 0.0  ;;  %v9043_v44 = vld [vmem:[#allocation8 + $0x38] sm:$0xff] }
 0x992   : > { %v15141_v27 = vpop.f32.mrb[60].mxu0  ;;  %9677 = vmatprep.mubr.f32.mxu1 %v20121_v53  ;;  %16078 = vmatprep.subr.bf16.mxu1 %v16077_v60  ;;  %v20332_v46 = vmax.f32 %v8998_v24, 0.0  ;;  %v16089_v60 = vpack.c.bf16 %v9113_v21, %v9105_v10  ;;  %v9042_v10 = vld [vmem:[#allocation8 + $0x30] sm:$0xff] }
 0x993   : > { %v9001_v39 = vadd.f32 %v15141_v27, %v20198_v62  ;;  %v8914_v5 = vpop.f32.mrb[61].mxu0  ;;  %v9050_v21 = vld [vmem:[#allocation8 + $0x70] sm:$0xff] }
 0x994   : > { %v9000_v50 = vadd.f32 %v20198_v62, %v8914_v5  ;;  %9349 = vmatmul.mubr.f32.gmra.mrb[90].mxu0 %v20314_v61  ;;  %9678 = vmatmul.mubr.f32.gmra.mrb[34].mxu1 %v20318_v30  ;;  %v9161_v5 = vld [vmem:[#allocation8 + $0x3e8] sm:$0xff]  ;;  %v16107_v6 = vpack.c.bf16 %v9050_v21, %v9042_v10  ;;  %v9130_v10 = vld [vmem:[#allocation8 + $0x2f0] sm:$0xff]  ;;  %v9139_v21 = vld [vmem:[#allocation8 + $0x338] sm:$0xff] }
 0x995   : > { %16080 = vmatpush1.bf16.msra.mxu1 %v16079_v16  ;;  %9354 = vmatprep.mubr.f32.mxu0 %v20121_v53  ;;  %v9128_v16 = vld [vmem:[#allocation8 + $0x2e0] sm:$0xff]  ;;  %v20362_v24 = vmax.f32 %v9001_v39, 0.0 }
 0x996   : > { %v15144_v7 = vpop.f32.mrb[62].mxu0  ;;  %9683 = vmatprep.mubr.f32.mxu1 %v20121_v53  ;;  %16082 = vmatprep.subr.bf16.mxu1 %v16081_v57  ;;  %v20353_v14 = vmax.f32 %v9000_v50, 0.0  ;;  %v9137_v57 = vld [vmem:[#allocation8 + $0x328] sm:$0xff]  ;;  %v16095_v41 = vpack.c.bf16 %v9128_v16, %v9120_v20  ;;  %v16099_v50 = vpack.c.bf16 %v9144_v36, %v9136_v63  ;;  %v9074_v20 = vld [vmem:[#allocation8 + $0x130] sm:$0xff] }
 0x997   : > { %v20336_v2 = vadd.f32 %v15144_v7, %v20198_v62  ;;  %v8924_v3 = vpop.f32.mrb[63].mxu0  ;;  %v16097_v27 = vpack.c.bf16 %v9145_v38, %v9137_v57  ;;  %v9051_v7 = vld [vmem:[#allocation8 + $0x78] sm:$0xff]  ;;  %v9082_v16 = vld [vmem:[#allocation8 + $0x170] sm:$0xff] }
 0x998   : > { %v9002_v42 = vadd.f32 %v20198_v62, %v8924_v3  ;;  %9355 = vmatmul.mubr.f32.gmra.mrb[92].mxu0 %v20329_v15  ;;  %9684 = vmatmul.mubr.f32.gmra.mrb[36].mxu1 %v20332_v46  ;;  %v9129_v62 = vld [vmem:[#allocation8 + $0x2e8] sm:$0xff]  ;;  %v16105_v3 = vpack.c.bf16 %v9051_v7, %v9043_v44  ;;  %v9091_v57 = vld [vmem:[#allocation8 + $0x1b8] sm:$0xff]  ;;  %v9090_v63 = vld [vmem:[#allocation8 + $0x1b0] sm:$0xff] }
 0x999   : > { %16084 = vmatpush1.bf16.msra.mxu1 %v16083_v45  ;;  %9360 = vmatprep.mubr.f32.mxu0 %v20121_v53  ;;  %v16093_v49 = vpack.c.bf16 %v9129_v62, %v9121_v19  ;;  %v16101_v45 = vpack.c.bf16 %v9161_v5, %v9153_v47  ;;  %v20381_v4 = vmax.f32 %v20336_v2, 0.0  ;;  %v9075_v19 = vld [vmem:[#allocation8 + $0x138] sm:$0xff]  ;;  %v9098_v36 = vld [vmem:[#allocation8 + $0x1f0] sm:$0xff] }
 0x99a   : > { %9689 = vmatprep.mubr.f32.mxu1 %v20121_v53  ;;  %16086 = vmatprep.subr.bf16.mxu1 %v16085_v12  ;;  %v20371_v39 = vmax.f32 %v9002_v42, 0.0  ;;  %v9152_v12 = vld [vmem:[#allocation8 + $0x3a0] sm:$0xff]  ;;  %v9059_v42 = vld [vmem:[#allocation8 + $0xb8] sm:$0xff] }
 0x99b   : > { %v16103_v54 = vpack.c.bf16 %v9160_v18, %v9152_v12  ;;  %v9083_v62 = vld [vmem:[#allocation8 + $0x178] sm:$0xff]  ;;  %v9106_v12 = vld [vmem:[#allocation8 + $0x230] sm:$0xff] }
 0x99c   : > { %9361 = vmatmul.mubr.f32.gmra.mrb[94].mxu0 %v20342_v51  ;;  %9690 = vmatmul.mubr.f32.gmra.mrb[38].mxu1 %v20344_v37  ;;  %v9099_v38 = vld [vmem:[#allocation8 + $0x1f8] sm:$0xff]  ;;  %v9114_v18 = vld [vmem:[#allocation8 + $0x270] sm:$0xff] }
 0x99d   : > { %16088 = vmatpush1.bf16.msra.mxu1 %v16087_v25  ;;  %9366 = vmatprep.mubr.f32.mxu0 %v20121_v53  ;;  %v9067_v25 = vld [vmem:[#allocation8 + $0xf8] sm:$0xff] }
 0x99e   : > { %9695 = vmatprep.mubr.f32.mxu1 %v20121_v53  ;;  %16090 = vmatprep.subr.bf16.mxu1 %v16089_v60  ;;  %v20388_v60 = vmax.f32 %v20284_v33, 0.0  ;;  %v16109_v2 = vpack.c.bf16 %v9067_v25, %v9059_v42  ;;  %v16111_v33 = vpack.c.bf16 %v9066_v40, %v9058_v31  ;;  %v9107_v47 = vld [vmem:[#allocation8 + $0x238] sm:$0xff]  ;;  %v9146_v31 = vld [vmem:[#allocation8 + $0x370] sm:$0xff] }
 0x99f   : > { %v9115_v5 = vld [vmem:[#allocation8 + $0x278] sm:$0xff] }
 0x9a0   : > { %9367 = vmatmul.mubr.f32.gmra.mrb[96].mxu0 %v20351_v0  ;;  %9696 = vmatmul.mubr.f32.gmra.mrb[40].mxu1 %v20353_v14  ;;  %v9123_v44 = vld [vmem:[#allocation8 + $0x2b8] sm:$0xff] }
 0x9a1   : > { %16092 = vmatpush1.bf16.msra.mxu1 %v16091_v34  ;;  %9372 = vmatprep.mubr.f32.mxu0 %v20121_v53  ;;  %v20395_v34 = vmax.f32 %v20281_v55, 0.0  ;;  %v20403_v55 = vmax.f32 %v20295_v35, 0.0  ;;  %v16119_v35 = vpack.c.bf16 %v9098_v36, %v9090_v63  ;;  %v9131_v7 = vld [vmem:[#allocation8 + $0x2f8] sm:$0xff]  ;;  %v10492_v63 = vld [vmem:[#allocation10 + $0x10] sm:$0xff] }
 0x9a2   : > { %9701 = vmatprep.mubr.f32.mxu1 %v20121_v53  ;;  %16094 = vmatprep.subr.bf16.mxu1 %v16093_v49  ;;  %v16113_v49 = vpack.c.bf16 %v9083_v62, %v9075_v19  ;;  %v9147_v42 = vld [vmem:[#allocation8 + $0x378] sm:$0xff] }
 0x9a3   : > { %v9155_v40 = vld [vmem:[#allocation8 + $0x3b8] sm:$0xff] }
 0x9a4   : > { %9373 = vmatmul.mubr.f32.gmra.mrb[98].mxu0 %v20360_v8  ;;  %9702 = vmatmul.mubr.f32.gmra.mrb[42].mxu1 %v20362_v24  ;;  %v9163_v19 = vld [vmem:[#allocation8 + $0x3f8] sm:$0xff] }
 0x9a5   : > { %16096 = vmatpush1.bf16.msra.mxu1 %v16095_v41  ;;  %9378 = vmatprep.mubr.f32.mxu0 %v20121_v53  ;;  %v16115_v41 = vpack.c.bf16 %v9082_v16, %v9074_v20  ;;  %v9162_v20 = vld [vmem:[#allocation8 + $0x3f0] sm:$0xff]  ;;  %v10493_v36 = vld [vmem:[#allocation10 + $0x18] sm:$0xff] }
 0x9a6   : > { %9707 = vmatprep.mubr.f32.mxu1 %v20121_v53  ;;  %16098 = vmatprep.subr.bf16.mxu1 %v16097_v27  ;;  %v16117_v27 = vpack.c.bf16 %v9099_v38, %v9091_v57  ;;  %v22154_v57 = vmov 0.0|0.0   ;;  %v20471_v38 = vld [vmem:[#allocation2 + $0x8] sm:$0xff] }
 0x9a8   : > { %9379 = vmatmul.mubr.f32.gmra.mrb[100].mxu0 %v20369_v26  ;;  %9708 = vmatmul.mubr.f32.gmra.mrb[44].mxu1 %v20371_v39 }
 0x9a9   : > { %16100 = vmatpush1.bf16.msra.mxu1 %v16099_v50  ;;  %9384 = vmatprep.mubr.f32.mxu0 %v20121_v53  ;;  %v20410_v50 = vmax.f32 %v20292_v13, 0.0  ;;  %v16125_v13 = vpack.c.bf16 %v9131_v7, %v9123_v44  ;;  %v10496_v44 = vld [vmem:[#allocation10 + $0x30] sm:$0xff]  ;;  %v10497_v7 = vld [vmem:[#allocation10 + $0x38] sm:$0xff] }
 0x9aa   : > { %9713 = vmatprep.mubr.f32.mxu1 %v20121_v53  ;;  %16102 = vmatprep.subr.bf16.mxu1 %v16101_v45  ;;  %v16121_v45 = vpack.c.bf16 %v9115_v5, %v9107_v47  ;;  %v16141_v47 = vpack.c.bf16 %v10493_v36, %v10492_v63 }
 0x9ac   : > { %9385 = vmatmul.mubr.f32.gmra.mrb[102].mxu0 %v20378_v11  ;;  %9714 = vmatmul.mubr.f32.gmra.mrb[46].mxu1 %v20381_v4 }
 0x9ad   : > { %16104 = vmatpush1.bf16.msra.mxu1 %v16103_v54  ;;  %9390 = vmatprep.mubr.f32.mxu0 %v20121_v53  ;;  %v16123_v54 = vpack.c.bf16 %v9114_v18, %v9106_v12 }
 0x9ae   : > { %9784 = vmatprep.mubr.f32.mxu1 %v20121_v53  ;;  %16106 = vmatprep.subr.bf16.mxu1 %v16105_v3  ;;  %v9122_v3 = vld [vmem:[#allocation8 + $0x2b0] sm:$0xff] }
 0x9af   : > { %v16127_v25 = vpack.c.bf16 %v9130_v10, %v9122_v3  ;;  %v10498_v3 = vld [vmem:[#allocation10 + $0x40] sm:$0xff]  ;;  %v10499_v10 = vld [vmem:[#allocation10 + $0x48] sm:$0xff] }
 0x9b0   : > { %9391 = vmatmul.mubr.f32.gmra.mrb[104].mxu0 %v20388_v60  ;;  %9785 = vmatmul.mubr.f32.vlgmr.msra.gmra.mrb[48].mxu1 %v20202_v23 }
 0x9b1   : > { %16108 = vmatpush1.bf16.msra.mxu1 %v16107_v6  ;;  %9396 = vmatprep.mubr.f32.mxu0 %v20121_v53  ;;  %v16129_v6 = vpack.c.bf16 %v9147_v42, %v9139_v21 }
 0x9b2   : > { %9790 = vmatprep.mubr.f32.mxu1 %v20121_v53  ;;  %16110 = vmatprep.subr.bf16.mxu1 %v16109_v2  ;;  %v9138_v2 = vld [vmem:[#allocation8 + $0x330] sm:$0xff] }
 0x9b3   : > { %v16131_v62 = vpack.c.bf16 %v9146_v31, %v9138_v2 }
 0x9b4   : > { %9397 = vmatmul.mubr.f32.gmra.mrb[106].mxu0 %v20395_v34  ;;  %9791 = vmatmul.mubr.f32.gmra.mrb[50].mxu1 %v20207_v58 }
 0x9b5   : > { %9402 = vmatprep.mubr.f32.mxu0 %v20121_v53  ;;  %9796 = vmatprep.mubr.f32.mxu1 %v20121_v53 }
 0x9b6   : > { %16112 = vmatpush1.bf16.msra.mxu1 %v16111_v33  ;;  %v16133_v33 = vpack.c.bf16 %v9163_v19, %v9155_v40  ;;  %v10503_v19 = vld [vmem:[#allocation10 + $0x68] sm:$0xff] }
 0x9b7   : > { %16114 = vmatprep.subr.bf16.mxu1 %v16113_v49  ;;  %v9154_v49 = vld [vmem:[#allocation8 + $0x3b0] sm:$0xff] }
 0x9b8   : > { %9403 = vmatmul.mubr.f32.gmra.mrb[108].mxu0 %v20403_v55  ;;  %9797 = vmatmul.mubr.f32.gmra.mrb[52].mxu1 %v20215_v48  ;;  %v16135_v16 = vpack.c.bf16 %v9162_v20, %v9154_v49  ;;  %v10505_v20 = vld [vmem:[#allocation10 + $0x78] sm:$0xff] }
 0x9b9   : > { %9408 = vmatprep.mubr.f32.mxu0 %v20121_v53  ;;  %9802 = vmatprep.mubr.f32.mxu1 %v20121_v53 }
 0x9ba   : > { %16116 = vmatpush1.bf16.msra.mxu1 %v16115_v41  ;;  %v10491_v41 = vld [vmem:[#allocation10 + $0x8] sm:$0xff] }
 0x9bb   : > { %16118 = vmatprep.subr.bf16.mxu1 %v16117_v27 }
 0x9bc   : > { %9409 = vmatmul.mubr.f32.gmra.mrb[110].mxu0 %v20410_v50  ;;  %9803 = vmatmul.mubr.f32.gmra.mrb[54].mxu1 %v20221_v29 }
 0x9bd   : > { %9414 = vmatprep.mubr.f32.mxu0 %v20121_v53  ;;  %9808 = vmatprep.mubr.f32.mxu1 %v20121_v53 }
 0x9be   : > { %16120 = vmatpush1.bf16.msra.mxu1 %v16119_v35  ;;  %v10494_v35 = vld [vmem:[#allocation10 + $0x20] sm:$0xff] }
 0x9bf   : > { %16122 = vmatprep.subr.bf16.mxu1 %v16121_v45  ;;  %v10495_v45 = vld [vmem:[#allocation10 + $0x28] sm:$0xff] }
 0x9c0   : > { %9415 = vmatmul.mubr.f32.gmra.mrb[112].mxu0 %v20309_v22  ;;  %9809 = vmatmul.mubr.f32.gmra.mrb[56].mxu1 %v20229_v28 }
 0x9c1   : > { %9420 = vmatprep.mubr.f32.mxu0 %v20121_v53  ;;  %9814 = vmatprep.mubr.f32.mxu1 %v20121_v53 }
 0x9c2   : > { %16124 = vmatpush1.bf16.msra.mxu1 %v16123_v54 }
 0x9c3   : > { %16126 = vmatprep.subr.bf16.mxu1 %v16125_v13 }
 0x9c4   : > { %9421 = vmatmul.mubr.f32.gmra.mrb[114].mxu0 %v20318_v30  ;;  %9815 = vmatmul.mubr.f32.gmra.mrb[58].mxu1 %v20235_v59 }
 0x9c5   : > { %9426 = vmatprep.mubr.f32.mxu0 %v20121_v53  ;;  %9820 = vmatprep.mubr.f32.mxu1 %v20121_v53 }
 0x9c6   : > { %16128 = vmatpush1.bf16.msra.mxu1 %v16127_v25  ;;  %v10500_v25 = vld [vmem:[#allocation10 + $0x50] sm:$0xff] }
 0x9c7   : > { %16130 = vmatprep.subr.bf16.mxu1 %v16129_v6  ;;  %v10501_v6 = vld [vmem:[#allocation10 + $0x58] sm:$0xff] }
 0x9c8   : > { %9427 = vmatmul.mubr.f32.gmra.mrb[116].mxu0 %v20332_v46  ;;  %9821 = vmatmul.mubr.f32.gmra.mrb[60].mxu1 %v20243_v56  ;;  %v16153_v31 = vpack.c.bf16 %v10501_v6, %v10500_v25 }
 0x9c9   : > { %9432 = vmatprep.mubr.f32.mxu0 %v20121_v53  ;;  %9826 = vmatprep.mubr.f32.mxu1 %v20121_v53 }
 0x9ca   : > { %16132 = vmatpush1.bf16.msra.mxu1 %v16131_v62 }
 0x9cb   : > { %16134 = vmatprep.subr.bf16.mxu1 %v16133_v33 }
 0x9cc   : > { %9433 = vmatmul.mubr.f32.gmra.mrb[118].mxu0 %v20344_v37  ;;  %9827 = vmatmul.mubr.f32.gmra.mrb[62].mxu1 %v20253_v43 }
 0x9cd   : > { %9438 = vmatprep.mubr.f32.mxu0 %v20121_v53  ;;  %9832 = vmatprep.mubr.f32.mxu1 %v20121_v53 }
 0x9ce   : > { %16136 = vmatpush1.bf16.msra.mxu1 %v16135_v16 }
 0x9cf   : > { %16137 = vmatprep.subr.bf16.mxu1 %v22154_v57 }
 0x9d0   : > { %9439 = vmatmul.mubr.f32.gmra.mrb[120].mxu0 %v20353_v14  ;;  %9833 = vmatmul.mubr.f32.gmra.mrb[64].mxu1 %v20267_v32 }
 0x9d1   : > { %9444 = vmatprep.mubr.f32.mxu0 %v20121_v53  ;;  %9838 = vmatprep.mubr.f32.mxu1 %v20121_v53 }
 0x9d4   : > { %9445 = vmatmul.mubr.f32.gmra.mrb[122].mxu0 %v20362_v24  ;;  %9839 = vmatmul.mubr.f32.gmra.mrb[66].mxu1 %v20277_v52 }
 0x9d5   : > { %9450 = vmatprep.mubr.f32.mxu0 %v20121_v53  ;;  %9844 = vmatprep.mubr.f32.mxu1 %v20121_v53 }
 0x9d8   : > { %9451 = vmatmul.mubr.f32.gmra.mrb[124].mxu0 %v20371_v39  ;;  %9845 = vmatmul.mubr.f32.gmra.mrb[68].mxu1 %v20289_v17 }
 0x9d9   : > { %9456 = vmatprep.mubr.f32.mxu0 %v20121_v53  ;;  %9850 = vmatprep.mubr.f32.mxu1 %v20121_v53 }
 0x9dc   : > { %9457 = vmatmul.mubr.f32.gmra.mrb[126].mxu0 %v20381_v4  ;;  %9851 = vmatmul.mubr.f32.gmra.mrb[70].mxu1 %v20299_v9 }
 0x9dd   : > { %9527 = vmatprep.mubr.f32.mxu0 %v20121_v53  ;;  %9856 = vmatprep.mubr.f32.mxu1 %v20121_v53 }
 0x9e0   : > { %9528 = vmatmul.mubr.f32.vlgmr.msra.gmra.mrb[128].mxu0 %v20202_v23  ;;  %9857 = vmatmul.mubr.f32.gmra.mrb[72].mxu1 %v20306_v1 }
 0x9e1   : > { %9533 = vmatprep.mubr.f32.mxu0 %v20121_v53  ;;  %9862 = vmatprep.mubr.f32.mxu1 %v20121_v53 }
 0x9e4   : > { %9534 = vmatmul.mubr.f32.gmra.mrb[130].mxu0 %v20207_v58  ;;  %9863 = vmatmul.mubr.f32.gmra.mrb[74].mxu1 %v20314_v61 }
 0x9e5   : > { %9539 = vmatprep.mubr.f32.mxu0 %v20121_v53  ;;  %9868 = vmatprep.mubr.f32.mxu1 %v20121_v53 }
 0x9e8   : > { %9540 = vmatmul.mubr.f32.gmra.mrb[132].mxu0 %v20215_v48  ;;  %9869 = vmatmul.mubr.f32.gmra.mrb[76].mxu1 %v20329_v15 }
 0x9e9   : > { %9545 = vmatprep.mubr.f32.mxu0 %v20121_v53  ;;  %9874 = vmatprep.mubr.f32.mxu1 %v20121_v53 }
 0x9ec   : > { %9546 = vmatmul.mubr.f32.gmra.mrb[134].mxu0 %v20221_v29  ;;  %9875 = vmatmul.mubr.f32.gmra.mrb[78].mxu1 %v20342_v51 }
 0x9ed   : > { %9551 = vmatprep.mubr.f32.mxu0 %v20121_v53  ;;  %9880 = vmatprep.mubr.f32.mxu1 %v20121_v53 }
 0x9f0   : > { %9552 = vmatmul.mubr.f32.gmra.mrb[136].mxu0 %v20229_v28  ;;  %9881 = vmatmul.mubr.f32.gmra.mrb[80].mxu1 %v20351_v0 }
 0x9f1   : > { %9557 = vmatprep.mubr.f32.mxu0 %v20121_v53  ;;  %9886 = vmatprep.mubr.f32.mxu1 %v20121_v53  ;;  %v10490_v53 = vld [vmem:[#allocation10] sm:$0xff] }
 0x9f2   : > { %v16138_v27 = vpack.c.bf16 %v10491_v41, %v10490_v53 }
 0x9f4   : > { %9558 = vmatmul.mubr.f32.gmra.mrb[138].mxu0 %v20235_v59  ;;  %9887 = vmatmul.mubr.f32.gmra.mrb[82].mxu1 %v20360_v8 }
 0x9f5   : > { %9563 = vmatprep.mubr.f32.mxu0 %v20471_v38  ;;  %9892 = vmatprep.mubr.f32.mxu1 %v20471_v38 }
 0x9f8   : > { %9564 = vmatmul.mubr.f32.gmra.mrb[140].mxu0 %v20243_v56  ;;  %9893 = vmatmul.mubr.f32.gmra.mrb[84].mxu1 %v20369_v26 }
 0x9f9   : > { %9569 = vmatprep.mubr.f32.mxu0 %v20471_v38  ;;  %9898 = vmatprep.mubr.f32.mxu1 %v20471_v38 }
 0x9fc   : > { %9570 = vmatmul.mubr.f32.gmra.mrb[142].mxu0 %v20253_v43  ;;  %9899 = vmatmul.mubr.f32.gmra.mrb[86].mxu1 %v20378_v11 }
 0x9fd   : > { %9575 = vmatprep.mubr.f32.mxu0 %v20471_v38  ;;  %9904 = vmatprep.mubr.f32.mxu1 %v20471_v38 }
 0xa00   : > { %9576 = vmatmul.mubr.f32.gmra.mrb[144].mxu0 %v20267_v32  ;;  %9905 = vmatmul.mubr.f32.gmra.mrb[88].mxu1 %v20388_v60 }
 0xa01   : > { %9581 = vmatprep.mubr.f32.mxu0 %v20471_v38  ;;  %9910 = vmatprep.mubr.f32.mxu1 %v20471_v38 }
 0xa04   : > { %9582 = vmatmul.mubr.f32.gmra.mrb[146].mxu0 %v20277_v52  ;;  %9911 = vmatmul.mubr.f32.gmra.mrb[90].mxu1 %v20395_v34 }
 0xa05   : > { %9587 = vmatprep.mubr.f32.mxu0 %v20471_v38  ;;  %9916 = vmatprep.mubr.f32.mxu1 %v20471_v38 }
 0xa08   : > { %9588 = vmatmul.mubr.f32.gmra.mrb[148].mxu0 %v20289_v17  ;;  %9917 = vmatmul.mubr.f32.gmra.mrb[92].mxu1 %v20403_v55 }
 0xa09   : > { %9593 = vmatprep.mubr.f32.mxu0 %v20471_v38  ;;  %9922 = vmatprep.mubr.f32.mxu1 %v20471_v38 }
 0xa0c   : > { %9594 = vmatmul.mubr.f32.gmra.mrb[150].mxu0 %v20299_v9  ;;  %9923 = vmatmul.mubr.f32.gmra.mrb[94].mxu1 %v20410_v50 }
 0xa0d   : > { %9599 = vmatprep.mubr.f32.mxu0 %v20471_v38  ;;  %9928 = vmatprep.mubr.f32.mxu1 %v20471_v38 }
 0xa10   : > { %9600 = vmatmul.mubr.f32.gmra.mrb[152].mxu0 %v20306_v1  ;;  %9929 = vmatmul.mubr.f32.gmra.mrb[96].mxu1 %v20309_v22 }
 0xa11   : > { %9605 = vmatprep.mubr.f32.mxu0 %v20471_v38  ;;  %9934 = vmatprep.mubr.f32.mxu1 %v20471_v38 }
 0xa14   : > { %9606 = vmatmul.mubr.f32.gmra.mrb[154].mxu0 %v20314_v61  ;;  %9935 = vmatmul.mubr.f32.gmra.mrb[98].mxu1 %v20318_v30 }
 0xa15   : > { %9611 = vmatprep.mubr.f32.mxu0 %v20471_v38  ;;  %9940 = vmatprep.mubr.f32.mxu1 %v20471_v38 }
 0xa18   : > { %9612 = vmatmul.mubr.f32.gmra.mrb[156].mxu0 %v20329_v15  ;;  %9941 = vmatmul.mubr.f32.gmra.mrb[100].mxu1 %v20332_v46 }
 0xa19   : > { %9617 = vmatprep.mubr.f32.mxu0 %v20471_v38  ;;  %9946 = vmatprep.mubr.f32.mxu1 %v20471_v38 }
 0xa1c   : > { %9618 = vmatmul.mubr.f32.gmra.mrb[158].mxu0 %v20342_v51  ;;  %9947 = vmatmul.mubr.f32.gmra.mrb[102].mxu1 %v20344_v37 }
 0xa1d   : > { %9623 = vmatprep.mubr.f32.mxu0 %v20471_v38  ;;  %9952 = vmatprep.mubr.f32.mxu1 %v20471_v38 }
 0xa20   : > { %9624 = vmatmul.mubr.f32.gmra.mrb[160].mxu0 %v20351_v0  ;;  %9953 = vmatmul.mubr.f32.gmra.mrb[104].mxu1 %v20353_v14 }
 0xa21   : > { %9629 = vmatprep.mubr.f32.mxu0 %v20471_v38  ;;  %9958 = vmatprep.mubr.f32.mxu1 %v20471_v38 }
 0xa24   : > { %9630 = vmatmul.mubr.f32.gmra.mrb[162].mxu0 %v20360_v8  ;;  %9959 = vmatmul.mubr.f32.gmra.mrb[106].mxu1 %v20362_v24 }
 0xa25   : > { %9635 = vmatprep.mubr.f32.mxu0 %v20471_v38  ;;  %9964 = vmatprep.mubr.f32.mxu1 %v20471_v38 }
 0xa28   : > { %9636 = vmatmul.mubr.f32.gmra.mrb[164].mxu0 %v20369_v26  ;;  %9965 = vmatmul.mubr.f32.gmra.mrb[108].mxu1 %v20371_v39 }
 0xa29   : > { %9641 = vmatprep.mubr.f32.mxu0 %v20471_v38  ;;  %9970 = vmatprep.mubr.f32.mxu1 %v20471_v38 }
 0xa2c   : > { %9642 = vmatmul.mubr.f32.gmra.mrb[166].mxu0 %v20378_v11  ;;  %9971 = vmatmul.mubr.f32.gmra.mrb[110].mxu1 %v20381_v4 }
 0xa2d   : > { %9647 = vmatprep.mubr.f32.mxu0 %v20471_v38  ;;  %10041 = vmatprep.mubr.f32.mxu1 %v20471_v38 }
 0xa30   : > { %9648 = vmatmul.mubr.f32.gmra.mrb[168].mxu0 %v20388_v60  ;;  %10042 = vmatmul.mubr.f32.vlgmr.msra.gmra.mrb[112].mxu1 %v20202_v23  ;;  %v16144_v23 = vpack.c.bf16 %v10495_v45, %v10494_v35  ;;  %v10509_v35 = vld [vmem:[#allocation10 + $0x98] sm:$0xff] }
 0xa31   : > { %16139 = vmatpush1.bf16.msra.mxu1 %v16138_v27  ;;  %9653 = vmatprep.mubr.f32.mxu0 %v20471_v38  ;;  %v10507_v27 = vld [vmem:[#allocation10 + $0x88] sm:$0xff] }
 0xa32   : > { %10047 = vmatprep.mubr.f32.mxu1 %v20471_v38  ;;  %16140 = vmatprep.subr.bf16.mxu1 %v22154_v57 }
 0xa33   : > { %v20536_v5 = vpop.f32.mrb[64].mxu0 }
 0xa34   : > { %v20538_v12 = vpop.f32.mrb[65].mxu0  ;;  %9654 = vmatmul.mubr.f32.gmra.mrb[170].mxu0 %v20395_v34  ;;  %10048 = vmatmul.mubr.f32.gmra.mrb[114].mxu1 %v20207_v58  ;;  %v16147_v58 = vpack.c.bf16 %v10497_v7, %v10496_v44  ;;  %v10511_v7 = vld [vmem:[#allocation10 + $0xa8] sm:$0xff] }
 0xa35   : > { %9659 = vmatprep.mubr.f32.mxu0 %v20471_v38  ;;  %10053 = vmatprep.mubr.f32.mxu1 %v20471_v38 }
 0xa36   : > { %16142 = vmatpush1.bf16.msra.mxu1 %v16141_v47 }
 0xa37   : > { %v20544_v18 = vpop.f32.mrb[66].mxu0  ;;  %16143 = vmatprep.subr.bf16.mxu1 %v22154_v57 }
 0xa38   : > { %v20547_v54 = vpop.f32.mrb[67].mxu0  ;;  %9660 = vmatmul.mubr.f32.gmra.mrb[172].mxu0 %v20403_v55  ;;  %10054 = vmatmul.mubr.f32.gmra.mrb[116].mxu1 %v20215_v48  ;;  %v16150_v48 = vpack.c.bf16 %v10499_v10, %v10498_v3 }
 0xa39   : > { %9665 = vmatprep.mubr.f32.mxu0 %v20471_v38  ;;  %10059 = vmatprep.mubr.f32.mxu1 %v20471_v38 }
 0xa3a   : > { %16145 = vmatpush1.bf16.msra.mxu1 %v16144_v23 }
 0xa3b   : > { %v20553_v13 = vpop.f32.mrb[68].mxu0  ;;  %16146 = vmatprep.subr.bf16.mxu1 %v22154_v57 }
 0xa3c   : > { %v20556_v21 = vpop.f32.mrb[69].mxu0  ;;  %9666 = vmatmul.mubr.f32.gmra.mrb[174].mxu0 %v20410_v50  ;;  %10060 = vmatmul.mubr.f32.gmra.mrb[118].mxu1 %v20221_v29  ;;  %v10502_v29 = vld [vmem:[#allocation10 + $0x60] sm:$0xff] }
 0xa3d   : > { %10065 = vmatprep.mubr.f32.mxu1 %v20471_v38  ;;  %v16156_v33 = vpack.c.bf16 %v10503_v19, %v10502_v29  ;;  %v10515_v29 = vld [vmem:[#allocation10 + $0xc8] sm:$0xff] }
 0xa3e   : > { %16148 = vmatpush1.bf16.msra.mxu1 %v16147_v58 }
 0xa3f   : > { %v20561_v42 = vpop.f32.mrb[70].mxu0  ;;  %16149 = vmatprep.subr.bf16.mxu1 %v22154_v57 }
 0xa40   : > { %v20564_v2 = vpop.f32.mrb[71].mxu0  ;;  %10066 = vmatmul.mubr.f32.gmra.mrb[120].mxu1 %v20229_v28  ;;  %v10504_v28 = vld [vmem:[#allocation10 + $0x70] sm:$0xff] }
 0xa41   : > { %10071 = vmatprep.mubr.f32.mxu1 %v20471_v38  ;;  %v16159_v53 = vpack.c.bf16 %v10505_v20, %v10504_v28  ;;  %v10517_v20 = vld [vmem:[#allocation10 + $0xd8] sm:$0xff] }
 0xa42   : > { %16151 = vmatpush1.bf16.msra.mxu1 %v16150_v48  ;;  %v10513_v48 = vld [vmem:[#allocation10 + $0xb8] sm:$0xff] }
 0xa43   : > { %v20568_v40 = vpop.f32.mrb[72].mxu0  ;;  %16152 = vmatprep.subr.bf16.mxu1 %v22154_v57 }
 0xa44   : > { %v20571_v62 = vpop.f32.mrb[73].mxu0  ;;  %10072 = vmatmul.mubr.f32.gmra.mrb[122].mxu1 %v20235_v59  ;;  %v10506_v59 = vld [vmem:[#allocation10 + $0x80] sm:$0xff] }
 0xa45   : > { %10077 = vmatprep.mubr.f32.mxu1 %v20471_v38  ;;  %v16162_v36 = vpack.c.bf16 %v10507_v27, %v10506_v59 }
 0xa46   : > { %16154 = vmatpush1.bf16.msra.mxu1 %v16153_v31 }
 0xa47   : > { %v20575_v49 = vpop.f32.mrb[74].mxu0  ;;  %16155 = vmatprep.subr.bf16.mxu1 %v22154_v57 }
 0xa48   : > { %v20578_v16 = vpop.f32.mrb[75].mxu0  ;;  %10078 = vmatmul.mubr.f32.gmra.mrb[124].mxu1 %v20243_v56  ;;  %v10508_v56 = vld [vmem:[#allocation10 + $0x90] sm:$0xff] }
 0xa49   : > { %10083 = vmatprep.mubr.f32.mxu1 %v20471_v38  ;;  %v16165_v23 = vpack.c.bf16 %v10509_v35, %v10508_v56  ;;  %v10519_v56 = vld [vmem:[#allocation10 + $0xe8] sm:$0xff] }
 0xa4a   : > { %16157 = vmatpush1.bf16.msra.mxu1 %v16156_v33 }
 0xa4b   : > { %v20582_v41 = vpop.f32.mrb[76].mxu0  ;;  %16158 = vmatprep.subr.bf16.mxu1 %v22154_v57 }
 0xa4c   : > { %v20585_v63 = vpop.f32.mrb[77].mxu0  ;;  %10084 = vmatmul.mubr.f32.gmra.mrb[126].mxu1 %v20253_v43  ;;  %v10510_v43 = vld [vmem:[#allocation10 + $0xa0] sm:$0xff] }
 0xa4d   : > { %10089 = vmatprep.mubr.f32.mxu1 %v20471_v38  ;;  %v16168_v3 = vpack.c.bf16 %v10511_v7, %v10510_v43 }
 0xa4e   : > { %16160 = vmatpush1.bf16.msra.mxu1 %v16159_v53 }
 0xa4f   : > { %v20589_v47 = vpop.f32.mrb[78].mxu0  ;;  %16161 = vmatprep.subr.bf16.mxu1 %v22154_v57 }
 0xa50   : > { %v20592_v45 = vpop.f32.mrb[79].mxu0  ;;  %10090 = vmatmul.mubr.f32.gmra.mrb[128].mxu1 %v20267_v32  ;;  %v10512_v32 = vld [vmem:[#allocation10 + $0xb0] sm:$0xff] }
 0xa51   : > { %10095 = vmatprep.mubr.f32.mxu1 %v20471_v38  ;;  %v16171_v6 = vpack.c.bf16 %v10513_v48, %v10512_v32  ;;  %v10521_v32 = vld [vmem:[#allocation10 + $0xf8] sm:$0xff] }
 0xa52   : > { %16163 = vmatpush1.bf16.msra.mxu1 %v16162_v36  ;;  %v10518_v36 = vld [vmem:[#allocation10 + $0xe0] sm:$0xff] }
 0xa53   : > { %v20596_v44 = vpop.f32.mrb[80].mxu0  ;;  %16164 = vmatprep.subr.bf16.mxu1 %v22154_v57 }
 0xa54   : > { %v20599_v58 = vpop.f32.mrb[81].mxu0  ;;  %10096 = vmatmul.mubr.f32.gmra.mrb[130].mxu1 %v20277_v52  ;;  %v10514_v52 = vld [vmem:[#allocation10 + $0xc0] sm:$0xff] }
 0xa55   : > { %10101 = vmatprep.mubr.f32.mxu1 %v20471_v38  ;;  %v16174_v33 = vpack.c.bf16 %v10515_v29, %v10514_v52 }
 0xa56   : > { %16166 = vmatpush1.bf16.msra.mxu1 %v16165_v23 }
 0xa57   : > { %v20603_v10 = vpop.f32.mrb[82].mxu0  ;;  %16167 = vmatprep.subr.bf16.mxu1 %v22154_v57 }
 0xa58   : > { %v20606_v25 = vpop.f32.mrb[83].mxu0  ;;  %10102 = vmatmul.mubr.f32.gmra.mrb[132].mxu1 %v20289_v17  ;;  %v10516_v17 = vld [vmem:[#allocation10 + $0xd0] sm:$0xff] }
 0xa59   : > { %10107 = vmatprep.mubr.f32.mxu1 %v20471_v38  ;;  %v16177_v59 = vpack.c.bf16 %v10517_v20, %v10516_v17 }
 0xa5a   : > { %16169 = vmatpush1.bf16.msra.mxu1 %v16168_v3  ;;  %v10520_v3 = vld [vmem:[#allocation10 + $0xf0] sm:$0xff] }
 0xa5b   : > { %v20610_v31 = vpop.f32.mrb[84].mxu0  ;;  %16170 = vmatprep.subr.bf16.mxu1 %v22154_v57 }
 0xa5c   : > { %v20613_v19 = vpop.f32.mrb[85].mxu0  ;;  %10108 = vmatmul.mubr.f32.gmra.mrb[134].mxu1 %v20299_v9 }
 0xa5d   : > { %10113 = vmatprep.mubr.f32.mxu1 %v20471_v38 }
 0xa5e   : > { %16172 = vmatpush1.bf16.msra.mxu1 %v16171_v6 }
 0xa5f   : > { %v20617_v28 = vpop.f32.mrb[86].mxu0  ;;  %16173 = vmatprep.subr.bf16.mxu1 %v22154_v57 }
 0xa60   : > { %v20620_v53 = vpop.f32.mrb[87].mxu0  ;;  %10114 = vmatmul.mubr.f32.gmra.mrb[136].mxu1 %v20306_v1  ;;  %v16180_v1 = vpack.c.bf16 %v10519_v56, %v10518_v36 }
 0xa61   : > { %10119 = vmatprep.mubr.f32.mxu1 %v20471_v38 }
 0xa62   : > { %16175 = vmatpush1.bf16.msra.mxu1 %v16174_v33 }
 0xa63   : > { %v20624_v27 = vpop.f32.mrb[88].mxu0  ;;  %v20626_v9 = vpop.f32.mrb[32].mxu1  ;;  %16176 = vmatprep.subr.bf16.mxu1 %v22154_v57 }
 0xa64   : > { %22667 = vst [vmem:[#allocation15_spill] sm:$0xff] %v20626_v9  ;;  %v20629_v35 = vpop.f32.mrb[89].mxu0  ;;  %v20631_v23 = vpop.f32.mrb[33].mxu1  ;;  %10120 = vmatmul.mubr.f32.gmra.mrb[138].mxu1 %v20314_v61  ;;  %v16183_v61 = vpack.c.bf16 %v10521_v32, %v10520_v3 }
 0xa65   : > { %22668 = vst [vmem:[#allocation18_spill] sm:$0xff] %v20631_v23  ;;  %10125 = vmatprep.mubr.f32.mxu1 %v20471_v38 }
 0xa66   : > { %16178 = vmatpush1.bf16.msra.mxu1 %v16177_v59 }
 0xa67   : > { %v20635_v43 = vpop.f32.mrb[90].mxu0  ;;  %v20637_v7 = vpop.f32.mrb[34].mxu1  ;;  %16179 = vmatprep.subr.bf16.mxu1 %v22154_v57 }
 0xa68   : > { %22669 = vst [vmem:[#allocation17_spill] sm:$0xff] %v20637_v7  ;;  %v20640_v48 = vpop.f32.mrb[91].mxu0  ;;  %v20642_v6 = vpop.f32.mrb[35].mxu1  ;;  %10126 = vmatmul.mubr.f32.gmra.mrb[140].mxu1 %v20329_v15 }
 0xa69   : > { %22670 = vst [vmem:[#allocation20_spill] sm:$0xff] %v20642_v6  ;;  %10131 = vmatprep.mubr.f32.mxu1 %v20471_v38 }
 0xa6a   : > { %16181 = vmatpush1.bf16.msra.mxu1 %v16180_v1 }
 0xa6b   : > { %v20646_v52 = vpop.f32.mrb[92].mxu0  ;;  %v20648_v29 = vpop.f32.mrb[36].mxu1  ;;  %16182 = vmatprep.subr.bf16.mxu1 %v22154_v57 }
 0xa6c   : > { %22671 = vst [vmem:[#allocation19_spill] sm:$0xff] %v20648_v29  ;;  %v20651_v33 = vpop.f32.mrb[93].mxu0  ;;  %v20653_v17 = vpop.f32.mrb[37].mxu1  ;;  %10132 = vmatmul.mubr.f32.gmra.mrb[142].mxu1 %v20342_v51 }
 0xa6d   : > { %22672 = vst [vmem:[#allocation22_spill] sm:$0xff] %v20653_v17  ;;  %10137 = vmatprep.mubr.f32.mxu1 %v20471_v38 }
 0xa6e   : > { %16184 = vmatpush1.bf16.msra.mxu1 %v16183_v61 }
 0xa6f   : > { %v20657_v15 = vpop.f32.mrb[94].mxu0  ;;  %v20659_v20 = vpop.f32.mrb[38].mxu1  ;;  %16185 = vmatprep.subr.bf16.mxu1 %v22154_v57 }
 0xa70   : > { %22673 = vst [vmem:[#allocation21_spill] sm:$0xff] %v20659_v20  ;;  %v20662_v59 = vpop.f32.mrb[95].mxu0  ;;  %v20664_v36 = vpop.f32.mrb[39].mxu1  ;;  %10138 = vmatmul.mubr.f32.gmra.mrb[144].mxu1 %v20351_v0 }
 0xa71   : > { %22674 = vst [vmem:[#allocation24_spill] sm:$0xff] %v20664_v36  ;;  %10143 = vmatprep.mubr.f32.mxu1 %v20471_v38 }
 0xa73   : > { %v20668_v56 = vpop.f32.mrb[96].mxu0  ;;  %v20670_v51 = vpop.f32.mrb[40].mxu1 }
 0xa74   : > { %22675 = vst [vmem:[#allocation23_spill] sm:$0xff] %v20670_v51  ;;  %v20672_v1 = vpop.f32.mrb[97].mxu0  ;;  %v20674_v3 = vpop.f32.mrb[41].mxu1  ;;  %10144 = vmatmul.mubr.f32.gmra.mrb[146].mxu1 %v20360_v8 }
 0xa75   : > { %22676 = vst [vmem:[#allocation26_spill] sm:$0xff] %v20674_v3  ;;  %10149 = vmatprep.mubr.f32.mxu1 %v20471_v38 }
 0xa77   : > { %v20678_v32 = vpop.f32.mrb[98].mxu0  ;;  %v20680_v61 = vpop.f32.mrb[42].mxu1 }
 0xa78   : > { %22677 = vst [vmem:[#allocation25_spill] sm:$0xff] %v20680_v61  ;;  %v20682_v57 = vpop.f32.mrb[99].mxu0  ;;  %v20684_v0 = vpop.f32.mrb[43].mxu1  ;;  %10150 = vmatmul.mubr.f32.gmra.mrb[148].mxu1 %v20369_v26 }
 0xa79   : > { %22678 = vst [vmem:[#allocation28_spill] sm:$0xff] %v20684_v0  ;;  %10155 = vmatprep.mubr.f32.mxu1 %v20471_v38 }
 0xa7b   : > { %v20688_v51 = vpop.f32.mrb[100].mxu0  ;;  %v20690_v20 = vpop.f32.mrb[44].mxu1 }
 0xa7c   : > { %22679 = vst [vmem:[#allocation27_spill] sm:$0xff] %v20690_v20  ;;  %v20692_v3 = vpop.f32.mrb[101].mxu0  ;;  %v20694_v8 = vpop.f32.mrb[45].mxu1  ;;  %10156 = vmatmul.mubr.f32.gmra.mrb[150].mxu1 %v20378_v11 }
 0xa7d   : > { %22680 = vst [vmem:[#allocation30_spill] sm:$0xff] %v20694_v8  ;;  %10161 = vmatprep.mubr.f32.mxu1 %v20471_v38 }
 0xa7f   : > { %v20698_v61 = vpop.f32.mrb[102].mxu0  ;;  %v20700_v36 = vpop.f32.mrb[46].mxu1 }
 0xa80   : > { %22681 = vst [vmem:[#allocation29_spill] sm:$0xff] %v20700_v36  ;;  %v20702_v0 = vpop.f32.mrb[103].mxu0  ;;  %v20704_v26 = vpop.f32.mrb[47].mxu1  ;;  %10162 = vmatmul.mubr.f32.gmra.mrb[152].mxu1 %v20388_v60 }
 0xa81   : > { %22682 = vst [vmem:[#allocation32_spill] sm:$0xff] %v20704_v26  ;;  %10167 = vmatprep.mubr.f32.mxu1 %v20471_v38 }
 0xa83   : > { %v20708_v20 = vpop.f32.mrb[104].mxu0  ;;  %v20710_v29 = vpop.f32.mrb[48].mxu1 }
 0xa84   : > { %22683 = vst [vmem:[#allocation31_spill] sm:$0xff] %v20710_v29  ;;  %v20712_v8 = vpop.f32.mrb[105].mxu0  ;;  %v20714_v11 = vpop.f32.mrb[49].mxu1  ;;  %10168 = vmatmul.mubr.f32.gmra.mrb[154].mxu1 %v20395_v34 }
 0xa85   : > { %22684 = vst [vmem:[#allocation34_spill] sm:$0xff] %v20714_v11  ;;  %10173 = vmatprep.mubr.f32.mxu1 %v20471_v38 }
 0xa87   : > { %v20718_v36 = vpop.f32.mrb[106].mxu0  ;;  %v20720_v17 = vpop.f32.mrb[50].mxu1 }
 0xa88   : > { %22685 = vst [vmem:[#allocation33_spill] sm:$0xff] %v20720_v17  ;;  %v20722_v26 = vpop.f32.mrb[107].mxu0  ;;  %v20724_v60 = vpop.f32.mrb[51].mxu1  ;;  %10174 = vmatmul.mubr.f32.gmra.mrb[156].mxu1 %v20403_v55 }
 0xa89   : > { %22686 = vst [vmem:[#allocation36_spill] sm:$0xff] %v20724_v60  ;;  %10179 = vmatprep.mubr.f32.mxu1 %v20471_v38 }
 0xa8b   : > { %v20728_v29 = vpop.f32.mrb[108].mxu0  ;;  %v20730_v7 = vpop.f32.mrb[52].mxu1 }
 0xa8c   : > { %22687 = vst [vmem:[#allocation35_spill] sm:$0xff] %v20730_v7  ;;  %v20732_v11 = vpop.f32.mrb[109].mxu0  ;;  %v20734_v34 = vpop.f32.mrb[53].mxu1  ;;  %10180 = vmatmul.mubr.f32.gmra.mrb[158].mxu1 %v20410_v50 }
 0xa8d   : > { %22688 = vst [vmem:[#allocation38_spill] sm:$0xff] %v20734_v34  ;;  %10185 = vmatprep.mubr.f32.mxu1 %v20471_v38 }
 0xa8f   : > { %v20738_v17 = vpop.f32.mrb[110].mxu0  ;;  %v20740_v6 = vpop.f32.mrb[54].mxu1 }
 0xa90   : > { %22689 = vst [vmem:[#allocation37_spill] sm:$0xff] %v20738_v17  ;;  %22690 = vst [vmem:[#allocation40_spill] sm:$0xff] %v20740_v6  ;;  %v20742_v60 = vpop.f32.mrb[111].mxu0  ;;  %v20744_v55 = vpop.f32.mrb[55].mxu1  ;;  %10186 = vmatmul.mubr.f32.gmra.mrb[160].mxu1 %v20309_v22  ;;  %v9166_v6 = vlaneseq }
 0xa91   : > { %22691 = vst [vmem:[#allocation39_spill] sm:$0xff] %v20744_v55  ;;  %10191 = vmatprep.mubr.f32.mxu1 %v20471_v38 }
 0xa93   : > { %v20748_v7 = vpop.f32.mrb[112].mxu0  ;;  %v20750_v9 = vpop.f32.mrb[56].mxu1 }
 0xa94   : > { %22692 = vst [vmem:[#allocation42_spill] sm:$0xff] %v20748_v7  ;;  %22693 = vst [vmem:[#allocation41_spill] sm:$0xff] %v20750_v9  ;;  %v20752_v34 = vpop.f32.mrb[113].mxu0  ;;  %v20754_v50 = vpop.f32.mrb[57].mxu1  ;;  %10192 = vmatmul.mubr.f32.gmra.mrb[162].mxu1 %v20318_v30  ;;  %v20768_v9 = vshrl.u32 %v9166_v6, 7  ;;  %v20788_v6 = vld [vmem:[%s21821_s10] sm:$0xff] }
 0xa95   : > { %22694 = vst [vmem:[#allocation44_spill] sm:$0xff] %v20752_v34  ;;  %22695 = vst [vmem:[#allocation43_spill] sm:$0xff] %v20754_v50  ;;  %10197 = vmatprep.mubr.f32.mxu1 %v20471_v38 }
 0xa96   : > { %22699 = vst [vmem:[#allocation47_spill] sm:$0xff] %v20768_v9  ;;  %22706 = vst [vmem:[#allocation56_spill] sm:$0xff] %v20788_v6 }
 0xa97   : > { %v20758_v23 = vpop.f32.mrb[114].mxu0  ;;  %v20760_v55 = vpop.f32.mrb[58].mxu1 }
 0xa98   : > { %22696 = vst [vmem:[#allocation46_spill] sm:$0xff] %v20758_v23  ;;  %22697 = vst [vmem:[#allocation45_spill] sm:$0xff] %v20760_v55  ;;  %v20762_v22 = vpop.f32.mrb[115].mxu0  ;;  %v20764_v17 = vpop.f32.mrb[59].mxu1  ;;  %10198 = vmatmul.mubr.f32.gmra.mrb[164].mxu1 %v20332_v46  ;;  %v9172_v55 = vsub.s32 1, %v20768_v9 }
 0xa99   : > { %22698 = vst [vmem:[#allocation48_spill] sm:$0xff] %v20764_v17  ;;  %10203 = vmatprep.mubr.f32.mxu1 %v20471_v38 }
 0xa9b   : > { %v20770_v50 = vpop.f32.mrb[116].mxu0  ;;  %v20772_v30 = vpop.f32.mrb[60].mxu1 }
 0xa9c   : > { %22700 = vst [vmem:[#allocation50_spill] sm:$0xff] %v20770_v50  ;;  %22701 = vst [vmem:[#allocation49_spill] sm:$0xff] %v20772_v30  ;;  %v20774_v7 = vpop.f32.mrb[117].mxu0  ;;  %v20776_v34 = vpop.f32.mrb[61].mxu1  ;;  %10204 = vmatmul.mubr.f32.gmra.mrb[166].mxu1 %v20344_v37  ;;  %v9168_v37 = vsub.s32 0, %v20768_v9 }
 0xa9d   : > { %22702 = vst [vmem:[#allocation52_spill] sm:$0xff] %v20774_v7  ;;  %22703 = vst [vmem:[#allocation51_spill] sm:$0xff] %v20776_v34  ;;  %10209 = vmatprep.mubr.f32.mxu1 %v20471_v38  ;;  %v20798_v34 = vrot.slane %v20788_v6, %v9172_v55 }
 0xa9f   : > { %v20781_v17 = vpop.f32.mrb[118].mxu0  ;;  %v20783_v46 = vpop.f32.mrb[62].mxu1 }
 0xaa0   : > { %22704 = vst [vmem:[#allocation54_spill] sm:$0xff] %v20781_v17  ;;  %22705 = vst [vmem:[#allocation53_spill] sm:$0xff] %v20783_v46  ;;  %v20790_v30 = vpop.f32.mrb[119].mxu0  ;;  %v20792_v50 = vpop.f32.mrb[63].mxu1  ;;  %10210 = vmatmul.mubr.f32.gmra.mrb[168].mxu1 %v20353_v14  ;;  %v20811_v14 = vrot.slane %v20788_v6, %v9168_v37  ;;  %v10522_v37 = vld [vmem:[#allocation10 + $0x100] sm:$0xff] }
 0xaa1   : > { %22707 = vst [vmem:[#allocation55_spill] sm:$0xff] %v20790_v30  ;;  %22708 = vst [vmem:[#allocation58_spill] sm:$0xff] %v20792_v50  ;;  %10215 = vmatprep.mubr.f32.mxu1 %v20471_v38  ;;  %v9275_v50 = vadd.f32 %v20538_v12, %v20798_v34  ;;  %v9281_v12 = vadd.f32 %v20547_v54, %v20798_v34  ;;  %v9287_v54 = vadd.f32 %v20556_v21, %v20798_v34  ;;  %v10527_v21 = vld [vmem:[#allocation10 + $0x128] sm:$0xff] }
 0xaa3   : > { %v20800_v17 = vpop.f32.mrb[120].mxu0  ;;  %v20802_v46 = vpop.f32.mrb[64].mxu1  ;;  %v10235_v6 = vmax.f32 %v9275_v50, 0.0  ;;  %v10524_v50 = vld [vmem:[#allocation10 + $0x110] sm:$0xff]  ;;  %v10243_v30 = vmax.f32 %v9281_v12, 0.0  ;;  %v9293_v12 = vadd.f32 %v20564_v2, %v20798_v34  ;;  %v10529_v2 = vld [vmem:[#allocation10 + $0x138] sm:$0xff] }
 0xaa4   : > { %22709 = vst [vmem:[#allocation57_spill] sm:$0xff] %v20800_v17  ;;  %22710 = vst [vmem:[#allocation60_spill] sm:$0xff] %v20802_v46  ;;  %v20804_v7 = vpop.f32.mrb[121].mxu0  ;;  %v20806_v23 = vpop.f32.mrb[65].mxu1  ;;  %10216 = vmatmul.mubr.f32.gmra.mrb[170].mxu1 %v20362_v24  ;;  %v9273_v24 = vadd.f32 %v20536_v5, %v20811_v14  ;;  %v9279_v5 = vadd.f32 %v20544_v18, %v20811_v14  ;;  %v9285_v18 = vadd.f32 %v20553_v13, %v20811_v14 }
 0xaa5   : > { %22711 = vst [vmem:[#allocation59_spill] sm:$0xff] %v20804_v7  ;;  %22712 = vst [vmem:[#allocation62_spill] sm:$0xff] %v20806_v23  ;;  %10221 = vmatprep.mubr.f32.mxu1 %v20471_v38  ;;  %v10523_v23 = vld [vmem:[#allocation10 + $0x108] sm:$0xff]  ;;  %v10525_v7 = vld [vmem:[#allocation10 + $0x118] sm:$0xff] }
 0xaa7   : > { %v20815_v55 = vpop.f32.mrb[122].mxu0  ;;  %v20817_v9 = vpop.f32.mrb[66].mxu1 }
 0xaa8   : > { %22713 = vst [vmem:[#allocation61_spill] sm:$0xff] %v20815_v55  ;;  %22714 = vst [vmem:[#allocation64_spill] sm:$0xff] %v20817_v9  ;;  %v20819_v17 = vpop.f32.mrb[123].mxu0  ;;  %v20821_v46 = vpop.f32.mrb[67].mxu1  ;;  %10222 = vmatmul.mubr.f32.gmra.mrb[172].mxu1 %v20371_v39  ;;  %v16186_v39 = vpack.c.bf16 %v10523_v23, %v10522_v37  ;;  %v10242_v23 = vmax.f32 %v9279_v5, 0.0  ;;  %v10251_v37 = vmax.f32 %v9287_v54, 0.0  ;;  %v9299_v54 = vadd.f32 %v20571_v62, %v20798_v34 }
 0xaa9   : > { %22715 = vst [vmem:[#allocation63_spill] sm:$0xff] %v20819_v17  ;;  %22716 = vst [vmem:[#allocation66_spill] sm:$0xff] %v20821_v46  ;;  %10227 = vmatprep.mubr.f32.mxu1 %v20471_v38  ;;  %v10234_v38 = vmax.f32 %v9273_v24, 0.0  ;;  %v10526_v24 = vld [vmem:[#allocation10 + $0x120] sm:$0xff]  ;;  %v10528_v5 = vld [vmem:[#allocation10 + $0x130] sm:$0xff] }
 0xaaa   : > { %v16192_v13 = vpack.c.bf16 %v10527_v21, %v10526_v24  ;;  %v9297_v24 = vadd.f32 %v20568_v40, %v20811_v14  ;;  %v10530_v21 = vld [vmem:[#allocation10 + $0x140] sm:$0xff]  ;;  %v10531_v62 = vld [vmem:[#allocation10 + $0x148] sm:$0xff] }
 0xaab   : > { %v20829_v55 = vpop.f32.mrb[124].mxu0  ;;  %v20831_v9 = vpop.f32.mrb[68].mxu1  ;;  %v16198_v40 = vpack.c.bf16 %v10531_v62, %v10530_v21  ;;  %v9309_v21 = vadd.f32 %v20582_v41, %v20811_v14  ;;  %v10534_v62 = vld [vmem:[#allocation10 + $0x160] sm:$0xff] }
 0xaac   : > { %22717 = vst [vmem:[#allocation65_spill] sm:$0xff] %v20829_v55  ;;  %22718 = vst [vmem:[#allocation68_spill] sm:$0xff] %v20831_v9  ;;  %v20833_v17 = vpop.f32.mrb[125].mxu0  ;;  %v20835_v46 = vpop.f32.mrb[69].mxu1  ;;  %10228 = vmatmul.mubr.f32.gmra.mrb[174].mxu1 %v20381_v4  ;;  %v16189_v4 = vpack.c.bf16 %v10525_v7, %v10524_v50  ;;  %v10250_v7 = vmax.f32 %v9285_v18, 0.0  ;;  %v10259_v50 = vmax.f32 %v9293_v12, 0.0  ;;  %v9305_v12 = vadd.f32 %v20578_v16, %v20798_v34 }
 0xaad   : > { %22719 = vst [vmem:[#allocation67_spill] sm:$0xff] %v20833_v17  ;;  %22720 = vst [vmem:[#allocation72_spill] sm:$0xff] %v20835_v46  ;;  %10689 = vmatprep.mubr.f32.mxu1 %v10235_v6  ;;  %v22724_v6 = vmov 0.0|0.0   ;;  %v10533_v16 = vld [vmem:[#allocation10 + $0x158] sm:$0xff] }
 0xaaf   : > { %v20842_v55 = vpop.f32.mrb[126].mxu0  ;;  %v20844_v9 = vpop.f32.mrb[70].mxu1 }
 0xab0   : > { %22721 = vst [vmem:[#allocation71_spill] sm:$0xff] %v20842_v55  ;;  %22722 = vst [vmem:[#allocation76_spill] sm:$0xff] %v20844_v9  ;;  %v20846_v17 = vpop.f32.mrb[127].mxu0  ;;  %v20848_v46 = vpop.f32.mrb[71].mxu1  ;;  %10690 = vmatmul.mubr.f32.vlgmr.msra.gmra.mrb[176].mxu1 %v10234_v38 }
 0xab1   : > { %22723 = vst [vmem:[#allocation75_spill] sm:$0xff] %v20848_v46  ;;  %16187 = vmatpush1.bf16.msra.mxu1 %v16186_v39  ;;  %10694 = vmatprep.mubr.f32.mxu1 %v10243_v30  ;;  %v9291_v39 = vadd.f32 %v20561_v42, %v20811_v14  ;;  %v16195_v42 = vpack.c.bf16 %v10529_v2, %v10528_v5  ;;  %v10532_v2 = vld [vmem:[#allocation10 + $0x150] sm:$0xff] }
 0xab2   : > { %16188 = vmatprep.subr.bf16.mxu1 %v22724_v6  ;;  %v9303_v5 = vadd.f32 %v20575_v49, %v20811_v14  ;;  %v16201_v49 = vpack.c.bf16 %v10533_v16, %v10532_v2  ;;  %v9315_v2 = vadd.f32 %v20589_v47, %v20811_v14  ;;  %v10536_v16 = vld [vmem:[#allocation10 + $0x170] sm:$0xff] }
 0xab3   : > { %v20855_v9 = vpop.f32.mrb[128].mxu0  ;;  %v20857_v55 = vpop.f32.mrb[72].mxu1  ;;  %v10258_v18 = vmax.f32 %v9291_v39, 0.0  ;;  %v10266_v39 = vmax.f32 %v9297_v24, 0.0 }
 0xab4   : > { %22725 = vst [vmem:[#allocation80_spill] sm:$0xff] %v20857_v55  ;;  %v20859_v38 = vpop.f32.mrb[129].mxu0  ;;  %v20861_v30 = vpop.f32.mrb[73].mxu1  ;;  %10695 = vmatmul.mubr.f32.gmra.mrb[178].mxu1 %v10242_v23  ;;  %v10274_v24 = vmax.f32 %v9303_v5, 0.0  ;;  %v10282_v5 = vmax.f32 %v9309_v21, 0.0  ;;  %v10290_v21 = vmax.f32 %v9315_v2, 0.0 }
 0xab5   : > { %22726 = vst [vmem:[#allocation79_spill] sm:$0xff] %v20861_v30  ;;  %10699 = vmatprep.mubr.f32.mxu1 %v10251_v37  ;;  %16190 = vmatpush1.bf16.msra.mxu1 %v16189_v4  ;;  %v10267_v37 = vmax.f32 %v9299_v54, 0.0  ;;  %v9311_v54 = vadd.f32 %v20585_v63, %v20798_v34  ;;  %v10535_v63 = vld [vmem:[#allocation10 + $0x168] sm:$0xff] }
 0xab6   : > { %16191 = vmatprep.subr.bf16.mxu1 %v22724_v6  ;;  %v16204_v41 = vpack.c.bf16 %v10535_v63, %v10534_v62  ;;  %v9321_v62 = vadd.f32 %v20596_v44, %v20811_v14  ;;  %v10538_v63 = vld [vmem:[#allocation10 + $0x180] sm:$0xff] }
 0xab7   : > { %v20868_v55 = vpop.f32.mrb[130].mxu0  ;;  %v20870_v46 = vpop.f32.mrb[74].mxu1 }
 0xab8   : > { %22727 = vst [vmem:[#allocation84_spill] sm:$0xff] %v20870_v46  ;;  %v20872_v23 = vpop.f32.mrb[131].mxu0  ;;  %v20874_v4 = vpop.f32.mrb[75].mxu1  ;;  %10700 = vmatmul.mubr.f32.gmra.mrb[180].mxu1 %v10250_v7  ;;  %v10298_v2 = vmax.f32 %v9321_v62, 0.0 }
 0xab9   : > { %22728 = vst [vmem:[#allocation83_spill] sm:$0xff] %v20874_v4  ;;  %10704 = vmatprep.mubr.f32.mxu1 %v10259_v50  ;;  %16193 = vmatpush1.bf16.msra.mxu1 %v16192_v13  ;;  %v10275_v50 = vmax.f32 %v9305_v12, 0.0  ;;  %v9317_v12 = vadd.f32 %v20592_v45, %v20798_v34  ;;  %v10537_v45 = vld [vmem:[#allocation10 + $0x178] sm:$0xff] }
 0xaba   : > { %16194 = vmatprep.subr.bf16.mxu1 %v22724_v6  ;;  %v16207_v47 = vpack.c.bf16 %v10537_v45, %v10536_v16  ;;  %v9327_v16 = vadd.f32 %v20603_v10, %v20811_v14  ;;  %v10540_v45 = vld [vmem:[#allocation10 + $0x190] sm:$0xff] }
 0xabb   : > { %v20881_v46 = vpop.f32.mrb[132].mxu0  ;;  %v20883_v30 = vpop.f32.mrb[76].mxu1 }
 0xabc   : > { %22729 = vst [vmem:[#allocation88_spill] sm:$0xff] %v20883_v30  ;;  %v20885_v7 = vpop.f32.mrb[133].mxu0  ;;  %v20887_v13 = vpop.f32.mrb[77].mxu1  ;;  %10705 = vmatmul.mubr.f32.gmra.mrb[182].mxu1 %v10258_v18  ;;  %v10306_v62 = vmax.f32 %v9327_v16, 0.0 }
 0xabd   : > { %22730 = vst [vmem:[#allocation87_spill] sm:$0xff] %v20887_v13  ;;  %10709 = vmatprep.mubr.f32.mxu1 %v10267_v37  ;;  %16196 = vmatpush1.bf16.msra.mxu1 %v16195_v42  ;;  %v10283_v37 = vmax.f32 %v9311_v54, 0.0  ;;  %v9323_v54 = vadd.f32 %v20599_v58, %v20798_v34  ;;  %v10539_v58 = vld [vmem:[#allocation10 + $0x188] sm:$0xff] }
 0xabe   : > { %16197 = vmatprep.subr.bf16.mxu1 %v22724_v6  ;;  %v16210_v44 = vpack.c.bf16 %v10539_v58, %v10538_v63  ;;  %v9333_v63 = vadd.f32 %v20610_v31, %v20811_v14  ;;  %v10542_v58 = vld [vmem:[#allocation10 + $0x1a0] sm:$0xff] }
 0xabf   : > { %v20894_v30 = vpop.f32.mrb[134].mxu0  ;;  %v20896_v4 = vpop.f32.mrb[78].mxu1 }
 0xac0   : > { %22731 = vst [vmem:[#allocation92_spill] sm:$0xff] %v20896_v4  ;;  %v20898_v18 = vpop.f32.mrb[135].mxu0  ;;  %v20900_v42 = vpop.f32.mrb[79].mxu1  ;;  %10710 = vmatmul.mubr.f32.gmra.mrb[184].mxu1 %v10266_v39  ;;  %v10314_v16 = vmax.f32 %v9333_v63, 0.0 }
 0xac1   : > { %22732 = vst [vmem:[#allocation91_spill] sm:$0xff] %v20900_v42  ;;  %10714 = vmatprep.mubr.f32.mxu1 %v10275_v50  ;;  %16199 = vmatpush1.bf16.msra.mxu1 %v16198_v40  ;;  %v10291_v50 = vmax.f32 %v9317_v12, 0.0  ;;  %v9329_v12 = vadd.f32 %v20606_v25, %v20798_v34  ;;  %v10541_v25 = vld [vmem:[#allocation10 + $0x198] sm:$0xff] }
 0xac2   : > { %16200 = vmatprep.subr.bf16.mxu1 %v22724_v6  ;;  %v16213_v10 = vpack.c.bf16 %v10541_v25, %v10540_v45  ;;  %v9339_v45 = vadd.f32 %v20617_v28, %v20811_v14  ;;  %v10544_v25 = vld [vmem:[#allocation10 + $0x1b0] sm:$0xff] }
 0xac3   : > { %v20907_v4 = vpop.f32.mrb[136].mxu0  ;;  %v20909_v13 = vpop.f32.mrb[80].mxu1 }
 0xac4   : > { %22733 = vst [vmem:[#allocation102_spill] sm:$0xff] %v20909_v13  ;;  %v20911_v39 = vpop.f32.mrb[137].mxu0  ;;  %v20913_v40 = vpop.f32.mrb[81].mxu1  ;;  %10715 = vmatmul.mubr.f32.gmra.mrb[186].mxu1 %v10274_v24  ;;  %v10322_v63 = vmax.f32 %v9339_v45, 0.0 }
 0xac5   : > { %22734 = vst [vmem:[#allocation93_spill] sm:$0xff] %v20913_v40  ;;  %10719 = vmatprep.mubr.f32.mxu1 %v10283_v37  ;;  %16202 = vmatpush1.bf16.msra.mxu1 %v16201_v49  ;;  %v10299_v37 = vmax.f32 %v9323_v54, 0.0  ;;  %v9335_v54 = vadd.f32 %v20613_v19, %v20798_v34  ;;  %v10543_v19 = vld [vmem:[#allocation10 + $0x1a8] sm:$0xff] }
 0xac6   : > { %16203 = vmatprep.subr.bf16.mxu1 %v22724_v6  ;;  %v16216_v31 = vpack.c.bf16 %v10543_v19, %v10542_v58  ;;  %v9345_v58 = vadd.f32 %v20624_v27, %v20811_v14  ;;  %v10546_v19 = vld [vmem:[#allocation10 + $0x1c0] sm:$0xff] }
 0xac7   : > { %v20920_v13 = vpop.f32.mrb[138].mxu0  ;;  %v20922_v42 = vpop.f32.mrb[82].mxu1 }
 0xac8   : > { %22735 = vst [vmem:[#allocation104_spill] sm:$0xff] %v20922_v42  ;;  %v20924_v24 = vpop.f32.mrb[139].mxu0  ;;  %v20926_v49 = vpop.f32.mrb[83].mxu1  ;;  %10720 = vmatmul.mubr.f32.gmra.mrb[188].mxu1 %v10282_v5  ;;  %v10330_v45 = vmax.f32 %v9345_v58, 0.0 }
 0xac9   : > { %22736 = vst [vmem:[#allocation101_spill] sm:$0xff] %v20926_v49  ;;  %10724 = vmatprep.mubr.f32.mxu1 %v10291_v50  ;;  %16205 = vmatpush1.bf16.msra.mxu1 %v16204_v41  ;;  %v10307_v50 = vmax.f32 %v9329_v12, 0.0  ;;  %v9341_v12 = vadd.f32 %v20620_v53, %v20798_v34  ;;  %v10545_v53 = vld [vmem:[#allocation10 + $0x1b8] sm:$0xff] }
 0xaca   : > { %16206 = vmatprep.subr.bf16.mxu1 %v22724_v6  ;;  %v16219_v28 = vpack.c.bf16 %v10545_v53, %v10544_v25  ;;  %v9351_v25 = vadd.f32 %v20635_v43, %v20811_v14  ;;  %v10548_v53 = vld [vmem:[#allocation10 + $0x1d0] sm:$0xff] }
 0xacb   : > { %v20933_v42 = vpop.f32.mrb[140].mxu0  ;;  %v20935_v40 = vpop.f32.mrb[84].mxu1 }
 0xacc   : > { %22737 = vst [vmem:[#allocation106_spill] sm:$0xff] %v20935_v40  ;;  %v20937_v5 = vpop.f32.mrb[141].mxu0  ;;  %v20939_v41 = vpop.f32.mrb[85].mxu1  ;;  %10725 = vmatmul.mubr.f32.gmra.mrb[190].mxu1 %v10290_v21  ;;  %v10338_v58 = vmax.f32 %v9351_v25, 0.0 }
 0xacd   : > { %22738 = vst [vmem:[#allocation103_spill] sm:$0xff] %v20939_v41  ;;  %10729 = vmatprep.mubr.f32.mxu1 %v10299_v37  ;;  %16208 = vmatpush1.bf16.msra.mxu1 %v16207_v47  ;;  %v10315_v37 = vmax.f32 %v9335_v54, 0.0  ;;  %v9347_v54 = vadd.f32 %v20629_v35, %v20798_v34  ;;  %v10547_v35 = vld [vmem:[#allocation10 + $0x1c8] sm:$0xff] }
 0xace   : > { %16209 = vmatprep.subr.bf16.mxu1 %v22724_v6  ;;  %v16222_v27 = vpack.c.bf16 %v10547_v35, %v10546_v19  ;;  %v9357_v19 = vadd.f32 %v20646_v52, %v20811_v14  ;;  %v10550_v35 = vld [vmem:[#allocation10 + $0x1e0] sm:$0xff] }
 0xacf   : > { %v20946_v40 = vpop.f32.mrb[142].mxu0  ;;  %v20948_v49 = vpop.f32.mrb[86].mxu1 }
 0xad0   : > { %22739 = vst [vmem:[#allocation108_spill] sm:$0xff] %v20948_v49  ;;  %v20950_v21 = vpop.f32.mrb[143].mxu0  ;;  %v20952_v47 = vpop.f32.mrb[87].mxu1  ;;  %10730 = vmatmul.mubr.f32.gmra.mrb[192].mxu1 %v10298_v2  ;;  %v10346_v25 = vmax.f32 %v9357_v19, 0.0 }
 0xad1   : > { %22740 = vst [vmem:[#allocation105_spill] sm:$0xff] %v20952_v47  ;;  %10734 = vmatprep.mubr.f32.mxu1 %v10307_v50  ;;  %16211 = vmatpush1.bf16.msra.mxu1 %v16210_v44  ;;  %v10323_v50 = vmax.f32 %v9341_v12, 0.0  ;;  %v9353_v12 = vadd.f32 %v20640_v48, %v20798_v34  ;;  %v10549_v48 = vld [vmem:[#allocation10 + $0x1d8] sm:$0xff] }
 0xad2   : > { %16212 = vmatprep.subr.bf16.mxu1 %v22724_v6  ;;  %v16225_v43 = vpack.c.bf16 %v10549_v48, %v10548_v53  ;;  %v9363_v53 = vadd.f32 %v20657_v15, %v20811_v14  ;;  %v10552_v48 = vld [vmem:[#allocation10 + $0x1f0] sm:$0xff] }
 0xad3   : > { %v20959_v49 = vpop.f32.mrb[144].mxu0  ;;  %v20961_v41 = vpop.f32.mrb[88].mxu1 }
 0xad4   : > { %22741 = vst [vmem:[#allocation110_spill] sm:$0xff] %v20961_v41  ;;  %v20963_v2 = vpop.f32.mrb[145].mxu0  ;;  %v20965_v44 = vpop.f32.mrb[89].mxu1  ;;  %10735 = vmatmul.mubr.f32.gmra.mrb[194].mxu1 %v10306_v62  ;;  %v10354_v19 = vmax.f32 %v9363_v53, 0.0 }
 0xad5   : > { %22742 = vst [vmem:[#allocation107_spill] sm:$0xff] %v20965_v44  ;;  %10739 = vmatprep.mubr.f32.mxu1 %v10315_v37  ;;  %16214 = vmatpush1.bf16.msra.mxu1 %v16213_v10  ;;  %v10331_v37 = vmax.f32 %v9347_v54, 0.0  ;;  %v9359_v54 = vadd.f32 %v20651_v33, %v20798_v34  ;;  %v10551_v33 = vld [vmem:[#allocation10 + $0x1e8] sm:$0xff] }
 0xad6   : > { %16215 = vmatprep.subr.bf16.mxu1 %v22724_v6  ;;  %v16228_v52 = vpack.c.bf16 %v10551_v33, %v10550_v35  ;;  %v9369_v35 = vadd.f32 %v20668_v56, %v20811_v14  ;;  %v9375_v56 = vadd.f32 %v20678_v32, %v20811_v14  ;;  %v9381_v32 = vadd.f32 %v20688_v51, %v20811_v14 }
 0xad7   : > { %v20972_v41 = vpop.f32.mrb[146].mxu0  ;;  %v20974_v47 = vpop.f32.mrb[90].mxu1  ;;  %v9395_v51 = vadd.f32 %v20712_v8, %v20798_v34 }
 0xad8   : > { %22743 = vst [vmem:[#allocation112_spill] sm:$0xff] %v20974_v47  ;;  %v20976_v62 = vpop.f32.mrb[147].mxu0  ;;  %v20978_v10 = vpop.f32.mrb[91].mxu1  ;;  %10740 = vmatmul.mubr.f32.gmra.mrb[196].mxu1 %v10314_v16 }
 0xad9   : > { %22744 = vst [vmem:[#allocation109_spill] sm:$0xff] %v20978_v10  ;;  %10744 = vmatprep.mubr.f32.mxu1 %v10323_v50  ;;  %16217 = vmatpush1.bf16.msra.mxu1 %v16216_v31  ;;  %v10339_v50 = vmax.f32 %v9353_v12, 0.0  ;;  %v9365_v12 = vadd.f32 %v20662_v59, %v20798_v34  ;;  %v10553_v59 = vld [vmem:[#allocation10 + $0x1f8] sm:$0xff] }
 0xada   : > { %16218 = vmatprep.subr.bf16.mxu1 %v22724_v6  ;;  %v16231_v15 = vpack.c.bf16 %v10553_v59, %v10552_v48 }
 0xadb   : > { %v20985_v47 = vpop.f32.mrb[148].mxu0  ;;  %v20987_v44 = vpop.f32.mrb[92].mxu1 }
 0xadc   : > { %22745 = vst [vmem:[#allocation114_spill] sm:$0xff] %v20987_v44  ;;  %v20989_v16 = vpop.f32.mrb[149].mxu0  ;;  %v20991_v31 = vpop.f32.mrb[93].mxu1  ;;  %10745 = vmatmul.mubr.f32.gmra.mrb[198].mxu1 %v10322_v63 }
 0xadd   : > { %22746 = vst [vmem:[#allocation111_spill] sm:$0xff] %v20991_v31  ;;  %10749 = vmatprep.mubr.f32.mxu1 %v10331_v37  ;;  %16220 = vmatpush1.bf16.msra.mxu1 %v16219_v28  ;;  %v10347_v37 = vmax.f32 %v9359_v54, 0.0  ;;  %v9371_v54 = vadd.f32 %v20672_v1, %v20798_v34  ;;  %v9377_v1 = vadd.f32 %v20682_v57, %v20798_v34 }
 0xade   : > { %16221 = vmatprep.subr.bf16.mxu1 %v22724_v6  ;;  %v9383_v57 = vadd.f32 %v20692_v3, %v20798_v34 }
 0xadf   : > { %v20998_v44 = vpop.f32.mrb[150].mxu0  ;;  %v21000_v10 = vpop.f32.mrb[94].mxu1  ;;  %v10363_v33 = vmax.f32 %v9371_v54, 0.0  ;;  %v10371_v53 = vmax.f32 %v9377_v1, 0.0 }
 0xae0   : > { %22747 = vst [vmem:[#allocation115_spill] sm:$0xff] %v21000_v10  ;;  %v21002_v63 = vpop.f32.mrb[151].mxu0  ;;  %v21004_v28 = vpop.f32.mrb[95].mxu1  ;;  %10750 = vmatmul.mubr.f32.gmra.mrb[200].mxu1 %v10330_v45 }
 0xae1   : > { %22748 = vst [vmem:[#allocation113_spill] sm:$0xff] %v21004_v28  ;;  %10754 = vmatprep.mubr.f32.mxu1 %v10339_v50  ;;  %16223 = vmatpush1.bf16.msra.mxu1 %v16222_v27  ;;  %v10355_v50 = vmax.f32 %v9365_v12, 0.0 }
 0xae2   : > { %16224 = vmatprep.subr.bf16.mxu1 %v22724_v6 }
 0xae3   : > { %v21011_v10 = vpop.f32.mrb[152].mxu0  ;;  %v21013_v31 = vpop.f32.mrb[96].mxu1 }
 0xae4   : > { %22749 = vst [vmem:[#allocation116_spill] sm:$0xff] %v21013_v31  ;;  %v21015_v45 = vpop.f32.mrb[153].mxu0  ;;  %v21017_v27 = vpop.f32.mrb[97].mxu1  ;;  %10755 = vmatmul.mubr.f32.gmra.mrb[202].mxu1 %v10338_v58 }
 0xae5   : > { %22750 = vst [vmem:[#allocation117_spill] sm:$0xff] %v21017_v27  ;;  %10759 = vmatprep.mubr.f32.mxu1 %v10347_v37  ;;  %16226 = vmatpush1.bf16.msra.mxu1 %v16225_v43 }
 0xae6   : > { %16227 = vmatprep.subr.bf16.mxu1 %v22724_v6 }
 0xae7   : > { %v21024_v31 = vpop.f32.mrb[154].mxu0  ;;  %v21026_v28 = vpop.f32.mrb[98].mxu1 }
 0xae8   : > { %22751 = vst [vmem:[#allocation118_spill] sm:$0xff] %v21026_v28  ;;  %v21028_v58 = vpop.f32.mrb[155].mxu0  ;;  %v21030_v43 = vpop.f32.mrb[99].mxu1  ;;  %10760 = vmatmul.mubr.f32.gmra.mrb[204].mxu1 %v10346_v25 }
 0xae9   : > { %22752 = vst [vmem:[#allocation119_spill] sm:$0xff] %v21030_v43  ;;  %10764 = vmatprep.mubr.f32.mxu1 %v10355_v50  ;;  %16229 = vmatpush1.bf16.msra.mxu1 %v16228_v52  ;;  %v10362_v52 = vmax.f32 %v9369_v35, 0.0  ;;  %v9389_v35 = vadd.f32 %v20702_v0, %v20798_v34 }
 0xaea   : > { %16230 = vmatprep.subr.bf16.mxu1 %v22724_v6 }
 0xaeb   : > { %v21037_v37 = vpop.f32.mrb[156].mxu0  ;;  %v21039_v12 = vpop.f32.mrb[100].mxu1 }
 0xaec   : > { %22753 = vst [vmem:[#allocation120_spill] sm:$0xff] %v21039_v12  ;;  %v21041_v28 = vpop.f32.mrb[157].mxu0  ;;  %v21043_v25 = vpop.f32.mrb[101].mxu1  ;;  %10765 = vmatmul.mubr.f32.gmra.mrb[206].mxu1 %v10354_v19  ;;  %v10379_v19 = vmax.f32 %v9383_v57, 0.0 }
 0xaed   : > { %22754 = vst [vmem:[#allocation121_spill] sm:$0xff] %v21043_v25  ;;  %10769 = vmatprep.mubr.f32.mxu1 %v10363_v33  ;;  %16232 = vmatpush1.bf16.msra.mxu1 %v16231_v15  ;;  %v10370_v15 = vmax.f32 %v9375_v56, 0.0  ;;  %v9387_v56 = vadd.f32 %v20698_v61, %v20811_v14  ;;  %v9401_v61 = vadd.f32 %v20722_v26, %v20798_v34 }
 0xaee   : > { %16233 = vmatprep.subr.bf16.mxu1 %v22724_v6 }
 0xaef   : > { %v21050_v48 = vpop.f32.mrb[158].mxu0  ;;  %v21052_v59 = vpop.f32.mrb[102].mxu1 }
 0xaf0   : > { %22755 = vst [vmem:[#allocation122_spill] sm:$0xff] %v21052_v59  ;;  %v21054_v50 = vpop.f32.mrb[159].mxu0  ;;  %v21056_v54 = vpop.f32.mrb[103].mxu1  ;;  %10770 = vmatmul.mubr.f32.gmra.mrb[208].mxu1 %v10362_v52  ;;  %v10378_v52 = vmax.f32 %v9381_v32, 0.0  ;;  %v9393_v32 = vadd.f32 %v20708_v20, %v20811_v14  ;;  %v9407_v20 = vadd.f32 %v20732_v11, %v20798_v34 }
 0xaf1   : > { %22756 = vst [vmem:[#allocation123_spill] sm:$0xff] %v21056_v54  ;;  %10774 = vmatprep.mubr.f32.mxu1 %v10371_v53  ;;  %v10387_v53 = vmax.f32 %v9389_v35, 0.0 }
 0xaf3   : > { %v21062_v33 = vpop.f32.mrb[160].mxu0  ;;  %v21064_v3 = vpop.f32.mrb[104].mxu1 }
 0xaf4   : > { %22757 = vst [vmem:[#allocation69_spill] sm:$0xff] %v21064_v3  ;;  %v21066_v1 = vpop.f32.mrb[161].mxu0  ;;  %v21068_v59 = vpop.f32.mrb[105].mxu1  ;;  %10775 = vmatmul.mubr.f32.gmra.mrb[210].mxu1 %v10370_v15  ;;  %v10386_v15 = vmax.f32 %v9387_v56, 0.0  ;;  %v9399_v56 = vadd.f32 %v20718_v36, %v20811_v14  ;;  %v9413_v36 = vadd.f32 %v20742_v60, %v20798_v34 }
 0xaf5   : > { %22758 = vst [vmem:[#allocation70_spill] sm:$0xff] %v21068_v59  ;;  %10779 = vmatprep.mubr.f32.mxu1 %v10379_v19  ;;  %v10395_v19 = vmax.f32 %v9395_v51, 0.0 }
 0xaf7   : > { %v21074_v57 = vpop.f32.mrb[162].mxu0  ;;  %v21076_v0 = vpop.f32.mrb[106].mxu1 }
 0xaf8   : > { %22759 = vst [vmem:[#allocation73_spill] sm:$0xff] %v21076_v0  ;;  %v21078_v54 = vpop.f32.mrb[163].mxu0  ;;  %v21080_v3 = vpop.f32.mrb[107].mxu1  ;;  %10780 = vmatmul.mubr.f32.gmra.mrb[212].mxu1 %v10378_v52  ;;  %v10394_v52 = vmax.f32 %v9393_v32, 0.0  ;;  %v9405_v32 = vadd.f32 %v20728_v29, %v20811_v14  ;;  %v22768_v29 = vld [vmem:[#allocation44_spill] sm:$0xff] }
 0xaf9   : > { %22760 = vst [vmem:[#allocation74_spill] sm:$0xff] %v21080_v3  ;;  %10784 = vmatprep.mubr.f32.mxu1 %v10387_v53  ;;  %v10403_v53 = vmax.f32 %v9401_v61, 0.0 }
 0xafb   : > { %v21086_v35 = vpop.f32.mrb[164].mxu0  ;;  %v21088_v8 = vpop.f32.mrb[108].mxu1 }
 0xafc   : > { %22761 = vst [vmem:[#allocation77_spill] sm:$0xff] %v21088_v8  ;;  %v21090_v59 = vpop.f32.mrb[165].mxu0  ;;  %v21092_v0 = vpop.f32.mrb[109].mxu1  ;;  %10785 = vmatmul.mubr.f32.gmra.mrb[214].mxu1 %v10386_v15  ;;  %v10402_v15 = vmax.f32 %v9399_v56, 0.0  ;;  %v22767_v56 = vld [vmem:[#allocation37_spill] sm:$0xff] }
 0xafd   : > { %22762 = vst [vmem:[#allocation78_spill] sm:$0xff] %v21092_v0  ;;  %10789 = vmatprep.mubr.f32.mxu1 %v10395_v19  ;;  %v10411_v19 = vmax.f32 %v9407_v20, 0.0  ;;  %v9419_v20 = vadd.f32 %v22768_v29, %v20798_v34 }
 0xaff   : > { %v21098_v51 = vpop.f32.mrb[166].mxu0  ;;  %v21100_v26 = vpop.f32.mrb[110].mxu1 }
 0xb00   : > { %22763 = vst [vmem:[#allocation81_spill] sm:$0xff] %v21100_v26  ;;  %v21102_v3 = vpop.f32.mrb[167].mxu0  ;;  %v21104_v8 = vpop.f32.mrb[111].mxu1  ;;  %10790 = vmatmul.mubr.f32.gmra.mrb[216].mxu1 %v10394_v52  ;;  %v10410_v52 = vmax.f32 %v9405_v32, 0.0  ;;  %v22771_v32 = vld [vmem:[#allocation42_spill] sm:$0xff] }
 0xb01   : > { %22764 = vst [vmem:[#allocation82_spill] sm:$0xff] %v21104_v8  ;;  %10794 = vmatprep.mubr.f32.mxu1 %v10403_v53  ;;  %v9411_v53 = vadd.f32 %v22767_v56, %v20811_v14  ;;  %v10419_v8 = vmax.f32 %v9413_v36, 0.0  ;;  %v9425_v36 = vadd.f32 %v20762_v22, %v20798_v34 }
 0xb03   : > { %v21110_v61 = vpop.f32.mrb[168].mxu0  ;;  %v21112_v11 = vpop.f32.mrb[112].mxu1 }
 0xb04   : > { %22765 = vst [vmem:[#allocation85_spill] sm:$0xff] %v21112_v11  ;;  %v21114_v0 = vpop.f32.mrb[169].mxu0  ;;  %v21116_v26 = vpop.f32.mrb[113].mxu1  ;;  %10795 = vmatmul.mubr.f32.gmra.mrb[218].mxu1 %v10402_v15  ;;  %v10418_v15 = vmax.f32 %v9411_v53, 0.0 }
 0xb05   : > { %22766 = vst [vmem:[#allocation86_spill] sm:$0xff] %v21116_v26  ;;  %10799 = vmatprep.mubr.f32.mxu1 %v10411_v19  ;;  %v9417_v19 = vadd.f32 %v22771_v32, %v20811_v14  ;;  %v10427_v26 = vmax.f32 %v9419_v20, 0.0  ;;  %v22777_v20 = vld [vmem:[#allocation52_spill] sm:$0xff] }
 0xb06   : > { %v9431_v32 = vadd.f32 %v22777_v20, %v20798_v34 }
 0xb07   : > { %v21122_v12 = vpop.f32.mrb[170].mxu0  ;;  %v21124_v60 = vpop.f32.mrb[114].mxu1 }
 0xb08   : > { %22769 = vst [vmem:[#allocation89_spill] sm:$0xff] %v21124_v60  ;;  %v21126_v25 = vpop.f32.mrb[171].mxu0  ;;  %v21128_v11 = vpop.f32.mrb[115].mxu1  ;;  %10800 = vmatmul.mubr.f32.gmra.mrb[220].mxu1 %v10410_v52  ;;  %v10426_v52 = vmax.f32 %v9417_v19, 0.0 }
 0xb09   : > { %22770 = vst [vmem:[#allocation90_spill] sm:$0xff] %v21128_v11  ;;  %10804 = vmatprep.mubr.f32.mxu1 %v10419_v8  ;;  %v22776_v8 = vld [vmem:[#allocation46_spill] sm:$0xff]  ;;  %v10435_v11 = vmax.f32 %v9425_v36, 0.0  ;;  %v22783_v36 = vld [vmem:[#allocation55_spill] sm:$0xff] }
 0xb0a   : > { %v9423_v53 = vadd.f32 %v22776_v8, %v20811_v14  ;;  %v9437_v8 = vadd.f32 %v22783_v36, %v20798_v34  ;;  %v22790_v36 = vld [vmem:[#allocation57_spill] sm:$0xff] }
 0xb0b   : > { %v21134_v56 = vpop.f32.mrb[172].mxu0  ;;  %v21136_v29 = vpop.f32.mrb[116].mxu1 }
 0xb0c   : > { %22772 = vst [vmem:[#allocation95_spill] sm:$0xff] %v21134_v56  ;;  %22773 = vst [vmem:[#allocation94_spill] sm:$0xff] %v21136_v29  ;;  %v21138_v43 = vpop.f32.mrb[173].mxu0  ;;  %v21140_v60 = vpop.f32.mrb[117].mxu1  ;;  %10805 = vmatmul.mubr.f32.gmra.mrb[222].mxu1 %v10418_v15  ;;  %v10434_v15 = vmax.f32 %v9423_v53, 0.0 }
 0xb0d   : > { %22774 = vst [vmem:[#allocation96_spill] sm:$0xff] %v21138_v43  ;;  %22775 = vst [vmem:[#allocation97_spill] sm:$0xff] %v21140_v60  ;;  %10809 = vmatprep.mubr.f32.mxu1 %v10427_v26  ;;  %v22782_v26 = vld [vmem:[#allocation50_spill] sm:$0xff]  ;;  %v10443_v60 = vmax.f32 %v9431_v32, 0.0 }
 0xb0e   : > { %v9429_v19 = vadd.f32 %v22782_v26, %v20811_v14 }
 0xb0f   : > { %v21146_v27 = vpop.f32.mrb[174].mxu0  ;;  %v21148_v22 = vpop.f32.mrb[118].mxu1 }
 0xb10   : > { %22778 = vst [vmem:[#allocation124_spill] sm:$0xff] %v21146_v27  ;;  %22779 = vst [vmem:[#allocation125_spill] sm:$0xff] %v21148_v22  ;;  %v21150_v56 = vpop.f32.mrb[175].mxu0  ;;  %v21152_v29 = vpop.f32.mrb[119].mxu1  ;;  %10810 = vmatmul.mubr.f32.gmra.mrb[224].mxu1 %v10426_v52  ;;  %v10442_v22 = vmax.f32 %v9429_v19, 0.0  ;;  %v22786_v27 = vld [vmem:[#allocation54_spill] sm:$0xff] }
 0xb11   : > { %22780 = vst [vmem:[#allocation126_spill] sm:$0xff] %v21150_v56  ;;  %22781 = vst [vmem:[#allocation127_spill] sm:$0xff] %v21152_v29  ;;  %10814 = vmatprep.mubr.f32.mxu1 %v10435_v11  ;;  %v9435_v29 = vadd.f32 %v22786_v27, %v20811_v14  ;;  %v10451_v52 = vmax.f32 %v9437_v8, 0.0  ;;  %v22787_v11 = vld [vmem:[#allocation59_spill] sm:$0xff] }
 0xb12   : > { %v9443_v53 = vadd.f32 %v22787_v11, %v20798_v34  ;;  %v22794_v11 = vld [vmem:[#allocation61_spill] sm:$0xff] }
 0xb13   : > { %v21158_v43 = vpop.f32.mrb[120].mxu1  ;;  %v10450_v26 = vmax.f32 %v9435_v29, 0.0  ;;  %v22795_v29 = vld [vmem:[#allocation67_spill] sm:$0xff] }
 0xb14   : > { %22784 = vst [vmem:[#allocation128_spill] sm:$0xff] %v21158_v43  ;;  %v21160_v20 = vpop.f32.mrb[121].mxu1  ;;  %10815 = vmatmul.mubr.f32.gmra.mrb[226].mxu1 %v10434_v15  ;;  %v9441_v43 = vadd.f32 %v22790_v36, %v20811_v14  ;;  %v10459_v15 = vmax.f32 %v9443_v53, 0.0  ;;  %v22798_v36 = vld [vmem:[#allocation47_spill] sm:$0xff] }
 0xb15   : > { %22785 = vst [vmem:[#allocation100_spill] sm:$0xff] %v21160_v20  ;;  %10819 = vmatprep.mubr.f32.mxu1 %v10443_v60  ;;  %v22791_v60 = vld [vmem:[#allocation63_spill] sm:$0xff] }
 0xb16   : > { %v9449_v19 = vadd.f32 %v22791_v60, %v20798_v34  ;;  %v10458_v8 = vmax.f32 %v9441_v43, 0.0  ;;  %v9180_v60 = vsub.s32 3, %v22798_v36 }
 0xb17   : > { %v21166_v56 = vpop.f32.mrb[122].mxu1 }
 0xb18   : > { %22788 = vst [vmem:[#allocation16_spill] sm:$0xff] %v21166_v56  ;;  %v21168_v32 = vpop.f32.mrb[123].mxu1  ;;  %10820 = vmatmul.mubr.f32.gmra.mrb[228].mxu1 %v10442_v22  ;;  %v9447_v56 = vadd.f32 %v22794_v11, %v20811_v14  ;;  %v10467_v22 = vmax.f32 %v9449_v19, 0.0  ;;  %v9461_v11 = vadd.f32 %v20846_v17, %v20798_v34 }
 0xb19   : > { %22789 = vst [vmem:[#allocation99_spill] sm:$0xff] %v21168_v32  ;;  %10824 = vmatprep.mubr.f32.mxu1 %v10451_v52  ;;  %v9455_v52 = vadd.f32 %v22795_v29, %v20798_v34  ;;  %v9176_v29 = vsub.s32 2, %v22798_v36 }
 0xb1b   : > { %v21174_v20 = vpop.f32.mrb[124].mxu1  ;;  %v10475_v43 = vmax.f32 %v9455_v52, 0.0 }
 0xb1c   : > { %22792 = vst [vmem:[#allocation98_spill] sm:$0xff] %v21174_v20  ;;  %v21176_v27 = vpop.f32.mrb[125].mxu1  ;;  %10825 = vmatmul.mubr.f32.gmra.mrb[230].mxu1 %v10450_v26  ;;  %v10466_v20 = vmax.f32 %v9447_v56, 0.0  ;;  %v22799_v26 = vld [vmem:[#allocation65_spill] sm:$0xff]  ;;  %v22802_v56 = vld [vmem:[#allocation71_spill] sm:$0xff] }
 0xb1d   : > { %22793 = vst [vmem:[#allocation37_spill] sm:$0xff] %v21176_v27  ;;  %10829 = vmatprep.mubr.f32.mxu1 %v10459_v15  ;;  %v9453_v15 = vadd.f32 %v22799_v26, %v20811_v14  ;;  %v10483_v26 = vmax.f32 %v9461_v11, 0.0 }
 0xb1f   : > { %v21182_v32 = vpop.f32.mrb[126].mxu1 }
 0xb20   : > { %22796 = vst [vmem:[#allocation44_spill] sm:$0xff] %v21182_v32  ;;  %v21184_v53 = vpop.f32.mrb[127].mxu1  ;;  %10830 = vmatmul.mubr.f32.gmra.mrb[232].mxu1 %v10458_v8  ;;  %v22801_v32 = vld [vmem:[#allocation56_spill] sm:$0xff] }
 0xb21   : > { %22797 = vst [vmem:[#allocation42_spill] sm:$0xff] %v21184_v53  ;;  %10834 = vmatprep.mubr.f32.mxu1 %v10467_v22  ;;  %v21197_v8 = vrot.slane %v22801_v32, %v9180_v60  ;;  %v10474_v22 = vmax.f32 %v9453_v15, 0.0  ;;  %v9459_v53 = vadd.f32 %v22802_v56, %v20811_v14  ;;  %v21206_v34 = vrot.slane %v22801_v32, %v9176_v29  ;;  %v10554_v15 = vld [vmem:[#allocation10 + $0x200] sm:$0xff] }
 0xb23   : > { %v21191_v19 = vpop.f32.mrb[128].mxu1  ;;  %v9532_v52 = vadd.f32 %v20859_v38, %v21197_v8  ;;  %v9530_v60 = vadd.f32 %v20855_v9, %v21206_v34  ;;  %v9538_v11 = vadd.f32 %v20872_v23, %v21197_v8 }
 0xb24   : > { %22800 = vst [vmem:[#allocation46_spill] sm:$0xff] %v21191_v19  ;;  %v21194_v27 = vpop.f32.mrb[129].mxu1  ;;  %10835 = vmatmul.mubr.f32.gmra.mrb[234].mxu1 %v10466_v20  ;;  %v10482_v20 = vmax.f32 %v9459_v53, 0.0  ;;  %v9536_v53 = vadd.f32 %v20868_v55, %v21206_v34  ;;  %v10558_v55 = vld [vmem:[#allocation10 + $0x220] sm:$0xff] }
 0xb25   : > { %10839 = vmatprep.mubr.f32.mxu1 %v10475_v43  ;;  %v10555_v43 = vld [vmem:[#allocation10 + $0x208] sm:$0xff]  ;;  %v10237_v14 = vmax.f32 %v9532_v52, 0.0  ;;  %v10236_v29 = vmax.f32 %v9530_v60, 0.0  ;;  %v10245_v9 = vmax.f32 %v9538_v11, 0.0  ;;  %v9544_v52 = vadd.f32 %v20885_v7, %v21197_v8 }
 0xb26   : > { %v16234_v32 = vpack.c.bf16 %v10555_v43, %v10554_v15  ;;  %v9542_v60 = vadd.f32 %v20881_v46, %v21206_v34  ;;  %v10559_v15 = vld [vmem:[#allocation10 + $0x228] sm:$0xff]  ;;  %v9550_v7 = vadd.f32 %v20898_v18, %v21197_v8  ;;  %v9548_v46 = vadd.f32 %v20894_v30, %v21206_v34 }
 0xb27   : > { %v21203_v17 = vpop.f32.mrb[130].mxu1  ;;  %v10253_v43 = vmax.f32 %v9544_v52, 0.0  ;;  %v9556_v18 = vadd.f32 %v20911_v39, %v21197_v8  ;;  %v9554_v30 = vadd.f32 %v20907_v4, %v21206_v34  ;;  %v9562_v39 = vadd.f32 %v20924_v24, %v21197_v8 }
 0xb28   : > { %22803 = vst [vmem:[#allocation52_spill] sm:$0xff] %v21203_v17  ;;  %v21208_v19 = vpop.f32.mrb[131].mxu1  ;;  %10840 = vmatmul.mubr.f32.gmra.mrb[236].mxu1 %v10474_v22  ;;  %v10556_v22 = vld [vmem:[#allocation10 + $0x210] sm:$0xff]  ;;  %v9560_v4 = vadd.f32 %v20920_v13, %v21206_v34  ;;  %v9568_v24 = vadd.f32 %v20937_v5, %v21197_v8  ;;  %v9566_v13 = vadd.f32 %v20933_v42, %v21206_v34 }
 0xb29   : > { %10844 = vmatprep.mubr.f32.mxu1 %v10483_v26  ;;  %v10557_v26 = vld [vmem:[#allocation10 + $0x218] sm:$0xff]  ;;  %v9574_v5 = vadd.f32 %v20950_v21, %v21197_v8  ;;  %v9572_v42 = vadd.f32 %v20946_v40, %v21206_v34  ;;  %v9580_v21 = vadd.f32 %v20963_v2, %v21197_v8  ;;  %v9578_v40 = vadd.f32 %v20959_v49, %v21206_v34 }
 0xb2a   : > { %v9586_v2 = vadd.f32 %v20976_v62, %v21197_v8  ;;  %v9584_v49 = vadd.f32 %v20972_v41, %v21206_v34  ;;  %v9592_v62 = vadd.f32 %v20989_v16, %v21197_v8  ;;  %v9590_v41 = vadd.f32 %v20985_v47, %v21206_v34 }
 0xb2b   : > { %v21214_v38 = vpop.f32.mrb[132].mxu1  ;;  %v9598_v16 = vadd.f32 %v21002_v63, %v21197_v8  ;;  %v9596_v47 = vadd.f32 %v20998_v44, %v21206_v34  ;;  %v9604_v63 = vadd.f32 %v21015_v45, %v21197_v8  ;;  %v9602_v44 = vadd.f32 %v21011_v10, %v21206_v34 }
 0xb2c   : > { %v21216_v56 = vpop.f32.mrb[133].mxu1  ;;  %10845 = vmatmul.mubr.f32.gmra.mrb[238].mxu1 %v10482_v20  ;;  %v16237_v20 = vpack.c.bf16 %v10557_v26, %v10556_v22  ;;  %v10561_v22 = vld [vmem:[#allocation10 + $0x238] sm:$0xff]  ;;  %v10261_v26 = vmax.f32 %v9550_v7, 0.0  ;;  %v9610_v45 = vadd.f32 %v21028_v58, %v21197_v8  ;;  %v9608_v10 = vadd.f32 %v21024_v31, %v21206_v34 }
 0xb2d   : > { %10914 = vmatprep.mubr.f32.mxu1 %v10237_v14  ;;  %v10244_v14 = vmax.f32 %v9536_v53, 0.0  ;;  %v10560_v53 = vld [vmem:[#allocation10 + $0x230] sm:$0xff]  ;;  %v9616_v58 = vadd.f32 %v21041_v28, %v21197_v8  ;;  %v9614_v31 = vadd.f32 %v21037_v37, %v21206_v34  ;;  %v9622_v28 = vadd.f32 %v21054_v50, %v21197_v8 }
 0xb2e   : > { %v9620_v37 = vadd.f32 %v21050_v48, %v21206_v34  ;;  %v9628_v50 = vadd.f32 %v21066_v1, %v21197_v8  ;;  %v9626_v48 = vadd.f32 %v21062_v33, %v21206_v34 }
 0xb2f   : > { %v21222_v17 = vpop.f32.mrb[134].mxu1 }
 0xb30   : > { %22804 = vst [vmem:[#allocation50_spill] sm:$0xff] %v21222_v17  ;;  %v21224_v23 = vpop.f32.mrb[135].mxu1  ;;  %10915 = vmatmul.mubr.f32.vlgmr.msra.gmra.mrb[176].mxu1 %v10236_v29  ;;  %v10252_v29 = vmax.f32 %v9542_v60, 0.0  ;;  %v10562_v60 = vld [vmem:[#allocation10 + $0x240] sm:$0xff] }
 0xb31   : > { %16235 = vmatpush1.bf16.msra.mxu1 %v16234_v32  ;;  %10919 = vmatprep.mubr.f32.mxu1 %v10245_v9  ;;  %v16240_v32 = vpack.c.bf16 %v10559_v15, %v10558_v55  ;;  %v10563_v55 = vld [vmem:[#allocation10 + $0x248] sm:$0xff]  ;;  %v10269_v15 = vmax.f32 %v9556_v18, 0.0 }
 0xb32   : > { %16236 = vmatprep.subr.bf16.mxu1 %v22724_v6 }
 0xb33   : > { %v21231_v11 = vpop.f32.mrb[136].mxu1 }
 0xb34   : > { %v21233_v17 = vpop.f32.mrb[137].mxu1  ;;  %10920 = vmatmul.mubr.f32.gmra.mrb[178].mxu1 %v10244_v14  ;;  %v10260_v14 = vmax.f32 %v9548_v46, 0.0  ;;  %v10564_v46 = vld [vmem:[#allocation10 + $0x250] sm:$0xff] }
 0xb35   : > { %10924 = vmatprep.mubr.f32.mxu1 %v10253_v43  ;;  %16238 = vmatpush1.bf16.msra.mxu1 %v16237_v20  ;;  %v16243_v20 = vpack.c.bf16 %v10561_v22, %v10560_v53  ;;  %v10565_v53 = vld [vmem:[#allocation10 + $0x258] sm:$0xff]  ;;  %v10277_v22 = vmax.f32 %v9562_v39, 0.0 }
 0xb36   : > { %16239 = vmatprep.subr.bf16.mxu1 %v22724_v6 }
 0xb37   : > { %v21240_v9 = vpop.f32.mrb[138].mxu1 }
 0xb38   : > { %v21242_v52 = vpop.f32.mrb[139].mxu1  ;;  %10925 = vmatmul.mubr.f32.gmra.mrb[180].mxu1 %v10252_v29  ;;  %v10268_v29 = vmax.f32 %v9554_v30, 0.0  ;;  %v10566_v30 = vld [vmem:[#allocation10 + $0x260] sm:$0xff] }
 0xb39   : > { %10929 = vmatprep.mubr.f32.mxu1 %v10261_v26  ;;  %16241 = vmatpush1.bf16.msra.mxu1 %v16240_v32  ;;  %v16246_v32 = vpack.c.bf16 %v10563_v55, %v10562_v60  ;;  %v10567_v60 = vld [vmem:[#allocation10 + $0x268] sm:$0xff]  ;;  %v10285_v55 = vmax.f32 %v9568_v24, 0.0 }
 0xb3a   : > { %16242 = vmatprep.subr.bf16.mxu1 %v22724_v6 }
 0xb3b   : > { %v21249_v43 = vpop.f32.mrb[140].mxu1 }
 0xb3c   : > { %v21251_v7 = vpop.f32.mrb[141].mxu1  ;;  %10930 = vmatmul.mubr.f32.gmra.mrb[182].mxu1 %v10260_v14  ;;  %v10276_v14 = vmax.f32 %v9560_v4, 0.0  ;;  %v10568_v4 = vld [vmem:[#allocation10 + $0x270] sm:$0xff] }
 0xb3d   : > { %10934 = vmatprep.mubr.f32.mxu1 %v10269_v15  ;;  %16244 = vmatpush1.bf16.msra.mxu1 %v16243_v20  ;;  %v16249_v20 = vpack.c.bf16 %v10565_v53, %v10564_v46  ;;  %v10569_v46 = vld [vmem:[#allocation10 + $0x278] sm:$0xff]  ;;  %v10293_v53 = vmax.f32 %v9574_v5, 0.0 }
 0xb3e   : > { %16245 = vmatprep.subr.bf16.mxu1 %v22724_v6 }
 0xb3f   : > { %v21258_v26 = vpop.f32.mrb[142].mxu1 }
 0xb40   : > { %v21260_v18 = vpop.f32.mrb[143].mxu1  ;;  %10935 = vmatmul.mubr.f32.gmra.mrb[184].mxu1 %v10268_v29  ;;  %v10284_v29 = vmax.f32 %v9566_v13, 0.0  ;;  %v10570_v13 = vld [vmem:[#allocation10 + $0x280] sm:$0xff] }
 0xb41   : > { %10939 = vmatprep.mubr.f32.mxu1 %v10277_v22  ;;  %16247 = vmatpush1.bf16.msra.mxu1 %v16246_v32  ;;  %v16252_v32 = vpack.c.bf16 %v10567_v60, %v10566_v30  ;;  %v10571_v30 = vld [vmem:[#allocation10 + $0x288] sm:$0xff]  ;;  %v10301_v60 = vmax.f32 %v9580_v21, 0.0 }
 0xb42   : > { %16248 = vmatprep.subr.bf16.mxu1 %v22724_v6 }
 0xb43   : > { %v21267_v15 = vpop.f32.mrb[144].mxu1 }
 0xb44   : > { %v21269_v39 = vpop.f32.mrb[145].mxu1  ;;  %10940 = vmatmul.mubr.f32.gmra.mrb[186].mxu1 %v10276_v14  ;;  %v10292_v14 = vmax.f32 %v9572_v42, 0.0  ;;  %v10572_v42 = vld [vmem:[#allocation10 + $0x290] sm:$0xff] }
 0xb45   : > { %10944 = vmatprep.mubr.f32.mxu1 %v10285_v55  ;;  %16250 = vmatpush1.bf16.msra.mxu1 %v16249_v20  ;;  %v16255_v20 = vpack.c.bf16 %v10569_v46, %v10568_v4  ;;  %v10573_v4 = vld [vmem:[#allocation10 + $0x298] sm:$0xff]  ;;  %v10309_v46 = vmax.f32 %v9586_v2, 0.0 }
 0xb46   : > { %16251 = vmatprep.subr.bf16.mxu1 %v22724_v6 }
 0xb47   : > { %v21276_v22 = vpop.f32.mrb[146].mxu1 }
 0xb48   : > { %v21278_v24 = vpop.f32.mrb[147].mxu1  ;;  %10945 = vmatmul.mubr.f32.gmra.mrb[188].mxu1 %v10284_v29  ;;  %v10300_v29 = vmax.f32 %v9578_v40, 0.0  ;;  %v10574_v40 = vld [vmem:[#allocation10 + $0x2a0] sm:$0xff] }
 0xb49   : > { %10949 = vmatprep.mubr.f32.mxu1 %v10293_v53  ;;  %16253 = vmatpush1.bf16.msra.mxu1 %v16252_v32  ;;  %v16258_v32 = vpack.c.bf16 %v10571_v30, %v10570_v13  ;;  %v10575_v13 = vld [vmem:[#allocation10 + $0x2a8] sm:$0xff]  ;;  %v10317_v30 = vmax.f32 %v9592_v62, 0.0 }
 0xb4a   : > { %16254 = vmatprep.subr.bf16.mxu1 %v22724_v6 }
 0xb4b   : > { %v21285_v55 = vpop.f32.mrb[148].mxu1 }
 0xb4c   : > { %v21287_v5 = vpop.f32.mrb[149].mxu1  ;;  %10950 = vmatmul.mubr.f32.gmra.mrb[190].mxu1 %v10292_v14  ;;  %v10308_v14 = vmax.f32 %v9584_v49, 0.0  ;;  %v10576_v49 = vld [vmem:[#allocation10 + $0x2b0] sm:$0xff] }
 0xb4d   : > { %10954 = vmatprep.mubr.f32.mxu1 %v10301_v60  ;;  %16256 = vmatpush1.bf16.msra.mxu1 %v16255_v20  ;;  %v16261_v20 = vpack.c.bf16 %v10573_v4, %v10572_v42  ;;  %v10577_v42 = vld [vmem:[#allocation10 + $0x2b8] sm:$0xff]  ;;  %v10325_v4 = vmax.f32 %v9598_v16, 0.0 }
 0xb4e   : > { %16257 = vmatprep.subr.bf16.mxu1 %v22724_v6 }
 0xb4f   : > { %v21294_v53 = vpop.f32.mrb[150].mxu1 }
 0xb50   : > { %v21296_v21 = vpop.f32.mrb[151].mxu1  ;;  %10955 = vmatmul.mubr.f32.gmra.mrb[192].mxu1 %v10300_v29  ;;  %v10316_v29 = vmax.f32 %v9590_v41, 0.0  ;;  %v10578_v41 = vld [vmem:[#allocation10 + $0x2c0] sm:$0xff] }
 0xb51   : > { %10959 = vmatprep.mubr.f32.mxu1 %v10309_v46  ;;  %16259 = vmatpush1.bf16.msra.mxu1 %v16258_v32  ;;  %v16264_v32 = vpack.c.bf16 %v10575_v13, %v10574_v40  ;;  %v10579_v40 = vld [vmem:[#allocation10 + $0x2c8] sm:$0xff]  ;;  %v10333_v13 = vmax.f32 %v9604_v63, 0.0 }
 0xb52   : > { %16260 = vmatprep.subr.bf16.mxu1 %v22724_v6 }
 0xb53   : > { %v21303_v60 = vpop.f32.mrb[152].mxu1 }
 0xb54   : > { %v21305_v2 = vpop.f32.mrb[153].mxu1  ;;  %10960 = vmatmul.mubr.f32.gmra.mrb[194].mxu1 %v10308_v14  ;;  %v10324_v14 = vmax.f32 %v9596_v47, 0.0  ;;  %v10580_v47 = vld [vmem:[#allocation10 + $0x2d0] sm:$0xff] }
 0xb55   : > { %10964 = vmatprep.mubr.f32.mxu1 %v10317_v30  ;;  %16262 = vmatpush1.bf16.msra.mxu1 %v16261_v20  ;;  %v16267_v20 = vpack.c.bf16 %v10577_v42, %v10576_v49  ;;  %v10581_v49 = vld [vmem:[#allocation10 + $0x2d8] sm:$0xff]  ;;  %v10341_v42 = vmax.f32 %v9610_v45, 0.0 }
 0xb56   : > { %16263 = vmatprep.subr.bf16.mxu1 %v22724_v6 }
 0xb57   : > { %v21312_v46 = vpop.f32.mrb[154].mxu1 }
 0xb58   : > { %v21314_v62 = vpop.f32.mrb[155].mxu1  ;;  %10965 = vmatmul.mubr.f32.gmra.mrb[196].mxu1 %v10316_v29  ;;  %v10332_v29 = vmax.f32 %v9602_v44, 0.0  ;;  %v10582_v44 = vld [vmem:[#allocation10 + $0x2e0] sm:$0xff] }
 0xb59   : > { %10969 = vmatprep.mubr.f32.mxu1 %v10325_v4  ;;  %16265 = vmatpush1.bf16.msra.mxu1 %v16264_v32  ;;  %v16270_v32 = vpack.c.bf16 %v10579_v40, %v10578_v41  ;;  %v10583_v41 = vld [vmem:[#allocation10 + $0x2e8] sm:$0xff]  ;;  %v10349_v40 = vmax.f32 %v9616_v58, 0.0 }
 0xb5a   : > { %16266 = vmatprep.subr.bf16.mxu1 %v22724_v6 }
 0xb5b   : > { %v21321_v30 = vpop.f32.mrb[156].mxu1 }
 0xb5c   : > { %v21323_v16 = vpop.f32.mrb[157].mxu1  ;;  %10970 = vmatmul.mubr.f32.gmra.mrb[198].mxu1 %v10324_v14  ;;  %v10340_v14 = vmax.f32 %v9608_v10, 0.0  ;;  %v10584_v10 = vld [vmem:[#allocation10 + $0x2f0] sm:$0xff] }
 0xb5d   : > { %10974 = vmatprep.mubr.f32.mxu1 %v10333_v13  ;;  %16268 = vmatpush1.bf16.msra.mxu1 %v16267_v20  ;;  %v16273_v20 = vpack.c.bf16 %v10581_v49, %v10580_v47  ;;  %v10585_v47 = vld [vmem:[#allocation10 + $0x2f8] sm:$0xff]  ;;  %v10357_v49 = vmax.f32 %v9622_v28, 0.0  ;;  %v9632_v28 = vadd.f32 %v21074_v57, %v21206_v34  ;;  %v9646_v57 = vadd.f32 %v21102_v3, %v21197_v8 }
 0xb5e   : > { %16269 = vmatprep.subr.bf16.mxu1 %v22724_v6 }
 0xb5f   : > { %v21330_v4 = vpop.f32.mrb[158].mxu1 }
 0xb60   : > { %v21332_v63 = vpop.f32.mrb[159].mxu1  ;;  %10975 = vmatmul.mubr.f32.gmra.mrb[200].mxu1 %v10332_v29  ;;  %v10348_v29 = vmax.f32 %v9614_v31, 0.0  ;;  %v10365_v31 = vmax.f32 %v9628_v50, 0.0 }
 0xb61   : > { %10979 = vmatprep.mubr.f32.mxu1 %v10341_v42  ;;  %16271 = vmatpush1.bf16.msra.mxu1 %v16270_v32  ;;  %v16276_v32 = vpack.c.bf16 %v10583_v41, %v10582_v44  ;;  %v9634_v44 = vadd.f32 %v21078_v54, %v21197_v8 }
 0xb62   : > { %16272 = vmatprep.subr.bf16.mxu1 %v22724_v6 }
 0xb63   : > { %v21339_v13 = vpop.f32.mrb[160].mxu1  ;;  %v10373_v33 = vmax.f32 %v9634_v44, 0.0  ;;  %v9650_v44 = vadd.f32 %v21110_v61, %v21206_v34 }
 0xb64   : > { %v21341_v45 = vpop.f32.mrb[161].mxu1  ;;  %10980 = vmatmul.mubr.f32.gmra.mrb[202].mxu1 %v10340_v14  ;;  %v10356_v14 = vmax.f32 %v9620_v37, 0.0  ;;  %v10372_v37 = vmax.f32 %v9632_v28, 0.0  ;;  %v9658_v28 = vadd.f32 %v21126_v25, %v21197_v8 }
 0xb65   : > { %10984 = vmatprep.mubr.f32.mxu1 %v10349_v40  ;;  %16274 = vmatpush1.bf16.msra.mxu1 %v16273_v20  ;;  %v16279_v20 = vpack.c.bf16 %v10585_v47, %v10584_v10  ;;  %v10364_v40 = vmax.f32 %v9626_v48, 0.0  ;;  %v9638_v10 = vadd.f32 %v21086_v35, %v21206_v34  ;;  %v9652_v48 = vadd.f32 %v21114_v0, %v21197_v8 }
 0xb66   : > { %16275 = vmatprep.subr.bf16.mxu1 %v22724_v6  ;;  %v10396_v0 = vmax.f32 %v9650_v44, 0.0  ;;  %v22812_v44 = vld [vmem:[#allocation124_spill] sm:$0xff] }
 0xb67   : > { %v21348_v42 = vpop.f32.mrb[162].mxu1 }
 0xb68   : > { %v21350_v58 = vpop.f32.mrb[163].mxu1  ;;  %10985 = vmatmul.mubr.f32.gmra.mrb[204].mxu1 %v10348_v29 }
 0xb69   : > { %10989 = vmatprep.mubr.f32.mxu1 %v10357_v49  ;;  %16277 = vmatpush1.bf16.msra.mxu1 %v16276_v32  ;;  %v9640_v32 = vadd.f32 %v21090_v59, %v21197_v8  ;;  %v10380_v59 = vmax.f32 %v9638_v10, 0.0  ;;  %v22807_v10 = vld [vmem:[#allocation96_spill] sm:$0xff] }
 0xb6a   : > { %16278 = vmatprep.subr.bf16.mxu1 %v22724_v6 }
 0xb6b   : > { %v21357_v41 = vpop.f32.mrb[164].mxu1  ;;  %v10381_v47 = vmax.f32 %v9640_v32, 0.0  ;;  %v9656_v32 = vadd.f32 %v21122_v12, %v21206_v34 }
 0xb6c   : > { %v21359_v1 = vpop.f32.mrb[165].mxu1  ;;  %10990 = vmatmul.mubr.f32.gmra.mrb[206].mxu1 %v10356_v14  ;;  %v10389_v14 = vmax.f32 %v9646_v57, 0.0 }
 0xb6d   : > { %10994 = vmatprep.mubr.f32.mxu1 %v10365_v31  ;;  %16280 = vmatpush1.bf16.msra.mxu1 %v16279_v20  ;;  %v9644_v20 = vadd.f32 %v21098_v51, %v21206_v34  ;;  %v10404_v25 = vmax.f32 %v9656_v32, 0.0 }
 0xb6e   : > { %16281 = vmatprep.subr.bf16.mxu1 %v22724_v6 }
 0xb6f   : > { %v21366_v29 = vpop.f32.mrb[166].mxu1  ;;  %v10388_v3 = vmax.f32 %v9644_v20, 0.0 }
 0xb70   : > { %v21368_v54 = vpop.f32.mrb[167].mxu1  ;;  %10995 = vmatmul.mubr.f32.gmra.mrb[208].mxu1 %v10364_v40  ;;  %v10397_v40 = vmax.f32 %v9652_v48, 0.0  ;;  %v22811_v48 = vld [vmem:[#allocation126_spill] sm:$0xff] }
 0xb71   : > { %10999 = vmatprep.mubr.f32.mxu1 %v10373_v33 }
 0xb73   : > { %v21374_v49 = vpop.f32.mrb[168].mxu1 }
 0xb74   : > { %v21376_v50 = vpop.f32.mrb[169].mxu1  ;;  %11000 = vmatmul.mubr.f32.gmra.mrb[210].mxu1 %v10372_v37  ;;  %v10405_v37 = vmax.f32 %v9658_v28, 0.0  ;;  %v22813_v28 = vld [vmem:[#allocation18_spill] sm:$0xff] }
 0xb75   : > { %11004 = vmatprep.mubr.f32.mxu1 %v10381_v47  ;;  %v9664_v47 = vadd.f32 %v22807_v10, %v21197_v8  ;;  %v9676_v10 = vadd.f32 %v22813_v28, %v21197_v8  ;;  %v22817_v28 = vld [vmem:[#allocation22_spill] sm:$0xff] }
 0xb77   : > { %v21382_v31 = vpop.f32.mrb[170].mxu1 }
 0xb78   : > { %v21384_v35 = vpop.f32.mrb[171].mxu1  ;;  %11005 = vmatmul.mubr.f32.gmra.mrb[212].mxu1 %v10380_v59  ;;  %v22810_v59 = vld [vmem:[#allocation95_spill] sm:$0xff] }
 0xb79   : > { %11009 = vmatprep.mubr.f32.mxu1 %v10389_v14  ;;  %v9662_v20 = vadd.f32 %v22810_v59, %v21206_v34  ;;  %v10413_v14 = vmax.f32 %v9664_v47, 0.0  ;;  %v10429_v47 = vmax.f32 %v9676_v10, 0.0  ;;  %v22815_v59 = vld [vmem:[#allocation20_spill] sm:$0xff] }
 0xb7b   : > { %v21390_v33 = vpop.f32.mrb[172].mxu1  ;;  %v10412_v12 = vmax.f32 %v9662_v20, 0.0  ;;  %v22816_v20 = vld [vmem:[#allocation17_spill] sm:$0xff] }
 0xb7c   : > { %22805 = vst [vmem:[#allocation55_spill] sm:$0xff] %v21390_v33  ;;  %v21392_v51 = vpop.f32.mrb[173].mxu1  ;;  %11010 = vmatmul.mubr.f32.gmra.mrb[214].mxu1 %v10388_v3  ;;  %v9670_v3 = vadd.f32 %v22811_v48, %v21197_v8  ;;  %v9682_v48 = vadd.f32 %v22815_v59, %v21197_v8 }
 0xb7d   : > { %22806 = vst [vmem:[#allocation54_spill] sm:$0xff] %v21392_v51  ;;  %11014 = vmatprep.mubr.f32.mxu1 %v10397_v40  ;;  %v9668_v40 = vadd.f32 %v22812_v44, %v21206_v34 }
 0xb7e   : > { %v10437_v44 = vmax.f32 %v9682_v48, 0.0 }
 0xb7f   : > { %v21398_v57 = vpop.f32.mrb[174].mxu1 }
 0xb80   : > { %22808 = vst [vmem:[#allocation59_spill] sm:$0xff] %v21398_v57  ;;  %v21400_v61 = vpop.f32.mrb[175].mxu1  ;;  %11015 = vmatmul.mubr.f32.gmra.mrb[216].mxu1 %v10396_v0  ;;  %v10421_v57 = vmax.f32 %v9670_v3, 0.0  ;;  %v22814_v0 = vld [vmem:[#allocation15_spill] sm:$0xff]  ;;  %v9688_v3 = vadd.f32 %v22817_v28, %v21197_v8 }
 0xb81   : > { %22809 = vst [vmem:[#allocation57_spill] sm:$0xff] %v21400_v61  ;;  %11019 = vmatprep.mubr.f32.mxu1 %v10405_v37  ;;  %v9674_v32 = vadd.f32 %v22814_v0, %v21206_v34  ;;  %v10420_v37 = vmax.f32 %v9668_v40, 0.0  ;;  %v22819_v0 = vld [vmem:[#allocation24_spill] sm:$0xff]  ;;  %v10586_v61 = vld [vmem:[#allocation10 + $0x300] sm:$0xff] }
 0xb82   : > { %v10445_v10 = vmax.f32 %v9688_v3, 0.0  ;;  %v9694_v59 = vadd.f32 %v22819_v0, %v21197_v8 }
 0xb84   : > { %11020 = vmatmul.mubr.f32.gmra.mrb[218].mxu1 %v10404_v25  ;;  %v10428_v25 = vmax.f32 %v9674_v32, 0.0  ;;  %v10453_v48 = vmax.f32 %v9694_v59, 0.0 }
 0xb85   : > { %11024 = vmatprep.mubr.f32.mxu1 %v10413_v14  ;;  %v9680_v14 = vadd.f32 %v22816_v20, %v21206_v34  ;;  %v22821_v20 = vld [vmem:[#allocation26_spill] sm:$0xff] }
 0xb86   : > { %v9700_v28 = vadd.f32 %v22821_v20, %v21197_v8 }
 0xb88   : > { %11025 = vmatmul.mubr.f32.gmra.mrb[220].mxu1 %v10412_v12  ;;  %v22818_v12 = vld [vmem:[#allocation19_spill] sm:$0xff]  ;;  %v10461_v3 = vmax.f32 %v9700_v28, 0.0 }
 0xb89   : > { %11029 = vmatprep.mubr.f32.mxu1 %v10421_v57  ;;  %v10436_v57 = vmax.f32 %v9680_v14, 0.0  ;;  %v9686_v40 = vadd.f32 %v22818_v12, %v21206_v34  ;;  %v22822_v14 = vld [vmem:[#allocation23_spill] sm:$0xff]  ;;  %v22823_v12 = vld [vmem:[#allocation28_spill] sm:$0xff] }
 0xb8a   : > { %v9706_v0 = vadd.f32 %v22823_v12, %v21197_v8  ;;  %v21443_v12 = vld [vmem:[%s21821_s10] sm:$0xff] }
 0xb8b   : > { %v10444_v32 = vmax.f32 %v9686_v40, 0.0  ;;  %v22824_v40 = vld [vmem:[#allocation25_spill] sm:$0xff] }
 0xb8c   : > { %11030 = vmatmul.mubr.f32.gmra.mrb[222].mxu1 %v10420_v37  ;;  %v22820_v37 = vld [vmem:[#allocation21_spill] sm:$0xff]  ;;  %v10469_v59 = vmax.f32 %v9706_v0, 0.0 }
 0xb8d   : > { %11034 = vmatprep.mubr.f32.mxu1 %v10429_v47  ;;  %v9692_v47 = vadd.f32 %v22820_v37, %v21206_v34  ;;  %v22825_v37 = vld [vmem:[#allocation30_spill] sm:$0xff] }
 0xb8e   : > { %v9712_v20 = vadd.f32 %v22825_v37, %v21197_v8 }
 0xb90   : > { %11035 = vmatmul.mubr.f32.gmra.mrb[224].mxu1 %v10428_v25  ;;  %v10452_v25 = vmax.f32 %v9692_v47, 0.0 }
 0xb91   : > { %11039 = vmatprep.mubr.f32.mxu1 %v10437_v44  ;;  %v9698_v44 = vadd.f32 %v22822_v14, %v21206_v34  ;;  %v9184_v14 = vsub.s32 4, %v22798_v36 }
 0xb94   : > { %11040 = vmatmul.mubr.f32.gmra.mrb[226].mxu1 %v10436_v57  ;;  %v10460_v57 = vmax.f32 %v9698_v44, 0.0  ;;  %v22827_v44 = vld [vmem:[#allocation32_spill] sm:$0xff] }
 0xb95   : > { %11044 = vmatprep.mubr.f32.mxu1 %v10445_v10  ;;  %v9704_v10 = vadd.f32 %v22824_v40, %v21206_v34  ;;  %v22828_v40 = vld [vmem:[#allocation29_spill] sm:$0xff] }
 0xb97   : > { %v10468_v47 = vmax.f32 %v9704_v10, 0.0  ;;  %v9716_v10 = vadd.f32 %v22828_v40, %v21206_v34 }
 0xb98   : > { %11045 = vmatmul.mubr.f32.gmra.mrb[228].mxu1 %v10444_v32  ;;  %v9188_v32 = vsub.s32 5, %v22798_v36 }
 0xb99   : > { %11049 = vmatprep.mubr.f32.mxu1 %v10453_v48  ;;  %v22826_v48 = vld [vmem:[#allocation27_spill] sm:$0xff] }
 0xb9a   : > { %v9710_v28 = vadd.f32 %v22826_v48, %v21206_v34  ;;  %v21446_v0 = vrot.slane %v21443_v12, %v9188_v32  ;;  %v10484_v48 = vmax.f32 %v9716_v10, 0.0  ;;  %v22833_v10 = vld [vmem:[#allocation38_spill] sm:$0xff] }
 0xb9c   : > { %11050 = vmatmul.mubr.f32.gmra.mrb[230].mxu1 %v10452_v25  ;;  %v10477_v25 = vmax.f32 %v9712_v20, 0.0  ;;  %v9801_v51 = vadd.f32 %v22833_v10, %v21446_v0  ;;  %v22837_v10 = vld [vmem:[#allocation43_spill] sm:$0xff] }
 0xb9d   : > { %11054 = vmatprep.mubr.f32.mxu1 %v10461_v3  ;;  %v9718_v3 = vadd.f32 %v22827_v44, %v21197_v8  ;;  %v22829_v8 = vld [vmem:[#allocation34_spill] sm:$0xff]  ;;  %v22830_v44 = vld [vmem:[#allocation31_spill] sm:$0xff] }
 0xb9e   : > { %v9789_v20 = vadd.f32 %v22829_v8, %v21446_v0  ;;  %v10588_v8 = vld [vmem:[#allocation10 + $0x310] sm:$0xff] }
 0xb9f   : > { %v10485_v37 = vmax.f32 %v9718_v3, 0.0  ;;  %v22832_v3 = vld [vmem:[#allocation33_spill] sm:$0xff] }
 0xba0   : > { %11055 = vmatmul.mubr.f32.gmra.mrb[232].mxu1 %v10460_v57  ;;  %v10476_v57 = vmax.f32 %v9710_v28, 0.0  ;;  %v22831_v28 = vld [vmem:[#allocation36_spill] sm:$0xff] }
 0xba1   : > { %11059 = vmatprep.mubr.f32.mxu1 %v10469_v59  ;;  %v21451_v59 = vrot.slane %v21443_v12, %v9184_v14  ;;  %v9795_v33 = vadd.f32 %v22831_v28, %v21446_v0  ;;  %v22834_v28 = vld [vmem:[#allocation35_spill] sm:$0xff] }
 0xba3   : > { %v9787_v32 = vadd.f32 %v22830_v44, %v21451_v59  ;;  %v9793_v40 = vadd.f32 %v22832_v3, %v21451_v59 }
 0xba4   : > { %11060 = vmatmul.mubr.f32.gmra.mrb[234].mxu1 %v10468_v47  ;;  %v10587_v47 = vld [vmem:[#allocation10 + $0x308] sm:$0xff] }
 0xba5   : > { %11064 = vmatprep.mubr.f32.mxu1 %v10477_v25  ;;  %v10239_v25 = vmax.f32 %v9789_v20, 0.0  ;;  %v16282_v34 = vpack.c.bf16 %v10587_v47, %v10586_v61  ;;  %v10238_v14 = vmax.f32 %v9787_v32, 0.0  ;;  %v10246_v44 = vmax.f32 %v9793_v40, 0.0  ;;  %v10590_v61 = vld [vmem:[#allocation10 + $0x320] sm:$0xff]  ;;  %v10591_v32 = vld [vmem:[#allocation10 + $0x328] sm:$0xff]  ;;  %v10592_v40 = vld [vmem:[#allocation10 + $0x330] sm:$0xff] }
 0xba6   : > { %v10255_v47 = vmax.f32 %v9801_v51, 0.0 }
 0xba8   : > { %11065 = vmatmul.mubr.f32.gmra.mrb[236].mxu1 %v10476_v57  ;;  %v10589_v57 = vld [vmem:[#allocation10 + $0x318] sm:$0xff] }
 0xba9   : > { %11069 = vmatprep.mubr.f32.mxu1 %v10485_v37  ;;  %v10247_v37 = vmax.f32 %v9795_v33, 0.0  ;;  %v16285_v20 = vpack.c.bf16 %v10589_v57, %v10588_v8  ;;  %v16288_v33 = vpack.c.bf16 %v10591_v32, %v10590_v61  ;;  %v10593_v57 = vld [vmem:[#allocation10 + $0x338] sm:$0xff]  ;;  %v10595_v32 = vld [vmem:[#allocation10 + $0x348] sm:$0xff] }
 0xbaa   : > { %v16291_v51 = vpack.c.bf16 %v10593_v57, %v10592_v40  ;;  %v10597_v57 = vld [vmem:[#allocation10 + $0x358] sm:$0xff] }
 0xbac   : > { %11070 = vmatmul.mubr.f32.gmra.mrb[238].mxu1 %v10484_v48  ;;  %v9799_v48 = vadd.f32 %v22834_v28, %v21451_v59  ;;  %v9813_v28 = vadd.f32 %v22837_v10, %v21446_v0  ;;  %v22841_v10 = vld [vmem:[#allocation51_spill] sm:$0xff] }
 0xbad   : > { %11139 = vmatprep.mubr.f32.mxu1 %v10239_v25  ;;  %v22835_v25 = vld [vmem:[#allocation39_spill] sm:$0xff] }
 0xbae   : > { %v9807_v3 = vadd.f32 %v22835_v25, %v21446_v0  ;;  %v22839_v25 = vld [vmem:[#allocation48_spill] sm:$0xff] }
 0xbb0   : > { %11140 = vmatmul.mubr.f32.vlgmr.msra.gmra.mrb[176].mxu1 %v10238_v14  ;;  %v10254_v14 = vmax.f32 %v9799_v48, 0.0  ;;  %v10594_v48 = vld [vmem:[#allocation10 + $0x340] sm:$0xff] }
 0xbb1   : > { %16283 = vmatpush1.bf16.msra.mxu1 %v16282_v34  ;;  %11144 = vmatprep.mubr.f32.mxu1 %v10247_v37  ;;  %v22836_v34 = vld [vmem:[#allocation40_spill] sm:$0xff]  ;;  %v10263_v37 = vmax.f32 %v9807_v3, 0.0  ;;  %v16294_v3 = vpack.c.bf16 %v10595_v32, %v10594_v48 }
 0xbb2   : > { %16284 = vmatprep.subr.bf16.mxu1 %v22724_v6  ;;  %v9805_v8 = vadd.f32 %v22836_v34, %v21451_v59  ;;  %v9819_v34 = vadd.f32 %v22839_v25, %v21446_v0  ;;  %v10599_v32 = vld [vmem:[#allocation10 + $0x368] sm:$0xff]  ;;  %v22843_v25 = vld [vmem:[#allocation58_spill] sm:$0xff] }
 0xbb4   : > { %11145 = vmatmul.mubr.f32.gmra.mrb[178].mxu1 %v10246_v44  ;;  %v10262_v44 = vmax.f32 %v9805_v8, 0.0  ;;  %v10596_v8 = vld [vmem:[#allocation10 + $0x350] sm:$0xff] }
 0xbb5   : > { %11149 = vmatprep.mubr.f32.mxu1 %v10255_v47  ;;  %16286 = vmatpush1.bf16.msra.mxu1 %v16285_v20  ;;  %v22838_v20 = vld [vmem:[#allocation41_spill] sm:$0xff]  ;;  %v10271_v47 = vmax.f32 %v9813_v28, 0.0  ;;  %v16297_v28 = vpack.c.bf16 %v10597_v57, %v10596_v8  ;;  %v10601_v57 = vld [vmem:[#allocation10 + $0x378] sm:$0xff] }
 0xbb6   : > { %16287 = vmatprep.subr.bf16.mxu1 %v22724_v6  ;;  %v9811_v61 = vadd.f32 %v22838_v20, %v21451_v59  ;;  %v9825_v20 = vadd.f32 %v22841_v10, %v21446_v0  ;;  %v22845_v10 = vld [vmem:[#allocation62_spill] sm:$0xff] }
 0xbb8   : > { %11150 = vmatmul.mubr.f32.gmra.mrb[180].mxu1 %v10254_v14  ;;  %v10270_v14 = vmax.f32 %v9811_v61, 0.0  ;;  %v10598_v61 = vld [vmem:[#allocation10 + $0x360] sm:$0xff] }
 0xbb9   : > { %11154 = vmatprep.mubr.f32.mxu1 %v10263_v37  ;;  %16289 = vmatpush1.bf16.msra.mxu1 %v16288_v33  ;;  %v22840_v33 = vld [vmem:[#allocation45_spill] sm:$0xff]  ;;  %v10279_v37 = vmax.f32 %v9819_v34, 0.0  ;;  %v16300_v34 = vpack.c.bf16 %v10599_v32, %v10598_v61  ;;  %v10603_v32 = vld [vmem:[#allocation10 + $0x388] sm:$0xff] }
 0xbba   : > { %16290 = vmatprep.subr.bf16.mxu1 %v22724_v6  ;;  %v9817_v40 = vadd.f32 %v22840_v33, %v21451_v59  ;;  %v9831_v33 = vadd.f32 %v22843_v25, %v21446_v0  ;;  %v22847_v25 = vld [vmem:[#allocation66_spill] sm:$0xff] }
 0xbbc   : > { %11155 = vmatmul.mubr.f32.gmra.mrb[182].mxu1 %v10262_v44  ;;  %v10278_v44 = vmax.f32 %v9817_v40, 0.0  ;;  %v10600_v40 = vld [vmem:[#allocation10 + $0x370] sm:$0xff] }
 0xbbd   : > { %11159 = vmatprep.mubr.f32.mxu1 %v10271_v47  ;;  %16292 = vmatpush1.bf16.msra.mxu1 %v16291_v51  ;;  %v22842_v51 = vld [vmem:[#allocation49_spill] sm:$0xff]  ;;  %v10287_v47 = vmax.f32 %v9825_v20, 0.0  ;;  %v16303_v20 = vpack.c.bf16 %v10601_v57, %v10600_v40  ;;  %v10605_v57 = vld [vmem:[#allocation10 + $0x398] sm:$0xff] }
 0xbbe   : > { %16293 = vmatprep.subr.bf16.mxu1 %v22724_v6  ;;  %v9823_v48 = vadd.f32 %v22842_v51, %v21451_v59  ;;  %v9837_v51 = vadd.f32 %v22845_v10, %v21446_v0  ;;  %v22849_v10 = vld [vmem:[#allocation72_spill] sm:$0xff] }
 0xbc0   : > { %11160 = vmatmul.mubr.f32.gmra.mrb[184].mxu1 %v10270_v14  ;;  %v10286_v14 = vmax.f32 %v9823_v48, 0.0  ;;  %v10602_v48 = vld [vmem:[#allocation10 + $0x380] sm:$0xff] }
 0xbc1   : > { %11164 = vmatprep.mubr.f32.mxu1 %v10279_v37  ;;  %16295 = vmatpush1.bf16.msra.mxu1 %v16294_v3  ;;  %v22844_v3 = vld [vmem:[#allocation53_spill] sm:$0xff]  ;;  %v10295_v37 = vmax.f32 %v9831_v33, 0.0  ;;  %v16306_v33 = vpack.c.bf16 %v10603_v32, %v10602_v48  ;;  %v10607_v32 = vld [vmem:[#allocation10 + $0x3a8] sm:$0xff] }
 0xbc2   : > { %16296 = vmatprep.subr.bf16.mxu1 %v22724_v6  ;;  %v9829_v8 = vadd.f32 %v22844_v3, %v21451_v59  ;;  %v9843_v3 = vadd.f32 %v22847_v25, %v21446_v0  ;;  %v22851_v25 = vld [vmem:[#allocation75_spill] sm:$0xff] }
 0xbc4   : > { %11165 = vmatmul.mubr.f32.gmra.mrb[186].mxu1 %v10278_v44  ;;  %v10294_v44 = vmax.f32 %v9829_v8, 0.0  ;;  %v10604_v8 = vld [vmem:[#allocation10 + $0x390] sm:$0xff] }
 0xbc5   : > { %11169 = vmatprep.mubr.f32.mxu1 %v10287_v47  ;;  %16298 = vmatpush1.bf16.msra.mxu1 %v16297_v28  ;;  %v22846_v28 = vld [vmem:[#allocation60_spill] sm:$0xff]  ;;  %v10303_v47 = vmax.f32 %v9837_v51, 0.0  ;;  %v16309_v51 = vpack.c.bf16 %v10605_v57, %v10604_v8  ;;  %v10609_v57 = vld [vmem:[#allocation10 + $0x3b8] sm:$0xff] }
 0xbc6   : > { %16299 = vmatprep.subr.bf16.mxu1 %v22724_v6  ;;  %v9835_v61 = vadd.f32 %v22846_v28, %v21451_v59  ;;  %v9849_v28 = vadd.f32 %v22849_v10, %v21446_v0  ;;  %v22853_v10 = vld [vmem:[#allocation79_spill] sm:$0xff] }
 0xbc8   : > { %11170 = vmatmul.mubr.f32.gmra.mrb[188].mxu1 %v10286_v14  ;;  %v10302_v14 = vmax.f32 %v9835_v61, 0.0  ;;  %v10606_v61 = vld [vmem:[#allocation10 + $0x3a0] sm:$0xff] }
 0xbc9   : > { %11174 = vmatprep.mubr.f32.mxu1 %v10295_v37  ;;  %16301 = vmatpush1.bf16.msra.mxu1 %v16300_v34  ;;  %v22848_v34 = vld [vmem:[#allocation64_spill] sm:$0xff]  ;;  %v10311_v37 = vmax.f32 %v9843_v3, 0.0  ;;  %v16312_v3 = vpack.c.bf16 %v10607_v32, %v10606_v61 }
 0xbca   : > { %16302 = vmatprep.subr.bf16.mxu1 %v22724_v6  ;;  %v9841_v40 = vadd.f32 %v22848_v34, %v21451_v59  ;;  %v9855_v34 = vadd.f32 %v22851_v25, %v21446_v0  ;;  %v10611_v32 = vld [vmem:[#allocation10 + $0x3c8] sm:$0xff]  ;;  %v22855_v25 = vld [vmem:[#allocation83_spill] sm:$0xff] }
 0xbcc   : > { %11175 = vmatmul.mubr.f32.gmra.mrb[190].mxu1 %v10294_v44  ;;  %v10310_v44 = vmax.f32 %v9841_v40, 0.0  ;;  %v10608_v40 = vld [vmem:[#allocation10 + $0x3b0] sm:$0xff] }
 0xbcd   : > { %11179 = vmatprep.mubr.f32.mxu1 %v10303_v47  ;;  %16304 = vmatpush1.bf16.msra.mxu1 %v16303_v20  ;;  %v22850_v20 = vld [vmem:[#allocation68_spill] sm:$0xff]  ;;  %v10319_v47 = vmax.f32 %v9849_v28, 0.0  ;;  %v16315_v28 = vpack.c.bf16 %v10609_v57, %v10608_v40  ;;  %v10613_v57 = vld [vmem:[#allocation10 + $0x3d8] sm:$0xff] }
 0xbce   : > { %16305 = vmatprep.subr.bf16.mxu1 %v22724_v6  ;;  %v9847_v48 = vadd.f32 %v22850_v20, %v21451_v59  ;;  %v9861_v20 = vadd.f32 %v22853_v10, %v21446_v0  ;;  %v22857_v10 = vld [vmem:[#allocation87_spill] sm:$0xff] }
 0xbd0   : > { %11180 = vmatmul.mubr.f32.gmra.mrb[192].mxu1 %v10302_v14  ;;  %v10318_v14 = vmax.f32 %v9847_v48, 0.0  ;;  %v10610_v48 = vld [vmem:[#allocation10 + $0x3c0] sm:$0xff] }
 0xbd1   : > { %11184 = vmatprep.mubr.f32.mxu1 %v10311_v37  ;;  %16307 = vmatpush1.bf16.msra.mxu1 %v16306_v33  ;;  %v22852_v33 = vld [vmem:[#allocation76_spill] sm:$0xff]  ;;  %v10327_v37 = vmax.f32 %v9855_v34, 0.0  ;;  %v16318_v34 = vpack.c.bf16 %v10611_v32, %v10610_v48 }
 0xbd2   : > { %16308 = vmatprep.subr.bf16.mxu1 %v22724_v6  ;;  %v9853_v8 = vadd.f32 %v22852_v33, %v21451_v59  ;;  %v9867_v33 = vadd.f32 %v22855_v25, %v21446_v0  ;;  %v10615_v32 = vld [vmem:[#allocation10 + $0x3e8] sm:$0xff]  ;;  %v22859_v25 = vld [vmem:[#allocation91_spill] sm:$0xff] }
 0xbd4   : > { %11185 = vmatmul.mubr.f32.gmra.mrb[194].mxu1 %v10310_v44  ;;  %v10326_v44 = vmax.f32 %v9853_v8, 0.0  ;;  %v10612_v8 = vld [vmem:[#allocation10 + $0x3d0] sm:$0xff] }
 0xbd5   : > { %11189 = vmatprep.mubr.f32.mxu1 %v10319_v47  ;;  %16310 = vmatpush1.bf16.msra.mxu1 %v16309_v51  ;;  %v22854_v51 = vld [vmem:[#allocation80_spill] sm:$0xff]  ;;  %v10335_v47 = vmax.f32 %v9861_v20, 0.0  ;;  %v16321_v20 = vpack.c.bf16 %v10613_v57, %v10612_v8  ;;  %v10617_v57 = vld [vmem:[#allocation10 + $0x3f8] sm:$0xff] }
 0xbd6   : > { %16311 = vmatprep.subr.bf16.mxu1 %v22724_v6  ;;  %v9859_v61 = vadd.f32 %v22854_v51, %v21451_v59  ;;  %v9873_v51 = vadd.f32 %v22857_v10, %v21446_v0  ;;  %v22861_v10 = vld [vmem:[#allocation93_spill] sm:$0xff] }
 0xbd8   : > { %11190 = vmatmul.mubr.f32.gmra.mrb[196].mxu1 %v10318_v14  ;;  %v10334_v14 = vmax.f32 %v9859_v61, 0.0  ;;  %v10614_v61 = vld [vmem:[#allocation10 + $0x3e0] sm:$0xff] }
 0xbd9   : > { %11194 = vmatprep.mubr.f32.mxu1 %v10327_v37  ;;  %16313 = vmatpush1.bf16.msra.mxu1 %v16312_v3  ;;  %v22856_v3 = vld [vmem:[#allocation84_spill] sm:$0xff]  ;;  %v10343_v37 = vmax.f32 %v9867_v33, 0.0  ;;  %v16324_v33 = vpack.c.bf16 %v10615_v32, %v10614_v61  ;;  %v22863_v32 = vld [vmem:[#allocation101_spill] sm:$0xff] }
 0xbda   : > { %16314 = vmatprep.subr.bf16.mxu1 %v22724_v6  ;;  %v9865_v40 = vadd.f32 %v22856_v3, %v21451_v59  ;;  %v9879_v3 = vadd.f32 %v22859_v25, %v21446_v0 }
 0xbdc   : > { %11195 = vmatmul.mubr.f32.gmra.mrb[198].mxu1 %v10326_v44  ;;  %v10342_v44 = vmax.f32 %v9865_v40, 0.0  ;;  %v10616_v40 = vld [vmem:[#allocation10 + $0x3f0] sm:$0xff] }
 0xbdd   : > { %11199 = vmatprep.mubr.f32.mxu1 %v10335_v47  ;;  %16316 = vmatpush1.bf16.msra.mxu1 %v16315_v28  ;;  %v22858_v28 = vld [vmem:[#allocation88_spill] sm:$0xff]  ;;  %v10351_v47 = vmax.f32 %v9873_v51, 0.0  ;;  %v16327_v51 = vpack.c.bf16 %v10617_v57, %v10616_v40 }
 0xbde   : > { %16317 = vmatprep.subr.bf16.mxu1 %v22724_v6  ;;  %v9871_v48 = vadd.f32 %v22858_v28, %v21451_v59  ;;  %v9885_v28 = vadd.f32 %v22861_v10, %v21446_v0  ;;  %v22867_v10 = vld [vmem:[#allocation105_spill] sm:$0xff] }
 0xbe0   : > { %11200 = vmatmul.mubr.f32.gmra.mrb[200].mxu1 %v10334_v14  ;;  %v10350_v14 = vmax.f32 %v9871_v48, 0.0  ;;  %v10367_v48 = vmax.f32 %v9885_v28, 0.0  ;;  %v9903_v28 = vadd.f32 %v22867_v10, %v21446_v0 }
 0xbe1   : > { %11204 = vmatprep.mubr.f32.mxu1 %v10343_v37  ;;  %16319 = vmatpush1.bf16.msra.mxu1 %v16318_v34  ;;  %v22860_v34 = vld [vmem:[#allocation92_spill] sm:$0xff]  ;;  %v10359_v37 = vmax.f32 %v9879_v3, 0.0 }
 0xbe2   : > { %16320 = vmatprep.subr.bf16.mxu1 %v22724_v6  ;;  %v9877_v8 = vadd.f32 %v22860_v34, %v21451_v59  ;;  %v22864_v3 = vld [vmem:[#allocation104_spill] sm:$0xff] }
 0xbe4   : > { %11205 = vmatmul.mubr.f32.gmra.mrb[202].mxu1 %v10342_v44  ;;  %v10358_v44 = vmax.f32 %v9877_v8, 0.0 }
 0xbe5   : > { %11209 = vmatprep.mubr.f32.mxu1 %v10351_v47  ;;  %16322 = vmatpush1.bf16.msra.mxu1 %v16321_v20  ;;  %v22862_v20 = vld [vmem:[#allocation102_spill] sm:$0xff]  ;;  %v9891_v47 = vadd.f32 %v22863_v32, %v21446_v0 }
 0xbe6   : > { %16323 = vmatprep.subr.bf16.mxu1 %v22724_v6  ;;  %v9883_v61 = vadd.f32 %v22862_v20, %v21451_v59 }
 0xbe7   : > { %v10375_v34 = vmax.f32 %v9891_v47, 0.0 }
 0xbe8   : > { %11210 = vmatmul.mubr.f32.gmra.mrb[204].mxu1 %v10350_v14  ;;  %v10366_v25 = vmax.f32 %v9883_v61, 0.0  ;;  %v9889_v14 = vadd.f32 %v22864_v3, %v21451_v59  ;;  %v10391_v61 = vmax.f32 %v9903_v28, 0.0 }
 0xbe9   : > { %11214 = vmatprep.mubr.f32.mxu1 %v10359_v37  ;;  %16325 = vmatpush1.bf16.msra.mxu1 %v16324_v33  ;;  %v22865_v33 = vld [vmem:[#allocation103_spill] sm:$0xff] }
 0xbea   : > { %16326 = vmatprep.subr.bf16.mxu1 %v22724_v6  ;;  %v9897_v8 = vadd.f32 %v22865_v33, %v21446_v0  ;;  %v10374_v40 = vmax.f32 %v9889_v14, 0.0  ;;  %v22866_v6 = vld [vmem:[#allocation106_spill] sm:$0xff] }
 0xbeb   : > { %v9895_v57 = vadd.f32 %v22866_v6, %v21451_v59 }
 0xbec   : > { %11215 = vmatmul.mubr.f32.gmra.mrb[206].mxu1 %v10358_v44  ;;  %v10383_v37 = vmax.f32 %v9897_v8, 0.0  ;;  %v22868_v44 = vld [vmem:[#allocation108_spill] sm:$0xff] }
 0xbed   : > { %11219 = vmatprep.mubr.f32.mxu1 %v10367_v48  ;;  %16328 = vmatpush1.bf16.msra.mxu1 %v16327_v51  ;;  %v10382_v51 = vmax.f32 %v9895_v57, 0.0  ;;  %v9901_v20 = vadd.f32 %v22868_v44, %v21451_v59  ;;  %v22869_v48 = vld [vmem:[#allocation107_spill] sm:$0xff] }
 0xbee   : > { %v9909_v32 = vadd.f32 %v22869_v48, %v21446_v0 }
 0xbef   : > { %v10390_v47 = vmax.f32 %v9901_v20, 0.0 }
 0xbf0   : > { %11220 = vmatmul.mubr.f32.gmra.mrb[208].mxu1 %v10366_v25  ;;  %v22870_v25 = vld [vmem:[#allocation110_spill] sm:$0xff]  ;;  %v10399_v14 = vmax.f32 %v9909_v32, 0.0 }
 0xbf1   : > { %11224 = vmatprep.mubr.f32.mxu1 %v10375_v34  ;;  %v9907_v3 = vadd.f32 %v22870_v25, %v21451_v59  ;;  %v22871_v34 = vld [vmem:[#allocation109_spill] sm:$0xff] }
 0xbf2   : > { %v9915_v33 = vadd.f32 %v22871_v34, %v21446_v0 }
 0xbf3   : > { %v10398_v8 = vmax.f32 %v9907_v3, 0.0 }
 0xbf4   : > { %11225 = vmatmul.mubr.f32.gmra.mrb[210].mxu1 %v10374_v40  ;;  %v22872_v40 = vld [vmem:[#allocation112_spill] sm:$0xff]  ;;  %v10407_v57 = vmax.f32 %v9915_v33, 0.0 }
 0xbf5   : > { %11229 = vmatprep.mubr.f32.mxu1 %v10383_v37  ;;  %v9913_v6 = vadd.f32 %v22872_v40, %v21451_v59  ;;  %v22873_v37 = vld [vmem:[#allocation111_spill] sm:$0xff] }
 0xbf6   : > { %v9921_v10 = vadd.f32 %v22873_v37, %v21446_v0 }
 0xbf7   : > { %v10406_v28 = vmax.f32 %v9913_v6, 0.0 }
 0xbf8   : > { %11230 = vmatmul.mubr.f32.gmra.mrb[212].mxu1 %v10382_v51  ;;  %v22874_v51 = vld [vmem:[#allocation114_spill] sm:$0xff]  ;;  %v10415_v20 = vmax.f32 %v9921_v10, 0.0 }
 0xbf9   : > { %11234 = vmatprep.mubr.f32.mxu1 %v10391_v61  ;;  %v9919_v44 = vadd.f32 %v22874_v51, %v21451_v59  ;;  %v22875_v61 = vld [vmem:[#allocation113_spill] sm:$0xff] }
 0xbfa   : > { %v9927_v48 = vadd.f32 %v22875_v61, %v21446_v0 }
 0xbfb   : > { %v10414_v32 = vmax.f32 %v9919_v44, 0.0 }
 0xbfc   : > { %11235 = vmatmul.mubr.f32.gmra.mrb[214].mxu1 %v10390_v47  ;;  %v22876_v47 = vld [vmem:[#allocation115_spill] sm:$0xff]  ;;  %v10423_v3 = vmax.f32 %v9927_v48, 0.0 }
 0xbfd   : > { %11239 = vmatprep.mubr.f32.mxu1 %v10399_v14  ;;  %v9925_v25 = vadd.f32 %v22876_v47, %v21451_v59  ;;  %v22877_v14 = vld [vmem:[#allocation117_spill] sm:$0xff] }
 0xbfe   : > { %v9933_v34 = vadd.f32 %v22877_v14, %v21446_v0 }
 0xbff   : > { %v10422_v33 = vmax.f32 %v9925_v25, 0.0 }
 0xc00   : > { %11240 = vmatmul.mubr.f32.gmra.mrb[216].mxu1 %v10398_v8  ;;  %v22878_v8 = vld [vmem:[#allocation116_spill] sm:$0xff]  ;;  %v10431_v6 = vmax.f32 %v9933_v34, 0.0 }
 0xc01   : > { %11244 = vmatprep.mubr.f32.mxu1 %v10407_v57  ;;  %v9931_v40 = vadd.f32 %v22878_v8, %v21451_v59  ;;  %v22879_v57 = vld [vmem:[#allocation119_spill] sm:$0xff] }
 0xc02   : > { %v9939_v37 = vadd.f32 %v22879_v57, %v21446_v0 }
 0xc03   : > { %v10430_v10 = vmax.f32 %v9931_v40, 0.0 }
 0xc04   : > { %11245 = vmatmul.mubr.f32.gmra.mrb[218].mxu1 %v10406_v28  ;;  %v22880_v28 = vld [vmem:[#allocation118_spill] sm:$0xff]  ;;  %v10439_v44 = vmax.f32 %v9939_v37, 0.0 }
 0xc05   : > { %11249 = vmatprep.mubr.f32.mxu1 %v10415_v20  ;;  %v9937_v51 = vadd.f32 %v22880_v28, %v21451_v59  ;;  %v22881_v20 = vld [vmem:[#allocation121_spill] sm:$0xff] }
 0xc06   : > { %v9945_v61 = vadd.f32 %v22881_v20, %v21446_v0 }
 0xc07   : > { %v10438_v48 = vmax.f32 %v9937_v51, 0.0 }
 0xc08   : > { %11250 = vmatmul.mubr.f32.gmra.mrb[220].mxu1 %v10414_v32  ;;  %v22882_v32 = vld [vmem:[#allocation120_spill] sm:$0xff]  ;;  %v10447_v25 = vmax.f32 %v9945_v61, 0.0 }
 0xc09   : > { %11254 = vmatprep.mubr.f32.mxu1 %v10423_v3  ;;  %v9943_v47 = vadd.f32 %v22882_v32, %v21451_v59  ;;  %v22883_v3 = vld [vmem:[#allocation123_spill] sm:$0xff] }
 0xc0a   : > { %v9951_v14 = vadd.f32 %v22883_v3, %v21446_v0 }
 0xc0b   : > { %v10446_v34 = vmax.f32 %v9943_v47, 0.0 }
 0xc0c   : > { %11255 = vmatmul.mubr.f32.gmra.mrb[222].mxu1 %v10422_v33  ;;  %v22884_v33 = vld [vmem:[#allocation122_spill] sm:$0xff]  ;;  %v10455_v40 = vmax.f32 %v9951_v14, 0.0  ;;  %v9196_v14 = vsub.s32 7, %v22798_v36 }
 0xc0d   : > { %11259 = vmatprep.mubr.f32.mxu1 %v10431_v6  ;;  %v9949_v8 = vadd.f32 %v22884_v33, %v21451_v59  ;;  %v22885_v6 = vld [vmem:[#allocation70_spill] sm:$0xff]  ;;  %v22890_v33 = vld [vmem:[#allocation77_spill] sm:$0xff] }
 0xc0e   : > { %v9957_v57 = vadd.f32 %v22885_v6, %v21446_v0 }
 0xc0f   : > { %v10454_v37 = vmax.f32 %v9949_v8, 0.0  ;;  %v9967_v8 = vadd.f32 %v22890_v33, %v21451_v59 }
 0xc10   : > { %11260 = vmatmul.mubr.f32.gmra.mrb[224].mxu1 %v10430_v10  ;;  %v22886_v10 = vld [vmem:[#allocation69_spill] sm:$0xff]  ;;  %v10463_v51 = vmax.f32 %v9957_v57, 0.0  ;;  %v22891_v57 = vld [vmem:[#allocation82_spill] sm:$0xff] }
 0xc11   : > { %11264 = vmatprep.mubr.f32.mxu1 %v10439_v44  ;;  %v9955_v28 = vadd.f32 %v22886_v10, %v21451_v59  ;;  %v22887_v44 = vld [vmem:[#allocation74_spill] sm:$0xff]  ;;  %v21597_v10 = vrot.slane %v21443_v12, %v9196_v14 }
 0xc12   : > { %v9963_v20 = vadd.f32 %v22887_v44, %v21446_v0 }
 0xc13   : > { %v10462_v61 = vmax.f32 %v9955_v28, 0.0  ;;  %v10478_v28 = vmax.f32 %v9967_v8, 0.0  ;;  %v22897_v8 = vld [vmem:[#allocation97_spill] sm:$0xff] }
 0xc14   : > { %11265 = vmatmul.mubr.f32.gmra.mrb[226].mxu1 %v10438_v48  ;;  %v22888_v48 = vld [vmem:[#allocation73_spill] sm:$0xff]  ;;  %v10471_v47 = vmax.f32 %v9963_v20, 0.0 }
 0xc15   : > { %11269 = vmatprep.mubr.f32.mxu1 %v10447_v25  ;;  %v9961_v32 = vadd.f32 %v22888_v48, %v21451_v59  ;;  %v22889_v25 = vld [vmem:[#allocation78_spill] sm:$0xff] }
 0xc16   : > { %v9969_v3 = vadd.f32 %v22889_v25, %v21446_v0  ;;  %v22893_v48 = vld [vmem:[#allocation86_spill] sm:$0xff] }
 0xc18   : > { %11270 = vmatmul.mubr.f32.gmra.mrb[228].mxu1 %v10446_v34  ;;  %v10470_v34 = vmax.f32 %v9961_v32, 0.0  ;;  %v10479_v6 = vmax.f32 %v9969_v3, 0.0  ;;  %v22895_v3 = vld [vmem:[#allocation90_spill] sm:$0xff] }
 0xc19   : > { %11274 = vmatprep.mubr.f32.mxu1 %v10455_v40  ;;  %v9192_v40 = vsub.s32 6, %v22798_v36  ;;  %v10046_v36 = vadd.f32 %v22893_v48, %v21597_v10  ;;  %v10052_v14 = vadd.f32 %v22895_v3, %v21597_v10  ;;  %v22900_v48 = vld [vmem:[#allocation125_spill] sm:$0xff]  ;;  %v22902_v3 = vld [vmem:[#allocation128_spill] sm:$0xff] }
 0xc1b   : > { %v21602_v20 = vrot.slane %v21443_v12, %v9192_v40  ;;  %v10241_v25 = vmax.f32 %v10046_v36, 0.0  ;;  %v22896_v12 = vld [vmem:[#allocation89_spill] sm:$0xff]  ;;  %v10249_v33 = vmax.f32 %v10052_v14, 0.0  ;;  %v10058_v40 = vadd.f32 %v22897_v8, %v21597_v10  ;;  %v22904_v8 = vld [vmem:[#allocation16_spill] sm:$0xff] }
 0xc1c   : > { %11275 = vmatmul.mubr.f32.gmra.mrb[230].mxu1 %v10454_v37  ;;  %v9975_v37 = vadd.f32 %v22891_v57, %v21446_v0  ;;  %v22894_v0 = vld [vmem:[#allocation85_spill] sm:$0xff]  ;;  %v22898_v57 = vld [vmem:[#allocation94_spill] sm:$0xff] }
 0xc1d   : > { %11279 = vmatprep.mubr.f32.mxu1 %v10463_v51  ;;  %v22892_v51 = vld [vmem:[#allocation81_spill] sm:$0xff]  ;;  %v10062_v36 = vadd.f32 %v22900_v48, %v21602_v20  ;;  %v10068_v14 = vadd.f32 %v22902_v3, %v21602_v20  ;;  %v22907_v48 = vld [vmem:[#allocation42_spill] sm:$0xff]  ;;  %v10094_v3 = vadd.f32 %v21194_v27, %v21597_v10  ;;  %v10106_v27 = vadd.f32 %v21216_v56, %v21597_v10 }
 0xc1e   : > { %v9973_v44 = vadd.f32 %v22892_v51, %v21451_v59  ;;  %v22899_v51 = vld [vmem:[#allocation127_spill] sm:$0xff]  ;;  %v10118_v56 = vadd.f32 %v21233_v17, %v21597_v10  ;;  %v10130_v17 = vadd.f32 %v21251_v7, %v21597_v10  ;;  %v10142_v7 = vadd.f32 %v21269_v39, %v21597_v10 }
 0xc1f   : > { %v10154_v39 = vadd.f32 %v21287_v5, %v21597_v10  ;;  %v10166_v5 = vadd.f32 %v21305_v2, %v21597_v10  ;;  %v10178_v2 = vadd.f32 %v21323_v16, %v21597_v10  ;;  %v10190_v16 = vadd.f32 %v21341_v45, %v21597_v10 }
 0xc20   : > { %11280 = vmatmul.mubr.f32.gmra.mrb[232].mxu1 %v10462_v61  ;;  %v10487_v61 = vmax.f32 %v9975_v37, 0.0  ;;  %v10486_v32 = vmax.f32 %v9973_v44, 0.0  ;;  %v10056_v37 = vadd.f32 %v22898_v57, %v21602_v20  ;;  %v10064_v44 = vadd.f32 %v22899_v51, %v21597_v10  ;;  %v22905_v57 = vld [vmem:[#allocation37_spill] sm:$0xff]  ;;  %v22906_v51 = vld [vmem:[#allocation98_spill] sm:$0xff] }
 0xc21   : > { %11284 = vmatprep.mubr.f32.mxu1 %v10471_v47  ;;  %v10044_v47 = vadd.f32 %v22894_v0, %v21602_v20  ;;  %v22901_v0 = vld [vmem:[#allocation100_spill] sm:$0xff]  ;;  %v10202_v45 = vadd.f32 %v21359_v1, %v21597_v10  ;;  %v10214_v1 = vadd.f32 %v21376_v50, %v21597_v10 }
 0xc23   : > { %v10240_v59 = vmax.f32 %v10044_v47, 0.0  ;;  %v10070_v47 = vadd.f32 %v22901_v0, %v21597_v10  ;;  %v22908_v0 = vld [vmem:[#allocation44_spill] sm:$0xff] }
 0xc24   : > { %11285 = vmatmul.mubr.f32.gmra.mrb[234].mxu1 %v10470_v34  ;;  %v10050_v34 = vadd.f32 %v22896_v12, %v21602_v20  ;;  %v22903_v12 = vld [vmem:[#allocation99_spill] sm:$0xff] }
 0xc25   : > { %11289 = vmatprep.mubr.f32.mxu1 %v10479_v6 }
 0xc26   : > { %v10248_v6 = vmax.f32 %v10050_v34, 0.0  ;;  %v10076_v34 = vadd.f32 %v22903_v12, %v21597_v10 }
 0xc28   : > { %11290 = vmatmul.mubr.f32.gmra.mrb[236].mxu1 %v10478_v28  ;;  %v10257_v28 = vmax.f32 %v10058_v40, 0.0  ;;  %v10074_v40 = vadd.f32 %v22904_v8, %v21602_v20 }
 0xc29   : > { %11294 = vmatprep.mubr.f32.mxu1 %v10487_v61  ;;  %v10256_v61 = vmax.f32 %v10056_v37, 0.0  ;;  %v10082_v37 = vadd.f32 %v22905_v57, %v21597_v10 }
 0xc2c   : > { %11295 = vmatmul.mubr.f32.gmra.mrb[238].mxu1 %v10486_v32  ;;  %v10265_v32 = vmax.f32 %v10064_v44, 0.0  ;;  %v10080_v44 = vadd.f32 %v22906_v51, %v21602_v20  ;;  %v10321_v51 = vmax.f32 %v10106_v27, 0.0  ;;  %v10385_v27 = vmax.f32 %v10154_v39, 0.0 }
 0xc2d   : > { %11364 = vmatprep.mubr.f32.mxu1 %v10241_v25  ;;  %v10264_v25 = vmax.f32 %v10062_v36, 0.0  ;;  %v10088_v36 = vadd.f32 %v22907_v48, %v21597_v10 }
 0xc30   : > { %11365 = vmatmul.mubr.f32.vlgmr.msra.gmra.mrb[176].mxu1 %v10240_v59  ;;  %v10273_v59 = vmax.f32 %v10070_v47, 0.0  ;;  %v10086_v47 = vadd.f32 %v22908_v0, %v21602_v20  ;;  %v10337_v0 = vmax.f32 %v10118_v56, 0.0 }
 0xc31   : > { %11369 = vmatprep.mubr.f32.mxu1 %v10249_v33  ;;  %v10272_v33 = vmax.f32 %v10068_v14, 0.0 }
 0xc32   : > { %v10296_v14 = vmax.f32 %v10086_v47, 0.0 }
 0xc34   : > { %11370 = vmatmul.mubr.f32.gmra.mrb[178].mxu1 %v10248_v6  ;;  %v10281_v6 = vmax.f32 %v10076_v34, 0.0  ;;  %v10305_v34 = vmax.f32 %v10094_v3, 0.0 }
 0xc35   : > { %11374 = vmatprep.mubr.f32.mxu1 %v10257_v28  ;;  %v10280_v28 = vmax.f32 %v10074_v40, 0.0  ;;  %v22910_v40 = vld [vmem:[#allocation52_spill] sm:$0xff] }
 0xc38   : > { %11375 = vmatmul.mubr.f32.gmra.mrb[180].mxu1 %v10256_v61  ;;  %v10289_v61 = vmax.f32 %v10082_v37, 0.0 }
 0xc39   : > { %11379 = vmatprep.mubr.f32.mxu1 %v10265_v32  ;;  %v10288_v32 = vmax.f32 %v10080_v44, 0.0 }
 0xc3c   : > { %11380 = vmatmul.mubr.f32.gmra.mrb[182].mxu1 %v10264_v25  ;;  %v10297_v25 = vmax.f32 %v10088_v36, 0.0 }
 0xc3d   : > { %11384 = vmatprep.mubr.f32.mxu1 %v10273_v59  ;;  %v22909_v59 = vld [vmem:[#allocation46_spill] sm:$0xff] }
 0xc3e   : > { %v10092_v12 = vadd.f32 %v22909_v59, %v21602_v20  ;;  %v10353_v59 = vmax.f32 %v10130_v17, 0.0 }
 0xc40   : > { %11385 = vmatmul.mubr.f32.gmra.mrb[184].mxu1 %v10272_v33  ;;  %v10100_v33 = vadd.f32 %v21208_v19, %v21597_v10  ;;  %v10304_v8 = vmax.f32 %v10092_v12, 0.0  ;;  %v10112_v19 = vadd.f32 %v21224_v23, %v21597_v10  ;;  %v10124_v23 = vadd.f32 %v21242_v52, %v21597_v10 }
 0xc41   : > { %11389 = vmatprep.mubr.f32.mxu1 %v10281_v6  ;;  %v10098_v6 = vadd.f32 %v22910_v40, %v21602_v20  ;;  %v10136_v52 = vadd.f32 %v21260_v18, %v21597_v10  ;;  %v10148_v18 = vadd.f32 %v21278_v24, %v21597_v10  ;;  %v10160_v24 = vadd.f32 %v21296_v21, %v21597_v10 }
 0xc42   : > { %v10313_v57 = vmax.f32 %v10100_v33, 0.0  ;;  %v10329_v36 = vmax.f32 %v10112_v19, 0.0  ;;  %v10345_v3 = vmax.f32 %v10124_v23, 0.0  ;;  %v10401_v19 = vmax.f32 %v10166_v5, 0.0 }
 0xc43   : > { %v10312_v37 = vmax.f32 %v10098_v6, 0.0  ;;  %v10377_v6 = vmax.f32 %v10148_v18, 0.0  ;;  %v10172_v21 = vadd.f32 %v21314_v62, %v21597_v10  ;;  %v10184_v62 = vadd.f32 %v21332_v63, %v21597_v10 }
 0xc44   : > { %11390 = vmatmul.mubr.f32.gmra.mrb[186].mxu1 %v10280_v28  ;;  %v10104_v28 = vadd.f32 %v21214_v38, %v21602_v20  ;;  %v10116_v38 = vadd.f32 %v21231_v11, %v21602_v20  ;;  %v10128_v11 = vadd.f32 %v21249_v43, %v21602_v20  ;;  %v10140_v43 = vadd.f32 %v21267_v15, %v21602_v20 }
 0xc45   : > { %11394 = vmatprep.mubr.f32.mxu1 %v10289_v61  ;;  %v22911_v61 = vld [vmem:[#allocation50_spill] sm:$0xff]  ;;  %v10152_v15 = vadd.f32 %v21285_v55, %v21602_v20  ;;  %v10164_v55 = vadd.f32 %v21303_v60, %v21602_v20  ;;  %v10176_v60 = vadd.f32 %v21321_v30, %v21602_v20  ;;  %v10188_v30 = vadd.f32 %v21339_v13, %v21602_v20 }
 0xc46   : > { %v10320_v44 = vmax.f32 %v10104_v28, 0.0  ;;  %v10110_v48 = vadd.f32 %v22911_v61, %v21602_v20  ;;  %v10336_v47 = vmax.f32 %v10116_v38, 0.0  ;;  %v10352_v12 = vmax.f32 %v10128_v11, 0.0 }
 0xc47   : > { %v10368_v40 = vmax.f32 %v10140_v43, 0.0  ;;  %v10393_v28 = vmax.f32 %v10160_v24, 0.0  ;;  %v10409_v61 = vmax.f32 %v10172_v21, 0.0  ;;  %v10416_v56 = vmax.f32 %v10176_v60, 0.0 }
 0xc48   : > { %11395 = vmatmul.mubr.f32.gmra.mrb[188].mxu1 %v10288_v32  ;;  %v10328_v32 = vmax.f32 %v10110_v48, 0.0  ;;  %v10196_v63 = vadd.f32 %v21350_v58, %v21597_v10  ;;  %v10432_v23 = vmax.f32 %v10188_v30, 0.0  ;;  %v10200_v13 = vadd.f32 %v21357_v41, %v21602_v20 }
 0xc49   : > { %11399 = vmatprep.mubr.f32.mxu1 %v10297_v25  ;;  %v10122_v25 = vadd.f32 %v21240_v9, %v21602_v20  ;;  %v10134_v9 = vadd.f32 %v21258_v26, %v21602_v20  ;;  %v10146_v26 = vadd.f32 %v21276_v22, %v21602_v20  ;;  %v10158_v22 = vadd.f32 %v21294_v53, %v21602_v20 }
 0xc4a   : > { %v10170_v53 = vadd.f32 %v21312_v46, %v21602_v20  ;;  %v10182_v46 = vadd.f32 %v21330_v4, %v21602_v20  ;;  %v10194_v4 = vadd.f32 %v21348_v42, %v21602_v20  ;;  %v10208_v58 = vadd.f32 %v21368_v54, %v21597_v10 }
 0xc4b   : > { %v10360_v33 = vmax.f32 %v10134_v9, 0.0  ;;  %v10448_v17 = vmax.f32 %v10200_v13, 0.0  ;;  %v10206_v42 = vadd.f32 %v21366_v29, %v21602_v20  ;;  %v10212_v41 = vadd.f32 %v21374_v49, %v21602_v20  ;;  %v22912_v9 = vld [vmem:[#allocation54_spill] sm:$0xff]  ;;  %v22913_v49 = vld [vmem:[#allocation55_spill] sm:$0xff] }
 0xc4c   : > { %11400 = vmatmul.mubr.f32.gmra.mrb[190].mxu1 %v10296_v14  ;;  %v10344_v14 = vmax.f32 %v10122_v25, 0.0  ;;  %v10408_v48 = vmax.f32 %v10170_v53, 0.0  ;;  %v10424_v38 = vmax.f32 %v10182_v46, 0.0  ;;  %v10440_v25 = vmax.f32 %v10194_v4, 0.0 }
 0xc4d   : > { %11404 = vmatprep.mubr.f32.mxu1 %v10305_v34  ;;  %v10361_v34 = vmax.f32 %v10136_v52, 0.0  ;;  %v10456_v11 = vmax.f32 %v10206_v42, 0.0  ;;  %v10220_v54 = vadd.f32 %v21384_v35, %v21597_v10  ;;  %v10464_v52 = vmax.f32 %v10212_v41, 0.0  ;;  %v22914_v35 = vld [vmem:[#allocation57_spill] sm:$0xff] }
 0xc4e   : > { %v10218_v29 = vadd.f32 %v21382_v31, %v21602_v20  ;;  %v10226_v50 = vadd.f32 %v22912_v9, %v21597_v10  ;;  %v10232_v43 = vadd.f32 %v22914_v35, %v21597_v10  ;;  %v22915_v31 = vld [vmem:[#allocation59_spill] sm:$0xff] }
 0xc4f   : > { %v10230_v18 = vadd.f32 %v22915_v31, %v21602_v20 }
 0xc50   : > { %11405 = vmatmul.mubr.f32.gmra.mrb[192].mxu1 %v10304_v8  ;;  %v10369_v8 = vmax.f32 %v10142_v7, 0.0  ;;  %v10224_v7 = vadd.f32 %v22913_v49, %v21602_v20 }
 0xc51   : > { %11409 = vmatprep.mubr.f32.mxu1 %v10313_v57  ;;  %v10376_v57 = vmax.f32 %v10146_v26, 0.0  ;;  %v10488_v26 = vmax.f32 %v10230_v18, 0.0 }
 0xc54   : > { %11410 = vmatmul.mubr.f32.gmra.mrb[194].mxu1 %v10312_v37  ;;  %v10384_v37 = vmax.f32 %v10152_v15, 0.0 }
 0xc55   : > { %11414 = vmatprep.mubr.f32.mxu1 %v10321_v51  ;;  %v10392_v51 = vmax.f32 %v10158_v22, 0.0 }
 0xc58   : > { %11415 = vmatmul.mubr.f32.gmra.mrb[196].mxu1 %v10320_v44  ;;  %v10400_v44 = vmax.f32 %v10164_v55, 0.0 }
 0xc59   : > { %11419 = vmatprep.mubr.f32.mxu1 %v10329_v36  ;;  %v10417_v36 = vmax.f32 %v10178_v2, 0.0 }
 0xc5c   : > { %11420 = vmatmul.mubr.f32.gmra.mrb[198].mxu1 %v10328_v32  ;;  %v10425_v32 = vmax.f32 %v10184_v62, 0.0 }
 0xc5d   : > { %11424 = vmatprep.mubr.f32.mxu1 %v10337_v0  ;;  %v10433_v0 = vmax.f32 %v10190_v16, 0.0 }
 0xc60   : > { %11425 = vmatmul.mubr.f32.gmra.mrb[200].mxu1 %v10336_v47  ;;  %v10441_v47 = vmax.f32 %v10196_v63, 0.0 }
 0xc61   : > { %11429 = vmatprep.mubr.f32.mxu1 %v10345_v3  ;;  %v10449_v3 = vmax.f32 %v10202_v45, 0.0 }
 0xc64   : > { %11430 = vmatmul.mubr.f32.gmra.mrb[202].mxu1 %v10344_v14  ;;  %v10457_v14 = vmax.f32 %v10208_v58, 0.0 }
 0xc65   : > { %11434 = vmatprep.mubr.f32.mxu1 %v10353_v59  ;;  %v10465_v59 = vmax.f32 %v10214_v1, 0.0 }
 0xc68   : > { %11435 = vmatmul.mubr.f32.gmra.mrb[204].mxu1 %v10352_v12  ;;  %v10473_v12 = vmax.f32 %v10220_v54, 0.0 }
 0xc69   : > { %11439 = vmatprep.mubr.f32.mxu1 %v10361_v34  ;;  %v10472_v34 = vmax.f32 %v10218_v29, 0.0 }
 0xc6c   : > { %11440 = vmatmul.mubr.f32.gmra.mrb[206].mxu1 %v10360_v33  ;;  %v10481_v33 = vmax.f32 %v10226_v50, 0.0 }
 0xc6d   : > { %11444 = vmatprep.mubr.f32.mxu1 %v10369_v8  ;;  %v10480_v8 = vmax.f32 %v10224_v7, 0.0 }
 0xc70   : > { %11445 = vmatmul.mubr.f32.gmra.mrb[208].mxu1 %v10368_v40  ;;  %v10489_v40 = vmax.f32 %v10232_v43, 0.0 }
 0xc71   : > { %11449 = vmatprep.mubr.f32.mxu1 %v10377_v6  ;;  %v21735_v6 = vld [vmem:[%s21823_s12] ss:$0 sm:$0xff] }
 0xc74   : > { %11450 = vmatmul.mubr.f32.gmra.mrb[210].mxu1 %v10376_v57 }
 0xc75   : > { %11454 = vmatprep.mubr.f32.mxu1 %v10385_v27 }
 0xc78   : > { %11455 = vmatmul.mubr.f32.gmra.mrb[212].mxu1 %v10384_v37 }
 0xc79   : > { %11459 = vmatprep.mubr.f32.mxu1 %v10393_v28 }
 0xc7c   : > { %11460 = vmatmul.mubr.f32.gmra.mrb[214].mxu1 %v10392_v51 }
 0xc7d   : > { %11464 = vmatprep.mubr.f32.mxu1 %v10401_v19 }
 0xc80   : > { %11465 = vmatmul.mubr.f32.gmra.mrb[216].mxu1 %v10400_v44 }
 0xc81   : > { %11469 = vmatprep.mubr.f32.mxu1 %v10409_v61 }
 0xc84   : > { %11470 = vmatmul.mubr.f32.gmra.mrb[218].mxu1 %v10408_v48 }
 0xc85   : > { %11474 = vmatprep.mubr.f32.mxu1 %v10417_v36 }
 0xc88   : > { %11475 = vmatmul.mubr.f32.gmra.mrb[220].mxu1 %v10416_v56 }
 0xc89   : > { %11479 = vmatprep.mubr.f32.mxu1 %v10425_v32 }
 0xc8c   : > { %11480 = vmatmul.mubr.f32.gmra.mrb[222].mxu1 %v10424_v38 }
 0xc8d   : > { %11484 = vmatprep.mubr.f32.mxu1 %v10433_v0 }
 0xc90   : > { %11485 = vmatmul.mubr.f32.gmra.mrb[224].mxu1 %v10432_v23 }
 0xc91   : > { %11489 = vmatprep.mubr.f32.mxu1 %v10441_v47 }
 0xc94   : > { %11490 = vmatmul.mubr.f32.gmra.mrb[226].mxu1 %v10440_v25 }
 0xc95   : > { %11494 = vmatprep.mubr.f32.mxu1 %v10449_v3 }
 0xc98   : > { %11495 = vmatmul.mubr.f32.gmra.mrb[228].mxu1 %v10448_v17 }
 0xc99   : > { %11499 = vmatprep.mubr.f32.mxu1 %v10457_v14 }
 0xc9c   : > { %11500 = vmatmul.mubr.f32.gmra.mrb[230].mxu1 %v10456_v11 }
 0xc9d   : > { %11504 = vmatprep.mubr.f32.mxu1 %v10465_v59 }
 0xca0   : > { %11505 = vmatmul.mubr.f32.gmra.mrb[232].mxu1 %v10464_v52 }
 0xca1   : > { %11509 = vmatprep.mubr.f32.mxu1 %v10473_v12 }
 0xca4   : > { %11510 = vmatmul.mubr.f32.gmra.mrb[234].mxu1 %v10472_v34 }
 0xca5   : > { %11514 = vmatprep.mubr.f32.mxu1 %v10481_v33 }
 0xca8   : > { %11515 = vmatmul.mubr.f32.gmra.mrb[236].mxu1 %v10480_v8 }
 0xca9   : > { %11519 = vmatprep.mubr.f32.mxu1 %v10489_v40 }
 0xcac   : > { %11520 = vmatmul.mubr.f32.gmra.mrb[238].mxu1 %v10488_v26 }
 0xd03   : > { %v11366_v10 = vpop.f32.mrb[176].mxu1 }
 0xd04   : > { %v16345_v20 = vadd.f32 %v21735_v6, %v11366_v10  ;;  %v11368_v39 = vpop.f32.mrb[177].mxu1 }
 0xd06   : > { %11525 = vst [vmem:[%s21742_s22] sm:$0xff] %v16345_v20 }
 0xd07   : > { %v11371_v57 = vpop.f32.mrb[178].mxu1 }
 0xd08   : > { %v16346_v15 = vadd.f32 %v21735_v6, %v11371_v57  ;;  %v11373_v27 = vpop.f32.mrb[179].mxu1 }
 0xd0a   : > { %11526 = vst [vmem:[%s21742_s22 + $0x8] sm:$0xff] %v16346_v15 }
 0xd0b   : > { %v11376_v24 = vpop.f32.mrb[180].mxu1 }
 0xd0c   : > { %v16347_v37 = vadd.f32 %v21735_v6, %v11376_v24  ;;  %v11378_v22 = vpop.f32.mrb[181].mxu1 }
 0xd0e   : > { %11527 = vst [vmem:[%s21742_s22 + $0x10] sm:$0xff] %v16347_v37 }
 0xd0f   : > { %v11381_v28 = vpop.f32.mrb[182].mxu1 }
 0xd10   : > { %v16348_v5 = vadd.f32 %v21735_v6, %v11381_v28  ;;  %v11383_v51 = vpop.f32.mrb[183].mxu1 }
 0xd12   : > { %11528 = vst [vmem:[%s21742_s22 + $0x18] sm:$0xff] %v16348_v5 }
 0xd13   : > { %v11386_v55 = vpop.f32.mrb[184].mxu1 }
 0xd14   : > { %v16349_v19 = vadd.f32 %v21735_v6, %v11386_v55  ;;  %v11388_v21 = vpop.f32.mrb[185].mxu1 }
 0xd16   : > { %11529 = vst [vmem:[%s21742_s22 + $0x20] sm:$0xff] %v16349_v19 }
 0xd17   : > { %v11391_v44 = vpop.f32.mrb[186].mxu1 }
 0xd18   : > { %v16350_v53 = vadd.f32 %v21735_v6, %v11391_v44  ;;  %v11393_v61 = vpop.f32.mrb[187].mxu1 }
 0xd1a   : > { %11530 = vst [vmem:[%s21742_s22 + $0x28] sm:$0xff] %v16350_v53 }
 0xd1b   : > { %v11396_v2 = vpop.f32.mrb[188].mxu1 }
 0xd1c   : > { %v16351_v48 = vadd.f32 %v21735_v6, %v11396_v2  ;;  %v11398_v60 = vpop.f32.mrb[189].mxu1 }
 0xd1e   : > { %11531 = vst [vmem:[%s21742_s22 + $0x30] sm:$0xff] %v16351_v48 }
 0xd1f   : > { %v11401_v36 = vpop.f32.mrb[190].mxu1 }
 0xd20   : > { %v16352_v62 = vadd.f32 %v21735_v6, %v11401_v36  ;;  %v11403_v56 = vpop.f32.mrb[191].mxu1 }
 0xd22   : > { %11532 = vst [vmem:[%s21742_s22 + $0x38] sm:$0xff] %v16352_v62 }
 0xd23   : > { %v11406_v46 = vpop.f32.mrb[192].mxu1 }
 0xd24   : > { %v16353_v32 = vadd.f32 %v21735_v6, %v11406_v46  ;;  %v11408_v16 = vpop.f32.mrb[193].mxu1 }
 0xd26   : > { %11533 = vst [vmem:[%s21742_s22 + $0x40] sm:$0xff] %v16353_v32 }
 0xd27   : > { %v11411_v38 = vpop.f32.mrb[194].mxu1 }
 0xd28   : > { %v16354_v30 = vadd.f32 %v21735_v6, %v11411_v38  ;;  %v11413_v0 = vpop.f32.mrb[195].mxu1 }
 0xd2a   : > { %11534 = vst [vmem:[%s21742_s22 + $0x48] sm:$0xff] %v16354_v30 }
 0xd2b   : > { %v11416_v63 = vpop.f32.mrb[196].mxu1 }
 0xd2c   : > { %v16355_v23 = vadd.f32 %v21735_v6, %v11416_v63  ;;  %v11418_v4 = vpop.f32.mrb[197].mxu1 }
 0xd2e   : > { %11535 = vst [vmem:[%s21742_s22 + $0x50] sm:$0xff] %v16355_v23 }
 0xd2f   : > { %v11421_v47 = vpop.f32.mrb[198].mxu1 }
 0xd30   : > { %v16356_v45 = vadd.f32 %v21735_v6, %v11421_v47  ;;  %v11423_v25 = vpop.f32.mrb[199].mxu1 }
 0xd32   : > { %11536 = vst [vmem:[%s21742_s22 + $0x58] sm:$0xff] %v16356_v45 }
 0xd33   : > { %v11426_v13 = vpop.f32.mrb[200].mxu1 }
 0xd34   : > { %v16357_v3 = vadd.f32 %v21735_v6, %v11426_v13  ;;  %v11428_v58 = vpop.f32.mrb[201].mxu1 }
 0xd36   : > { %11537 = vst [vmem:[%s21742_s22 + $0x60] sm:$0xff] %v16357_v3 }
 0xd37   : > { %v11431_v17 = vpop.f32.mrb[202].mxu1 }
 0xd38   : > { %v16358_v42 = vadd.f32 %v21735_v6, %v11431_v17  ;;  %v11433_v14 = vpop.f32.mrb[203].mxu1 }
 0xd3a   : > { %11538 = vst [vmem:[%s21742_s22 + $0x68] sm:$0xff] %v16358_v42 }
 0xd3b   : > { %v11436_v1 = vpop.f32.mrb[204].mxu1 }
 0xd3c   : > { %v16359_v11 = vadd.f32 %v21735_v6, %v11436_v1  ;;  %v11438_v41 = vpop.f32.mrb[205].mxu1 }
 0xd3e   : > { %11539 = vst [vmem:[%s21742_s22 + $0x70] sm:$0xff] %v16359_v11 }
 0xd3f   : > { %v11441_v59 = vpop.f32.mrb[206].mxu1 }
 0xd40   : > { %v16360_v54 = vadd.f32 %v21735_v6, %v11441_v59  ;;  %v11443_v52 = vpop.f32.mrb[207].mxu1 }
 0xd42   : > { %11540 = vst [vmem:[%s21742_s22 + $0x78] sm:$0xff] %v16360_v54 }
 0xd43   : > { %v11446_v29 = vpop.f32.mrb[208].mxu1 }
 0xd44   : > { %v16361_v12 = vadd.f32 %v21735_v6, %v11446_v29  ;;  %v11448_v9 = vpop.f32.mrb[209].mxu1 }
 0xd46   : > { %11541 = vst [vmem:[%s21742_s22 + $0x80] sm:$0xff] %v16361_v12 }
 0xd47   : > { %v11451_v50 = vpop.f32.mrb[210].mxu1 }
 0xd48   : > { %v16362_v34 = vadd.f32 %v21735_v6, %v11451_v50  ;;  %v11453_v49 = vpop.f32.mrb[211].mxu1 }
 0xd4a   : > { %11542 = vst [vmem:[%s21742_s22 + $0x88] sm:$0xff] %v16362_v34 }
 0xd4b   : > { %v11456_v7 = vpop.f32.mrb[212].mxu1 }
 0xd4c   : > { %v16363_v33 = vadd.f32 %v21735_v6, %v11456_v7  ;;  %v11458_v35 = vpop.f32.mrb[213].mxu1 }
 0xd4e   : > { %11543 = vst [vmem:[%s21742_s22 + $0x90] sm:$0xff] %v16363_v33 }
 0xd4f   : > { %v11461_v43 = vpop.f32.mrb[214].mxu1 }
 0xd50   : > { %v16364_v8 = vadd.f32 %v21735_v6, %v11461_v43  ;;  %v11463_v31 = vpop.f32.mrb[215].mxu1 }
 0xd52   : > { %11544 = vst [vmem:[%s21742_s22 + $0x98] sm:$0xff] %v16364_v8 }
 0xd53   : > { %v11466_v18 = vpop.f32.mrb[216].mxu1 }
 0xd54   : > { %v16365_v40 = vadd.f32 %v21735_v6, %v11466_v18  ;;  %v11468_v26 = vpop.f32.mrb[217].mxu1 }
 0xd56   : > { %11545 = vst [vmem:[%s21742_s22 + $0xa0] sm:$0xff] %v16365_v40 }
 0xd57   : > { %v11471_v10 = vpop.f32.mrb[218].mxu1 }
 0xd58   : > { %v16366_v20 = vadd.f32 %v21735_v6, %v11471_v10  ;;  %v11473_v39 = vpop.f32.mrb[219].mxu1 }
 0xd5a   : > { %11546 = vst [vmem:[%s21742_s22 + $0xa8] sm:$0xff] %v16366_v20 }
 0xd5b   : > { %v11476_v57 = vpop.f32.mrb[220].mxu1 }
 0xd5c   : > { %v16367_v15 = vadd.f32 %v21735_v6, %v11476_v57  ;;  %v11478_v27 = vpop.f32.mrb[221].mxu1 }
 0xd5e   : > { %11547 = vst [vmem:[%s21742_s22 + $0xb0] sm:$0xff] %v16367_v15 }
 0xd5f   : > { %v11481_v24 = vpop.f32.mrb[222].mxu1 }
 0xd60   : > { %v16368_v37 = vadd.f32 %v21735_v6, %v11481_v24  ;;  %v11483_v22 = vpop.f32.mrb[223].mxu1 }
 0xd62   : > { %11548 = vst [vmem:[%s21742_s22 + $0xb8] sm:$0xff] %v16368_v37 }
 0xd63   : > { %v11486_v28 = vpop.f32.mrb[224].mxu1 }
 0xd64   : > { %v16369_v5 = vadd.f32 %v21735_v6, %v11486_v28  ;;  %v11488_v51 = vpop.f32.mrb[225].mxu1 }
 0xd66   : > { %11549 = vst [vmem:[%s21742_s22 + $0xc0] sm:$0xff] %v16369_v5 }
 0xd67   : > { %v11491_v55 = vpop.f32.mrb[226].mxu1 }
 0xd68   : > { %v16370_v19 = vadd.f32 %v21735_v6, %v11491_v55  ;;  %v11493_v21 = vpop.f32.mrb[227].mxu1 }
 0xd6a   : > { %11550 = vst [vmem:[%s21742_s22 + $0xc8] sm:$0xff] %v16370_v19 }
 0xd6b   : > { %v11496_v44 = vpop.f32.mrb[228].mxu1 }
 0xd6c   : > { %v16371_v53 = vadd.f32 %v21735_v6, %v11496_v44  ;;  %v11498_v61 = vpop.f32.mrb[229].mxu1 }
 0xd6e   : > { %11551 = vst [vmem:[%s21742_s22 + $0xd0] sm:$0xff] %v16371_v53 }
 0xd6f   : > { %v11501_v2 = vpop.f32.mrb[230].mxu1 }
 0xd70   : > { %v16372_v48 = vadd.f32 %v21735_v6, %v11501_v2  ;;  %v11503_v60 = vpop.f32.mrb[231].mxu1 }
 0xd72   : > { %11552 = vst [vmem:[%s21742_s22 + $0xd8] sm:$0xff] %v16372_v48 }
 0xd73   : > { %v11506_v36 = vpop.f32.mrb[232].mxu1 }
 0xd74   : > { %v16373_v62 = vadd.f32 %v21735_v6, %v11506_v36  ;;  %v11508_v56 = vpop.f32.mrb[233].mxu1 }
 0xd76   : > { %11553 = vst [vmem:[%s21742_s22 + $0xe0] sm:$0xff] %v16373_v62 }
 0xd77   : > { %v11511_v46 = vpop.f32.mrb[234].mxu1 }
 0xd78   : > { %v16374_v32 = vadd.f32 %v21735_v6, %v11511_v46  ;;  %v11513_v16 = vpop.f32.mrb[235].mxu1 }
 0xd7a   : > { %11554 = vst [vmem:[%s21742_s22 + $0xe8] sm:$0xff] %v16374_v32 }
 0xd7b   : > { %v11516_v38 = vpop.f32.mrb[236].mxu1 }
 0xd7c   : > { %v16375_v30 = vadd.f32 %v21735_v6, %v11516_v38  ;;  %v11518_v0 = vpop.f32.mrb[237].mxu1 }
 0xd7e   : > { %11555 = vst [vmem:[%s21742_s22 + $0xf0] sm:$0xff] %v16375_v30 }
 0xd7f   : > { %v11521_v63 = vpop.f32.mrb[238].mxu1 }
 0xd80   : > { %v16376_v23 = vadd.f32 %v21735_v6, %v11521_v63  ;;  %v11523_v4 = vpop.f32.mrb[239].mxu1 }
 0xd82   : > { %11556 = vst [vmem:[%s21742_s22 + $0xf8] sm:$0xff] %v16376_v23 }
 0xd83 PF: > { %s22917_s26 = sld [smem:[#allocation14_spill]] }
 0xd89   : > { %s26_s25 = sadd.s32 1, %s22917_s26  }
 0xd8a   : > { %p23_p1 = scmp.ge.s32.totalorder %s26_s25, 4  }
 0xd8c   :  { %25 = sbr.rel (!%p23_p1) target bundleno = 6 (0x6), region = 147 }
 0xd93   :  { %11578 = vsyncpa [#allocation4], 1 }
 0xd94   :  { %11580 = vsyncpa [#allocation4 + $0x1], 1 }
 0xd95   :  { %11581 = vsyncpa [#allocation6], 1 }
 0xd96   :  { %11582 = vsyncpa [#allocation9], 1 }

</bundles_post_ra>
